<compile_context>
chip_gen: v7x
topology: tpu7x:2x2x1
jax: 0.10.0
libtpu: 0.0.40
codegen_flags: <defaults>
</compile_context>

<pallas_src>
import functools

import jax
import jax.numpy as jnp
from jax.experimental import pallas as pl
from jax.experimental.pallas import tpu as pltpu

_BN_EPS = 1e-5


# --------------------------------------------------------------------------- #
# Helpers
# --------------------------------------------------------------------------- #

def _round_up(x, k):
    return ((x + k - 1) // k) * k


def _choose_tile(m, cap=1024):
    """Row tile: multiple of 128, <= cap, preferring >= 2 grid steps so the
    'parallel' grid axis can use both TensorCores on v7x.  cap=1024 keeps the
    largest per-step footprint (layer-3 affine: bf16 in + f32 out at C=512,
    double buffered ~6 MiB) inside v5e's 16 MiB scoped-VMEM default."""
    tm = min(cap, _round_up(m, 128))
    if m > 128 and pl.cdiv(m, tm) < 2:
        tm = max(128, _round_up(pl.cdiv(m, 2), 128))
    return tm


def _compiler_params():
    # No vmem_limit override: leave headroom for Mosaic scratch / double
    # buffering (v7x has only 64 MiB physical VMEM per TensorCore).
    return pltpu.CompilerParams(dimension_semantics=("parallel",))


# --------------------------------------------------------------------------- #
# Pallas kernels
# --------------------------------------------------------------------------- #

def _mm_stats_kernel(x_ref, w_ref, y_ref, stats_ref, *, m_true, tm):
    """Row tile of a 1x1 conv: y = x @ w (bf16 operands, f32 accumulate),
    written back as bf16, plus per-tile BatchNorm moments (column sum and
    sum-of-squares) kept in f32.  Tail rows of a partial last tile are masked
    in-register so the fused statistics stay exact (replaces _zero_pad_tail
    / _pad_rows HBM round trips)."""
    acc = jnp.dot(x_ref[...], w_ref[...], preferred_element_type=jnp.float32)
    if m_true % tm != 0:  # static: only traced when a partial tail tile exists
        row = pl.program_id(0) * tm + jax.lax.broadcasted_iota(
            jnp.int32, (tm, 1), 0)
        acc = jnp.where(row < m_true, acc, 0.0)
    y_ref[...] = acc.astype(y_ref.dtype)
    stats_ref[0, 0:1, :] = jnp.sum(acc, axis=0, keepdims=True)
    stats_ref[0, 1:2, :] = jnp.sum(acc * acc, axis=0, keepdims=True)


def _conv3x3_stats_kernel(xp_ref, w_ref, y_ref, stats_ref, acc_ref, *,
                          H, W, dilation):
    """One image of a dilated 3x3 conv: nine tap matmuls over shifted VMEM
    windows of the spatially pre-padded input (no im2col), accumulated into a
    VMEM f32 scratch (bounds vreg live ranges; maps onto the MRB in-place
    accumulate on v7x), plus per-image BatchNorm moments.  Output is bf16."""
    # TODO(synk): pair taps along K (K=256) to fill the 256-wide MXU on
    # v6e/v7x, and add a row-tile grid axis for large H*W / small N.
    for t in range(9):                       # static unrolled tap loop
        ky, kx = t // 3, t % 3
        oy, ox = ky * dilation, kx * dilation
        patch = xp_ref[0, oy:oy + H, ox:ox + W, :]          # (H, W, Cin) bf16
        patch = patch.reshape(H * W, patch.shape[-1])
        contrib = jnp.dot(patch, w_ref[t],
                          preferred_element_type=jnp.float32)
        if t == 0:
            acc_ref[...] = contrib
        else:
            acc_ref[...] += contrib
    acc = acc_ref[...]
    y_ref[0] = acc.astype(y_ref.dtype)
    stats_ref[0, 0:1, :] = jnp.sum(acc, axis=0, keepdims=True)
    stats_ref[0, 1:2, :] = jnp.sum(acc * acc, axis=0, keepdims=True)


def _affine_kernel(y_ref, s_ref, t_ref, o_ref):
    """Per-channel scale/shift (training-mode BN folded into an affine) +
    ReLU.  Reads bf16 conv output, does the affine in f32."""
    v = y_ref[...].astype(jnp.float32) * s_ref[...] + t_ref[...]
    o_ref[...] = jnp.maximum(v, 0.0).astype(o_ref.dtype)


def _affine_pad_kernel(y_ref, s_ref, t_ref, o_ref, *, H, W, d):
    """Layer-1 BN+ReLU fused with the spatial zero-padding required by the
    following dilated 3x3 conv: one image per grid step.  The padded block is
    memset to zero and the interior written in place, deleting a separate
    jnp.pad HBM round trip."""
    c = y_ref.shape[-1]
    v = y_ref[...].astype(jnp.float32) * s_ref[...] + t_ref[...]
    v = jnp.maximum(v, 0.0).astype(o_ref.dtype)
    o_ref[...] = jnp.zeros_like(o_ref)
    o_ref[0, d:d + H, d:d + W, :] = v.reshape(H, W, c)


# --------------------------------------------------------------------------- #
# pallas_call wrappers
# --------------------------------------------------------------------------- #

def conv1x1_stats(x_bf16, w_bf16):
    """x: (M, Cin) bf16; w: (Cin, Cout) bf16.
    Returns conv output (M, Cout) bf16 and per-tile f32 stats (gm, 2, Cout)."""
    m, cin = x_bf16.shape
    cout = w_bf16.shape[1]
    tm = _choose_tile(m)
    gm = pl.cdiv(m, tm)
    cost = pl.CostEstimate(
        flops=2 * m * cin * cout, transcendentals=0,
        bytes_accessed=m * cin * 2 + cin * cout * 2 + m * cout * 2)
    kernel = functools.partial(_mm_stats_kernel, m_true=m, tm=tm)
    return pl.pallas_call(
        kernel,
        out_shape=(jax.ShapeDtypeStruct((m, cout), jnp.bfloat16),
                   jax.ShapeDtypeStruct((gm, 2, cout), jnp.float32)),
        grid=(gm,),
        in_specs=[pl.BlockSpec((tm, cin), lambda i: (i, 0)),
                  pl.BlockSpec((cin, cout), lambda i: (0, 0))],
        out_specs=(pl.BlockSpec((tm, cout), lambda i: (i, 0)),
                   pl.BlockSpec((1, 2, cout), lambda i: (i, 0, 0))),
        compiler_params=_compiler_params(),
        cost_estimate=cost,
    )(x_bf16, w_bf16)


def conv3x3_stats(xp_bf16, w_bf16, H, W, dilation):
    """xp: (N, H+2d, W+2d, Cin) bf16 (pad fused into the previous kernel);
    w: (9, Cin, Cout) bf16.  Returns conv output (N, H*W, Cout) bf16 and
    per-image f32 stats (N, 2, Cout)."""
    n, hp, wp, cin = xp_bf16.shape
    cout = w_bf16.shape[-1]
    m = n * H * W
    cost = pl.CostEstimate(
        flops=2 * m * 9 * cin * cout, transcendentals=0,
        bytes_accessed=xp_bf16.size * 2 + w_bf16.size * 2 + m * cout * 2)
    kernel = functools.partial(_conv3x3_stats_kernel, H=H, W=W,
                               dilation=dilation)
    return pl.pallas_call(
        kernel,
        out_shape=(jax.ShapeDtypeStruct((n, H * W, cout), jnp.bfloat16),
                   jax.ShapeDtypeStruct((n, 2, cout), jnp.float32)),
        grid=(n,),
        in_specs=[pl.BlockSpec((1, hp, wp, cin), lambda i: (i, 0, 0, 0)),
                  pl.BlockSpec((9, cin, cout), lambda i: (0, 0, 0))],
        out_specs=(pl.BlockSpec((1, H * W, cout), lambda i: (i, 0, 0)),
                   pl.BlockSpec((1, 2, cout), lambda i: (i, 0, 0))),
        scratch_shapes=[pltpu.VMEM((H * W, cout), jnp.float32)],
        compiler_params=_compiler_params(),
        cost_estimate=cost,
    )(xp_bf16, w_bf16)


def _bn_scale_shift(stats, m_true, gamma, beta):
    """Training-mode BatchNorm batch statistics (from the fused conv moments)
    folded into a per-channel affine.  One-pass E[x^2]-E[x]^2 variance in f32;
    clamped at 0 (see correctness notes)."""
    s = jnp.sum(stats, axis=0)                           # (2, C) f32
    mean = s[0] / m_true
    var = jnp.maximum(s[1] / m_true - mean * mean, 0.0)  # biased, as in BN
    scale = gamma * jax.lax.rsqrt(var + _BN_EPS)
    shift = beta - mean * scale
    c = scale.shape[0]
    return scale.reshape(1, c), shift.reshape(1, c)


def bn_relu(y, stats, m_true, gamma, beta, *, out_dtype):
    """y*scale + shift, ReLU.  Row-tiled."""
    m, c = y.shape
    scale, shift = _bn_scale_shift(stats, m_true, gamma, beta)
    tm = _choose_tile(m)
    return pl.pallas_call(
        _affine_kernel,
        out_shape=jax.ShapeDtypeStruct((m, c), out_dtype),
        grid=(pl.cdiv(m, tm),),
        in_specs=[pl.BlockSpec((tm, c), lambda i: (i, 0)),
                  pl.BlockSpec((1, c), lambda i: (0, 0)),
                  pl.BlockSpec((1, c), lambda i: (0, 0))],
        out_specs=pl.BlockSpec((tm, c), lambda i: (i, 0)),
        compiler_params=_compiler_params(),
    )(y, scale, shift)


def bn_relu_pad(y, stats, m_true, gamma, beta, *, n, H, W, d):
    """Layer-1 BN+ReLU producing the spatially zero-padded bf16 NHWC image
    that feeds the dilated 3x3 conv directly."""
    m, c = y.shape
    scale, shift = _bn_scale_shift(stats, m_true, gamma, beta)
    kernel = functools.partial(_affine_pad_kernel, H=H, W=W, d=d)
    return pl.pallas_call(
        kernel,
        out_shape=jax.ShapeDtypeStruct((n, H + 2 * d, W + 2 * d, c),
                                       jnp.bfloat16),
        grid=(n,),
        in_specs=[pl.BlockSpec((H * W, c), lambda i: (i, 0)),
                  pl.BlockSpec((1, c), lambda i: (0, 0)),
                  pl.BlockSpec((1, c), lambda i: (0, 0))],
        out_specs=pl.BlockSpec((1, H + 2 * d, W + 2 * d, c),
                               lambda i: (i, 0, 0, 0)),
        compiler_params=_compiler_params(),
    )(y, scale, shift)


# --------------------------------------------------------------------------- #
# Bottleneck forward
# --------------------------------------------------------------------------- #

def bottleneck_forward(params, x_nchw, *, dilation):
    n, cin, h, w = x_nchw.shape
    mid = params["w2"].shape[0]
    m = n * h * w
    # Per-image input block of the fused-pad affine needs sublane alignment.
    assert (h * w) % 8 == 0, "H*W must be a multiple of 8"

    # Single NCHW -> NHWC transpose, emitted directly in bf16 (feeds conv1).
    x_rows = jnp.transpose(x_nchw, (0, 2, 3, 1)).reshape(m, cin) \
                .astype(jnp.bfloat16)

    # PyTorch conv weights -> (K, Cout) matmul operands, cast once to bf16.
    w1 = jnp.transpose(params["w1"][:, :, 0, 0], (1, 0)).astype(jnp.bfloat16)
    w2 = jnp.transpose(params["w2"], (2, 3, 1, 0)).reshape(9, mid, mid) \
            .astype(jnp.bfloat16)
    w3 = jnp.transpose(params["w3"][:, :, 0, 0], (1, 0)).astype(jnp.bfloat16)
    # Conv2d biases cancel exactly under training-mode BatchNorm (batch-mean
    # subtraction removes any per-channel constant), so they are dropped.

    # conv1: 1x1 (Cin -> mid); BN+ReLU fused with the 3x3 conv's zero-padding.
    y1, st1 = conv1x1_stats(x_rows, w1)
    xp2 = bn_relu_pad(y1, st1, m, params["g1"], params["b1"],
                      n=n, H=h, W=w, d=dilation)

    # conv2: dilated 3x3 (mid -> mid) + BN + ReLU (taps fused in-kernel).
    y2, st2 = conv3x3_stats(xp2, w2, h, w, dilation)
    a2 = bn_relu(y2.reshape(m, mid), st2, m, params["g2"], params["b2"],
                 out_dtype=jnp.bfloat16)

    # conv3: 1x1 (mid -> Cin) + BN + ReLU.
    y3, st3 = conv1x1_stats(a2, w3)
    o3 = bn_relu(y3, st3, m, params["g3"], params["b3"],
                 out_dtype=jnp.float32)

    # Residual add folded into the output NHWC -> NCHW transpose in XLA glue
    # (one read of o3, one read of x, one write of the result).
    # TODO(synk): accept/return NHWC (or block the layer-3 output over
    # channels) to delete the remaining layout transposes entirely.
    return x_nchw + jnp.transpose(o3.reshape(n, h, w, cin), (0, 3, 1, 2))


# --------------------------------------------------------------------------- #
# Deterministic parameters / test
# --------------------------------------------------------------------------- #

def init_params(key, in_channels=512, mid_channels=128):
    ks = iter(jax.random.split(key, 12))

    def wgt(shape, std=0.02):
        return (std * jax.random.normal(next(ks), shape)).astype(jnp.float32)

    def bnp(c):
        g = (1.0 + 0.1 * jax.random.normal(next(ks), (c,))).astype(jnp.float32)
        b = (0.1 * jax.random.normal(next(ks), (c,))).astype(jnp.float32)
        return g, b

    g1, b1 = bnp(mid_channels)
    g2, b2 = bnp(mid_channels)
    g3, b3 = bnp(in_channels)
    return dict(
        w1=wgt((mid_channels, in_channels, 1, 1)),
        w2=wgt((mid_channels, mid_channels, 3, 3)),
        w3=wgt((in_channels, mid_channels, 1, 1)),
        # Conv2d biases exist in the PyTorch module but are mathematically
        # cancelled by training-mode BatchNorm; the forward never reads them.
        bias1=jnp.zeros((mid_channels,), jnp.float32),
        bias2=jnp.zeros((mid_channels,), jnp.float32),
        bias3=jnp.zeros((in_channels,), jnp.float32),
        g1=g1, b1=b1, g2=g2, b2=b2, g3=g3, b3=b3,
    )


if __name__ == "__main__":
    key = jax.random.PRNGKey(0)
    kp, kx = jax.random.split(key)

    in_ch, mid_ch, dilation = 512, 128, 2      # module defaults, dilation=2
    n, h, w = 2, 16, 16

    params = init_params(kp, in_ch, mid_ch)
    x = jax.random.normal(kx, (n, in_ch, h, w), jnp.float32)

    fwd = jax.jit(functools.partial(bottleneck_forward, dilation=dilation))
    out = jax.block_until_ready(fwd(params, x))

    assert out.shape == (n, in_ch, h, w), out.shape
    assert out.dtype == jnp.float32
    assert bool(jnp.all(jnp.isfinite(out)))
    print("KERNEL_OK")
</pallas_src>

<mosaic_0001>
module attributes {stable_mosaic.version = 11 : i64} {
  func.func @_mm_stats_kernel(%arg0: i32, %arg1: memref<256x512xbf16, #tpu.memory_space<vmem>>, %arg2: memref<512x128xbf16, #tpu.memory_space<vmem>>, %arg3: memref<256x128xbf16, #tpu.memory_space<vmem>>, %arg4: memref<1x2x128xf32, #tpu.memory_space<vmem>>) attributes {dimension_semantics = [#tpu.dimension_semantics<parallel>], iteration_bounds = array<i64: 2>, scalar_prefetch = 0 : i64, scratch_operands = 0 : i64, tpu.core_type = #tpu.core_type<tc>, window_params = [{transform_indices = @transform_0, window_bounds = array<i64: 256, 512>}, {pipeline_mode = #tpu.pipeline_mode<synchronous>, transform_indices = @transform_1, window_bounds = array<i64: 512, 128>}, {transform_indices = @transform_2, window_bounds = array<i64: 256, 128>}, {transform_indices = @transform_3, window_bounds = array<i64: 1, 2, 128>}]} {
    %c0 = arith.constant 0 : index
    %c0_0 = arith.constant 0 : index
    %0 = vector.load %arg1[%c0, %c0_0] : memref<256x512xbf16, #tpu.memory_space<vmem>>, vector<256x512xbf16>
    %c0_1 = arith.constant 0 : index
    %c0_2 = arith.constant 0 : index
    %1 = vector.load %arg2[%c0_1, %c0_2] : memref<512x128xbf16, #tpu.memory_space<vmem>>, vector<512x128xbf16>
    %cst = arith.constant dense<0.000000e+00> : vector<256x128xf32>
    %2 = tpu.matmul %0, %1, %cst {dimension_numbers = #tpu.dot_dimension_numbers<[1], [0], [0], [1], [0, 0, 1, 1], [], []>} : vector<256x512xbf16>, vector<512x128xbf16>, vector<256x128xf32> -> vector<256x128xf32>
    %3 = arith.truncf %2 : vector<256x128xf32> to vector<256x128xbf16>
    %c0_3 = arith.constant 0 : index
    %c0_4 = arith.constant 0 : index
    %4 = vector.load %arg3[%c0_3, %c0_4] : memref<256x128xbf16, #tpu.memory_space<vmem>>, vector<256x128xbf16>
    tpu.vector_store %arg3[%c0_3, %c0_4], %3 {strides = array<i32>} : memref<256x128xbf16, #tpu.memory_space<vmem>>, vector<256x128xbf16>,
    %cst_5 = arith.constant dense<0.000000e+00> : vector<128xf32>
    %5 = vector.multi_reduction <add>, %2, %cst_5 [0] : vector<256x128xf32> to vector<128xf32>
    %6 = vector.shape_cast %5 : vector<128xf32> to vector<1x128xf32>
    %c0_6 = arith.constant 0 : index
    %c0_7 = arith.constant 0 : index
    %c0_8 = arith.constant 0 : index
    %7 = vector.load %arg4[%c0_6, %c0_7, %c0_8] : memref<1x2x128xf32, #tpu.memory_space<vmem>>, vector<1x1x128xf32>
    %8 = vector.shape_cast %7 : vector<1x1x128xf32> to vector<1x128xf32>
    %9 = vector.shape_cast %6 : vector<1x128xf32> to vector<1x1x128xf32>
    tpu.vector_store %arg4[%c0_6, %c0_7, %c0_8], %9 {strides = array<i32>} : memref<1x2x128xf32, #tpu.memory_space<vmem>>, vector<1x1x128xf32>,
    %10 = arith.mulf %2, %2 : vector<256x128xf32>
    %cst_9 = arith.constant dense<0.000000e+00> : vector<128xf32>
    %11 = vector.multi_reduction <add>, %10, %cst_9 [0] : vector<256x128xf32> to vector<128xf32>
    %12 = vector.shape_cast %11 : vector<128xf32> to vector<1x128xf32>
    %c0_10 = arith.constant 0 : index
    %c1 = arith.constant 1 : index
    %c0_11 = arith.constant 0 : index
    %13 = vector.load %arg4[%c0_10, %c1, %c0_11] : memref<1x2x128xf32, #tpu.memory_space<vmem>>, vector<1x1x128xf32>
    %14 = vector.shape_cast %13 : vector<1x1x128xf32> to vector<1x128xf32>
    %15 = vector.shape_cast %12 : vector<1x128xf32> to vector<1x1x128xf32>
    tpu.vector_store %arg4[%c0_10, %c1, %c0_11], %15 {strides = array<i32>} : memref<1x2x128xf32, #tpu.memory_space<vmem>>, vector<1x1x128xf32>,
    return
  }
  func.func @transform_0(%arg0: i32) -> (i32, i32) {
    %c0_i32 = arith.constant 0 : i32
    %c0_i32_0 = arith.constant 0 : i32
    return %arg0, %c0_i32 : i32, i32
  }
  func.func @transform_1(%arg0: i32) -> (i32, i32) {
    %c0_i32 = arith.constant 0 : i32
    %c0_i32_0 = arith.constant 0 : i32
    %c0_i32_1 = arith.constant 0 : i32
    return %c0_i32, %c0_i32_0 : i32, i32
  }
  func.func @transform_2(%arg0: i32) -> (i32, i32) {
    %c0_i32 = arith.constant 0 : i32
    %c0_i32_0 = arith.constant 0 : i32
    return %arg0, %c0_i32 : i32, i32
  }
  func.func @transform_3(%arg0: i32) -> (i32, i32, i32) {
    %c0_i32 = arith.constant 0 : i32
    %c0_i32_0 = arith.constant 0 : i32
    %c0_i32_1 = arith.constant 0 : i32
    return %arg0, %c0_i32, %c0_i32_0 : i32, i32, i32
  }
}

module attributes {stable_mosaic.version = 11 : i64} {
  func.func @_affine_pad_kernel(%arg0: i32, %arg1: memref<256x128xbf16, #tpu.memory_space<vmem>>, %arg2: memref<1x128xf32, #tpu.memory_space<vmem>>, %arg3: memref<1x128xf32, #tpu.memory_space<vmem>>, %arg4: memref<1x20x20x128xbf16, #tpu.memory_space<vmem>>) attributes {dimension_semantics = [#tpu.dimension_semantics<parallel>], iteration_bounds = array<i64: 2>, scalar_prefetch = 0 : i64, scratch_operands = 0 : i64, tpu.core_type = #tpu.core_type<tc>, window_params = [{transform_indices = @transform_0, window_bounds = array<i64: 256, 128>}, {pipeline_mode = #tpu.pipeline_mode<synchronous>, transform_indices = @transform_1, window_bounds = array<i64: 1, 128>}, {pipeline_mode = #tpu.pipeline_mode<synchronous>, transform_indices = @transform_2, window_bounds = array<i64: 1, 128>}, {transform_indices = @transform_3, window_bounds = array<i64: 1, 20, 20, 128>}]} {
    %c0 = arith.constant 0 : index
    %c0_0 = arith.constant 0 : index
    %0 = vector.load %arg1[%c0, %c0_0] : memref<256x128xbf16, #tpu.memory_space<vmem>>, vector<256x128xbf16>
    %1 = arith.extf %0 : vector<256x128xbf16> to vector<256x128xf32>
    %c0_1 = arith.constant 0 : index
    %c0_2 = arith.constant 0 : index
    %2 = vector.load %arg2[%c0_1, %c0_2] : memref<1x128xf32, #tpu.memory_space<vmem>>, vector<1x128xf32>
    %3 = vector.broadcast %2 : vector<1x128xf32> to vector<256x128xf32>
    %4 = arith.mulf %1, %3 : vector<256x128xf32>
    %c0_3 = arith.constant 0 : index
    %c0_4 = arith.constant 0 : index
    %5 = vector.load %arg3[%c0_3, %c0_4] : memref<1x128xf32, #tpu.memory_space<vmem>>, vector<1x128xf32>
    %6 = vector.broadcast %5 : vector<1x128xf32> to vector<256x128xf32>
    %7 = arith.addf %4, %6 : vector<256x128xf32>
    %cst = arith.constant 0.000000e+00 : f32
    %8 = vector.broadcast %cst : f32 to vector<256x128xf32>
    %9 = arith.maximumf %7, %8 : vector<256x128xf32>
    %10 = arith.truncf %9 : vector<256x128xf32> to vector<256x128xbf16>
    %cst_5 = arith.constant 0.000000e+00 : bf16
    %11 = vector.broadcast %cst_5 : bf16 to vector<1x20x20x128xbf16>
    %c0_6 = arith.constant 0 : index
    %c0_7 = arith.constant 0 : index
    %c0_8 = arith.constant 0 : index
    %c0_9 = arith.constant 0 : index
    %12 = vector.load %arg4[%c0_6, %c0_7, %c0_8, %c0_9] : memref<1x20x20x128xbf16, #tpu.memory_space<vmem>>, vector<1x20x20x128xbf16>
    tpu.vector_store %arg4[%c0_6, %c0_7, %c0_8, %c0_9], %11 {strides = array<i32>} : memref<1x20x20x128xbf16, #tpu.memory_space<vmem>>, vector<1x20x20x128xbf16>,
    %13 = vector.shape_cast %10 : vector<256x128xbf16> to vector<16x16x128xbf16>
    %c0_10 = arith.constant 0 : index
    %c2 = arith.constant 2 : index
    %c2_11 = arith.constant 2 : index
    %c0_12 = arith.constant 0 : index
    %14 = vector.load %arg4[%c0_10, %c2, %c2_11, %c0_12] : memref<1x20x20x128xbf16, #tpu.memory_space<vmem>>, vector<1x16x16x128xbf16>
    %15 = vector.shape_cast %14 : vector<1x16x16x128xbf16> to vector<16x16x128xbf16>
    %16 = vector.shape_cast %13 : vector<16x16x128xbf16> to vector<1x16x16x128xbf16>
    tpu.vector_store %arg4[%c0_10, %c2, %c2_11, %c0_12], %16 {strides = array<i32>} : memref<1x20x20x128xbf16, #tpu.memory_space<vmem>>, vector<1x16x16x128xbf16>,
    return
  }
  func.func @transform_0(%arg0: i32) -> (i32, i32) {
    %c0_i32 = arith.constant 0 : i32
    %c0_i32_0 = arith.constant 0 : i32
    return %arg0, %c0_i32 : i32, i32
  }
  func.func @transform_1(%arg0: i32) -> (i32, i32) {
    %c0_i32 = arith.constant 0 : i32
    %c0_i32_0 = arith.constant 0 : i32
    %c0_i32_1 = arith.constant 0 : i32
    return %c0_i32, %c0_i32_0 : i32, i32
  }
  func.func @transform_2(%arg0: i32) -> (i32, i32) {
    %c0_i32 = arith.constant 0 : i32
    %c0_i32_0 = arith.constant 0 : i32
    %c0_i32_1 = arith.constant 0 : i32
    return %c0_i32, %c0_i32_0 : i32, i32
  }
  func.func @transform_3(%arg0: i32) -> (i32, i32, i32, i32) {
    %c0_i32 = arith.constant 0 : i32
    %c0_i32_0 = arith.constant 0 : i32
    %c0_i32_1 = arith.constant 0 : i32
    %c0_i32_2 = arith.constant 0 : i32
    return %arg0, %c0_i32, %c0_i32_0, %c0_i32_1 : i32, i32, i32, i32
  }
}

module attributes {stable_mosaic.version = 11 : i64} {
  func.func @_conv3x3_stats_kernel(%arg0: i32, %arg1: memref<1x20x20x128xbf16, #tpu.memory_space<vmem>>, %arg2: memref<9x128x128xbf16, #tpu.memory_space<vmem>>, %arg3: memref<1x256x128xbf16, #tpu.memory_space<vmem>>, %arg4: memref<1x2x128xf32, #tpu.memory_space<vmem>>, %arg5: memref<256x128xf32, #tpu.memory_space<vmem>>) attributes {dimension_semantics = [#tpu.dimension_semantics<parallel>], iteration_bounds = array<i64: 2>, scalar_prefetch = 0 : i64, scratch_operands = 1 : i64, tpu.core_type = #tpu.core_type<tc>, window_params = [{transform_indices = @transform_0, window_bounds = array<i64: 1, 20, 20, 128>}, {pipeline_mode = #tpu.pipeline_mode<synchronous>, transform_indices = @transform_1, window_bounds = array<i64: 9, 128, 128>}, {transform_indices = @transform_2, window_bounds = array<i64: 1, 256, 128>}, {transform_indices = @transform_3, window_bounds = array<i64: 1, 2, 128>}]} {
    %c0 = arith.constant 0 : index
    %c0_0 = arith.constant 0 : index
    %c0_1 = arith.constant 0 : index
    %c0_2 = arith.constant 0 : index
    %0 = vector.load %arg1[%c0, %c0_0, %c0_1, %c0_2] : memref<1x20x20x128xbf16, #tpu.memory_space<vmem>>, vector<1x16x16x128xbf16>
    %1 = vector.shape_cast %0 : vector<1x16x16x128xbf16> to vector<16x16x128xbf16>
    %2 = vector.shape_cast %1 : vector<16x16x128xbf16> to vector<256x128xbf16>
    %c0_3 = arith.constant 0 : index
    %c0_4 = arith.constant 0 : index
    %c0_5 = arith.constant 0 : index
    %3 = vector.load %arg2[%c0_3, %c0_4, %c0_5] : memref<9x128x128xbf16, #tpu.memory_space<vmem>>, vector<1x128x128xbf16>
    %4 = vector.shape_cast %3 : vector<1x128x128xbf16> to vector<128x128xbf16>
    %cst = arith.constant dense<0.000000e+00> : vector<256x128xf32>
    %5 = tpu.matmul %2, %4, %cst {dimension_numbers = #tpu.dot_dimension_numbers<[1], [0], [0], [1], [0, 0, 1, 1], [], []>} : vector<256x128xbf16>, vector<128x128xbf16>, vector<256x128xf32> -> vector<256x128xf32>
    %c0_6 = arith.constant 0 : index
    %c0_7 = arith.constant 0 : index
    %6 = vector.load %arg5[%c0_6, %c0_7] : memref<256x128xf32, #tpu.memory_space<vmem>>, vector<256x128xf32>
    tpu.vector_store %arg5[%c0_6, %c0_7], %5 {strides = array<i32>} : memref<256x128xf32, #tpu.memory_space<vmem>>, vector<256x128xf32>,
    %c0_8 = arith.constant 0 : index
    %c0_9 = arith.constant 0 : index
    %c2 = arith.constant 2 : index
    %c0_10 = arith.constant 0 : index
    %7 = vector.load %arg1[%c0_8, %c0_9, %c2, %c0_10] : memref<1x20x20x128xbf16, #tpu.memory_space<vmem>>, vector<1x16x16x128xbf16>
    %8 = vector.shape_cast %7 : vector<1x16x16x128xbf16> to vector<16x16x128xbf16>
    %9 = vector.shape_cast %8 : vector<16x16x128xbf16> to vector<256x128xbf16>
    %c1 = arith.constant 1 : index
    %c0_11 = arith.constant 0 : index
    %c0_12 = arith.constant 0 : index
    %10 = vector.load %arg2[%c1, %c0_11, %c0_12] : memref<9x128x128xbf16, #tpu.memory_space<vmem>>, vector<1x128x128xbf16>
    %11 = vector.shape_cast %10 : vector<1x128x128xbf16> to vector<128x128xbf16>
    %cst_13 = arith.constant dense<0.000000e+00> : vector<256x128xf32>
    %12 = tpu.matmul %9, %11, %cst_13 {dimension_numbers = #tpu.dot_dimension_numbers<[1], [0], [0], [1], [0, 0, 1, 1], [], []>} : vector<256x128xbf16>, vector<128x128xbf16>, vector<256x128xf32> -> vector<256x128xf32>
    %c0_14 = arith.constant 0 : index
    %c0_15 = arith.constant 0 : index
    %13 = vector.load %arg5[%c0_14, %c0_15] : memref<256x128xf32, #tpu.memory_space<vmem>>, vector<256x128xf32>
    %14 = arith.addf %13, %12 : vector<256x128xf32>
    %c0_16 = arith.constant 0 : index
    %c0_17 = arith.constant 0 : index
    %15 = vector.load %arg5[%c0_16, %c0_17] : memref<256x128xf32, #tpu.memory_space<vmem>>, vector<256x128xf32>
    tpu.vector_store %arg5[%c0_16, %c0_17], %14 {strides = array<i32>} : memref<256x128xf32, #tpu.memory_space<vmem>>, vector<256x128xf32>,
    %c0_18 = arith.constant 0 : index
    %c0_19 = arith.constant 0 : index
    %c4 = arith.constant 4 : index
    %c0_20 = arith.constant 0 : index
    %16 = vector.load %arg1[%c0_18, %c0_19, %c4, %c0_20] : memref<1x20x20x128xbf16, #tpu.memory_space<vmem>>, vector<1x16x16x128xbf16>
    %17 = vector.shape_cast %16 : vector<1x16x16x128xbf16> to vector<16x16x128xbf16>
    %18 = vector.shape_cast %17 : vector<16x16x128xbf16> to vector<256x128xbf16>
    %c2_21 = arith.constant 2 : index
    %c0_22 = arith.constant 0 : index
    %c0_23 = arith.constant 0 : index
    %19 = vector.load %arg2[%c2_21, %c0_22, %c0_23] : memref<9x128x128xbf16, #tpu.memory_space<vmem>>, vector<1x128x128xbf16>
    %20 = vector.shape_cast %19 : vector<1x128x128xbf16> to vector<128x128xbf16>
    %cst_24 = arith.constant dense<0.000000e+00> : vector<256x128xf32>
    %21 = tpu.matmul %18, %20, %cst_24 {dimension_numbers = #tpu.dot_dimension_numbers<[1], [0], [0], [1], [0, 0, 1, 1], [], []>} : vector<256x128xbf16>, vector<128x128xbf16>, vector<256x128xf32> -> vector<256x128xf32>
    %c0_25 = arith.constant 0 : index
    %c0_26 = arith.constant 0 : index
    %22 = vector.load %arg5[%c0_25, %c0_26] : memref<256x128xf32, #tpu.memory_space<vmem>>, vector<256x128xf32>
    %23 = arith.addf %22, %21 : vector<256x128xf32>
    %c0_27 = arith.constant 0 : index
    %c0_28 = arith.constant 0 : index
    %24 = vector.load %arg5[%c0_27, %c0_28] : memref<256x128xf32, #tpu.memory_space<vmem>>, vector<256x128xf32>
    tpu.vector_store %arg5[%c0_27, %c0_28], %23 {strides = array<i32>} : memref<256x128xf32, #tpu.memory_space<vmem>>, vector<256x128xf32>,
    %c0_29 = arith.constant 0 : index
    %c2_30 = arith.constant 2 : index
    %c0_31 = arith.constant 0 : index
    %c0_32 = arith.constant 0 : index
    %25 = vector.load %arg1[%c0_29, %c2_30, %c0_31, %c0_32] : memref<1x20x20x128xbf16, #tpu.memory_space<vmem>>, vector<1x16x16x128xbf16>
    %26 = vector.shape_cast %25 : vector<1x16x16x128xbf16> to vector<16x16x128xbf16>
    %27 = vector.shape_cast %26 : vector<16x16x128xbf16> to vector<256x128xbf16>
    %c3 = arith.constant 3 : index
    %c0_33 = arith.constant 0 : index
    %c0_34 = arith.constant 0 : index
    %28 = vector.load %arg2[%c3, %c0_33, %c0_34] : memref<9x128x128xbf16, #tpu.memory_space<vmem>>, vector<1x128x128xbf16>
    %29 = vector.shape_cast %28 : vector<1x128x128xbf16> to vector<128x128xbf16>
    %cst_35 = arith.constant dense<0.000000e+00> : vector<256x128xf32>
    %30 = tpu.matmul %27, %29, %cst_35 {dimension_numbers = #tpu.dot_dimension_numbers<[1], [0], [0], [1], [0, 0, 1, 1], [], []>} : vector<256x128xbf16>, vector<128x128xbf16>, vector<256x128xf32> -> vector<256x128xf32>
    %c0_36 = arith.constant 0 : index
    %c0_37 = arith.constant 0 : index
    %31 = vector.load %arg5[%c0_36, %c0_37] : memref<256x128xf32, #tpu.memory_space<vmem>>, vector<256x128xf32>
    %32 = arith.addf %31, %30 : vector<256x128xf32>
    %c0_38 = arith.constant 0 : index
    %c0_39 = arith.constant 0 : index
    %33 = vector.load %arg5[%c0_38, %c0_39] : memref<256x128xf32, #tpu.memory_space<vmem>>, vector<256x128xf32>
    tpu.vector_store %arg5[%c0_38, %c0_39], %32 {strides = array<i32>} : memref<256x128xf32, #tpu.memory_space<vmem>>, vector<256x128xf32>,
    %c0_40 = arith.constant 0 : index
    %c2_41 = arith.constant 2 : index
    %c2_42 = arith.constant 2 : index
    %c0_43 = arith.constant 0 : index
    %34 = vector.load %arg1[%c0_40, %c2_41, %c2_42, %c0_43] : memref<1x20x20x128xbf16, #tpu.memory_space<vmem>>, vector<1x16x16x128xbf16>
    %35 = vector.shape_cast %34 : vector<1x16x16x128xbf16> to vector<16x16x128xbf16>
    %36 = vector.shape_cast %35 : vector<16x16x128xbf16> to vector<256x128xbf16>
    %c4_44 = arith.constant 4 : index
    %c0_45 = arith.constant 0 : index
    %c0_46 = arith.constant 0 : index
    %37 = vector.load %arg2[%c4_44, %c0_45, %c0_46] : memref<9x128x128xbf16, #tpu.memory_space<vmem>>, vector<1x128x128xbf16>
    %38 = vector.shape_cast %37 : vector<1x128x128xbf16> to vector<128x128xbf16>
    %cst_47 = arith.constant dense<0.000000e+00> : vector<256x128xf32>
    %39 = tpu.matmul %36, %38, %cst_47 {dimension_numbers = #tpu.dot_dimension_numbers<[1], [0], [0], [1], [0, 0, 1, 1], [], []>} : vector<256x128xbf16>, vector<128x128xbf16>, vector<256x128xf32> -> vector<256x128xf32>
    %c0_48 = arith.constant 0 : index
    %c0_49 = arith.constant 0 : index
    %40 = vector.load %arg5[%c0_48, %c0_49] : memref<256x128xf32, #tpu.memory_space<vmem>>, vector<256x128xf32>
    %41 = arith.addf %40, %39 : vector<256x128xf32>
    %c0_50 = arith.constant 0 : index
    %c0_51 = arith.constant 0 : index
    %42 = vector.load %arg5[%c0_50, %c0_51] : memref<256x128xf32, #tpu.memory_space<vmem>>, vector<256x128xf32>
    tpu.vector_store %arg5[%c0_50, %c0_51], %41 {strides = array<i32>} : memref<256x128xf32, #tpu.memory_space<vmem>>, vector<256x128xf32>,
    %c0_52 = arith.constant 0 : index
    %c2_53 = arith.constant 2 : index
    %c4_54 = arith.constant 4 : index
    %c0_55 = arith.constant 0 : index
    %43 = vector.load %arg1[%c0_52, %c2_53, %c4_54, %c0_55] : memref<1x20x20x128xbf16, #tpu.memory_space<vmem>>, vector<1x16x16x128xbf16>
    %44 = vector.shape_cast %43 : vector<1x16x16x128xbf16> to vector<16x16x128xbf16>
    %45 = vector.shape_cast %44 : vector<16x16x128xbf16> to vector<256x128xbf16>
    %c5 = arith.constant 5 : index
    %c0_56 = arith.constant 0 : index
    %c0_57 = arith.constant 0 : index
    %46 = vector.load %arg2[%c5, %c0_56, %c0_57] : memref<9x128x128xbf16, #tpu.memory_space<vmem>>, vector<1x128x128xbf16>
    %47 = vector.shape_cast %46 : vector<1x128x128xbf16> to vector<128x128xbf16>
    %cst_58 = arith.constant dense<0.000000e+00> : vector<256x128xf32>
    %48 = tpu.matmul %45, %47, %cst_58 {dimension_numbers = #tpu.dot_dimension_numbers<[1], [0], [0], [1], [0, 0, 1, 1], [], []>} : vector<256x128xbf16>, vector<128x128xbf16>, vector<256x128xf32> -> vector<256x128xf32>
    %c0_59 = arith.constant 0 : index
    %c0_60 = arith.constant 0 : index
    %49 = vector.load %arg5[%c0_59, %c0_60] : memref<256x128xf32, #tpu.memory_space<vmem>>, vector<256x128xf32>
    %50 = arith.addf %49, %48 : vector<256x128xf32>
    %c0_61 = arith.constant 0 : index
    %c0_62 = arith.constant 0 : index
    %51 = vector.load %arg5[%c0_61, %c0_62] : memref<256x128xf32, #tpu.memory_space<vmem>>, vector<256x128xf32>
    tpu.vector_store %arg5[%c0_61, %c0_62], %50 {strides = array<i32>} : memref<256x128xf32, #tpu.memory_space<vmem>>, vector<256x128xf32>,
    %c0_63 = arith.constant 0 : index
    %c4_64 = arith.constant 4 : index
    %c0_65 = arith.constant 0 : index
    %c0_66 = arith.constant 0 : index
    %52 = vector.load %arg1[%c0_63, %c4_64, %c0_65, %c0_66] : memref<1x20x20x128xbf16, #tpu.memory_space<vmem>>, vector<1x16x16x128xbf16>
    %53 = vector.shape_cast %52 : vector<1x16x16x128xbf16> to vector<16x16x128xbf16>
    %54 = vector.shape_cast %53 : vector<16x16x128xbf16> to vector<256x128xbf16>
    %c6 = arith.constant 6 : index
    %c0_67 = arith.constant 0 : index
    %c0_68 = arith.constant 0 : index
    %55 = vector.load %arg2[%c6, %c0_67, %c0_68] : memref<9x128x128xbf16, #tpu.memory_space<vmem>>, vector<1x128x128xbf16>
    %56 = vector.shape_cast %55 : vector<1x128x128xbf16> to vector<128x128xbf16>
    %cst_69 = arith.constant dense<0.000000e+00> : vector<256x128xf32>
    %57 = tpu.matmul %54, %56, %cst_69 {dimension_numbers = #tpu.dot_dimension_numbers<[1], [0], [0], [1], [0, 0, 1, 1], [], []>} : vector<256x128xbf16>, vector<128x128xbf16>, vector<256x128xf32> -> vector<256x128xf32>
    %c0_70 = arith.constant 0 : index
    %c0_71 = arith.constant 0 : index
    %58 = vector.load %arg5[%c0_70, %c0_71] : memref<256x128xf32, #tpu.memory_space<vmem>>, vector<256x128xf32>
    %59 = arith.addf %58, %57 : vector<256x128xf32>
    %c0_72 = arith.constant 0 : index
    %c0_73 = arith.constant 0 : index
    %60 = vector.load %arg5[%c0_72, %c0_73] : memref<256x128xf32, #tpu.memory_space<vmem>>, vector<256x128xf32>
    tpu.vector_store %arg5[%c0_72, %c0_73], %59 {strides = array<i32>} : memref<256x128xf32, #tpu.memory_space<vmem>>, vector<256x128xf32>,
    %c0_74 = arith.constant 0 : index
    %c4_75 = arith.constant 4 : index
    %c2_76 = arith.constant 2 : index
    %c0_77 = arith.constant 0 : index
    %61 = vector.load %arg1[%c0_74, %c4_75, %c2_76, %c0_77] : memref<1x20x20x128xbf16, #tpu.memory_space<vmem>>, vector<1x16x16x128xbf16>
    %62 = vector.shape_cast %61 : vector<1x16x16x128xbf16> to vector<16x16x128xbf16>
    %63 = vector.shape_cast %62 : vector<16x16x128xbf16> to vector<256x128xbf16>
    %c7 = arith.constant 7 : index
    %c0_78 = arith.constant 0 : index
    %c0_79 = arith.constant 0 : index
    %64 = vector.load %arg2[%c7, %c0_78, %c0_79] : memref<9x128x128xbf16, #tpu.memory_space<vmem>>, vector<1x128x128xbf16>
    %65 = vector.shape_cast %64 : vector<1x128x128xbf16> to vector<128x128xbf16>
    %cst_80 = arith.constant dense<0.000000e+00> : vector<256x128xf32>
    %66 = tpu.matmul %63, %65, %cst_80 {dimension_numbers = #tpu.dot_dimension_numbers<[1], [0], [0], [1], [0, 0, 1, 1], [], []>} : vector<256x128xbf16>, vector<128x128xbf16>, vector<256x128xf32> -> vector<256x128xf32>
    %c0_81 = arith.constant 0 : index
    %c0_82 = arith.constant 0 : index
    %67 = vector.load %arg5[%c0_81, %c0_82] : memref<256x128xf32, #tpu.memory_space<vmem>>, vector<256x128xf32>
    %68 = arith.addf %67, %66 : vector<256x128xf32>
    %c0_83 = arith.constant 0 : index
    %c0_84 = arith.constant 0 : index
    %69 = vector.load %arg5[%c0_83, %c0_84] : memref<256x128xf32, #tpu.memory_space<vmem>>, vector<256x128xf32>
    tpu.vector_store %arg5[%c0_83, %c0_84], %68 {strides = array<i32>} : memref<256x128xf32, #tpu.memory_space<vmem>>, vector<256x128xf32>,
    %c0_85 = arith.constant 0 : index
    %c4_86 = arith.constant 4 : index
    %c4_87 = arith.constant 4 : index
    %c0_88 = arith.constant 0 : index
    %70 = vector.load %arg1[%c0_85, %c4_86, %c4_87, %c0_88] : memref<1x20x20x128xbf16, #tpu.memory_space<vmem>>, vector<1x16x16x128xbf16>
    %71 = vector.shape_cast %70 : vector<1x16x16x128xbf16> to vector<16x16x128xbf16>
    %72 = vector.shape_cast %71 : vector<16x16x128xbf16> to vector<256x128xbf16>
    %c8 = arith.constant 8 : index
    %c0_89 = arith.constant 0 : index
    %c0_90 = arith.constant 0 : index
    %73 = vector.load %arg2[%c8, %c0_89, %c0_90] : memref<9x128x128xbf16, #tpu.memory_space<vmem>>, vector<1x128x128xbf16>
    %74 = vector.shape_cast %73 : vector<1x128x128xbf16> to vector<128x128xbf16>
    %cst_91 = arith.constant dense<0.000000e+00> : vector<256x128xf32>
    %75 = tpu.matmul %72, %74, %cst_91 {dimension_numbers = #tpu.dot_dimension_numbers<[1], [0], [0], [1], [0, 0, 1, 1], [], []>} : vector<256x128xbf16>, vector<128x128xbf16>, vector<256x128xf32> -> vector<256x128xf32>
    %c0_92 = arith.constant 0 : index
    %c0_93 = arith.constant 0 : index
    %76 = vector.load %arg5[%c0_92, %c0_93] : memref<256x128xf32, #tpu.memory_space<vmem>>, vector<256x128xf32>
    %77 = arith.addf %76, %75 : vector<256x128xf32>
    %c0_94 = arith.constant 0 : index
    %c0_95 = arith.constant 0 : index
    %78 = vector.load %arg5[%c0_94, %c0_95] : memref<256x128xf32, #tpu.memory_space<vmem>>, vector<256x128xf32>
    tpu.vector_store %arg5[%c0_94, %c0_95], %77 {strides = array<i32>} : memref<256x128xf32, #tpu.memory_space<vmem>>, vector<256x128xf32>,
    %c0_96 = arith.constant 0 : index
    %c0_97 = arith.constant 0 : index
    %79 = vector.load %arg5[%c0_96, %c0_97] : memref<256x128xf32, #tpu.memory_space<vmem>>, vector<256x128xf32>
    %80 = arith.truncf %79 : vector<256x128xf32> to vector<256x128xbf16>
    %c0_98 = arith.constant 0 : index
    %c0_99 = arith.constant 0 : index
    %c0_100 = arith.constant 0 : index
    %81 = vector.load %arg3[%c0_98, %c0_99, %c0_100] : memref<1x256x128xbf16, #tpu.memory_space<vmem>>, vector<1x256x128xbf16>
    %82 = vector.shape_cast %81 : vector<1x256x128xbf16> to vector<256x128xbf16>
    %83 = vector.shape_cast %80 : vector<256x128xbf16> to vector<1x256x128xbf16>
    tpu.vector_store %arg3[%c0_98, %c0_99, %c0_100], %83 {strides = array<i32>} : memref<1x256x128xbf16, #tpu.memory_space<vmem>>, vector<1x256x128xbf16>,
    %cst_101 = arith.constant dense<0.000000e+00> : vector<128xf32>
    %84 = vector.multi_reduction <add>, %79, %cst_101 [0] : vector<256x128xf32> to vector<128xf32>
    %85 = vector.shape_cast %84 : vector<128xf32> to vector<1x128xf32>
    %c0_102 = arith.constant 0 : index
    %c0_103 = arith.constant 0 : index
    %c0_104 = arith.constant 0 : index
    %86 = vector.load %arg4[%c0_102, %c0_103, %c0_104] : memref<1x2x128xf32, #tpu.memory_space<vmem>>, vector<1x1x128xf32>
    %87 = vector.shape_cast %86 : vector<1x1x128xf32> to vector<1x128xf32>
    %88 = vector.shape_cast %85 : vector<1x128xf32> to vector<1x1x128xf32>
    tpu.vector_store %arg4[%c0_102, %c0_103, %c0_104], %88 {strides = array<i32>} : memref<1x2x128xf32, #tpu.memory_space<vmem>>, vector<1x1x128xf32>,
    %89 = arith.mulf %79, %79 : vector<256x128xf32>
    %cst_105 = arith.constant dense<0.000000e+00> : vector<128xf32>
    %90 = vector.multi_reduction <add>, %89, %cst_105 [0] : vector<256x128xf32> to vector<128xf32>
    %91 = vector.shape_cast %90 : vector<128xf32> to vector<1x128xf32>
    %c0_106 = arith.constant 0 : index
    %c1_107 = arith.constant 1 : index
    %c0_108 = arith.constant 0 : index
    %92 = vector.load %arg4[%c0_106, %c1_107, %c0_108] : memref<1x2x128xf32, #tpu.memory_space<vmem>>, vector<1x1x128xf32>
    %93 = vector.shape_cast %92 : vector<1x1x128xf32> to vector<1x128xf32>
    %94 = vector.shape_cast %91 : vector<1x128xf32> to vector<1x1x128xf32>
    tpu.vector_store %arg4[%c0_106, %c1_107, %c0_108], %94 {strides = array<i32>} : memref<1x2x128xf32, #tpu.memory_space<vmem>>, vector<1x1x128xf32>,
    return
  }
  func.func @transform_0(%arg0: i32) -> (i32, i32, i32, i32) {
    %c0_i32 = arith.constant 0 : i32
    %c0_i32_0 = arith.constant 0 : i32
    %c0_i32_1 = arith.constant 0 : i32
    %c0_i32_2 = arith.constant 0 : i32
    return %arg0, %c0_i32, %c0_i32_0, %c0_i32_1 : i32, i32, i32, i32
  }
  func.func @transform_1(%arg0: i32) -> (i32, i32, i32) {
    %c0_i32 = arith.constant 0 : i32
    %c0_i32_0 = arith.constant 0 : i32
    %c0_i32_1 = arith.constant 0 : i32
    %c0_i32_2 = arith.constant 0 : i32
    return %c0_i32, %c0_i32_0, %c0_i32_1 : i32, i32, i32
  }
  func.func @transform_2(%arg0: i32) -> (i32, i32, i32) {
    %c0_i32 = arith.constant 0 : i32
    %c0_i32_0 = arith.constant 0 : i32
    %c0_i32_1 = arith.constant 0 : i32
    return %arg0, %c0_i32, %c0_i32_0 : i32, i32, i32
  }
  func.func @transform_3(%arg0: i32) -> (i32, i32, i32) {
    %c0_i32 = arith.constant 0 : i32
    %c0_i32_0 = arith.constant 0 : i32
    %c0_i32_1 = arith.constant 0 : i32
    return %arg0, %c0_i32, %c0_i32_0 : i32, i32, i32
  }
}

module attributes {stable_mosaic.version = 11 : i64} {
  func.func @_affine_kernel(%arg0: i32, %arg1: memref<256x128xbf16, #tpu.memory_space<vmem>>, %arg2: memref<1x128xf32, #tpu.memory_space<vmem>>, %arg3: memref<1x128xf32, #tpu.memory_space<vmem>>, %arg4: memref<256x128xbf16, #tpu.memory_space<vmem>>) attributes {dimension_semantics = [#tpu.dimension_semantics<parallel>], iteration_bounds = array<i64: 2>, scalar_prefetch = 0 : i64, scratch_operands = 0 : i64, tpu.core_type = #tpu.core_type<tc>, window_params = [{transform_indices = @transform_0, window_bounds = array<i64: 256, 128>}, {pipeline_mode = #tpu.pipeline_mode<synchronous>, transform_indices = @transform_1, window_bounds = array<i64: 1, 128>}, {pipeline_mode = #tpu.pipeline_mode<synchronous>, transform_indices = @transform_2, window_bounds = array<i64: 1, 128>}, {transform_indices = @transform_3, window_bounds = array<i64: 256, 128>}]} {
    %c0 = arith.constant 0 : index
    %c0_0 = arith.constant 0 : index
    %0 = vector.load %arg1[%c0, %c0_0] : memref<256x128xbf16, #tpu.memory_space<vmem>>, vector<256x128xbf16>
    %1 = arith.extf %0 : vector<256x128xbf16> to vector<256x128xf32>
    %c0_1 = arith.constant 0 : index
    %c0_2 = arith.constant 0 : index
    %2 = vector.load %arg2[%c0_1, %c0_2] : memref<1x128xf32, #tpu.memory_space<vmem>>, vector<1x128xf32>
    %3 = vector.broadcast %2 : vector<1x128xf32> to vector<256x128xf32>
    %4 = arith.mulf %1, %3 : vector<256x128xf32>
    %c0_3 = arith.constant 0 : index
    %c0_4 = arith.constant 0 : index
    %5 = vector.load %arg3[%c0_3, %c0_4] : memref<1x128xf32, #tpu.memory_space<vmem>>, vector<1x128xf32>
    %6 = vector.broadcast %5 : vector<1x128xf32> to vector<256x128xf32>
    %7 = arith.addf %4, %6 : vector<256x128xf32>
    %cst = arith.constant 0.000000e+00 : f32
    %8 = vector.broadcast %cst : f32 to vector<256x128xf32>
    %9 = arith.maximumf %7, %8 : vector<256x128xf32>
    %10 = arith.truncf %9 : vector<256x128xf32> to vector<256x128xbf16>
    %c0_5 = arith.constant 0 : index
    %c0_6 = arith.constant 0 : index
    %11 = vector.load %arg4[%c0_5, %c0_6] : memref<256x128xbf16, #tpu.memory_space<vmem>>, vector<256x128xbf16>
    tpu.vector_store %arg4[%c0_5, %c0_6], %10 {strides = array<i32>} : memref<256x128xbf16, #tpu.memory_space<vmem>>, vector<256x128xbf16>,
    return
  }
  func.func @transform_0(%arg0: i32) -> (i32, i32) {
    %c0_i32 = arith.constant 0 : i32
    %c0_i32_0 = arith.constant 0 : i32
    return %arg0, %c0_i32 : i32, i32
  }
  func.func @transform_1(%arg0: i32) -> (i32, i32) {
    %c0_i32 = arith.constant 0 : i32
    %c0_i32_0 = arith.constant 0 : i32
    %c0_i32_1 = arith.constant 0 : i32
    return %c0_i32, %c0_i32_0 : i32, i32
  }
  func.func @transform_2(%arg0: i32) -> (i32, i32) {
    %c0_i32 = arith.constant 0 : i32
    %c0_i32_0 = arith.constant 0 : i32
    %c0_i32_1 = arith.constant 0 : i32
    return %c0_i32, %c0_i32_0 : i32, i32
  }
  func.func @transform_3(%arg0: i32) -> (i32, i32) {
    %c0_i32 = arith.constant 0 : i32
    %c0_i32_0 = arith.constant 0 : i32
    return %arg0, %c0_i32 : i32, i32
  }
}

module attributes {stable_mosaic.version = 11 : i64} {
  func.func @_mm_stats_kernel(%arg0: i32, %arg1: memref<256x128xbf16, #tpu.memory_space<vmem>>, %arg2: memref<128x512xbf16, #tpu.memory_space<vmem>>, %arg3: memref<256x512xbf16, #tpu.memory_space<vmem>>, %arg4: memref<1x2x512xf32, #tpu.memory_space<vmem>>) attributes {dimension_semantics = [#tpu.dimension_semantics<parallel>], iteration_bounds = array<i64: 2>, scalar_prefetch = 0 : i64, scratch_operands = 0 : i64, tpu.core_type = #tpu.core_type<tc>, window_params = [{transform_indices = @transform_0, window_bounds = array<i64: 256, 128>}, {pipeline_mode = #tpu.pipeline_mode<synchronous>, transform_indices = @transform_1, window_bounds = array<i64: 128, 512>}, {transform_indices = @transform_2, window_bounds = array<i64: 256, 512>}, {transform_indices = @transform_3, window_bounds = array<i64: 1, 2, 512>}]} {
    %c0 = arith.constant 0 : index
    %c0_0 = arith.constant 0 : index
    %0 = vector.load %arg1[%c0, %c0_0] : memref<256x128xbf16, #tpu.memory_space<vmem>>, vector<256x128xbf16>
    %c0_1 = arith.constant 0 : index
    %c0_2 = arith.constant 0 : index
    %1 = vector.load %arg2[%c0_1, %c0_2] : memref<128x512xbf16, #tpu.memory_space<vmem>>, vector<128x512xbf16>
    %cst = arith.constant dense<0.000000e+00> : vector<256x512xf32>
    %2 = tpu.matmul %0, %1, %cst {dimension_numbers = #tpu.dot_dimension_numbers<[1], [0], [0], [1], [0, 0, 1, 1], [], []>} : vector<256x128xbf16>, vector<128x512xbf16>, vector<256x512xf32> -> vector<256x512xf32>
    %3 = arith.truncf %2 : vector<256x512xf32> to vector<256x512xbf16>
    %c0_3 = arith.constant 0 : index
    %c0_4 = arith.constant 0 : index
    %4 = vector.load %arg3[%c0_3, %c0_4] : memref<256x512xbf16, #tpu.memory_space<vmem>>, vector<256x512xbf16>
    tpu.vector_store %arg3[%c0_3, %c0_4], %3 {strides = array<i32>} : memref<256x512xbf16, #tpu.memory_space<vmem>>, vector<256x512xbf16>,
    %cst_5 = arith.constant dense<0.000000e+00> : vector<512xf32>
    %5 = vector.multi_reduction <add>, %2, %cst_5 [0] : vector<256x512xf32> to vector<512xf32>
    %6 = vector.shape_cast %5 : vector<512xf32> to vector<1x512xf32>
    %c0_6 = arith.constant 0 : index
    %c0_7 = arith.constant 0 : index
    %c0_8 = arith.constant 0 : index
    %7 = vector.load %arg4[%c0_6, %c0_7, %c0_8] : memref<1x2x512xf32, #tpu.memory_space<vmem>>, vector<1x1x512xf32>
    %8 = vector.shape_cast %7 : vector<1x1x512xf32> to vector<1x512xf32>
    %9 = vector.shape_cast %6 : vector<1x512xf32> to vector<1x1x512xf32>
    tpu.vector_store %arg4[%c0_6, %c0_7, %c0_8], %9 {strides = array<i32>} : memref<1x2x512xf32, #tpu.memory_space<vmem>>, vector<1x1x512xf32>,
    %10 = arith.mulf %2, %2 : vector<256x512xf32>
    %cst_9 = arith.constant dense<0.000000e+00> : vector<512xf32>
    %11 = vector.multi_reduction <add>, %10, %cst_9 [0] : vector<256x512xf32> to vector<512xf32>
    %12 = vector.shape_cast %11 : vector<512xf32> to vector<1x512xf32>
    %c0_10 = arith.constant 0 : index
    %c1 = arith.constant 1 : index
    %c0_11 = arith.constant 0 : index
    %13 = vector.load %arg4[%c0_10, %c1, %c0_11] : memref<1x2x512xf32, #tpu.memory_space<vmem>>, vector<1x1x512xf32>
    %14 = vector.shape_cast %13 : vector<1x1x512xf32> to vector<1x512xf32>
    %15 = vector.shape_cast %12 : vector<1x512xf32> to vector<1x1x512xf32>
    tpu.vector_store %arg4[%c0_10, %c1, %c0_11], %15 {strides = array<i32>} : memref<1x2x512xf32, #tpu.memory_space<vmem>>, vector<1x1x512xf32>,
    return
  }
  func.func @transform_0(%arg0: i32) -> (i32, i32) {
    %c0_i32 = arith.constant 0 : i32
    %c0_i32_0 = arith.constant 0 : i32
    return %arg0, %c0_i32 : i32, i32
  }
  func.func @transform_1(%arg0: i32) -> (i32, i32) {
    %c0_i32 = arith.constant 0 : i32
    %c0_i32_0 = arith.constant 0 : i32
    %c0_i32_1 = arith.constant 0 : i32
    return %c0_i32, %c0_i32_0 : i32, i32
  }
  func.func @transform_2(%arg0: i32) -> (i32, i32) {
    %c0_i32 = arith.constant 0 : i32
    %c0_i32_0 = arith.constant 0 : i32
    return %arg0, %c0_i32 : i32, i32
  }
  func.func @transform_3(%arg0: i32) -> (i32, i32, i32) {
    %c0_i32 = arith.constant 0 : i32
    %c0_i32_0 = arith.constant 0 : i32
    %c0_i32_1 = arith.constant 0 : i32
    return %arg0, %c0_i32, %c0_i32_0 : i32, i32, i32
  }
}

module attributes {stable_mosaic.version = 11 : i64} {
  func.func @_affine_kernel(%arg0: i32, %arg1: memref<256x512xbf16, #tpu.memory_space<vmem>>, %arg2: memref<1x512xf32, #tpu.memory_space<vmem>>, %arg3: memref<1x512xf32, #tpu.memory_space<vmem>>, %arg4: memref<256x512xf32, #tpu.memory_space<vmem>>) attributes {dimension_semantics = [#tpu.dimension_semantics<parallel>], iteration_bounds = array<i64: 2>, scalar_prefetch = 0 : i64, scratch_operands = 0 : i64, tpu.core_type = #tpu.core_type<tc>, window_params = [{transform_indices = @transform_0, window_bounds = array<i64: 256, 512>}, {pipeline_mode = #tpu.pipeline_mode<synchronous>, transform_indices = @transform_1, window_bounds = array<i64: 1, 512>}, {pipeline_mode = #tpu.pipeline_mode<synchronous>, transform_indices = @transform_2, window_bounds = array<i64: 1, 512>}, {transform_indices = @transform_3, window_bounds = array<i64: 256, 512>}]} {
    %c0 = arith.constant 0 : index
    %c0_0 = arith.constant 0 : index
    %0 = vector.load %arg1[%c0, %c0_0] : memref<256x512xbf16, #tpu.memory_space<vmem>>, vector<256x512xbf16>
    %1 = arith.extf %0 : vector<256x512xbf16> to vector<256x512xf32>
    %c0_1 = arith.constant 0 : index
    %c0_2 = arith.constant 0 : index
    %2 = vector.load %arg2[%c0_1, %c0_2] : memref<1x512xf32, #tpu.memory_space<vmem>>, vector<1x512xf32>
    %3 = vector.broadcast %2 : vector<1x512xf32> to vector<256x512xf32>
    %4 = arith.mulf %1, %3 : vector<256x512xf32>
    %c0_3 = arith.constant 0 : index
    %c0_4 = arith.constant 0 : index
    %5 = vector.load %arg3[%c0_3, %c0_4] : memref<1x512xf32, #tpu.memory_space<vmem>>, vector<1x512xf32>
    %6 = vector.broadcast %5 : vector<1x512xf32> to vector<256x512xf32>
    %7 = arith.addf %4, %6 : vector<256x512xf32>
    %cst = arith.constant 0.000000e+00 : f32
    %8 = vector.broadcast %cst : f32 to vector<256x512xf32>
    %9 = arith.maximumf %7, %8 : vector<256x512xf32>
    %c0_5 = arith.constant 0 : index
    %c0_6 = arith.constant 0 : index
    %10 = vector.load %arg4[%c0_5, %c0_6] : memref<256x512xf32, #tpu.memory_space<vmem>>, vector<256x512xf32>
    tpu.vector_store %arg4[%c0_5, %c0_6], %9 {strides = array<i32>} : memref<256x512xf32, #tpu.memory_space<vmem>>, vector<256x512xf32>,
    return
  }
  func.func @transform_0(%arg0: i32) -> (i32, i32) {
    %c0_i32 = arith.constant 0 : i32
    %c0_i32_0 = arith.constant 0 : i32
    return %arg0, %c0_i32 : i32, i32
  }
  func.func @transform_1(%arg0: i32) -> (i32, i32) {
    %c0_i32 = arith.constant 0 : i32
    %c0_i32_0 = arith.constant 0 : i32
    %c0_i32_1 = arith.constant 0 : i32
    return %c0_i32, %c0_i32_0 : i32, i32
  }
  func.func @transform_2(%arg0: i32) -> (i32, i32) {
    %c0_i32 = arith.constant 0 : i32
    %c0_i32_0 = arith.constant 0 : i32
    %c0_i32_1 = arith.constant 0 : i32
    return %c0_i32, %c0_i32_0 : i32, i32
  }
  func.func @transform_3(%arg0: i32) -> (i32, i32) {
    %c0_i32 = arith.constant 0 : i32
    %c0_i32_0 = arith.constant 0 : i32
    return %arg0, %c0_i32 : i32, i32
  }
}

</mosaic_0001>

<bundles_post_ra>
// kernel: bottleneck_forward.7
= control target key start
LH: loop header
LB: loop body
LE: loop exit
PB: predicated region body
PF: predicated region fallthrough
CT: control target
= control target key end

     0   :  { %s981_s12 = smov 0   ;;  %s1238_s0 = inlined_call_operand.vmem [shape: bf16[512,128], index: 0, kind: input, shape index: {}]   ;;  %s1239_s1 = inlined_call_operand.vmem [shape: f32[1,128], index: 1, kind: input, shape index: {}]   ;;  %s1240_s2 = inlined_call_operand.vmem [shape: f32[1,128], index: 2, kind: input, shape index: {}]   ;;  %s1241_s3 = inlined_call_operand.vmem [shape: bf16[2,20,20,128], index: 3, kind: output, shape index: {}]  }
   0x1 LB: > { %s739_s13 = sadd.s32 4294967295, %s958_s12   ;;  %p743_p0 = scmp.ge.s32.totalorder %s958_s12, 1  ;;  %s958_s12 = sphi %s981_s12, %s13_s12  }
   0x2   : > { %p138_p1 = scmp.lt.s32.totalorder %s958_s12, 3 }
   0x4   : > { %p139_p2 = pnand %p743_p0, %p138_p1 }
   0x5   : > { %p168_p3 = scmp.lt.s32.totalorder (!%p139_p2), %s739_s13, 1  ;;  %s744_s14 = sshll.u32 (!%p139_p2), %s739_s13, 5  ;;  %v1002_v0 = vld [vmem:[%s1239_s1] ss:$0 sm:$0xff] (!%p139_p2)  ;;  %v960_v1 = vmov (!%p139_p2), 0   ;;  %vm504_vm0 = vcmask (!%p139_p2), 1040384  }
   0x6   : > { %142 = sbr.rel (%p139_p2) target bundleno = 83 (0x53), region = 32  ;;  %p163_p4 = scmp.lt.s32.totalorder (!%p139_p2), %s744_s14, 63  ;;  %vm505_vm1 = vcmask (!%p139_p2), 1044484   ;;  %v1071_v10 = vld [vmem:[%s1240_s2] ss:$0 sm:$0xff] (!%p139_p2) }
   0x7   : > { %vm1091_vm2 = vmor (!%p139_p2), %vm504_vm0, %vm505_vm1 }
   0xd   : > { %s1245_s13 = smov (!%p168_p3, %s739_s13), 1  ;;  %s1247_s14 = smov (!%p163_p4, %s744_s14), 63 }
   0xe   : > { %s942_s15 = smul.u32 240, %s1245_s13  ;;  %s745_s16 = sshll.u32 %s1247_s14, 2 }
   0xf   : > { %s997_s22 = scalar_lea.vmem %s1238_s0, %s745_s16 }
  0x10   : > { %s992_s19 = scalar_lea.vmem %s1241_s3, %s942_s15  ;;  %v864_v2 = vld [vmem:[%s997_s22] sm:$0xff]   ;;  %v927_v3 = vld [vmem:[%s997_s22 + $0x8] sm:$0xff]   ;;  %v928_v4 = vld [vmem:[%s997_s22 + $0x10] sm:$0xff]  }
  0x11   : > { %370 = vst [vmem:[%s992_s19 + $0x18] sm:$0xf] %v960_v1  ;;  %364 = vst [vmem:[%s992_s19] sm:$0xf] %v960_v1  ;;  %v865_v5 = vunpack.c.l.bf16 %v864_v2  ;;  %v866_v6 = vunpack.c.h.bf16 %v864_v2  ;;  %v869_v7 = vunpack.c.l.bf16 %v927_v3  ;;  %v870_v8 = vunpack.c.h.bf16 %v927_v3  ;;  %v929_v9 = vld [vmem:[%s997_s22 + $0x18] sm:$0xff]   ;;  %v930_v56 = vld [vmem:[%s997_s22 + $0x20] sm:$0xff]  }
  0x12   : > { %365 = vst [vmem:[%s992_s19 + $0x4] sm:$0xf] %v960_v1  ;;  %366 = vst [vmem:[%s992_s19 + $0x8] sm:$0x3] %v960_v1  ;;  %v873_v11 = vunpack.c.l.bf16 %v928_v4  ;;  %v874_v12 = vunpack.c.h.bf16 %v928_v4  ;;  %v877_v13 = vunpack.c.l.bf16 %v929_v9  ;;  %v878_v14 = vunpack.c.h.bf16 %v929_v9  ;;  %v931_v61 = vld [vmem:[%s997_s22 + $0x28] sm:$0xff]   ;;  %v932_v3 = vld [vmem:[%s997_s22 + $0x30] sm:$0xff]  }
  0x13   : > { %367 = vst [vmem:[%s992_s19 + $0xc] sm:$0xf] %v960_v1  ;;  %368 = vst [vmem:[%s992_s19 + $0x10] sm:$0xf] %v960_v1  ;;  %v245_v15 = vmul.f32 %v865_v5, %v1002_v0  ;;  %v246_v16 = vmul.f32 %v866_v6, %v1002_v0  ;;  %v247_v17 = vmul.f32 %v869_v7, %v1002_v0  ;;  %v881_v6 = vunpack.c.l.bf16 %v930_v56 }
  0x14   : > { %369 = vst [vmem:[%s992_s19 + $0x14] sm:$0x3] %v960_v1  ;;  %371 = vst [vmem:[%s992_s19 + $0x1c] sm:$0xf] %v960_v1  ;;  %v248_v18 = vmul.f32 %v870_v8, %v1002_v0  ;;  %v249_v19 = vmul.f32 %v873_v11, %v1002_v0  ;;  %v250_v20 = vmul.f32 %v874_v12, %v1002_v0  ;;  %v882_v7 = vunpack.c.h.bf16 %v930_v56  ;;  %v933_v8 = vld [vmem:[%s997_s22 + $0x38] sm:$0xff]  }
  0x15   : > { %372 = vst [vmem:[%s992_s19 + $0x20] sm:$0x3] %v960_v1  ;;  %373 = vst [vmem:[%s992_s19 + $0x24] sm:$0xf] %v960_v1  ;;  %v251_v21 = vmul.f32 %v877_v13, %v1002_v0  ;;  %v252_v22 = vmul.f32 %v878_v14, %v1002_v0  ;;  %v284_v23 = vadd.f32 %v1071_v10, %v245_v15  ;;  %v885_v12 = vunpack.c.l.bf16 %v931_v61 }
  0x16   : > { %374 = vst [vmem:[%s992_s19 + $0x28] sm:$0xf] %v960_v1  ;;  %375 = vst [vmem:[%s992_s19 + $0x2c] sm:$0x3] %v960_v1  ;;  %v285_v24 = vadd.f32 %v1071_v10, %v246_v16  ;;  %v286_v25 = vadd.f32 %v1071_v10, %v247_v17  ;;  %v287_v26 = vadd.f32 %v1071_v10, %v248_v18  ;;  %v886_v13 = vunpack.c.h.bf16 %v931_v61 }
  0x17   : > { %376 = vst [vmem:[%s992_s19 + $0x30] sm:$0xf] %v960_v1  ;;  %377 = vst [vmem:[%s992_s19 + $0x34] sm:$0xf] %v960_v1  ;;  %v288_v27 = vadd.f32 %v1071_v10, %v249_v19  ;;  %v289_v28 = vadd.f32 %v1071_v10, %v250_v20  ;;  %v290_v29 = vadd.f32 %v1071_v10, %v251_v21  ;;  %v316_v31 = vmax.f32 %v284_v23, 0.0 }
  0x18   : > { %378 = vst [vmem:[%s992_s19 + $0x38] sm:$0x3] %v960_v1  ;;  %379 = vst [vmem:[%s992_s19 + $0x3c] sm:$0xf] %v960_v1  ;;  %v291_v30 = vadd.f32 %v1071_v10, %v252_v22  ;;  %v317_v32 = vmax.f32 %v285_v24, 0.0  ;;  %v318_v33 = vmax.f32 %v286_v25, 0.0  ;;  %v253_v14 = vmul.f32 %v881_v6, %v1002_v0 }
  0x19   : > { %380 = vst [vmem:[%s992_s19 + $0x40] sm:$0xf] %v960_v1  ;;  %381 = vst [vmem:[%s992_s19 + $0x44] sm:$0x3] %v960_v1  ;;  %v319_v34 = vmax.f32 %v287_v26, 0.0  ;;  %v320_v35 = vmax.f32 %v288_v27, 0.0  ;;  %v831_v39 = vpack.c.bf16 %v316_v31, %v316_v31  ;;  %v254_v15 = vmul.f32 %v882_v7, %v1002_v0 }
  0x1a   : > { %382 = vst [vmem:[%s992_s19 + $0x48] sm:$0xf] %v960_v1  ;;  %383 = vst [vmem:[%s992_s19 + $0x4c] sm:$0xf] %v960_v1  ;;  %v321_v36 = vmax.f32 %v289_v28, 0.0  ;;  %v322_v37 = vmax.f32 %v290_v29, 0.0  ;;  %v832_v40 = vpack.c.bf16 %v317_v32, %v317_v32  ;;  %v833_v41 = vpack.c.bf16 %v318_v33, %v318_v33 }
  0x1b   : > { %384 = vst [vmem:[%s992_s19 + $0x50] sm:$0x3] %v960_v1  ;;  %385 = vst [vmem:[%s992_s19 + $0x54] sm:$0xf] %v960_v1  ;;  %v323_v38 = vmax.f32 %v291_v30, 0.0  ;;  %v834_v42 = vpack.c.bf16 %v319_v34, %v319_v34  ;;  %v835_v43 = vpack.c.bf16 %v320_v35, %v320_v35  ;;  %v507_v47 = vrot.slane %v831_v39, 7 }
  0x1c   : > { %386 = vst [vmem:[%s992_s19 + $0x58] sm:$0xf] %v960_v1  ;;  %387 = vst [vmem:[%s992_s19 + $0x5c] sm:$0x3] %v960_v1  ;;  %v836_v44 = vpack.c.bf16 %v321_v36, %v321_v36  ;;  %v837_v45 = vpack.c.bf16 %v322_v37, %v322_v37  ;;  %v509_v48 = vrot.slane %v832_v40, 7  ;;  %v512_v49 = vrot.slane %v833_v41, 7 }
  0x1d   : > { %388 = vst [vmem:[%s992_s19 + $0x60] sm:$0xf] %v960_v1  ;;  %389 = vst [vmem:[%s992_s19 + $0x64] sm:$0xf] %v960_v1  ;;  %v838_v46 = vpack.c.bf16 %v323_v38, %v323_v38  ;;  %v514_v50 = vrot.slane %v834_v42, 7  ;;  %v517_v52 = vrot.slane %v835_v43, 7  ;;  %v889_v16 = vunpack.c.l.bf16 %v932_v3 }
  0x1e   : > { %390 = vst [vmem:[%s992_s19 + $0x68] sm:$0x3] %v960_v1  ;;  %391 = vst [vmem:[%s992_s19 + $0x6c] sm:$0xf] %v960_v1  ;;  %v519_v53 = vrot.slane %v836_v44, 7  ;;  %v522_v54 = vrot.slane %v837_v45, 7  ;;  %v890_v17 = vunpack.c.h.bf16 %v932_v3  ;;  %v255_v18 = vmul.f32 %v885_v12, %v1002_v0 }
  0x1f   : > { %392 = vst [vmem:[%s992_s19 + $0x70] sm:$0xf] %v960_v1  ;;  %393 = vst [vmem:[%s992_s19 + $0x74] sm:$0x3] %v960_v1  ;;  %v524_v55 = vrot.slane %v838_v46, 7  ;;  %v508_v57 = vrot.slane %v507_v47, 4  ;;  %v256_v19 = vmul.f32 %v886_v13, %v1002_v0  ;;  %v893_v20 = vunpack.c.l.bf16 %v933_v8 }
  0x20   : > { %394 = vst [vmem:[%s992_s19 + $0x78] sm:$0xf] %v960_v1  ;;  %395 = vst [vmem:[%s992_s19 + $0x7c] sm:$0xf] %v960_v1  ;;  %v511_v58 = vrot.slane %v509_v48, 4  ;;  %v513_v59 = vrot.slane %v512_v49, 4  ;;  %v894_v21 = vunpack.c.h.bf16 %v933_v8  ;;  %v292_v22 = vadd.f32 %v1071_v10, %v253_v14 }
  0x21   : > { %396 = vst [vmem:[%s992_s19 + $0x80] sm:$0x3] %v960_v1  ;;  %397 = vst [vmem:[%s992_s19 + $0x84] sm:$0xf] %v960_v1  ;;  %v516_v60 = vrot.slane %v514_v50, 4  ;;  %v518_v62 = vrot.slane %v517_v52, 4  ;;  %v510_v4 = vsel %vm1091_vm2, %v508_v57, %v509_v48  ;;  %v293_v23 = vadd.f32 %v1071_v10, %v254_v15 }
  0x22   : > { %398 = vst [vmem:[%s992_s19 + $0x88] sm:$0xf] %v960_v1  ;;  %399 = vst [vmem:[%s992_s19 + $0x8c] sm:$0x3] %v960_v1  ;;  %v521_v63 = vrot.slane %v519_v53, 4  ;;  %v526_v2 = vrot.slane %v524_v55, 4  ;;  %v515_v5 = vsel %vm1091_vm2, %v513_v59, %v514_v50  ;;  %v257_v24 = vmul.f32 %v889_v16, %v1002_v0 }
  0x23   : > { %400 = vst [vmem:[%s992_s19 + $0x90] sm:$0xf] %v960_v1  ;;  %401 = vst [vmem:[%s992_s19 + $0x94] sm:$0xf] %v960_v1  ;;  %v520_v9 = vsel %vm1091_vm2, %v518_v62, %v519_v53  ;;  %v258_v25 = vmul.f32 %v890_v17, %v1002_v0  ;;  %v294_v26 = vadd.f32 %v1071_v10, %v255_v18  ;;  %v324_v30 = vmax.f32 %v292_v22, 0.0  ;;  %v936_v6 = vld [vmem:[%s997_s22 + $0x50] sm:$0xff]  }
  0x24   : > { %402 = vst [vmem:[%s992_s19 + $0x98] sm:$0x3] %v960_v1  ;;  %403 = vst [vmem:[%s992_s19 + $0x9c] sm:$0xf] %v960_v1  ;;  %v295_v27 = vadd.f32 %v1071_v10, %v256_v19  ;;  %v259_v28 = vmul.f32 %v893_v20, %v1002_v0  ;;  %v260_v29 = vmul.f32 %v894_v21, %v1002_v0  ;;  %v325_v31 = vmax.f32 %v293_v23, 0.0  ;;  %v937_v12 = vld [vmem:[%s997_s22 + $0x58] sm:$0xff]  }
  0x25   : > { %404 = vst [vmem:[%s992_s19 + $0xa0] sm:$0xf] %v960_v1  ;;  %405 = vst [vmem:[%s992_s19 + $0xa4] sm:$0x3] %v960_v1  ;;  %v296_v32 = vadd.f32 %v1071_v10, %v257_v24  ;;  %v297_v33 = vadd.f32 %v1071_v10, %v258_v25  ;;  %v326_v34 = vmax.f32 %v294_v26, 0.0  ;;  %v839_v38 = vpack.c.bf16 %v324_v30, %v324_v30 }
  0x26   : > { %406 = vst [vmem:[%s992_s19 + $0xa8] sm:$0xf] %v960_v1  ;;  %407 = vst [vmem:[%s992_s19 + $0xac] sm:$0xf] %v960_v1  ;;  %v327_v35 = vmax.f32 %v295_v27, 0.0  ;;  %v298_v36 = vadd.f32 %v1071_v10, %v259_v28  ;;  %v299_v37 = vadd.f32 %v1071_v10, %v260_v29  ;;  %v840_v39 = vpack.c.bf16 %v325_v31, %v325_v31 }
  0x27   : > { %408 = vst [vmem:[%s992_s19 + $0xb0] sm:$0x3] %v960_v1  ;;  %409 = vst [vmem:[%s992_s19 + $0xb4] sm:$0xf] %v960_v1  ;;  %v328_v40 = vmax.f32 %v296_v32, 0.0  ;;  %v329_v41 = vmax.f32 %v297_v33, 0.0  ;;  %v841_v42 = vpack.c.bf16 %v326_v34, %v326_v34  ;;  %v905_v19 = vunpack.c.l.bf16 %v936_v6 }
  0x28   : > { %410 = vst [vmem:[%s992_s19 + $0xb8] sm:$0xf] %v960_v1  ;;  %411 = vst [vmem:[%s992_s19 + $0xbc] sm:$0x3] %v960_v1  ;;  %v842_v43 = vpack.c.bf16 %v327_v35, %v327_v35  ;;  %v330_v44 = vmax.f32 %v298_v36, 0.0  ;;  %v331_v45 = vmax.f32 %v299_v37, 0.0  ;;  %v906_v20 = vunpack.c.h.bf16 %v936_v6 }
  0x29   : > { %412 = vst [vmem:[%s992_s19 + $0xc0] sm:$0xf] %v960_v1  ;;  %413 = vst [vmem:[%s992_s19 + $0xc4] sm:$0xf] %v960_v1  ;;  %v527_v46 = vrot.slane %v839_v38, 7  ;;  %v843_v48 = vpack.c.bf16 %v328_v40, %v328_v40  ;;  %v532_v50 = vrot.slane %v841_v42, 7  ;;  %v909_v24 = vunpack.c.l.bf16 %v937_v12 }
  0x2a   : > { %414 = vst [vmem:[%s992_s19 + $0xc8] sm:$0x3] %v960_v1  ;;  %415 = vst [vmem:[%s992_s19 + $0xcc] sm:$0xf] %v960_v1  ;;  %v845_v53 = vpack.c.bf16 %v330_v44, %v330_v44  ;;  %v265_v26 = vmul.f32 %v905_v19, %v1002_v0  ;;  %v266_v27 = vmul.f32 %v906_v20, %v1002_v0  ;;  %v910_v28 = vunpack.c.h.bf16 %v937_v12 }
  0x2b   : > { %416 = vst [vmem:[%s992_s19 + $0xd0] sm:$0xf] %v960_v1  ;;  %417 = vst [vmem:[%s992_s19 + $0xd4] sm:$0x3] %v960_v1  ;;  %v528_v56 = vrot.slane %v527_v46, 4  ;;  %v267_v32 = vmul.f32 %v909_v24, %v1002_v0 }
  0x2c   : > { %418 = vst [vmem:[%s992_s19 + $0xd8] sm:$0xf] %v960_v1  ;;  %419 = vst [vmem:[%s992_s19 + $0xdc] sm:$0xf] %v960_v1  ;;  %v542_v62 = vrot.slane %v845_v53, 7  ;;  %v304_v34 = vadd.f32 %v1071_v10, %v265_v26  ;;  %v305_v35 = vadd.f32 %v1071_v10, %v266_v27  ;;  %v268_v36 = vmul.f32 %v910_v28, %v1002_v0 }
  0x2d   : > { %420 = vst [vmem:[%s992_s19 + $0xe0] sm:$0x3] %v960_v1  ;;  %421 = vst [vmem:[%s992_s19 + $0xe4] sm:$0xf] %v960_v1  ;;  %v306_v40 = vadd.f32 %v1071_v10, %v267_v32 }
  0x2e   : > { %422 = vst [vmem:[%s992_s19 + $0xe8] sm:$0xf] %v960_v1  ;;  %423 = vst [vmem:[%s992_s19 + $0xec] sm:$0x3] %v960_v1  ;;  %v523_v1 = vrot.slane %v522_v54, 4  ;;  %v543_v8 = vrot.slane %v542_v62, 4  ;;  %v307_v44 = vadd.f32 %v1071_v10, %v268_v36 }
  0x2f   : > { %781 = vst [vmem:[%s992_s19 + $0x18] sm:$0xe] %v507_v47  ;;  %784 = vst [vmem:[%s992_s19 + $0x24] sm:$0xe] %v512_v49  ;;  %v529_v47 = vrot.slane %v840_v39, 7  ;;  %v844_v49 = vpack.c.bf16 %v329_v41, %v329_v41  ;;  %v336_v42 = vmax.f32 %v304_v34, 0.0 }
  0x30   : > { %787 = vst [vmem:[%s992_s19 + $0x30] sm:$0xe] %v517_v52  ;;  %790 = vst [vmem:[%s992_s19 + $0x3c] sm:$0xe] %v522_v54  ;;  %v525_v11 = vsel %vm1091_vm2, %v523_v1, %v524_v55  ;;  %v534_v52 = vrot.slane %v842_v43, 7  ;;  %v846_v54 = vpack.c.bf16 %v331_v45, %v331_v45  ;;  %v934_v55 = vld [vmem:[%s997_s22 + $0x40] sm:$0xff]  }
  0x31   : > { %783 = vst [vmem:[%s992_s19 + $0x20] sm:$0x1] %v511_v58  ;;  %786 = vst [vmem:[%s992_s19 + $0x2c] sm:$0x1] %v516_v60  ;;  %v531_v57 = vrot.slane %v529_v47, 4  ;;  %v537_v58 = vrot.slane %v843_v48, 7 }
  0x32   : > { %782 = vst [vmem:[%s992_s19 + $0x1c] sm:$0xf] %v510_v4  ;;  %785 = vst [vmem:[%s992_s19 + $0x28] sm:$0xf] %v515_v5  ;;  %v539_v59 = vrot.slane %v844_v49, 7  ;;  %v533_v60 = vrot.slane %v532_v50, 4  ;;  %v897_v5 = vunpack.c.l.bf16 %v934_v55 }
  0x33   : > { %789 = vst [vmem:[%s992_s19 + $0x38] sm:$0x1] %v521_v63  ;;  %792 = vst [vmem:[%s992_s19 + $0x44] sm:$0x1] %v526_v2  ;;  %v536_v61 = vrot.slane %v534_v52, 4  ;;  %v544_v63 = vrot.slane %v846_v54, 7  ;;  %v530_v2 = vsel %vm1091_vm2, %v528_v56, %v529_v47 }
  0x34   : > { %788 = vst [vmem:[%s992_s19 + $0x34] sm:$0xf] %v520_v9  ;;  %791 = vst [vmem:[%s992_s19 + $0x40] sm:$0xf] %v525_v11  ;;  %v935_v1 = vld [vmem:[%s997_s22 + $0x48] sm:$0xff]   ;;  %v538_v3 = vrot.slane %v537_v58, 4  ;;  %v535_v7 = vsel %vm1091_vm2, %v533_v60, %v534_v52  ;;  %v898_v11 = vunpack.c.h.bf16 %v934_v55  ;;  %v261_v14 = vmul.f32 %v897_v5, %v1002_v0 }
  0x35   : > { %793 = vst [vmem:[%s992_s19 + $0x48] sm:$0xe] %v527_v46  ;;  %796 = vst [vmem:[%s992_s19 + $0x54] sm:$0xe] %v532_v50  ;;  %v541_v4 = vrot.slane %v539_v59, 4  ;;  %v546_v9 = vrot.slane %v544_v63, 4  ;;  %v901_v15 = vunpack.c.l.bf16 %v935_v1  ;;  %v902_v16 = vunpack.c.h.bf16 %v935_v1 }
  0x36   : > { %795 = vst [vmem:[%s992_s19 + $0x50] sm:$0x1] %v531_v57  ;;  %799 = vst [vmem:[%s992_s19 + $0x60] sm:$0xe] %v537_v58  ;;  %v540_v13 = vsel %vm1091_vm2, %v538_v3, %v539_v59  ;;  %v545_v17 = vsel %vm1091_vm2, %v543_v8, %v544_v63  ;;  %v262_v18 = vmul.f32 %v898_v11, %v1002_v0  ;;  %v337_v43 = vmax.f32 %v305_v35, 0.0  ;;  %v938_v58 = vld [vmem:[%s997_s22 + $0x60] sm:$0xff]  }
  0x37   : > { %794 = vst [vmem:[%s992_s19 + $0x4c] sm:$0xf] %v530_v2  ;;  %798 = vst [vmem:[%s992_s19 + $0x5c] sm:$0x1] %v536_v61  ;;  %v300_v21 = vadd.f32 %v1071_v10, %v261_v14  ;;  %v263_v22 = vmul.f32 %v901_v15, %v1002_v0  ;;  %v264_v23 = vmul.f32 %v902_v16, %v1002_v0  ;;  %v338_v48 = vmax.f32 %v306_v40, 0.0  ;;  %v939_v63 = vld [vmem:[%s997_s22 + $0x68] sm:$0xff]  }
  0x38   : > { %802 = vst [vmem:[%s992_s19 + $0x6c] sm:$0xe] %v542_v62  ;;  %797 = vst [vmem:[%s992_s19 + $0x58] sm:$0xf] %v535_v7  ;;  %v301_v25 = vadd.f32 %v1071_v10, %v262_v18  ;;  %v851_v50 = vpack.c.bf16 %v336_v42, %v336_v42  ;;  %v852_v52 = vpack.c.bf16 %v337_v43, %v337_v43  ;;  %v339_v53 = vmax.f32 %v307_v44, 0.0  ;;  %v941_v15 = vld [vmem:[%s997_s22 + $0x78] sm:$0xff]  }
  0x39   : > { %801 = vst [vmem:[%s992_s19 + $0x68] sm:$0x1] %v541_v4  ;;  %800 = vst [vmem:[%s992_s19 + $0x64] sm:$0xf] %v540_v13  ;;  %v332_v29 = vmax.f32 %v300_v21, 0.0  ;;  %v302_v30 = vadd.f32 %v1071_v10, %v263_v22  ;;  %v303_v31 = vadd.f32 %v1071_v10, %v264_v23  ;;  %v853_v57 = vpack.c.bf16 %v338_v48, %v338_v48 }
  0x3a   : > { %804 = vst [vmem:[%s992_s19 + $0x74] sm:$0x1] %v546_v9  ;;  %803 = vst [vmem:[%s992_s19 + $0x70] sm:$0xf] %v545_v17  ;;  %v333_v33 = vmax.f32 %v301_v25, 0.0  ;;  %v557_v60 = vrot.slane %v851_v50, 7  ;;  %v854_v62 = vpack.c.bf16 %v339_v53, %v339_v53  ;;  %v913_v8 = vunpack.c.l.bf16 %v938_v58 }
  0x3b   : > { %v847_v37 = vpack.c.bf16 %v332_v29, %v332_v29  ;;  %v334_v38 = vmax.f32 %v302_v30, 0.0  ;;  %v335_v39 = vmax.f32 %v303_v31, 0.0  ;;  %v559_v61 = vrot.slane %v852_v52, 7  ;;  %v940_v9 = vld [vmem:[%s997_s22 + $0x70] sm:$0xff]  }
  0x3c   : > { %v848_v41 = vpack.c.bf16 %v333_v33, %v333_v33  ;;  %v562_v4 = vrot.slane %v853_v57, 7  ;;  %v558_v5 = vrot.slane %v557_v60, 4  ;;  %811 = vst [vmem:[%s992_s19 + $0x90] sm:$0xe] %v557_v60  ;;  %v564_v7 = vrot.slane %v854_v62, 7 }
  0x3d   : > { %v547_v45 = vrot.slane %v847_v37, 7  ;;  %v849_v46 = vpack.c.bf16 %v334_v38, %v334_v38  ;;  %v850_v47 = vpack.c.bf16 %v335_v39, %v335_v39  ;;  %v561_v6 = vrot.slane %v559_v61, 4 }
  0x3e   : > { %v549_v49 = vrot.slane %v848_v41, 7  ;;  %v563_v12 = vrot.slane %v562_v4, 4  ;;  %814 = vst [vmem:[%s992_s19 + $0x9c] sm:$0xe] %v562_v4  ;;  %v914_v13 = vunpack.c.h.bf16 %v938_v58  ;;  %v917_v14 = vunpack.c.l.bf16 %v939_v63 }
  0x3f   : > { %v548_v54 = vrot.slane %v547_v45, 4  ;;  %805 = vst [vmem:[%s992_s19 + $0x78] sm:$0xe] %v547_v45  ;;  %v552_v55 = vrot.slane %v849_v46, 7  ;;  %v554_v56 = vrot.slane %v850_v47, 7  ;;  %v560_v16 = vsel %vm1091_vm2, %v558_v5, %v559_v61 }
  0x40   : > { %v551_v59 = vrot.slane %v549_v49, 4  ;;  %813 = vst [vmem:[%s992_s19 + $0x98] sm:$0x1] %v561_v6  ;;  %v566_v17 = vrot.slane %v564_v7, 4  ;;  %v269_v18 = vmul.f32 %v913_v8, %v1002_v0  ;;  %v918_v19 = vunpack.c.h.bf16 %v939_v63  ;;  %812 = vst [vmem:[%s992_s19 + $0x94] sm:$0xf] %v560_v16 }
  0x41   : > { %v550_v1 = vsel %vm1091_vm2, %v548_v54, %v549_v49  ;;  %v553_v2 = vrot.slane %v552_v55, 4  ;;  %808 = vst [vmem:[%s992_s19 + $0x84] sm:$0xe] %v552_v55  ;;  %v556_v3 = vrot.slane %v554_v56, 4  ;;  %v565_v20 = vsel %vm1091_vm2, %v563_v12, %v564_v7 }
  0x42   : > { %806 = vst [vmem:[%s992_s19 + $0x7c] sm:$0xf] %v550_v1  ;;  %807 = vst [vmem:[%s992_s19 + $0x80] sm:$0x1] %v551_v59  ;;  %v270_v21 = vmul.f32 %v914_v13, %v1002_v0  ;;  %v271_v22 = vmul.f32 %v917_v14, %v1002_v0  ;;  %v921_v23 = vunpack.c.l.bf16 %v940_v9  ;;  %v308_v24 = vadd.f32 %v1071_v10, %v269_v18 }
  0x43   : > { %v555_v11 = vsel %vm1091_vm2, %v553_v2, %v554_v56  ;;  %810 = vst [vmem:[%s992_s19 + $0x8c] sm:$0x1] %v556_v3  ;;  %815 = vst [vmem:[%s992_s19 + $0xa0] sm:$0xf] %v565_v20  ;;  %v272_v25 = vmul.f32 %v918_v19, %v1002_v0  ;;  %v922_v26 = vunpack.c.h.bf16 %v940_v9  ;;  %v925_v27 = vunpack.c.l.bf16 %v941_v15 }
  0x44   : > { %809 = vst [vmem:[%s992_s19 + $0x88] sm:$0xf] %v555_v11  ;;  %816 = vst [vmem:[%s992_s19 + $0xa4] sm:$0x1] %v566_v17  ;;  %v309_v28 = vadd.f32 %v1071_v10, %v270_v21  ;;  %v310_v29 = vadd.f32 %v1071_v10, %v271_v22  ;;  %v273_v30 = vmul.f32 %v921_v23, %v1002_v0  ;;  %v926_v31 = vunpack.c.h.bf16 %v941_v15 }
  0x45   : > { %v340_v32 = vmax.f32 %v308_v24, 0.0  ;;  %v311_v33 = vadd.f32 %v1071_v10, %v272_v25  ;;  %v274_v34 = vmul.f32 %v922_v26, %v1002_v0  ;;  %v275_v35 = vmul.f32 %v925_v27, %v1002_v0 }
  0x46   : > { %v341_v36 = vmax.f32 %v309_v28, 0.0  ;;  %v342_v37 = vmax.f32 %v310_v29, 0.0  ;;  %v312_v38 = vadd.f32 %v1071_v10, %v273_v30  ;;  %v276_v39 = vmul.f32 %v926_v31, %v1002_v0 }
  0x47   : > { %v855_v40 = vpack.c.bf16 %v340_v32, %v340_v32  ;;  %v343_v41 = vmax.f32 %v311_v33, 0.0  ;;  %v313_v42 = vadd.f32 %v1071_v10, %v274_v34  ;;  %v314_v43 = vadd.f32 %v1071_v10, %v275_v35 }
  0x48   : > { %v856_v44 = vpack.c.bf16 %v341_v36, %v341_v36  ;;  %v857_v45 = vpack.c.bf16 %v342_v37, %v342_v37  ;;  %v344_v46 = vmax.f32 %v312_v38, 0.0  ;;  %v315_v47 = vadd.f32 %v1071_v10, %v276_v39 }
  0x49   : > { %v567_v48 = vrot.slane %v855_v40, 7  ;;  %v858_v49 = vpack.c.bf16 %v343_v41, %v343_v41  ;;  %v345_v50 = vmax.f32 %v313_v42, 0.0  ;;  %v346_v52 = vmax.f32 %v314_v43, 0.0 }
  0x4a   : > { %v569_v53 = vrot.slane %v856_v44, 7  ;;  %v572_v54 = vrot.slane %v857_v45, 7  ;;  %v859_v0 = vpack.c.bf16 %v344_v46, %v344_v46  ;;  %v347_v55 = vmax.f32 %v315_v47, 0.0 }
  0x4b   : > { %v568_v56 = vrot.slane %v567_v48, 4  ;;  %817 = vst [vmem:[%s992_s19 + $0xa8] sm:$0xe] %v567_v48  ;;  %v574_v57 = vrot.slane %v858_v49, 7  ;;  %v860_v58 = vpack.c.bf16 %v345_v50, %v345_v50  ;;  %v861_v59 = vpack.c.bf16 %v346_v52, %v346_v52 }
  0x4c   : > { %v571_v60 = vrot.slane %v569_v53, 4  ;;  %v573_v10 = vrot.slane %v572_v54, 4  ;;  %820 = vst [vmem:[%s992_s19 + $0xb4] sm:$0xe] %v572_v54  ;;  %v577_v61 = vrot.slane %v859_v0, 7  ;;  %v862_v62 = vpack.c.bf16 %v347_v55, %v347_v55 }
  0x4d   : > { %v570_v63 = vsel %vm1091_vm2, %v568_v56, %v569_v53  ;;  %v576_v1 = vrot.slane %v574_v57, 4  ;;  %v579_v2 = vrot.slane %v860_v58, 7  ;;  %v582_v3 = vrot.slane %v861_v59, 7 }
  0x4e   : > { %818 = vst [vmem:[%s992_s19 + $0xac] sm:$0xf] %v570_v63  ;;  %819 = vst [vmem:[%s992_s19 + $0xb0] sm:$0x1] %v571_v60  ;;  %v575_v4 = vsel %vm1091_vm2, %v573_v10, %v574_v57  ;;  %v578_v5 = vrot.slane %v577_v61, 4  ;;  %v584_v6 = vrot.slane %v862_v62, 7 }
  0x4f   : > { %823 = vst [vmem:[%s992_s19 + $0xc0] sm:$0xe] %v577_v61  ;;  %821 = vst [vmem:[%s992_s19 + $0xb8] sm:$0xf] %v575_v4  ;;  %v581_v7 = vrot.slane %v579_v2, 4  ;;  %v583_v8 = vrot.slane %v582_v3, 4 }
  0x50   : > { %822 = vst [vmem:[%s992_s19 + $0xbc] sm:$0x1] %v576_v1  ;;  %826 = vst [vmem:[%s992_s19 + $0xcc] sm:$0xe] %v582_v3  ;;  %v580_v9 = vsel %vm1091_vm2, %v578_v5, %v579_v2  ;;  %v586_v11 = vrot.slane %v584_v6, 4 }
  0x51   : > { %824 = vst [vmem:[%s992_s19 + $0xc4] sm:$0xf] %v580_v9  ;;  %825 = vst [vmem:[%s992_s19 + $0xc8] sm:$0x1] %v581_v7  ;;  %v585_v12 = vsel %vm1091_vm2, %v583_v8, %v584_v6 }
  0x52   : > { %827 = vst [vmem:[%s992_s19 + $0xd0] sm:$0xf] %v585_v12  ;;  %828 = vst [vmem:[%s992_s19 + $0xd4] sm:$0x1] %v586_v11 }
  0x53 PF: > { %s13_s12 = sadd.s32 1, %s958_s12  }
  0x54   : > { %p10_p5 = scmp.ge.s32.totalorder %s13_s12, 4  }
  0x56   :  { %12 = sbr.rel (!%p10_p5) target bundleno = 1 (0x1), region = 63 }

// kernel: bottleneck_forward.6
= control target key start
LH: loop header
LB: loop body
LE: loop exit
PB: predicated region body
PF: predicated region fallthrough
CT: control target
= control target key end

     0   :  { %s2163_s12 = smov 0   ;;  %s2372_s0 = inlined_call_operand.vmem [shape: bf16[512,512], index: 0, kind: input, shape index: {}]   ;;  %s2373_s1 = inlined_call_operand.vmem [shape: bf16[512,128], index: 1, kind: input, shape index: {}]   ;;  %s2374_s2 = inlined_call_operand.vmem [shape: bf16[512,128], index: 2, kind: output, shape index: {0}]   ;;  %s2375_s3 = inlined_call_operand.vmem [shape: f32[2,2,128], index: 3, kind: output, shape index: {1}]  }
   0x1 LB: > { %s2169_s13 = sadd.s32 4294967295, %s2141_s12   ;;  %p1510_p0 = scmp.ge.s32.totalorder %s2141_s12, 1  ;;  %s2141_s12 = sphi %s2163_s12, %s14_s12  }
   0x2   : > { %p142_p1 = scmp.lt.s32.totalorder %s2141_s12, 3 }
   0x4   : > { %p143_p2 = pnand %p1510_p0, %p142_p1 }
   0x5   : > { %v2007_v0 = vld [vmem:[%s2373_s1 + $0x40] sm:$0xff] (!%p143_p2)   ;;  %v2011_v4 = vld [vmem:[%s2373_s1 + $0x48] sm:$0xff] (!%p143_p2)   ;;  %v2015_v8 = vld [vmem:[%s2373_s1 + $0x50] sm:$0xff] (!%p143_p2)   ;;  %s1511_s21 = sshll.u32 (!%p143_p2), %s2169_s13, 5  ;;  %p184_p4 = scmp.lt.s32.totalorder (!%p143_p2), %s2169_s13, 1 }
   0x6   : > { %146 = sbr.rel (%p143_p2) target bundleno = 396 (0x18c), region = 28  ;;  %v2008_v1 = vld [vmem:[%s2373_s1 + $0xc0] sm:$0xff] (!%p143_p2)   ;;  %1775 = vmatprep.subr.bf16.mxu0 (!%p143_p2), %v2007_v0  ;;  %v2012_v5 = vld [vmem:[%s2373_s1 + $0xc8] sm:$0xff] (!%p143_p2)   ;;  %v2016_v9 = vld [vmem:[%s2373_s1 + $0xd0] sm:$0xff] (!%p143_p2)   ;;  %p172_p3 = scmp.lt.s32.totalorder (!%p143_p2), %s1511_s21, 63 }
   0x7   : > { %v2009_v2 = vld [vmem:[%s2373_s1] sm:$0xff] (!%p143_p2)   ;;  %1887 = vmatprep.subr.bf16.mxu1 (!%p143_p2), %v2008_v1  ;;  %v2013_v6 = vld [vmem:[%s2373_s1 + $0x8] sm:$0xff] (!%p143_p2)   ;;  %v2017_v10 = vld [vmem:[%s2373_s1 + $0x10] sm:$0xff] (!%p143_p2)  }
   0x8   : > { %v2010_v3 = vld [vmem:[%s2373_s1 + $0x80] sm:$0xff] (!%p143_p2)   ;;  %1776 = vmatpush3.bf16.msra.mxu0 (!%p143_p2), %v2009_v2  ;;  %v2014_v7 = vld [vmem:[%s2373_s1 + $0x88] sm:$0xff] (!%p143_p2)   ;;  %v2018_v11 = vld [vmem:[%s2373_s1 + $0x90] sm:$0xff] (!%p143_p2)  }
   0x9   : > { %1888 = vmatpush3.bf16.msra.mxu1 (!%p143_p2), %v2010_v3  ;;  %1777 = vmatprep.subr.bf16.mxu0 (!%p143_p2), %v2011_v4  ;;  %v2019_v12 = vld [vmem:[%s2373_s1 + $0x58] sm:$0xff] (!%p143_p2)   ;;  %v2023_v16 = vld [vmem:[%s2373_s1 + $0x60] sm:$0xff] (!%p143_p2)   ;;  %v2027_v20 = vld [vmem:[%s2373_s1 + $0x68] sm:$0xff] (!%p143_p2)  }
   0xa   : > { %1889 = vmatprep.subr.bf16.mxu1 (!%p143_p2), %v2012_v5  ;;  %v2020_v13 = vld [vmem:[%s2373_s1 + $0xd8] sm:$0xff] (!%p143_p2)   ;;  %v2024_v17 = vld [vmem:[%s2373_s1 + $0xe0] sm:$0xff] (!%p143_p2)   ;;  %v2028_v21 = vld [vmem:[%s2373_s1 + $0xe8] sm:$0xff] (!%p143_p2)  }
   0xb   : > { %v2021_v14 = vld [vmem:[%s2373_s1 + $0x18] sm:$0xff] (!%p143_p2)   ;;  %v2025_v18 = vld [vmem:[%s2373_s1 + $0x20] sm:$0xff] (!%p143_p2)   ;;  %v2029_v22 = vld [vmem:[%s2373_s1 + $0x28] sm:$0xff] (!%p143_p2)  }
   0xc   : > { %1778 = vmatpush3.bf16.msra.mxu0 (!%p143_p2), %v2013_v6  ;;  %v2022_v15 = vld [vmem:[%s2373_s1 + $0x98] sm:$0xff] (!%p143_p2)   ;;  %v2026_v19 = vld [vmem:[%s2373_s1 + $0xa0] sm:$0xff] (!%p143_p2)   ;;  %v2030_v23 = vld [vmem:[%s2373_s1 + $0xa8] sm:$0xff] (!%p143_p2)  }
   0xd   : > { %1890 = vmatpush3.bf16.msra.mxu1 %v2014_v7  ;;  %1779 = vmatprep.subr.bf16.mxu0 %v2015_v8  ;;  %s2377_s21 = smov (!%p172_p3, %s1511_s21), 63  ;;  %v2031_v24 = vld [vmem:[%s2373_s1 + $0x70] sm:$0xff]   ;;  %v2035_v28 = vld [vmem:[%s2373_s1 + $0x78] sm:$0xff]   ;;  %s2379_s13 = smov (!%p184_p4, %s2169_s13), 1 }
   0xe   : > { %1891 = vmatprep.subr.bf16.mxu1 %v2016_v9  ;;  %v2032_v25 = vld [vmem:[%s2373_s1 + $0xf0] sm:$0xff]   ;;  %s1647_s19 = sshll.u32 %s2377_s21, 4  ;;  %v2036_v29 = vld [vmem:[%s2373_s1 + $0xf8] sm:$0xff]   ;;  %s1515_s7 = sshll.u32 %s2377_s21, 2 }
   0xf   : > { %v2033_v26 = vld [vmem:[%s2373_s1 + $0x30] sm:$0xff]   ;;  %s2270_s29 = scalar_lea.vmem %s2372_s0, %s1647_s19  ;;  %v2037_v30 = vld [vmem:[%s2373_s1 + $0x38] sm:$0xff]   ;;  %s2346_s10 = scalar_lea.vmem %s2374_s2, %s1515_s7 }
  0x10   : > { %1780 = vmatpush3.bf16.msra.mxu0 %v2017_v10  ;;  %v2034_v27 = vld [vmem:[%s2373_s1 + $0xb0] sm:$0xff]   ;;  %v2038_v31 = vld [vmem:[%s2373_s1 + $0xb8] sm:$0xff]   ;;  %s1516_s21 = sshll.u32 %s2379_s13, 1 }
  0x11   : > { %1892 = vmatpush3.bf16.msra.mxu1 %v2018_v11  ;;  %1781 = vmatprep.subr.bf16.mxu0 %v2019_v12  ;;  %v2039_v32 = vld [vmem:[%s2270_s29] ss:$16 sps:$4 sm:$0xff]   ;;  %v2041_v33 = vld [vmem:[%s2270_s29 + $0x4] ss:$16 sps:$4 sm:$0xff]   ;;  %v2042_v34 = vld [vmem:[%s2270_s29 + $0x8] ss:$16 sps:$4 sm:$0xff]   ;;  %s187_s15 = scalar_lea.vmem %s2375_s3, %s1516_s21 }
  0x12   : > { %1893 = vmatprep.subr.bf16.mxu1 %v2020_v13  ;;  %v2044_v35 = vld [vmem:[%s2270_s29 + $0xc] ss:$16 sps:$4 sm:$0xff]   ;;  %861 = vmatprep.mubr.bf16.mxu0 %v2041_v33  ;;  %v2045_v36 = vld [vmem:[%s2270_s29 + $0x24] ss:$16 sps:$4 sm:$0xff]   ;;  %v2049_v38 = vld [vmem:[%s2270_s29 + $0x20] ss:$16 sps:$4 sm:$0xff]  }
  0x13   : > { %1022 = vmatprep.mubr.bf16.mxu1 %v2044_v35  ;;  %v2047_v37 = vld [vmem:[%s2270_s29 + $0x2c] ss:$16 sps:$4 sm:$0xff]   ;;  %v2050_v39 = vld [vmem:[%s2270_s29 + $0x28] ss:$16 sps:$4 sm:$0xff]   ;;  %v2051_v40 = vld [vmem:[%s2270_s29 + $0x44] ss:$16 sps:$4 sm:$0xff]  }
  0x14   : > { %1782 = vmatpush3.bf16.msra.mxu0 %v2021_v14  ;;  %v2053_v41 = vld [vmem:[%s2270_s29 + $0x4c] ss:$16 sps:$4 sm:$0xff]   ;;  %v2055_v42 = vld [vmem:[%s2270_s29 + $0x40] ss:$16 sps:$4 sm:$0xff]   ;;  %v2056_v43 = vld [vmem:[%s2270_s29 + $0x48] ss:$16 sps:$4 sm:$0xff]  }
  0x15   : > { %1894 = vmatpush3.bf16.msra.mxu1 %v2022_v15  ;;  %1783 = vmatprep.subr.bf16.mxu0 %v2023_v16  ;;  %v2057_v44 = vld [vmem:[%s2270_s29 + $0x64] ss:$16 sps:$4 sm:$0xff]   ;;  %v2059_v45 = vld [vmem:[%s2270_s29 + $0x6c] ss:$16 sps:$4 sm:$0xff]   ;;  %v2061_v46 = vld [vmem:[%s2270_s29 + $0x60] ss:$16 sps:$4 sm:$0xff]  }
  0x16   : > { %1895 = vmatprep.subr.bf16.mxu1 %v2024_v17  ;;  %v2062_v47 = vld [vmem:[%s2270_s29 + $0x68] ss:$16 sps:$4 sm:$0xff]   ;;  %v2063_v48 = vld [vmem:[%s2270_s29 + $0x84] ss:$16 sps:$4 sm:$0xff]   ;;  %v2065_v49 = vld [vmem:[%s2270_s29 + $0x8c] ss:$16 sps:$4 sm:$0xff]  }
  0x17   : > { %v2067_v50 = vld [vmem:[%s2270_s29 + $0x80] ss:$16 sps:$4 sm:$0xff]   ;;  %v2068_v51 = vld [vmem:[%s2270_s29 + $0x88] ss:$16 sps:$4 sm:$0xff]   ;;  %v2069_v52 = vld [vmem:[%s2270_s29 + $0xa4] ss:$16 sps:$4 sm:$0xff]  }
  0x18   : > { %1784 = vmatpush3.bf16.msra.mxu0 %v2025_v18  ;;  %v2071_v53 = vld [vmem:[%s2270_s29 + $0xac] ss:$16 sps:$4 sm:$0xff]   ;;  %v2073_v54 = vld [vmem:[%s2270_s29 + $0xa0] ss:$16 sps:$4 sm:$0xff]   ;;  %v2074_v55 = vld [vmem:[%s2270_s29 + $0xa8] ss:$16 sps:$4 sm:$0xff]  }
  0x19   : > { %1896 = vmatpush3.bf16.msra.mxu1 %v2026_v19  ;;  %1785 = vmatprep.subr.bf16.mxu0 %v2027_v20  ;;  %v2075_v56 = vld [vmem:[%s2270_s29 + $0xc4] ss:$16 sps:$4 sm:$0xff]   ;;  %v2077_v57 = vld [vmem:[%s2270_s29 + $0xcc] ss:$16 sps:$4 sm:$0xff]   ;;  %v2079_v58 = vld [vmem:[%s2270_s29 + $0xc0] ss:$16 sps:$4 sm:$0xff]  }
  0x1a   : > { %1897 = vmatprep.subr.bf16.mxu1 %v2028_v21  ;;  %v2080_v59 = vld [vmem:[%s2270_s29 + $0xc8] ss:$16 sps:$4 sm:$0xff]   ;;  %v2081_v60 = vld [vmem:[%s2270_s29 + $0xe4] ss:$16 sps:$4 sm:$0xff]   ;;  %v2083_v61 = vld [vmem:[%s2270_s29 + $0xec] ss:$16 sps:$4 sm:$0xff]  }
  0x1b   : > { %v2085_v62 = vld [vmem:[%s2270_s29 + $0xe0] ss:$16 sps:$4 sm:$0xff]   ;;  %v2086_v63 = vld [vmem:[%s2270_s29 + $0xe8] ss:$16 sps:$4 sm:$0xff]   ;;  %v2087_v0 = vld [vmem:[%s2270_s29 + $0x104] ss:$16 sps:$4 sm:$0xff]  }
  0x1c   : > { %1786 = vmatpush3.bf16.msra.mxu0 %v2029_v22  ;;  %v2089_v1 = vld [vmem:[%s2270_s29 + $0x10c] ss:$16 sps:$4 sm:$0xff]   ;;  %v2091_v2 = vld [vmem:[%s2270_s29 + $0x100] ss:$16 sps:$4 sm:$0xff]   ;;  %v2092_v3 = vld [vmem:[%s2270_s29 + $0x108] ss:$16 sps:$4 sm:$0xff]  }
  0x1d   : > { %1898 = vmatpush3.bf16.msra.mxu1 %v2030_v23  ;;  %1787 = vmatprep.subr.bf16.mxu0 %v2031_v24  ;;  %v2093_v4 = vld [vmem:[%s2270_s29 + $0x124] ss:$16 sps:$4 sm:$0xff]   ;;  %v2095_v5 = vld [vmem:[%s2270_s29 + $0x12c] ss:$16 sps:$4 sm:$0xff]   ;;  %v2097_v6 = vld [vmem:[%s2270_s29 + $0x120] ss:$16 sps:$4 sm:$0xff]  }
  0x1e   : > { %1899 = vmatprep.subr.bf16.mxu1 %v2032_v25  ;;  %v2098_v7 = vld [vmem:[%s2270_s29 + $0x128] ss:$16 sps:$4 sm:$0xff]   ;;  %v2099_v8 = vld [vmem:[%s2270_s29 + $0x144] ss:$16 sps:$4 sm:$0xff]   ;;  %v2101_v9 = vld [vmem:[%s2270_s29 + $0x14c] ss:$16 sps:$4 sm:$0xff]  }
  0x1f   : > { %v2103_v10 = vld [vmem:[%s2270_s29 + $0x140] ss:$16 sps:$4 sm:$0xff]   ;;  %v2104_v11 = vld [vmem:[%s2270_s29 + $0x148] ss:$16 sps:$4 sm:$0xff]   ;;  %v2105_v12 = vld [vmem:[%s2270_s29 + $0x164] ss:$16 sps:$4 sm:$0xff]  }
  0x20   : > { %1788 = vmatpush3.bf16.msra.mxu0 %v2033_v26  ;;  %v2107_v13 = vld [vmem:[%s2270_s29 + $0x16c] ss:$16 sps:$4 sm:$0xff]   ;;  %v2109_v14 = vld [vmem:[%s2270_s29 + $0x160] ss:$16 sps:$4 sm:$0xff]   ;;  %v2110_v15 = vld [vmem:[%s2270_s29 + $0x168] ss:$16 sps:$4 sm:$0xff]  }
  0x21   : > { %1900 = vmatpush3.bf16.msra.mxu1 %v2034_v27  ;;  %1789 = vmatprep.subr.bf16.mxu0 %v2035_v28  ;;  %v2111_v16 = vld [vmem:[%s2270_s29 + $0x184] ss:$16 sps:$4 sm:$0xff]   ;;  %v2113_v17 = vld [vmem:[%s2270_s29 + $0x18c] ss:$16 sps:$4 sm:$0xff]   ;;  %v2115_v18 = vld [vmem:[%s2270_s29 + $0x180] ss:$16 sps:$4 sm:$0xff]  }
  0x22   : > { %1901 = vmatprep.subr.bf16.mxu1 %v2036_v29  ;;  %v2116_v19 = vld [vmem:[%s2270_s29 + $0x188] ss:$16 sps:$4 sm:$0xff]   ;;  %v2117_v20 = vld [vmem:[%s2270_s29 + $0x1a4] ss:$16 sps:$4 sm:$0xff]   ;;  %v2119_v21 = vld [vmem:[%s2270_s29 + $0x1ac] ss:$16 sps:$4 sm:$0xff]  }
  0x23   : > { %v2121_v22 = vld [vmem:[%s2270_s29 + $0x1a0] ss:$16 sps:$4 sm:$0xff]   ;;  %v2122_v23 = vld [vmem:[%s2270_s29 + $0x1a8] ss:$16 sps:$4 sm:$0xff]   ;;  %v2123_v24 = vld [vmem:[%s2270_s29 + $0x1c4] ss:$16 sps:$4 sm:$0xff]  }
  0x24   : > { %1790 = vmatpush3.bf16.msra.mxu0 %v2037_v30  ;;  %v2125_v25 = vld [vmem:[%s2270_s29 + $0x1cc] ss:$16 sps:$4 sm:$0xff]   ;;  %v2127_v26 = vld [vmem:[%s2270_s29 + $0x1c0] ss:$16 sps:$4 sm:$0xff]   ;;  %v2128_v27 = vld [vmem:[%s2270_s29 + $0x1c8] ss:$16 sps:$4 sm:$0xff]  }
  0x25   : > { %1902 = vmatpush3.bf16.msra.mxu1 %v2038_v31  ;;  %v2129_v28 = vld [vmem:[%s2270_s29 + $0x1e4] ss:$16 sps:$4 sm:$0xff]   ;;  %v2131_v29 = vld [vmem:[%s2270_s29 + $0x1ec] ss:$16 sps:$4 sm:$0xff]   ;;  %v2133_v30 = vld [vmem:[%s2270_s29 + $0x1e0] ss:$16 sps:$4 sm:$0xff]  }
  0x26   : > { %v2134_v31 = vld [vmem:[%s2270_s29 + $0x1e8] ss:$16 sps:$4 sm:$0xff]  }
  0x27   : > { %862 = vmatmul.mubr.bf16.vlgmr.msra.gmra.mrb[0].mxu0 %v2039_v32 }
  0x28   : > { %1023 = vmatmul.mubr.bf16.vlgmr.msra.gmra.mrb[0].mxu1 %v2042_v34  ;;  %869 = vmatprep.mubr.bf16.mxu0 %v2045_v36 }
  0x29   : > { %1030 = vmatprep.mubr.bf16.mxu1 %v2047_v37 }
  0x2f   : > { %870 = vmatmul.mubr.bf16.gmra.mrb[4].mxu0 %v2049_v38 }
  0x30   : > { %1031 = vmatmul.mubr.bf16.gmra.mrb[4].mxu1 %v2050_v39  ;;  %877 = vmatprep.mubr.bf16.mxu0 %v2051_v40 }
  0x31   : > { %1038 = vmatprep.mubr.bf16.mxu1 %v2053_v41 }
  0x37   : > { %878 = vmatmul.mubr.bf16.gmra.mrb[8].mxu0 %v2055_v42 }
  0x38   : > { %1039 = vmatmul.mubr.bf16.gmra.mrb[8].mxu1 %v2056_v43  ;;  %885 = vmatprep.mubr.bf16.mxu0 %v2057_v44 }
  0x39   : > { %1046 = vmatprep.mubr.bf16.mxu1 %v2059_v45 }
  0x3f   : > { %886 = vmatmul.mubr.bf16.gmra.mrb[12].mxu0 %v2061_v46 }
  0x40   : > { %1047 = vmatmul.mubr.bf16.gmra.mrb[12].mxu1 %v2062_v47  ;;  %893 = vmatprep.mubr.bf16.mxu0 %v2063_v48 }
  0x41   : > { %1054 = vmatprep.mubr.bf16.mxu1 %v2065_v49 }
  0x47   : > { %894 = vmatmul.mubr.bf16.gmra.mrb[16].mxu0 %v2067_v50 }
  0x48   : > { %1055 = vmatmul.mubr.bf16.gmra.mrb[16].mxu1 %v2068_v51  ;;  %901 = vmatprep.mubr.bf16.mxu0 %v2069_v52 }
  0x49   : > { %1062 = vmatprep.mubr.bf16.mxu1 %v2071_v53 }
  0x4f   : > { %902 = vmatmul.mubr.bf16.gmra.mrb[20].mxu0 %v2073_v54 }
  0x50   : > { %1063 = vmatmul.mubr.bf16.gmra.mrb[20].mxu1 %v2074_v55  ;;  %909 = vmatprep.mubr.bf16.mxu0 %v2075_v56 }
  0x51   : > { %1070 = vmatprep.mubr.bf16.mxu1 %v2077_v57 }
  0x57   : > { %910 = vmatmul.mubr.bf16.gmra.mrb[24].mxu0 %v2079_v58 }
  0x58   : > { %1071 = vmatmul.mubr.bf16.gmra.mrb[24].mxu1 %v2080_v59  ;;  %917 = vmatprep.mubr.bf16.mxu0 %v2081_v60 }
  0x59   : > { %1078 = vmatprep.mubr.bf16.mxu1 %v2083_v61 }
  0x5f   : > { %918 = vmatmul.mubr.bf16.gmra.mrb[28].mxu0 %v2085_v62 }
  0x60   : > { %1079 = vmatmul.mubr.bf16.gmra.mrb[28].mxu1 %v2086_v63  ;;  %925 = vmatprep.mubr.bf16.mxu0 %v2087_v0 }
  0x61   : > { %1086 = vmatprep.mubr.bf16.mxu1 %v2089_v1 }
  0x67   : > { %926 = vmatmul.mubr.bf16.gmra.mrb[32].mxu0 %v2091_v2 }
  0x68   : > { %1087 = vmatmul.mubr.bf16.gmra.mrb[32].mxu1 %v2092_v3  ;;  %933 = vmatprep.mubr.bf16.mxu0 %v2093_v4 }
  0x69   : > { %1094 = vmatprep.mubr.bf16.mxu1 %v2095_v5 }
  0x6f   : > { %934 = vmatmul.mubr.bf16.gmra.mrb[36].mxu0 %v2097_v6 }
  0x70   : > { %1095 = vmatmul.mubr.bf16.gmra.mrb[36].mxu1 %v2098_v7  ;;  %941 = vmatprep.mubr.bf16.mxu0 %v2099_v8 }
  0x71   : > { %1102 = vmatprep.mubr.bf16.mxu1 %v2101_v9 }
  0x77   : > { %942 = vmatmul.mubr.bf16.gmra.mrb[40].mxu0 %v2103_v10 }
  0x78   : > { %1103 = vmatmul.mubr.bf16.gmra.mrb[40].mxu1 %v2104_v11  ;;  %949 = vmatprep.mubr.bf16.mxu0 %v2105_v12 }
  0x79   : > { %1110 = vmatprep.mubr.bf16.mxu1 %v2107_v13 }
  0x7f   : > { %950 = vmatmul.mubr.bf16.gmra.mrb[44].mxu0 %v2109_v14 }
  0x80   : > { %1111 = vmatmul.mubr.bf16.gmra.mrb[44].mxu1 %v2110_v15  ;;  %957 = vmatprep.mubr.bf16.mxu0 %v2111_v16 }
  0x81   : > { %1118 = vmatprep.mubr.bf16.mxu1 %v2113_v17 }
  0x87   : > { %958 = vmatmul.mubr.bf16.gmra.mrb[48].mxu0 %v2115_v18 }
  0x88   : > { %1119 = vmatmul.mubr.bf16.gmra.mrb[48].mxu1 %v2116_v19  ;;  %965 = vmatprep.mubr.bf16.mxu0 %v2117_v20 }
  0x89   : > { %1126 = vmatprep.mubr.bf16.mxu1 %v2119_v21 }
  0x8f   : > { %966 = vmatmul.mubr.bf16.gmra.mrb[52].mxu0 %v2121_v22 }
  0x90   : > { %1127 = vmatmul.mubr.bf16.gmra.mrb[52].mxu1 %v2122_v23  ;;  %973 = vmatprep.mubr.bf16.mxu0 %v2123_v24 }
  0x91   : > { %1134 = vmatprep.mubr.bf16.mxu1 %v2125_v25 }
  0x97   : > { %974 = vmatmul.mubr.bf16.gmra.mrb[56].mxu0 %v2127_v26 }
  0x98   : > { %1135 = vmatmul.mubr.bf16.gmra.mrb[56].mxu1 %v2128_v27  ;;  %981 = vmatprep.mubr.bf16.mxu0 %v2129_v28 }
  0x99   : > { %1142 = vmatprep.mubr.bf16.mxu1 %v2131_v29 }
  0x9f   : > { %982 = vmatmul.mubr.bf16.gmra.mrb[60].mxu0 %v2133_v30 }
  0xa0   : > { %1143 = vmatmul.mubr.bf16.gmra.mrb[60].mxu1 %v2134_v31 }
  0xfa   : > { %v1791_v32 = vpop.f32.mrb[0].mxu0 }
  0xfb   : > { %v1903_v33 = vpop.f32.mrb[0].mxu1  ;;  %v1792_v34 = vpop.f32.mrb[1].mxu0 }
  0xfc   : > { %v1793_v35 = vadd.f32 %v1792_v34, %v1791_v32  ;;  %v1904_v36 = vpop.f32.mrb[1].mxu1  ;;  %v1794_v37 = vpop.f32.mrb[2].mxu0 }
  0xfd   : > { %v1905_v38 = vadd.f32 %v1904_v36, %v1903_v33  ;;  %v1906_v39 = vpop.f32.mrb[2].mxu1  ;;  %v1795_v40 = vpop.f32.mrb[3].mxu0 }
  0xfe   : > { %v1796_v41 = vadd.f32 %v1795_v40, %v1794_v37  ;;  %v1907_v42 = vpop.f32.mrb[3].mxu1 }
  0xff   : > { %v1025_v43 = vadd.f32 %v1905_v38, %v1793_v35  ;;  %v1908_v44 = vadd.f32 %v1907_v42, %v1906_v39 }
 0x101   : > { %v1028_v45 = vadd.f32 %v1908_v44, %v1796_v41  ;;  %v1349_v47 = vmul.f32 %v1025_v43, %v1025_v43 }
 0x102   : > { %v1797_v46 = vpop.f32.mrb[4].mxu0 }
 0x103   : > { %v1683_v48 = vpack.c.bf16 %v1028_v45, %v1025_v43  ;;  %v1311_v49 = vadd.f32 %v1028_v45, %v1025_v43  ;;  %v1350_v50 = vmul.f32 %v1028_v45, %v1028_v45  ;;  %v1909_v51 = vpop.f32.mrb[4].mxu1  ;;  %v1798_v52 = vpop.f32.mrb[5].mxu0 }
 0x104   : > { %v1799_v53 = vadd.f32 %v1798_v52, %v1797_v46  ;;  %v1910_v54 = vpop.f32.mrb[5].mxu1  ;;  %v1800_v55 = vpop.f32.mrb[6].mxu0 }
 0x105   : > { %1684 = vst [vmem:[%s2346_s10] sm:$0xff] %v1683_v48   ;;  %v1381_v56 = vadd.f32 %v1350_v50, %v1349_v47  ;;  %v1911_v57 = vadd.f32 %v1910_v54, %v1909_v51  ;;  %v1912_v58 = vpop.f32.mrb[6].mxu1  ;;  %v1801_v59 = vpop.f32.mrb[7].mxu0 }
 0x106   : > { %v1802_v60 = vadd.f32 %v1801_v59, %v1800_v55  ;;  %v1913_v61 = vpop.f32.mrb[7].mxu1 }
 0x107   : > { %v1033_v62 = vadd.f32 %v1911_v57, %v1799_v53  ;;  %v1914_v63 = vadd.f32 %v1913_v61, %v1912_v58 }
 0x109   : > { %v1312_v0 = vadd.f32 %v1311_v49, %v1033_v62  ;;  %v1351_v1 = vmul.f32 %v1033_v62, %v1033_v62  ;;  %v1036_v2 = vadd.f32 %v1914_v63, %v1802_v60 }
 0x10a   : > { %v1803_v3 = vpop.f32.mrb[8].mxu0 }
 0x10b   : > { %v1382_v4 = vadd.f32 %v1381_v56, %v1351_v1  ;;  %v1688_v5 = vpack.c.bf16 %v1036_v2, %v1033_v62  ;;  %v1313_v6 = vadd.f32 %v1312_v0, %v1036_v2  ;;  %v1352_v7 = vmul.f32 %v1036_v2, %v1036_v2  ;;  %v1915_v8 = vpop.f32.mrb[8].mxu1  ;;  %v1804_v9 = vpop.f32.mrb[9].mxu0 }
 0x10c   : > { %v1805_v10 = vadd.f32 %v1804_v9, %v1803_v3  ;;  %v1916_v11 = vpop.f32.mrb[9].mxu1  ;;  %v1806_v12 = vpop.f32.mrb[10].mxu0 }
 0x10d   : > { %1760 = vst [vmem:[%s2346_s10 + $0x8] sm:$0xff] %v1688_v5   ;;  %v1383_v13 = vadd.f32 %v1382_v4, %v1352_v7  ;;  %v1917_v14 = vadd.f32 %v1916_v11, %v1915_v8  ;;  %v1918_v15 = vpop.f32.mrb[10].mxu1  ;;  %v1807_v16 = vpop.f32.mrb[11].mxu0 }
 0x10e   : > { %v1808_v17 = vadd.f32 %v1807_v16, %v1806_v12  ;;  %v1919_v18 = vpop.f32.mrb[11].mxu1 }
 0x10f   : > { %v1041_v19 = vadd.f32 %v1917_v14, %v1805_v10  ;;  %v1920_v20 = vadd.f32 %v1919_v18, %v1918_v15 }
 0x111   : > { %v1314_v21 = vadd.f32 %v1313_v6, %v1041_v19  ;;  %v1353_v22 = vmul.f32 %v1041_v19, %v1041_v19  ;;  %v1044_v23 = vadd.f32 %v1920_v20, %v1808_v17 }
 0x112   : > { %v1809_v24 = vpop.f32.mrb[12].mxu0 }
 0x113   : > { %v1384_v25 = vadd.f32 %v1383_v13, %v1353_v22  ;;  %v1693_v26 = vpack.c.bf16 %v1044_v23, %v1041_v19  ;;  %v1315_v27 = vadd.f32 %v1314_v21, %v1044_v23  ;;  %v1354_v28 = vmul.f32 %v1044_v23, %v1044_v23  ;;  %v1921_v29 = vpop.f32.mrb[12].mxu1  ;;  %v1810_v30 = vpop.f32.mrb[13].mxu0 }
 0x114   : > { %v1811_v31 = vadd.f32 %v1810_v30, %v1809_v24  ;;  %v1922_v32 = vpop.f32.mrb[13].mxu1  ;;  %v1812_v33 = vpop.f32.mrb[14].mxu0 }
 0x115   : > { %1761 = vst [vmem:[%s2346_s10 + $0x10] sm:$0xff] %v1693_v26   ;;  %v1385_v34 = vadd.f32 %v1384_v25, %v1354_v28  ;;  %v1923_v35 = vadd.f32 %v1922_v32, %v1921_v29  ;;  %v1924_v36 = vpop.f32.mrb[14].mxu1  ;;  %v1813_v37 = vpop.f32.mrb[15].mxu0 }
 0x116   : > { %v1814_v38 = vadd.f32 %v1813_v37, %v1812_v33  ;;  %v1925_v39 = vpop.f32.mrb[15].mxu1 }
 0x117   : > { %v1049_v40 = vadd.f32 %v1923_v35, %v1811_v31  ;;  %v1926_v41 = vadd.f32 %v1925_v39, %v1924_v36 }
 0x119   : > { %v1316_v42 = vadd.f32 %v1315_v27, %v1049_v40  ;;  %v1355_v43 = vmul.f32 %v1049_v40, %v1049_v40  ;;  %v1052_v44 = vadd.f32 %v1926_v41, %v1814_v38 }
 0x11a   : > { %v1815_v45 = vpop.f32.mrb[16].mxu0 }
 0x11b   : > { %v1386_v46 = vadd.f32 %v1385_v34, %v1355_v43  ;;  %v1698_v47 = vpack.c.bf16 %v1052_v44, %v1049_v40  ;;  %v1317_v48 = vadd.f32 %v1316_v42, %v1052_v44  ;;  %v1356_v49 = vmul.f32 %v1052_v44, %v1052_v44  ;;  %v1927_v50 = vpop.f32.mrb[16].mxu1  ;;  %v1816_v51 = vpop.f32.mrb[17].mxu0 }
 0x11c   : > { %v1817_v52 = vadd.f32 %v1816_v51, %v1815_v45  ;;  %v1928_v53 = vpop.f32.mrb[17].mxu1  ;;  %v1818_v54 = vpop.f32.mrb[18].mxu0 }
 0x11d   : > { %1762 = vst [vmem:[%s2346_s10 + $0x18] sm:$0xff] %v1698_v47   ;;  %v1387_v55 = vadd.f32 %v1386_v46, %v1356_v49  ;;  %v1929_v56 = vadd.f32 %v1928_v53, %v1927_v50  ;;  %v1930_v57 = vpop.f32.mrb[18].mxu1  ;;  %v1819_v58 = vpop.f32.mrb[19].mxu0 }
 0x11e   : > { %v1820_v59 = vadd.f32 %v1819_v58, %v1818_v54  ;;  %v1931_v60 = vpop.f32.mrb[19].mxu1 }
 0x11f   : > { %v1057_v61 = vadd.f32 %v1929_v56, %v1817_v52  ;;  %v1932_v62 = vadd.f32 %v1931_v60, %v1930_v57 }
 0x121   : > { %v1318_v63 = vadd.f32 %v1317_v48, %v1057_v61  ;;  %v1357_v0 = vmul.f32 %v1057_v61, %v1057_v61  ;;  %v1060_v1 = vadd.f32 %v1932_v62, %v1820_v59 }
 0x122   : > { %v1821_v2 = vpop.f32.mrb[20].mxu0 }
 0x123   : > { %v1388_v3 = vadd.f32 %v1387_v55, %v1357_v0  ;;  %v1703_v4 = vpack.c.bf16 %v1060_v1, %v1057_v61  ;;  %v1319_v5 = vadd.f32 %v1318_v63, %v1060_v1  ;;  %v1358_v6 = vmul.f32 %v1060_v1, %v1060_v1  ;;  %v1933_v7 = vpop.f32.mrb[20].mxu1  ;;  %v1822_v8 = vpop.f32.mrb[21].mxu0 }
 0x124   : > { %v1823_v9 = vadd.f32 %v1822_v8, %v1821_v2  ;;  %v1934_v10 = vpop.f32.mrb[21].mxu1  ;;  %v1824_v11 = vpop.f32.mrb[22].mxu0 }
 0x125   : > { %1763 = vst [vmem:[%s2346_s10 + $0x20] sm:$0xff] %v1703_v4   ;;  %v1389_v12 = vadd.f32 %v1388_v3, %v1358_v6  ;;  %v1935_v13 = vadd.f32 %v1934_v10, %v1933_v7  ;;  %v1936_v14 = vpop.f32.mrb[22].mxu1  ;;  %v1825_v15 = vpop.f32.mrb[23].mxu0 }
 0x126   : > { %v1826_v16 = vadd.f32 %v1825_v15, %v1824_v11  ;;  %v1937_v17 = vpop.f32.mrb[23].mxu1 }
 0x127   : > { %v1065_v18 = vadd.f32 %v1935_v13, %v1823_v9  ;;  %v1938_v19 = vadd.f32 %v1937_v17, %v1936_v14 }
 0x129   : > { %v1320_v20 = vadd.f32 %v1319_v5, %v1065_v18  ;;  %v1359_v21 = vmul.f32 %v1065_v18, %v1065_v18  ;;  %v1068_v22 = vadd.f32 %v1938_v19, %v1826_v16 }
 0x12a   : > { %v1827_v23 = vpop.f32.mrb[24].mxu0 }
 0x12b   : > { %v1390_v24 = vadd.f32 %v1389_v12, %v1359_v21  ;;  %v1708_v25 = vpack.c.bf16 %v1068_v22, %v1065_v18  ;;  %v1321_v26 = vadd.f32 %v1320_v20, %v1068_v22  ;;  %v1360_v27 = vmul.f32 %v1068_v22, %v1068_v22  ;;  %v1939_v28 = vpop.f32.mrb[24].mxu1  ;;  %v1828_v29 = vpop.f32.mrb[25].mxu0 }
 0x12c   : > { %v1829_v30 = vadd.f32 %v1828_v29, %v1827_v23  ;;  %v1940_v31 = vpop.f32.mrb[25].mxu1  ;;  %v1830_v32 = vpop.f32.mrb[26].mxu0 }
 0x12d   : > { %1764 = vst [vmem:[%s2346_s10 + $0x28] sm:$0xff] %v1708_v25   ;;  %v1391_v33 = vadd.f32 %v1390_v24, %v1360_v27  ;;  %v1941_v34 = vadd.f32 %v1940_v31, %v1939_v28  ;;  %v1942_v35 = vpop.f32.mrb[26].mxu1  ;;  %v1831_v36 = vpop.f32.mrb[27].mxu0 }
 0x12e   : > { %v1832_v37 = vadd.f32 %v1831_v36, %v1830_v32  ;;  %v1943_v38 = vpop.f32.mrb[27].mxu1 }
 0x12f   : > { %v1073_v39 = vadd.f32 %v1941_v34, %v1829_v30  ;;  %v1944_v40 = vadd.f32 %v1943_v38, %v1942_v35 }
 0x131   : > { %v1322_v41 = vadd.f32 %v1321_v26, %v1073_v39  ;;  %v1361_v42 = vmul.f32 %v1073_v39, %v1073_v39  ;;  %v1076_v43 = vadd.f32 %v1944_v40, %v1832_v37 }
 0x132   : > { %v1833_v44 = vpop.f32.mrb[28].mxu0 }
 0x133   : > { %v1392_v45 = vadd.f32 %v1391_v33, %v1361_v42  ;;  %v1713_v46 = vpack.c.bf16 %v1076_v43, %v1073_v39  ;;  %v1323_v47 = vadd.f32 %v1322_v41, %v1076_v43  ;;  %v1362_v48 = vmul.f32 %v1076_v43, %v1076_v43  ;;  %v1945_v49 = vpop.f32.mrb[28].mxu1  ;;  %v1834_v50 = vpop.f32.mrb[29].mxu0 }
 0x134   : > { %v1835_v51 = vadd.f32 %v1834_v50, %v1833_v44  ;;  %v1946_v52 = vpop.f32.mrb[29].mxu1  ;;  %v1836_v53 = vpop.f32.mrb[30].mxu0 }
 0x135   : > { %1765 = vst [vmem:[%s2346_s10 + $0x30] sm:$0xff] %v1713_v46   ;;  %v1393_v54 = vadd.f32 %v1392_v45, %v1362_v48  ;;  %v1947_v55 = vadd.f32 %v1946_v52, %v1945_v49  ;;  %v1948_v56 = vpop.f32.mrb[30].mxu1  ;;  %v1837_v57 = vpop.f32.mrb[31].mxu0 }
 0x136   : > { %v1838_v58 = vadd.f32 %v1837_v57, %v1836_v53  ;;  %v1949_v59 = vpop.f32.mrb[31].mxu1 }
 0x137   : > { %v1081_v60 = vadd.f32 %v1947_v55, %v1835_v51  ;;  %v1950_v61 = vadd.f32 %v1949_v59, %v1948_v56 }
 0x139   : > { %v1324_v62 = vadd.f32 %v1323_v47, %v1081_v60  ;;  %v1363_v63 = vmul.f32 %v1081_v60, %v1081_v60  ;;  %v1084_v0 = vadd.f32 %v1950_v61, %v1838_v58 }
 0x13a   : > { %v1839_v1 = vpop.f32.mrb[32].mxu0 }
 0x13b   : > { %v1394_v2 = vadd.f32 %v1393_v54, %v1363_v63  ;;  %v1718_v3 = vpack.c.bf16 %v1084_v0, %v1081_v60  ;;  %v1325_v4 = vadd.f32 %v1324_v62, %v1084_v0  ;;  %v1364_v5 = vmul.f32 %v1084_v0, %v1084_v0  ;;  %v1951_v6 = vpop.f32.mrb[32].mxu1  ;;  %v1840_v7 = vpop.f32.mrb[33].mxu0 }
 0x13c   : > { %v1841_v8 = vadd.f32 %v1840_v7, %v1839_v1  ;;  %v1952_v9 = vpop.f32.mrb[33].mxu1  ;;  %v1842_v10 = vpop.f32.mrb[34].mxu0 }
 0x13d   : > { %1766 = vst [vmem:[%s2346_s10 + $0x38] sm:$0xff] %v1718_v3   ;;  %v1395_v11 = vadd.f32 %v1394_v2, %v1364_v5  ;;  %v1953_v12 = vadd.f32 %v1952_v9, %v1951_v6  ;;  %v1954_v13 = vpop.f32.mrb[34].mxu1  ;;  %v1843_v14 = vpop.f32.mrb[35].mxu0 }
 0x13e   : > { %v1844_v15 = vadd.f32 %v1843_v14, %v1842_v10  ;;  %v1955_v16 = vpop.f32.mrb[35].mxu1 }
 0x13f   : > { %v1089_v17 = vadd.f32 %v1953_v12, %v1841_v8  ;;  %v1956_v18 = vadd.f32 %v1955_v16, %v1954_v13 }
 0x141   : > { %v1326_v19 = vadd.f32 %v1325_v4, %v1089_v17  ;;  %v1365_v20 = vmul.f32 %v1089_v17, %v1089_v17  ;;  %v1092_v21 = vadd.f32 %v1956_v18, %v1844_v15 }
 0x142   : > { %v1845_v22 = vpop.f32.mrb[36].mxu0 }
 0x143   : > { %v1396_v23 = vadd.f32 %v1395_v11, %v1365_v20  ;;  %v1723_v24 = vpack.c.bf16 %v1092_v21, %v1089_v17  ;;  %v1327_v25 = vadd.f32 %v1326_v19, %v1092_v21  ;;  %v1366_v26 = vmul.f32 %v1092_v21, %v1092_v21  ;;  %v1957_v27 = vpop.f32.mrb[36].mxu1  ;;  %v1846_v28 = vpop.f32.mrb[37].mxu0 }
 0x144   : > { %v1847_v29 = vadd.f32 %v1846_v28, %v1845_v22  ;;  %v1958_v30 = vpop.f32.mrb[37].mxu1  ;;  %v1848_v31 = vpop.f32.mrb[38].mxu0 }
 0x145   : > { %1767 = vst [vmem:[%s2346_s10 + $0x40] sm:$0xff] %v1723_v24   ;;  %v1397_v32 = vadd.f32 %v1396_v23, %v1366_v26  ;;  %v1959_v33 = vadd.f32 %v1958_v30, %v1957_v27  ;;  %v1960_v34 = vpop.f32.mrb[38].mxu1  ;;  %v1849_v35 = vpop.f32.mrb[39].mxu0 }
 0x146   : > { %v1850_v36 = vadd.f32 %v1849_v35, %v1848_v31  ;;  %v1961_v37 = vpop.f32.mrb[39].mxu1 }
 0x147   : > { %v1097_v38 = vadd.f32 %v1959_v33, %v1847_v29  ;;  %v1962_v39 = vadd.f32 %v1961_v37, %v1960_v34 }
 0x149   : > { %v1328_v40 = vadd.f32 %v1327_v25, %v1097_v38  ;;  %v1367_v41 = vmul.f32 %v1097_v38, %v1097_v38  ;;  %v1100_v42 = vadd.f32 %v1962_v39, %v1850_v36 }
 0x14a   : > { %v1851_v43 = vpop.f32.mrb[40].mxu0 }
 0x14b   : > { %v1398_v44 = vadd.f32 %v1397_v32, %v1367_v41  ;;  %v1728_v45 = vpack.c.bf16 %v1100_v42, %v1097_v38  ;;  %v1329_v46 = vadd.f32 %v1328_v40, %v1100_v42  ;;  %v1368_v47 = vmul.f32 %v1100_v42, %v1100_v42  ;;  %v1963_v48 = vpop.f32.mrb[40].mxu1  ;;  %v1852_v49 = vpop.f32.mrb[41].mxu0 }
 0x14c   : > { %v1853_v50 = vadd.f32 %v1852_v49, %v1851_v43  ;;  %v1964_v51 = vpop.f32.mrb[41].mxu1  ;;  %v1854_v52 = vpop.f32.mrb[42].mxu0 }
 0x14d   : > { %1768 = vst [vmem:[%s2346_s10 + $0x48] sm:$0xff] %v1728_v45   ;;  %v1399_v53 = vadd.f32 %v1398_v44, %v1368_v47  ;;  %v1965_v54 = vadd.f32 %v1964_v51, %v1963_v48  ;;  %v1966_v55 = vpop.f32.mrb[42].mxu1  ;;  %v1855_v56 = vpop.f32.mrb[43].mxu0 }
 0x14e   : > { %v1856_v57 = vadd.f32 %v1855_v56, %v1854_v52  ;;  %v1967_v58 = vpop.f32.mrb[43].mxu1 }
 0x14f   : > { %v1105_v59 = vadd.f32 %v1965_v54, %v1853_v50  ;;  %v1968_v60 = vadd.f32 %v1967_v58, %v1966_v55 }
 0x151   : > { %v1330_v61 = vadd.f32 %v1329_v46, %v1105_v59  ;;  %v1369_v62 = vmul.f32 %v1105_v59, %v1105_v59  ;;  %v1108_v63 = vadd.f32 %v1968_v60, %v1856_v57 }
 0x152   : > { %v1857_v0 = vpop.f32.mrb[44].mxu0 }
 0x153   : > { %v1400_v1 = vadd.f32 %v1399_v53, %v1369_v62  ;;  %v1733_v2 = vpack.c.bf16 %v1108_v63, %v1105_v59  ;;  %v1331_v3 = vadd.f32 %v1330_v61, %v1108_v63  ;;  %v1370_v4 = vmul.f32 %v1108_v63, %v1108_v63  ;;  %v1969_v5 = vpop.f32.mrb[44].mxu1  ;;  %v1858_v6 = vpop.f32.mrb[45].mxu0 }
 0x154   : > { %v1859_v7 = vadd.f32 %v1858_v6, %v1857_v0  ;;  %v1970_v8 = vpop.f32.mrb[45].mxu1  ;;  %v1860_v9 = vpop.f32.mrb[46].mxu0 }
 0x155   : > { %1769 = vst [vmem:[%s2346_s10 + $0x50] sm:$0xff] %v1733_v2   ;;  %v1401_v10 = vadd.f32 %v1400_v1, %v1370_v4  ;;  %v1971_v11 = vadd.f32 %v1970_v8, %v1969_v5  ;;  %v1972_v12 = vpop.f32.mrb[46].mxu1  ;;  %v1861_v13 = vpop.f32.mrb[47].mxu0 }
 0x156   : > { %v1862_v14 = vadd.f32 %v1861_v13, %v1860_v9  ;;  %v1973_v15 = vpop.f32.mrb[47].mxu1 }
 0x157   : > { %v1113_v16 = vadd.f32 %v1971_v11, %v1859_v7  ;;  %v1974_v17 = vadd.f32 %v1973_v15, %v1972_v12 }
 0x159   : > { %v1332_v18 = vadd.f32 %v1331_v3, %v1113_v16  ;;  %v1371_v19 = vmul.f32 %v1113_v16, %v1113_v16  ;;  %v1116_v20 = vadd.f32 %v1974_v17, %v1862_v14 }
 0x15a   : > { %v1863_v21 = vpop.f32.mrb[48].mxu0 }
 0x15b   : > { %v1402_v22 = vadd.f32 %v1401_v10, %v1371_v19  ;;  %v1738_v23 = vpack.c.bf16 %v1116_v20, %v1113_v16  ;;  %v1333_v24 = vadd.f32 %v1332_v18, %v1116_v20  ;;  %v1372_v25 = vmul.f32 %v1116_v20, %v1116_v20  ;;  %v1975_v26 = vpop.f32.mrb[48].mxu1  ;;  %v1864_v27 = vpop.f32.mrb[49].mxu0 }
 0x15c   : > { %v1865_v28 = vadd.f32 %v1864_v27, %v1863_v21  ;;  %v1976_v29 = vpop.f32.mrb[49].mxu1  ;;  %v1866_v30 = vpop.f32.mrb[50].mxu0 }
 0x15d   : > { %1770 = vst [vmem:[%s2346_s10 + $0x58] sm:$0xff] %v1738_v23   ;;  %v1403_v31 = vadd.f32 %v1402_v22, %v1372_v25  ;;  %v1977_v32 = vadd.f32 %v1976_v29, %v1975_v26  ;;  %v1978_v33 = vpop.f32.mrb[50].mxu1  ;;  %v1867_v34 = vpop.f32.mrb[51].mxu0 }
 0x15e   : > { %v1868_v35 = vadd.f32 %v1867_v34, %v1866_v30  ;;  %v1979_v36 = vpop.f32.mrb[51].mxu1 }
 0x15f   : > { %v1121_v37 = vadd.f32 %v1977_v32, %v1865_v28  ;;  %v1980_v38 = vadd.f32 %v1979_v36, %v1978_v33 }
 0x161   : > { %v1334_v39 = vadd.f32 %v1333_v24, %v1121_v37  ;;  %v1373_v40 = vmul.f32 %v1121_v37, %v1121_v37  ;;  %v1124_v41 = vadd.f32 %v1980_v38, %v1868_v35 }
 0x162   : > { %v1869_v42 = vpop.f32.mrb[52].mxu0 }
 0x163   : > { %v1404_v43 = vadd.f32 %v1403_v31, %v1373_v40  ;;  %v1743_v44 = vpack.c.bf16 %v1124_v41, %v1121_v37  ;;  %v1335_v45 = vadd.f32 %v1334_v39, %v1124_v41  ;;  %v1374_v46 = vmul.f32 %v1124_v41, %v1124_v41  ;;  %v1981_v47 = vpop.f32.mrb[52].mxu1  ;;  %v1870_v48 = vpop.f32.mrb[53].mxu0 }
 0x164   : > { %v1871_v49 = vadd.f32 %v1870_v48, %v1869_v42  ;;  %v1982_v50 = vpop.f32.mrb[53].mxu1  ;;  %v1872_v51 = vpop.f32.mrb[54].mxu0 }
 0x165   : > { %1771 = vst [vmem:[%s2346_s10 + $0x60] sm:$0xff] %v1743_v44   ;;  %v1405_v52 = vadd.f32 %v1404_v43, %v1374_v46  ;;  %v1983_v53 = vadd.f32 %v1982_v50, %v1981_v47  ;;  %v1984_v54 = vpop.f32.mrb[54].mxu1  ;;  %v1873_v55 = vpop.f32.mrb[55].mxu0 }
 0x166   : > { %v1874_v56 = vadd.f32 %v1873_v55, %v1872_v51  ;;  %v1985_v57 = vpop.f32.mrb[55].mxu1 }
 0x167   : > { %v1129_v58 = vadd.f32 %v1983_v53, %v1871_v49  ;;  %v1986_v59 = vadd.f32 %v1985_v57, %v1984_v54 }
 0x169   : > { %v1336_v60 = vadd.f32 %v1335_v45, %v1129_v58  ;;  %v1375_v61 = vmul.f32 %v1129_v58, %v1129_v58  ;;  %v1132_v62 = vadd.f32 %v1986_v59, %v1874_v56 }
 0x16a   : > { %v1875_v63 = vpop.f32.mrb[56].mxu0 }
 0x16b   : > { %v1406_v0 = vadd.f32 %v1405_v52, %v1375_v61  ;;  %v1748_v1 = vpack.c.bf16 %v1132_v62, %v1129_v58  ;;  %v1337_v2 = vadd.f32 %v1336_v60, %v1132_v62  ;;  %v1376_v3 = vmul.f32 %v1132_v62, %v1132_v62  ;;  %v1987_v4 = vpop.f32.mrb[56].mxu1  ;;  %v1876_v5 = vpop.f32.mrb[57].mxu0 }
 0x16c   : > { %v1877_v6 = vadd.f32 %v1876_v5, %v1875_v63  ;;  %v1988_v7 = vpop.f32.mrb[57].mxu1  ;;  %v1878_v8 = vpop.f32.mrb[58].mxu0 }
 0x16d   : > { %1772 = vst [vmem:[%s2346_s10 + $0x68] sm:$0xff] %v1748_v1   ;;  %v1407_v9 = vadd.f32 %v1406_v0, %v1376_v3  ;;  %v1989_v10 = vadd.f32 %v1988_v7, %v1987_v4  ;;  %v1990_v11 = vpop.f32.mrb[58].mxu1  ;;  %v1879_v12 = vpop.f32.mrb[59].mxu0 }
 0x16e   : > { %v1880_v13 = vadd.f32 %v1879_v12, %v1878_v8  ;;  %v1991_v14 = vpop.f32.mrb[59].mxu1 }
 0x16f   : > { %v1137_v15 = vadd.f32 %v1989_v10, %v1877_v6  ;;  %v1992_v16 = vadd.f32 %v1991_v14, %v1990_v11 }
 0x171   : > { %v1338_v17 = vadd.f32 %v1337_v2, %v1137_v15  ;;  %v1377_v18 = vmul.f32 %v1137_v15, %v1137_v15  ;;  %v1140_v19 = vadd.f32 %v1992_v16, %v1880_v13 }
 0x172   : > { %v1881_v20 = vpop.f32.mrb[60].mxu0 }
 0x173   : > { %v1408_v21 = vadd.f32 %v1407_v9, %v1377_v18  ;;  %v1753_v22 = vpack.c.bf16 %v1140_v19, %v1137_v15  ;;  %v1339_v23 = vadd.f32 %v1338_v17, %v1140_v19  ;;  %v1378_v24 = vmul.f32 %v1140_v19, %v1140_v19  ;;  %v1993_v25 = vpop.f32.mrb[60].mxu1  ;;  %v1882_v26 = vpop.f32.mrb[61].mxu0 }
 0x174   : > { %v1883_v27 = vadd.f32 %v1882_v26, %v1881_v20  ;;  %v1994_v28 = vpop.f32.mrb[61].mxu1  ;;  %v1884_v29 = vpop.f32.mrb[62].mxu0 }
 0x175   : > { %1773 = vst [vmem:[%s2346_s10 + $0x70] sm:$0xff] %v1753_v22   ;;  %v1409_v30 = vadd.f32 %v1408_v21, %v1378_v24  ;;  %v1995_v31 = vadd.f32 %v1994_v28, %v1993_v25  ;;  %v1996_v32 = vpop.f32.mrb[62].mxu1  ;;  %v1885_v33 = vpop.f32.mrb[63].mxu0 }
 0x176   : > { %v1886_v34 = vadd.f32 %v1885_v33, %v1884_v29  ;;  %v1997_v35 = vpop.f32.mrb[63].mxu1 }
 0x177   : > { %v1145_v36 = vadd.f32 %v1995_v31, %v1883_v27  ;;  %v1998_v37 = vadd.f32 %v1997_v35, %v1996_v32 }
 0x179   : > { %v1340_v38 = vadd.f32 %v1339_v23, %v1145_v36  ;;  %v1379_v39 = vmul.f32 %v1145_v36, %v1145_v36  ;;  %v1148_v40 = vadd.f32 %v1998_v37, %v1886_v34 }
 0x17b   : > { %v1410_v41 = vadd.f32 %v1409_v30, %v1379_v39  ;;  %v1758_v42 = vpack.c.bf16 %v1148_v40, %v1145_v36  ;;  %v1341_v43 = vadd.f32 %v1340_v38, %v1148_v40  ;;  %v1380_v44 = vmul.f32 %v1148_v40, %v1148_v40 }
 0x17d   : > { %1774 = vst [vmem:[%s2346_s10 + $0x78] sm:$0xff] %v1758_v42   ;;  %v1342_v45 = vrot.slane %v1341_v43, 4  ;;  %v1411_v46 = vadd.f32 %v1410_v41, %v1380_v44 }
 0x17f   : > { %v1343_v47 = vadd.f32 %v1342_v45, %v1341_v43  ;;  %v1412_v48 = vrot.slane %v1411_v46, 4 }
 0x181   : > { %v1344_v49 = vrot.slane %v1343_v47, 2  ;;  %v1413_v50 = vadd.f32 %v1412_v48, %v1411_v46 }
 0x183   : > { %v1345_v51 = vadd.f32 %v1344_v49, %v1343_v47  ;;  %v1414_v52 = vrot.slane %v1413_v50, 2 }
 0x185   : > { %v1346_v53 = vrot.slane %v1345_v51, 1  ;;  %v1415_v54 = vadd.f32 %v1414_v52, %v1413_v50 }
 0x187   : > { %v1347_v55 = vadd.f32 %v1346_v53, %v1345_v51  ;;  %v1416_v56 = vrot.slane %v1415_v54, 1 }
 0x189   : > { %1348 = vst [vmem:[%s187_s15] sm:$0x1] %v1347_v55  ;;  %v1417_v57 = vadd.f32 %v1416_v56, %v1415_v54 }
 0x18b   : > { %1418 = vst [vmem:[%s187_s15 + $0x1] sm:$0x1] %v1417_v57 }
 0x18c PF: > { %s14_s12 = sadd.s32 1, %s2141_s12  }
 0x18d   : > { %p11_p5 = scmp.ge.s32.totalorder %s14_s12, 4  }
 0x18f   :  { %13 = sbr.rel (!%p11_p5) target bundleno = 1 (0x1), region = 70 }

// kernel: bottleneck_forward.9
= control target key start
LH: loop header
LB: loop body
LE: loop exit
PB: predicated region body
PF: predicated region fallthrough
CT: control target
= control target key end

     0   :  { %s851_s12 = smov 0   ;;  %s985_s0 = inlined_call_operand.vmem [shape: bf16[512,128], index: 0, kind: input, shape index: {}]   ;;  %s986_s1 = inlined_call_operand.vmem [shape: f32[1,128], index: 1, kind: input, shape index: {}]   ;;  %s987_s2 = inlined_call_operand.vmem [shape: f32[1,128], index: 2, kind: input, shape index: {}]   ;;  %s988_s3 = inlined_call_operand.vmem [shape: bf16[512,128], index: 3, kind: output, shape index: {}]  }
   0x1 LB: > { %s564_s13 = sadd.s32 4294967295, %s829_s12   ;;  %p568_p0 = scmp.ge.s32.totalorder %s829_s12, 1  ;;  %s829_s12 = sphi %s851_s12, %s13_s12  }
   0x2   : > { %p138_p1 = scmp.lt.s32.totalorder %s829_s12, 3 }
   0x4   : > { %p139_p2 = pnand %p568_p0, %p138_p1 }
   0x5   : > { %s569_s14 = sshll.u32 (!%p139_p2), %s564_s13, 5  ;;  %v872_v0 = vld [vmem:[%s986_s1] ss:$0 sm:$0xff] (!%p139_p2) }
   0x6   : > { %142 = sbr.rel (%p139_p2) target bundleno = 59 (0x3b), region = 32  ;;  %p163_p3 = scmp.lt.s32.totalorder (!%p139_p2), %s569_s14, 63  ;;  %v881_v9 = vld [vmem:[%s987_s2] ss:$0 sm:$0xff] (!%p139_p2) }
   0xd   : > { %s990_s14 = smov (!%p163_p3, %s569_s14), 63 }
   0xe   : > { %s570_s15 = sshll.u32 %s990_s14, 2 }
   0xf   : > { %s867_s18 = scalar_lea.vmem %s985_s0, %s570_s15  ;;  %s906_s25 = scalar_lea.vmem %s988_s3, %s570_s15 }
  0x10   : > { %v642_v1 = vld [vmem:[%s867_s18] sm:$0xff]   ;;  %v785_v2 = vld [vmem:[%s867_s18 + $0x8] sm:$0xff]   ;;  %v786_v3 = vld [vmem:[%s867_s18 + $0x10] sm:$0xff]  }
  0x11   : > { %v643_v4 = vunpack.c.l.bf16 %v642_v1  ;;  %v644_v5 = vunpack.c.h.bf16 %v642_v1  ;;  %v647_v6 = vunpack.c.l.bf16 %v785_v2  ;;  %v648_v7 = vunpack.c.h.bf16 %v785_v2  ;;  %v787_v8 = vld [vmem:[%s867_s18 + $0x18] sm:$0xff]   ;;  %v788_v30 = vld [vmem:[%s867_s18 + $0x20] sm:$0xff]   ;;  %v789_v35 = vld [vmem:[%s867_s18 + $0x28] sm:$0xff]  }
  0x12   : > { %v651_v10 = vunpack.c.l.bf16 %v786_v3  ;;  %v652_v11 = vunpack.c.h.bf16 %v786_v3  ;;  %v655_v12 = vunpack.c.l.bf16 %v787_v8  ;;  %v656_v13 = vunpack.c.h.bf16 %v787_v8  ;;  %v790_v40 = vld [vmem:[%s867_s18 + $0x30] sm:$0xff]   ;;  %v791_v45 = vld [vmem:[%s867_s18 + $0x38] sm:$0xff]   ;;  %v792_v3 = vld [vmem:[%s867_s18 + $0x40] sm:$0xff]  }
  0x13   : > { %v245_v14 = vmul.f32 %v643_v4, %v872_v0  ;;  %v246_v15 = vmul.f32 %v644_v5, %v872_v0  ;;  %v247_v16 = vmul.f32 %v647_v6, %v872_v0  ;;  %v248_v17 = vmul.f32 %v648_v7, %v872_v0 }
  0x14   : > { %v249_v18 = vmul.f32 %v651_v10, %v872_v0  ;;  %v250_v19 = vmul.f32 %v652_v11, %v872_v0  ;;  %v251_v20 = vmul.f32 %v655_v12, %v872_v0  ;;  %v252_v21 = vmul.f32 %v656_v13, %v872_v0  ;;  %v793_v13 = vld [vmem:[%s867_s18 + $0x48] sm:$0xff]  }
  0x15   : > { %v284_v22 = vadd.f32 %v881_v9, %v245_v14  ;;  %v285_v23 = vadd.f32 %v881_v9, %v246_v15  ;;  %v286_v24 = vadd.f32 %v881_v9, %v247_v16  ;;  %v287_v25 = vadd.f32 %v881_v9, %v248_v17 }
  0x16   : > { %v288_v26 = vadd.f32 %v881_v9, %v249_v18  ;;  %v289_v27 = vadd.f32 %v881_v9, %v250_v19  ;;  %v290_v28 = vadd.f32 %v881_v9, %v251_v20  ;;  %v291_v29 = vadd.f32 %v881_v9, %v252_v21  ;;  %v794_v18 = vld [vmem:[%s867_s18 + $0x50] sm:$0xff]  }
  0x17   : > { %v316_v31 = vmax.f32 %v284_v22, 0.0  ;;  %v317_v32 = vmax.f32 %v285_v23, 0.0  ;;  %v318_v33 = vmax.f32 %v286_v24, 0.0  ;;  %v319_v34 = vmax.f32 %v287_v25, 0.0  ;;  %v795_v23 = vld [vmem:[%s867_s18 + $0x58] sm:$0xff]  }
  0x18   : > { %v320_v36 = vmax.f32 %v288_v26, 0.0  ;;  %v321_v37 = vmax.f32 %v289_v27, 0.0  ;;  %v322_v38 = vmax.f32 %v290_v28, 0.0  ;;  %v323_v39 = vmax.f32 %v291_v29, 0.0 }
  0x19   : > { %v708_v41 = vpack.c.bf16 %v317_v32, %v316_v31  ;;  %v713_v42 = vpack.c.bf16 %v319_v34, %v318_v33  ;;  %v659_v43 = vunpack.c.l.bf16 %v788_v30  ;;  %v660_v44 = vunpack.c.h.bf16 %v788_v30 }
  0x1a   : > { %v718_v46 = vpack.c.bf16 %v321_v37, %v320_v36  ;;  %v723_v47 = vpack.c.bf16 %v323_v39, %v322_v38  ;;  %v663_v48 = vunpack.c.l.bf16 %v789_v35  ;;  %v664_v49 = vunpack.c.h.bf16 %v789_v35 }
  0x1b   : > { %709 = vst [vmem:[%s906_s25] sm:$0xff] %v708_v41   ;;  %800 = vst [vmem:[%s906_s25 + $0x8] sm:$0xff] %v713_v42   ;;  %v253_v50 = vmul.f32 %v659_v43, %v872_v0  ;;  %v254_v51 = vmul.f32 %v660_v44, %v872_v0  ;;  %v667_v52 = vunpack.c.l.bf16 %v790_v40  ;;  %v668_v53 = vunpack.c.h.bf16 %v790_v40  ;;  %v796_v40 = vld [vmem:[%s867_s18 + $0x60] sm:$0xff]  }
  0x1c   : > { %801 = vst [vmem:[%s906_s25 + $0x10] sm:$0xff] %v718_v46   ;;  %802 = vst [vmem:[%s906_s25 + $0x18] sm:$0xff] %v723_v47   ;;  %v255_v54 = vmul.f32 %v663_v48, %v872_v0  ;;  %v256_v55 = vmul.f32 %v664_v49, %v872_v0  ;;  %v671_v56 = vunpack.c.l.bf16 %v791_v45  ;;  %v672_v57 = vunpack.c.h.bf16 %v791_v45 }
  0x1d   : > { %v292_v58 = vadd.f32 %v881_v9, %v253_v50  ;;  %v293_v59 = vadd.f32 %v881_v9, %v254_v51  ;;  %v257_v60 = vmul.f32 %v667_v52, %v872_v0  ;;  %v258_v61 = vmul.f32 %v668_v53, %v872_v0  ;;  %v797_v53 = vld [vmem:[%s867_s18 + $0x68] sm:$0xff]  }
  0x1e   : > { %v294_v62 = vadd.f32 %v881_v9, %v255_v54  ;;  %v295_v63 = vadd.f32 %v881_v9, %v256_v55  ;;  %v259_v1 = vmul.f32 %v671_v56, %v872_v0  ;;  %v260_v2 = vmul.f32 %v672_v57, %v872_v0 }
  0x1f   : > { %v324_v4 = vmax.f32 %v292_v58, 0.0  ;;  %v325_v5 = vmax.f32 %v293_v59, 0.0  ;;  %v296_v6 = vadd.f32 %v881_v9, %v257_v60  ;;  %v297_v7 = vadd.f32 %v881_v9, %v258_v61  ;;  %v798_v58 = vld [vmem:[%s867_s18 + $0x70] sm:$0xff]  }
  0x20   : > { %v326_v8 = vmax.f32 %v294_v62, 0.0  ;;  %v327_v10 = vmax.f32 %v295_v63, 0.0  ;;  %v298_v11 = vadd.f32 %v881_v9, %v259_v1  ;;  %v299_v12 = vadd.f32 %v881_v9, %v260_v2  ;;  %v799_v63 = vld [vmem:[%s867_s18 + $0x78] sm:$0xff]  }
  0x21   : > { %v728_v14 = vpack.c.bf16 %v325_v5, %v324_v4  ;;  %v328_v15 = vmax.f32 %v296_v6, 0.0  ;;  %v329_v16 = vmax.f32 %v297_v7, 0.0  ;;  %v675_v17 = vunpack.c.l.bf16 %v792_v3 }
  0x22   : > { %v733_v19 = vpack.c.bf16 %v327_v10, %v326_v8  ;;  %v330_v20 = vmax.f32 %v298_v11, 0.0  ;;  %v331_v21 = vmax.f32 %v299_v12, 0.0  ;;  %v676_v22 = vunpack.c.h.bf16 %v792_v3 }
  0x23   : > { %803 = vst [vmem:[%s906_s25 + $0x20] sm:$0xff] %v728_v14   ;;  %v738_v24 = vpack.c.bf16 %v329_v16, %v328_v15  ;;  %v261_v25 = vmul.f32 %v675_v17, %v872_v0  ;;  %v679_v26 = vunpack.c.l.bf16 %v793_v13  ;;  %v680_v27 = vunpack.c.h.bf16 %v793_v13 }
  0x24   : > { %804 = vst [vmem:[%s906_s25 + $0x28] sm:$0xff] %v733_v19   ;;  %v743_v28 = vpack.c.bf16 %v331_v21, %v330_v20  ;;  %v262_v29 = vmul.f32 %v676_v22, %v872_v0  ;;  %v683_v30 = vunpack.c.l.bf16 %v794_v18  ;;  %v684_v31 = vunpack.c.h.bf16 %v794_v18 }
  0x25   : > { %805 = vst [vmem:[%s906_s25 + $0x30] sm:$0xff] %v738_v24   ;;  %v300_v32 = vadd.f32 %v881_v9, %v261_v25  ;;  %v263_v33 = vmul.f32 %v679_v26, %v872_v0  ;;  %v264_v34 = vmul.f32 %v680_v27, %v872_v0  ;;  %v687_v35 = vunpack.c.l.bf16 %v795_v23 }
  0x26   : > { %806 = vst [vmem:[%s906_s25 + $0x38] sm:$0xff] %v743_v28   ;;  %v301_v36 = vadd.f32 %v881_v9, %v262_v29  ;;  %v265_v37 = vmul.f32 %v683_v30, %v872_v0  ;;  %v266_v38 = vmul.f32 %v684_v31, %v872_v0  ;;  %v688_v39 = vunpack.c.h.bf16 %v795_v23 }
  0x27   : > { %v332_v41 = vmax.f32 %v300_v32, 0.0  ;;  %v302_v42 = vadd.f32 %v881_v9, %v263_v33  ;;  %v303_v43 = vadd.f32 %v881_v9, %v264_v34  ;;  %v267_v44 = vmul.f32 %v687_v35, %v872_v0 }
  0x28   : > { %v333_v45 = vmax.f32 %v301_v36, 0.0  ;;  %v304_v46 = vadd.f32 %v881_v9, %v265_v37  ;;  %v305_v47 = vadd.f32 %v881_v9, %v266_v38  ;;  %v268_v48 = vmul.f32 %v688_v39, %v872_v0 }
  0x29   : > { %v334_v49 = vmax.f32 %v302_v42, 0.0  ;;  %v335_v50 = vmax.f32 %v303_v43, 0.0  ;;  %v306_v51 = vadd.f32 %v881_v9, %v267_v44  ;;  %v691_v52 = vunpack.c.l.bf16 %v796_v40 }
  0x2a   : > { %v748_v54 = vpack.c.bf16 %v333_v45, %v332_v41  ;;  %v336_v55 = vmax.f32 %v304_v46, 0.0  ;;  %v337_v56 = vmax.f32 %v305_v47, 0.0  ;;  %v307_v57 = vadd.f32 %v881_v9, %v268_v48 }
  0x2b   : > { %v753_v59 = vpack.c.bf16 %v335_v50, %v334_v49  ;;  %v338_v60 = vmax.f32 %v306_v51, 0.0  ;;  %v692_v61 = vunpack.c.h.bf16 %v796_v40  ;;  %v269_v62 = vmul.f32 %v691_v52, %v872_v0 }
  0x2c   : > { %807 = vst [vmem:[%s906_s25 + $0x40] sm:$0xff] %v748_v54   ;;  %v758_v1 = vpack.c.bf16 %v337_v56, %v336_v55  ;;  %v339_v2 = vmax.f32 %v307_v57, 0.0  ;;  %v695_v3 = vunpack.c.l.bf16 %v797_v53  ;;  %v696_v4 = vunpack.c.h.bf16 %v797_v53 }
  0x2d   : > { %808 = vst [vmem:[%s906_s25 + $0x48] sm:$0xff] %v753_v59   ;;  %v270_v5 = vmul.f32 %v692_v61, %v872_v0  ;;  %v308_v6 = vadd.f32 %v881_v9, %v269_v62  ;;  %v699_v7 = vunpack.c.l.bf16 %v798_v58  ;;  %v700_v8 = vunpack.c.h.bf16 %v798_v58 }
  0x2e   : > { %809 = vst [vmem:[%s906_s25 + $0x50] sm:$0xff] %v758_v1   ;;  %v763_v10 = vpack.c.bf16 %v339_v2, %v338_v60  ;;  %v271_v11 = vmul.f32 %v695_v3, %v872_v0  ;;  %v272_v12 = vmul.f32 %v696_v4, %v872_v0  ;;  %v703_v13 = vunpack.c.l.bf16 %v799_v63 }
  0x2f   : > { %v309_v14 = vadd.f32 %v881_v9, %v270_v5  ;;  %v340_v15 = vmax.f32 %v308_v6, 0.0  ;;  %v273_v16 = vmul.f32 %v699_v7, %v872_v0  ;;  %v274_v17 = vmul.f32 %v700_v8, %v872_v0 }
  0x30   : > { %810 = vst [vmem:[%s906_s25 + $0x58] sm:$0xff] %v763_v10   ;;  %v310_v18 = vadd.f32 %v881_v9, %v271_v11  ;;  %v311_v19 = vadd.f32 %v881_v9, %v272_v12  ;;  %v704_v20 = vunpack.c.h.bf16 %v799_v63  ;;  %v275_v21 = vmul.f32 %v703_v13, %v872_v0 }
  0x31   : > { %v341_v22 = vmax.f32 %v309_v14, 0.0  ;;  %v312_v23 = vadd.f32 %v881_v9, %v273_v16  ;;  %v313_v24 = vadd.f32 %v881_v9, %v274_v17 }
  0x32   : > { %v342_v25 = vmax.f32 %v310_v18, 0.0  ;;  %v343_v26 = vmax.f32 %v311_v19, 0.0  ;;  %v276_v27 = vmul.f32 %v704_v20, %v872_v0  ;;  %v314_v28 = vadd.f32 %v881_v9, %v275_v21 }
  0x33   : > { %v768_v29 = vpack.c.bf16 %v341_v22, %v340_v15  ;;  %v344_v30 = vmax.f32 %v312_v23, 0.0  ;;  %v345_v31 = vmax.f32 %v313_v24, 0.0 }
  0x34   : > { %v773_v32 = vpack.c.bf16 %v343_v26, %v342_v25  ;;  %v315_v33 = vadd.f32 %v881_v9, %v276_v27  ;;  %v346_v34 = vmax.f32 %v314_v28, 0.0 }
  0x35   : > { %811 = vst [vmem:[%s906_s25 + $0x60] sm:$0xff] %v768_v29   ;;  %v778_v35 = vpack.c.bf16 %v345_v31, %v344_v30 }
  0x36   : > { %812 = vst [vmem:[%s906_s25 + $0x68] sm:$0xff] %v773_v32   ;;  %v347_v36 = vmax.f32 %v315_v33, 0.0 }
  0x37   : > { %813 = vst [vmem:[%s906_s25 + $0x70] sm:$0xff] %v778_v35  }
  0x38   : > { %v783_v37 = vpack.c.bf16 %v347_v36, %v346_v34 }
  0x3a   : > { %814 = vst [vmem:[%s906_s25 + $0x78] sm:$0xff] %v783_v37  }
  0x3b PF: > { %s13_s12 = sadd.s32 1, %s829_s12  }
  0x3c   : > { %p10_p4 = scmp.ge.s32.totalorder %s13_s12, 4  }
  0x3e   :  { %12 = sbr.rel (!%p10_p4) target bundleno = 1 (0x1), region = 62 }

// kernel: bottleneck_forward.10
= control target key start
LH: loop header
LB: loop body
LE: loop exit
PB: predicated region body
PF: predicated region fallthrough
CT: control target
= control target key end

     0   :  { %s2221_s12 = smov 0   ;;  %s2474_s0 = inlined_call_operand.vmem [shape: bf16[512,128], index: 0, kind: input, shape index: {}]   ;;  %s2475_s1 = inlined_call_operand.vmem [shape: bf16[128,512], index: 1, kind: input, shape index: {}]   ;;  %s2476_s2 = inlined_call_operand.vmem [shape: bf16[512,512], index: 2, kind: output, shape index: {0}]   ;;  %s2477_s3 = inlined_call_operand.vmem [shape: f32[2,2,512], index: 3, kind: output, shape index: {1}]  }
   0x1 LB: > { %s2227_s13 = sadd.s32 4294967295, %s2197_s12   ;;  %p1928_p0 = scmp.ge.s32.totalorder %s2197_s12, 1  ;;  %s2197_s12 = sphi %s2221_s12, %s14_s12  }
   0x2   : > { %p141_p1 = scmp.lt.s32.totalorder %s2197_s12, 3 }
   0x4   : > { %p142_p2 = pnand %p1928_p0, %p141_p1 }
   0x5   : > { %v2127_v0 = vld [vmem:[%s2475_s1 + $0x4] ss:$16 sps:$4 sm:$0xff] (!%p142_p2)   ;;  %v2129_v1 = vld [vmem:[%s2475_s1 + $0xc] ss:$16 sps:$4 sm:$0xff] (!%p142_p2)   ;;  %v2199_v2 = vmov (!%p142_p2), 0   ;;  %s1929_s5 = sshll.u32 (!%p142_p2), %s2227_s13, 5 }
   0x6   : > { %145 = sbr.rel (%p142_p2) target bundleno = 404 (0x194), region = 28  ;;  %542 = vmatprep.mubr.bf16.mxu0 (!%p142_p2), %v2199_v2  ;;  %735 = vmatprep.mubr.bf16.mxu1 (!%p142_p2), %v2199_v2  ;;  %v2131_v3 = vld [vmem:[%s2475_s1] ss:$16 sps:$4 sm:$0xff] (!%p142_p2)   ;;  %v2132_v4 = vld [vmem:[%s2475_s1 + $0x8] ss:$16 sps:$4 sm:$0xff] (!%p142_p2)   ;;  %p172_p3 = scmp.lt.s32.totalorder (!%p142_p2), %s1929_s5, 63 }
   0x7   : > { %510 = vmatprep.subr.bf16.mxu0 (!%p142_p2), %v2127_v0  ;;  %703 = vmatprep.subr.bf16.mxu1 (!%p142_p2), %v2129_v1  ;;  %v2133_v5 = vld [vmem:[%s2475_s1 + $0x24] ss:$16 sps:$4 sm:$0xff] (!%p142_p2)   ;;  %v2135_v6 = vld [vmem:[%s2475_s1 + $0x2c] ss:$16 sps:$4 sm:$0xff] (!%p142_p2)   ;;  %v2137_v7 = vld [vmem:[%s2475_s1 + $0x20] ss:$16 sps:$4 sm:$0xff] (!%p142_p2)  }
   0x8   : > { %511 = vmatpush1.bf16.msra.mxu0 (!%p142_p2), %v2131_v3  ;;  %704 = vmatpush1.bf16.msra.mxu1 (!%p142_p2), %v2132_v4  ;;  %v2138_v8 = vld [vmem:[%s2475_s1 + $0x28] ss:$16 sps:$4 sm:$0xff] (!%p142_p2)   ;;  %v2139_v9 = vld [vmem:[%s2475_s1 + $0x44] ss:$16 sps:$4 sm:$0xff] (!%p142_p2)   ;;  %v2141_v10 = vld [vmem:[%s2475_s1 + $0x4c] ss:$16 sps:$4 sm:$0xff] (!%p142_p2)  }
   0x9   : > { %512 = vmatprep.subr.bf16.mxu0 (!%p142_p2), %v2133_v5  ;;  %705 = vmatprep.subr.bf16.mxu1 (!%p142_p2), %v2135_v6  ;;  %v2143_v11 = vld [vmem:[%s2475_s1 + $0x40] ss:$16 sps:$4 sm:$0xff] (!%p142_p2)   ;;  %v2144_v12 = vld [vmem:[%s2475_s1 + $0x48] ss:$16 sps:$4 sm:$0xff] (!%p142_p2)   ;;  %v2145_v13 = vld [vmem:[%s2475_s1 + $0x64] ss:$16 sps:$4 sm:$0xff] (!%p142_p2)  }
   0xa   : > { %v2147_v14 = vld [vmem:[%s2475_s1 + $0x6c] ss:$16 sps:$4 sm:$0xff] (!%p142_p2)   ;;  %v2149_v15 = vld [vmem:[%s2475_s1 + $0x60] ss:$16 sps:$4 sm:$0xff] (!%p142_p2)   ;;  %v2150_v16 = vld [vmem:[%s2475_s1 + $0x68] ss:$16 sps:$4 sm:$0xff] (!%p142_p2)  }
   0xb   : > { %v2151_v17 = vld [vmem:[%s2475_s1 + $0x84] ss:$16 sps:$4 sm:$0xff] (!%p142_p2)   ;;  %v2153_v18 = vld [vmem:[%s2475_s1 + $0x8c] ss:$16 sps:$4 sm:$0xff] (!%p142_p2)   ;;  %v2155_v19 = vld [vmem:[%s2475_s1 + $0x80] ss:$16 sps:$4 sm:$0xff] (!%p142_p2)  }
   0xc   : > { %513 = vmatpush1.bf16.msra.mxu0 (!%p142_p2), %v2137_v7  ;;  %706 = vmatpush1.bf16.msra.mxu1 (!%p142_p2), %v2138_v8  ;;  %v2156_v20 = vld [vmem:[%s2475_s1 + $0x88] ss:$16 sps:$4 sm:$0xff] (!%p142_p2)   ;;  %v2157_v21 = vld [vmem:[%s2475_s1 + $0xa4] ss:$16 sps:$4 sm:$0xff] (!%p142_p2)   ;;  %v2159_v22 = vld [vmem:[%s2475_s1 + $0xac] ss:$16 sps:$4 sm:$0xff] (!%p142_p2)  }
   0xd   : > { %514 = vmatprep.subr.bf16.mxu0 %v2139_v9  ;;  %707 = vmatprep.subr.bf16.mxu1 %v2141_v10  ;;  %s2479_s5 = smov (!%p172_p3, %s1929_s5), 63  ;;  %v2161_v23 = vld [vmem:[%s2475_s1 + $0xa0] ss:$16 sps:$4 sm:$0xff]   ;;  %v2162_v24 = vld [vmem:[%s2475_s1 + $0xa8] ss:$16 sps:$4 sm:$0xff]   ;;  %p184_p4 = scmp.lt.s32.totalorder %s2227_s13, 1 }
   0xe   : > { %s1930_s8 = sshll.u32 %s2479_s5, 2  ;;  %v2163_v25 = vld [vmem:[%s2475_s1 + $0xc4] ss:$16 sps:$4 sm:$0xff]   ;;  %v2165_v26 = vld [vmem:[%s2475_s1 + $0xcc] ss:$16 sps:$4 sm:$0xff]  }
   0xf   : > { %s2315_s19 = scalar_lea.vmem %s2474_s0, %s1930_s8  ;;  %v2167_v27 = vld [vmem:[%s2475_s1 + $0xc0] ss:$16 sps:$4 sm:$0xff]   ;;  %v2168_v28 = vld [vmem:[%s2475_s1 + $0xc8] ss:$16 sps:$4 sm:$0xff]   ;;  %v2169_v29 = vld [vmem:[%s2475_s1 + $0xe4] ss:$16 sps:$4 sm:$0xff]  }
  0x10   : > { %515 = vmatpush1.bf16.msra.mxu0 %v2143_v11  ;;  %708 = vmatpush1.bf16.msra.mxu1 %v2144_v12  ;;  %v2171_v30 = vld [vmem:[%s2475_s1 + $0xec] ss:$16 sps:$4 sm:$0xff]   ;;  %v2173_v31 = vld [vmem:[%s2475_s1 + $0xe0] ss:$16 sps:$4 sm:$0xff]   ;;  %v2174_v32 = vld [vmem:[%s2475_s1 + $0xe8] ss:$16 sps:$4 sm:$0xff]  }
  0x11   : > { %516 = vmatprep.subr.bf16.mxu0 %v2145_v13  ;;  %709 = vmatprep.subr.bf16.mxu1 %v2147_v14  ;;  %v2175_v33 = vld [vmem:[%s2315_s19] sm:$0xff]   ;;  %v2176_v34 = vld [vmem:[%s2315_s19 + $0x8] sm:$0xff]   ;;  %v2177_v35 = vld [vmem:[%s2315_s19 + $0x10] sm:$0xff]   ;;  %s2051_s8 = sshll.u32 %s2479_s5, 4  ;;  %s2481_s13 = smov (!%p184_p4, %s2227_s13), 1 }
  0x12   : > { %v2178_v36 = vld [vmem:[%s2315_s19 + $0x18] sm:$0xff]   ;;  %v2179_v37 = vld [vmem:[%s2315_s19 + $0x20] sm:$0xff]   ;;  %v2180_v38 = vld [vmem:[%s2315_s19 + $0x28] sm:$0xff]   ;;  %s2388_s11 = scalar_lea.vmem %s2476_s2, %s2051_s8  ;;  %s2052_s5 = sshll.u32 %s2481_s13, 3 }
  0x13   : > { %v2181_v39 = vld [vmem:[%s2315_s19 + $0x30] sm:$0xff]   ;;  %v2182_v40 = vld [vmem:[%s2315_s19 + $0x38] sm:$0xff]   ;;  %v2183_v41 = vld [vmem:[%s2315_s19 + $0x40] sm:$0xff]   ;;  %s188_s16 = scalar_lea.vmem %s2477_s3, %s2052_s5 }
  0x14   : > { %517 = vmatpush1.bf16.msra.mxu0 %v2149_v15  ;;  %710 = vmatpush1.bf16.msra.mxu1 %v2150_v16  ;;  %v2184_v42 = vld [vmem:[%s2315_s19 + $0x48] sm:$0xff]   ;;  %v2185_v43 = vld [vmem:[%s2315_s19 + $0x50] sm:$0xff]   ;;  %v2186_v44 = vld [vmem:[%s2315_s19 + $0x58] sm:$0xff]  }
  0x15   : > { %518 = vmatprep.subr.bf16.mxu0 %v2151_v17  ;;  %711 = vmatprep.subr.bf16.mxu1 %v2153_v18  ;;  %v2187_v45 = vld [vmem:[%s2315_s19 + $0x60] sm:$0xff]   ;;  %v2188_v46 = vld [vmem:[%s2315_s19 + $0x68] sm:$0xff]   ;;  %v2189_v47 = vld [vmem:[%s2315_s19 + $0x70] sm:$0xff]  }
  0x16   : > { %v2190_v48 = vld [vmem:[%s2315_s19 + $0x78] sm:$0xff]  }
  0x18   : > { %519 = vmatpush1.bf16.msra.mxu0 %v2155_v19  ;;  %712 = vmatpush1.bf16.msra.mxu1 %v2156_v20 }
  0x19   : > { %520 = vmatprep.subr.bf16.mxu0 %v2157_v21  ;;  %713 = vmatprep.subr.bf16.mxu1 %v2159_v22 }
  0x1c   : > { %521 = vmatpush1.bf16.msra.mxu0 %v2161_v23  ;;  %714 = vmatpush1.bf16.msra.mxu1 %v2162_v24 }
  0x1d   : > { %522 = vmatprep.subr.bf16.mxu0 %v2163_v25  ;;  %715 = vmatprep.subr.bf16.mxu1 %v2165_v26 }
  0x20   : > { %523 = vmatpush1.bf16.msra.mxu0 %v2167_v27  ;;  %716 = vmatpush1.bf16.msra.mxu1 %v2168_v28 }
  0x21   : > { %524 = vmatprep.subr.bf16.mxu0 %v2169_v29  ;;  %717 = vmatprep.subr.bf16.mxu1 %v2171_v30 }
  0x24   : > { %525 = vmatpush1.bf16.msra.mxu0 %v2173_v31  ;;  %718 = vmatpush1.bf16.msra.mxu1 %v2174_v32 }
  0x27   : > { %543 = vmatmul.mubr.bf16.vlgmr.msra.gmra.mrb[0].mxu0 %v2175_v33  ;;  %736 = vmatmul.mubr.bf16.vlgmr.msra.gmra.mrb[0].mxu1 %v2175_v33 }
  0x28   : > { %552 = vmatprep.mubr.bf16.mxu0 %v2199_v2  ;;  %745 = vmatprep.mubr.bf16.mxu1 %v2199_v2 }
  0x2f   : > { %553 = vmatmul.mubr.bf16.gmra.mrb[4].mxu0 %v2176_v34  ;;  %746 = vmatmul.mubr.bf16.gmra.mrb[4].mxu1 %v2176_v34 }
  0x30   : > { %562 = vmatprep.mubr.bf16.mxu0 %v2199_v2  ;;  %755 = vmatprep.mubr.bf16.mxu1 %v2199_v2 }
  0x37   : > { %563 = vmatmul.mubr.bf16.gmra.mrb[8].mxu0 %v2177_v35  ;;  %756 = vmatmul.mubr.bf16.gmra.mrb[8].mxu1 %v2177_v35 }
  0x38   : > { %572 = vmatprep.mubr.bf16.mxu0 %v2199_v2  ;;  %765 = vmatprep.mubr.bf16.mxu1 %v2199_v2 }
  0x3f   : > { %573 = vmatmul.mubr.bf16.gmra.mrb[12].mxu0 %v2178_v36  ;;  %766 = vmatmul.mubr.bf16.gmra.mrb[12].mxu1 %v2178_v36 }
  0x40   : > { %582 = vmatprep.mubr.bf16.mxu0 %v2199_v2  ;;  %775 = vmatprep.mubr.bf16.mxu1 %v2199_v2 }
  0x47   : > { %583 = vmatmul.mubr.bf16.gmra.mrb[16].mxu0 %v2179_v37  ;;  %776 = vmatmul.mubr.bf16.gmra.mrb[16].mxu1 %v2179_v37 }
  0x48   : > { %592 = vmatprep.mubr.bf16.mxu0 %v2199_v2  ;;  %785 = vmatprep.mubr.bf16.mxu1 %v2199_v2 }
  0x4f   : > { %593 = vmatmul.mubr.bf16.gmra.mrb[20].mxu0 %v2180_v38  ;;  %786 = vmatmul.mubr.bf16.gmra.mrb[20].mxu1 %v2180_v38 }
  0x50   : > { %602 = vmatprep.mubr.bf16.mxu0 %v2199_v2  ;;  %795 = vmatprep.mubr.bf16.mxu1 %v2199_v2 }
  0x57   : > { %603 = vmatmul.mubr.bf16.gmra.mrb[24].mxu0 %v2181_v39  ;;  %796 = vmatmul.mubr.bf16.gmra.mrb[24].mxu1 %v2181_v39 }
  0x58   : > { %612 = vmatprep.mubr.bf16.mxu0 %v2199_v2  ;;  %805 = vmatprep.mubr.bf16.mxu1 %v2199_v2 }
  0x5f   : > { %613 = vmatmul.mubr.bf16.gmra.mrb[28].mxu0 %v2182_v40  ;;  %806 = vmatmul.mubr.bf16.gmra.mrb[28].mxu1 %v2182_v40 }
  0x60   : > { %622 = vmatprep.mubr.bf16.mxu0 %v2199_v2  ;;  %815 = vmatprep.mubr.bf16.mxu1 %v2199_v2 }
  0x67   : > { %623 = vmatmul.mubr.bf16.gmra.mrb[32].mxu0 %v2183_v41  ;;  %816 = vmatmul.mubr.bf16.gmra.mrb[32].mxu1 %v2183_v41 }
  0x68   : > { %632 = vmatprep.mubr.bf16.mxu0 %v2199_v2  ;;  %825 = vmatprep.mubr.bf16.mxu1 %v2199_v2 }
  0x6f   : > { %633 = vmatmul.mubr.bf16.gmra.mrb[36].mxu0 %v2184_v42  ;;  %826 = vmatmul.mubr.bf16.gmra.mrb[36].mxu1 %v2184_v42 }
  0x70   : > { %642 = vmatprep.mubr.bf16.mxu0 %v2199_v2  ;;  %835 = vmatprep.mubr.bf16.mxu1 %v2199_v2 }
  0x77   : > { %643 = vmatmul.mubr.bf16.gmra.mrb[40].mxu0 %v2185_v43  ;;  %836 = vmatmul.mubr.bf16.gmra.mrb[40].mxu1 %v2185_v43 }
  0x78   : > { %652 = vmatprep.mubr.bf16.mxu0 %v2199_v2  ;;  %845 = vmatprep.mubr.bf16.mxu1 %v2199_v2 }
  0x7f   : > { %653 = vmatmul.mubr.bf16.gmra.mrb[44].mxu0 %v2186_v44  ;;  %846 = vmatmul.mubr.bf16.gmra.mrb[44].mxu1 %v2186_v44 }
  0x80   : > { %662 = vmatprep.mubr.bf16.mxu0 %v2199_v2  ;;  %855 = vmatprep.mubr.bf16.mxu1 %v2199_v2 }
  0x87   : > { %663 = vmatmul.mubr.bf16.gmra.mrb[48].mxu0 %v2187_v45  ;;  %856 = vmatmul.mubr.bf16.gmra.mrb[48].mxu1 %v2187_v45 }
  0x88   : > { %672 = vmatprep.mubr.bf16.mxu0 %v2199_v2  ;;  %865 = vmatprep.mubr.bf16.mxu1 %v2199_v2 }
  0x8f   : > { %673 = vmatmul.mubr.bf16.gmra.mrb[52].mxu0 %v2188_v46  ;;  %866 = vmatmul.mubr.bf16.gmra.mrb[52].mxu1 %v2188_v46 }
  0x90   : > { %682 = vmatprep.mubr.bf16.mxu0 %v2199_v2  ;;  %875 = vmatprep.mubr.bf16.mxu1 %v2199_v2 }
  0x97   : > { %683 = vmatmul.mubr.bf16.gmra.mrb[56].mxu0 %v2189_v47  ;;  %876 = vmatmul.mubr.bf16.gmra.mrb[56].mxu1 %v2189_v47 }
  0x98   : > { %692 = vmatprep.mubr.bf16.mxu0 %v2199_v2  ;;  %885 = vmatprep.mubr.bf16.mxu1 %v2199_v2 }
  0x9f   : > { %693 = vmatmul.mubr.bf16.gmra.mrb[60].mxu0 %v2190_v48  ;;  %886 = vmatmul.mubr.bf16.gmra.mrb[60].mxu1 %v2190_v48 }
  0xfa   : > { %v544_v49 = vpop.f32.mrb[0].mxu0  ;;  %v737_v50 = vpop.f32.mrb[0].mxu1 }
  0xfb   : > { %v1526_v51 = vmul.f32 %v544_v49, %v544_v49  ;;  %v1528_v52 = vmul.f32 %v737_v50, %v737_v50  ;;  %v546_v53 = vpop.f32.mrb[1].mxu0  ;;  %v739_v54 = vpop.f32.mrb[1].mxu1 }
  0xfc   : > { %v2053_v55 = vpack.c.bf16 %v546_v53, %v544_v49  ;;  %v1527_v56 = vmul.f32 %v546_v53, %v546_v53  ;;  %v2054_v57 = vpack.c.bf16 %v739_v54, %v737_v50  ;;  %v1529_v58 = vmul.f32 %v739_v54, %v739_v54  ;;  %v548_v59 = vpop.f32.mrb[2].mxu0  ;;  %v741_v60 = vpop.f32.mrb[2].mxu1 }
  0xfd   : > { %v1344_v61 = vadd.f32 %v548_v59, %v544_v49  ;;  %v1530_v62 = vmul.f32 %v548_v59, %v548_v59  ;;  %v1418_v63 = vadd.f32 %v741_v60, %v737_v50  ;;  %v1532_v0 = vmul.f32 %v741_v60, %v741_v60  ;;  %v550_v1 = vpop.f32.mrb[3].mxu0  ;;  %v743_v2 = vpop.f32.mrb[3].mxu1 }
  0xfe   : > { %1280 = vst [vmem:[%s2388_s11] sm:$0xff] %v2053_v55  ;;  %1281 = vst [vmem:[%s2388_s11 + $0x8] sm:$0xff] %v2054_v57  ;;  %v2055_v3 = vpack.c.bf16 %v550_v1, %v548_v59  ;;  %v1381_v4 = vadd.f32 %v550_v1, %v546_v53  ;;  %v1531_v5 = vmul.f32 %v550_v1, %v550_v1 }
  0xff   : > { %v2056_v6 = vpack.c.bf16 %v743_v2, %v741_v60  ;;  %v1654_v7 = vadd.f32 %v1530_v62, %v1526_v51  ;;  %v1728_v8 = vadd.f32 %v1532_v0, %v1528_v52  ;;  %v1455_v9 = vadd.f32 %v743_v2, %v739_v54 }
 0x100   : > { %v1533_v10 = vmul.f32 %v743_v2, %v743_v2  ;;  %1282 = vst [vmem:[%s2388_s11 + $0x10] sm:$0xff] %v2055_v3  ;;  %v1691_v11 = vadd.f32 %v1531_v5, %v1527_v56 }
 0x101   : > { %1283 = vst [vmem:[%s2388_s11 + $0x18] sm:$0xff] %v2056_v6 }
 0x102   : > { %v1765_v12 = vadd.f32 %v1533_v10, %v1529_v58  ;;  %v554_v13 = vpop.f32.mrb[4].mxu0  ;;  %v747_v14 = vpop.f32.mrb[4].mxu1 }
 0x103   : > { %v1345_v15 = vadd.f32 %v1344_v61, %v554_v13  ;;  %v1534_v16 = vmul.f32 %v554_v13, %v554_v13  ;;  %v1419_v17 = vadd.f32 %v1418_v63, %v747_v14  ;;  %v1536_v18 = vmul.f32 %v747_v14, %v747_v14  ;;  %v556_v19 = vpop.f32.mrb[5].mxu0  ;;  %v749_v20 = vpop.f32.mrb[5].mxu1 }
 0x104   : > { %v2057_v21 = vpack.c.bf16 %v556_v19, %v554_v13  ;;  %v1382_v22 = vadd.f32 %v1381_v4, %v556_v19  ;;  %v1535_v23 = vmul.f32 %v556_v19, %v556_v19  ;;  %v2058_v24 = vpack.c.bf16 %v749_v20, %v747_v14  ;;  %v558_v25 = vpop.f32.mrb[6].mxu0  ;;  %v751_v26 = vpop.f32.mrb[6].mxu1 }
 0x105   : > { %v1655_v27 = vadd.f32 %v1654_v7, %v1534_v16  ;;  %v1729_v28 = vadd.f32 %v1728_v8, %v1536_v18  ;;  %v1456_v29 = vadd.f32 %v1455_v9, %v749_v20  ;;  %v1537_v30 = vmul.f32 %v749_v20, %v749_v20  ;;  %v560_v31 = vpop.f32.mrb[7].mxu0  ;;  %v753_v32 = vpop.f32.mrb[7].mxu1 }
 0x106   : > { %1284 = vst [vmem:[%s2388_s11 + $0x20] sm:$0xff] %v2057_v21  ;;  %v1692_v33 = vadd.f32 %v1691_v11, %v1535_v23  ;;  %1285 = vst [vmem:[%s2388_s11 + $0x28] sm:$0xff] %v2058_v24  ;;  %v1346_v34 = vadd.f32 %v1345_v15, %v558_v25  ;;  %v1538_v35 = vmul.f32 %v558_v25, %v558_v25 }
 0x107   : > { %v1420_v36 = vadd.f32 %v1419_v17, %v751_v26  ;;  %v1766_v37 = vadd.f32 %v1765_v12, %v1537_v30  ;;  %v1540_v38 = vmul.f32 %v751_v26, %v751_v26  ;;  %v2059_v39 = vpack.c.bf16 %v560_v31, %v558_v25 }
 0x108   : > { %v1383_v40 = vadd.f32 %v1382_v22, %v560_v31  ;;  %v1656_v41 = vadd.f32 %v1655_v27, %v1538_v35  ;;  %v1539_v42 = vmul.f32 %v560_v31, %v560_v31  ;;  %v2060_v43 = vpack.c.bf16 %v753_v32, %v751_v26 }
 0x109   : > { %v1457_v44 = vadd.f32 %v1456_v29, %v753_v32  ;;  %v1730_v45 = vadd.f32 %v1729_v28, %v1540_v38  ;;  %1286 = vst [vmem:[%s2388_s11 + $0x30] sm:$0xff] %v2059_v39  ;;  %v1541_v46 = vmul.f32 %v753_v32, %v753_v32 }
 0x10a   : > { %v1693_v47 = vadd.f32 %v1692_v33, %v1539_v42  ;;  %1287 = vst [vmem:[%s2388_s11 + $0x38] sm:$0xff] %v2060_v43  ;;  %v564_v48 = vpop.f32.mrb[8].mxu0  ;;  %v757_v49 = vpop.f32.mrb[8].mxu1 }
 0x10b   : > { %v1767_v50 = vadd.f32 %v1766_v37, %v1541_v46  ;;  %v1347_v51 = vadd.f32 %v1346_v34, %v564_v48  ;;  %v1542_v52 = vmul.f32 %v564_v48, %v564_v48  ;;  %v1421_v53 = vadd.f32 %v1420_v36, %v757_v49  ;;  %v566_v54 = vpop.f32.mrb[9].mxu0  ;;  %v759_v55 = vpop.f32.mrb[9].mxu1 }
 0x10c   : > { %v1544_v56 = vmul.f32 %v757_v49, %v757_v49  ;;  %v2061_v57 = vpack.c.bf16 %v566_v54, %v564_v48  ;;  %v1384_v58 = vadd.f32 %v1383_v40, %v566_v54  ;;  %v1543_v59 = vmul.f32 %v566_v54, %v566_v54  ;;  %v568_v60 = vpop.f32.mrb[10].mxu0  ;;  %v761_v61 = vpop.f32.mrb[10].mxu1 }
 0x10d   : > { %v1657_v62 = vadd.f32 %v1656_v41, %v1542_v52  ;;  %v2062_v63 = vpack.c.bf16 %v759_v55, %v757_v49  ;;  %v1458_v0 = vadd.f32 %v1457_v44, %v759_v55  ;;  %v1545_v1 = vmul.f32 %v759_v55, %v759_v55  ;;  %v570_v2 = vpop.f32.mrb[11].mxu0  ;;  %v763_v3 = vpop.f32.mrb[11].mxu1 }
 0x10e   : > { %v1731_v4 = vadd.f32 %v1730_v45, %v1544_v56  ;;  %1288 = vst [vmem:[%s2388_s11 + $0x40] sm:$0xff] %v2061_v57  ;;  %v1694_v5 = vadd.f32 %v1693_v47, %v1543_v59  ;;  %v1348_v6 = vadd.f32 %v1347_v51, %v568_v60  ;;  %v1546_v7 = vmul.f32 %v568_v60, %v568_v60 }
 0x10f   : > { %1289 = vst [vmem:[%s2388_s11 + $0x48] sm:$0xff] %v2062_v63  ;;  %v1768_v8 = vadd.f32 %v1767_v50, %v1545_v1  ;;  %v1422_v9 = vadd.f32 %v1421_v53, %v761_v61  ;;  %v1548_v10 = vmul.f32 %v761_v61, %v761_v61  ;;  %v2063_v11 = vpack.c.bf16 %v570_v2, %v568_v60 }
 0x110   : > { %v1658_v12 = vadd.f32 %v1657_v62, %v1546_v7  ;;  %v1385_v13 = vadd.f32 %v1384_v58, %v570_v2  ;;  %v1547_v14 = vmul.f32 %v570_v2, %v570_v2  ;;  %v2064_v15 = vpack.c.bf16 %v763_v3, %v761_v61 }
 0x111   : > { %v1732_v16 = vadd.f32 %v1731_v4, %v1548_v10  ;;  %1290 = vst [vmem:[%s2388_s11 + $0x50] sm:$0xff] %v2063_v11  ;;  %v1459_v17 = vadd.f32 %v1458_v0, %v763_v3  ;;  %v1549_v18 = vmul.f32 %v763_v3, %v763_v3 }
 0x112   : > { %v1695_v19 = vadd.f32 %v1694_v5, %v1547_v14  ;;  %1291 = vst [vmem:[%s2388_s11 + $0x58] sm:$0xff] %v2064_v15  ;;  %v574_v20 = vpop.f32.mrb[12].mxu0  ;;  %v767_v21 = vpop.f32.mrb[12].mxu1 }
 0x113   : > { %v1769_v22 = vadd.f32 %v1768_v8, %v1549_v18  ;;  %v1349_v23 = vadd.f32 %v1348_v6, %v574_v20  ;;  %v1550_v24 = vmul.f32 %v574_v20, %v574_v20  ;;  %v1423_v25 = vadd.f32 %v1422_v9, %v767_v21  ;;  %v576_v26 = vpop.f32.mrb[13].mxu0  ;;  %v769_v27 = vpop.f32.mrb[13].mxu1 }
 0x114   : > { %v1552_v28 = vmul.f32 %v767_v21, %v767_v21  ;;  %v2065_v29 = vpack.c.bf16 %v576_v26, %v574_v20  ;;  %v1386_v30 = vadd.f32 %v1385_v13, %v576_v26  ;;  %v1551_v31 = vmul.f32 %v576_v26, %v576_v26  ;;  %v578_v32 = vpop.f32.mrb[14].mxu0  ;;  %v771_v33 = vpop.f32.mrb[14].mxu1 }
 0x115   : > { %v1659_v34 = vadd.f32 %v1658_v12, %v1550_v24  ;;  %v2066_v35 = vpack.c.bf16 %v769_v27, %v767_v21  ;;  %v1460_v36 = vadd.f32 %v1459_v17, %v769_v27  ;;  %v1553_v37 = vmul.f32 %v769_v27, %v769_v27  ;;  %v580_v38 = vpop.f32.mrb[15].mxu0  ;;  %v773_v39 = vpop.f32.mrb[15].mxu1 }
 0x116   : > { %v1733_v40 = vadd.f32 %v1732_v16, %v1552_v28  ;;  %1292 = vst [vmem:[%s2388_s11 + $0x60] sm:$0xff] %v2065_v29  ;;  %v1696_v41 = vadd.f32 %v1695_v19, %v1551_v31  ;;  %v1350_v42 = vadd.f32 %v1349_v23, %v578_v32  ;;  %v1554_v43 = vmul.f32 %v578_v32, %v578_v32 }
 0x117   : > { %1293 = vst [vmem:[%s2388_s11 + $0x68] sm:$0xff] %v2066_v35  ;;  %v1770_v44 = vadd.f32 %v1769_v22, %v1553_v37  ;;  %v1424_v45 = vadd.f32 %v1423_v25, %v771_v33  ;;  %v1556_v46 = vmul.f32 %v771_v33, %v771_v33  ;;  %v2067_v47 = vpack.c.bf16 %v580_v38, %v578_v32 }
 0x118   : > { %v1660_v48 = vadd.f32 %v1659_v34, %v1554_v43  ;;  %v1387_v49 = vadd.f32 %v1386_v30, %v580_v38  ;;  %v1555_v50 = vmul.f32 %v580_v38, %v580_v38  ;;  %v2068_v51 = vpack.c.bf16 %v773_v39, %v771_v33 }
 0x119   : > { %v1734_v52 = vadd.f32 %v1733_v40, %v1556_v46  ;;  %1294 = vst [vmem:[%s2388_s11 + $0x70] sm:$0xff] %v2067_v47  ;;  %v1461_v53 = vadd.f32 %v1460_v36, %v773_v39  ;;  %v1557_v54 = vmul.f32 %v773_v39, %v773_v39 }
 0x11a   : > { %v1697_v55 = vadd.f32 %v1696_v41, %v1555_v50  ;;  %1295 = vst [vmem:[%s2388_s11 + $0x78] sm:$0xff] %v2068_v51  ;;  %v584_v56 = vpop.f32.mrb[16].mxu0  ;;  %v777_v57 = vpop.f32.mrb[16].mxu1 }
 0x11b   : > { %v1771_v58 = vadd.f32 %v1770_v44, %v1557_v54  ;;  %v1351_v59 = vadd.f32 %v1350_v42, %v584_v56  ;;  %v1558_v60 = vmul.f32 %v584_v56, %v584_v56  ;;  %v1425_v61 = vadd.f32 %v1424_v45, %v777_v57  ;;  %v586_v62 = vpop.f32.mrb[17].mxu0  ;;  %v779_v63 = vpop.f32.mrb[17].mxu1 }
 0x11c   : > { %v1560_v0 = vmul.f32 %v777_v57, %v777_v57  ;;  %v2069_v1 = vpack.c.bf16 %v586_v62, %v584_v56  ;;  %v1388_v2 = vadd.f32 %v1387_v49, %v586_v62  ;;  %v1559_v3 = vmul.f32 %v586_v62, %v586_v62  ;;  %v588_v4 = vpop.f32.mrb[18].mxu0  ;;  %v781_v5 = vpop.f32.mrb[18].mxu1 }
 0x11d   : > { %v1661_v6 = vadd.f32 %v1660_v48, %v1558_v60  ;;  %v2070_v7 = vpack.c.bf16 %v779_v63, %v777_v57  ;;  %v1462_v8 = vadd.f32 %v1461_v53, %v779_v63  ;;  %v1561_v9 = vmul.f32 %v779_v63, %v779_v63  ;;  %v590_v10 = vpop.f32.mrb[19].mxu0  ;;  %v783_v11 = vpop.f32.mrb[19].mxu1 }
 0x11e   : > { %v1735_v12 = vadd.f32 %v1734_v52, %v1560_v0  ;;  %1296 = vst [vmem:[%s2388_s11 + $0x80] sm:$0xff] %v2069_v1  ;;  %v1698_v13 = vadd.f32 %v1697_v55, %v1559_v3  ;;  %v1352_v14 = vadd.f32 %v1351_v59, %v588_v4  ;;  %v1562_v15 = vmul.f32 %v588_v4, %v588_v4 }
 0x11f   : > { %1297 = vst [vmem:[%s2388_s11 + $0x88] sm:$0xff] %v2070_v7  ;;  %v1772_v16 = vadd.f32 %v1771_v58, %v1561_v9  ;;  %v1426_v17 = vadd.f32 %v1425_v61, %v781_v5  ;;  %v1564_v18 = vmul.f32 %v781_v5, %v781_v5  ;;  %v2071_v19 = vpack.c.bf16 %v590_v10, %v588_v4 }
 0x120   : > { %v1662_v20 = vadd.f32 %v1661_v6, %v1562_v15  ;;  %v1389_v21 = vadd.f32 %v1388_v2, %v590_v10  ;;  %v1563_v22 = vmul.f32 %v590_v10, %v590_v10  ;;  %v2072_v23 = vpack.c.bf16 %v783_v11, %v781_v5 }
 0x121   : > { %v1736_v24 = vadd.f32 %v1735_v12, %v1564_v18  ;;  %1298 = vst [vmem:[%s2388_s11 + $0x90] sm:$0xff] %v2071_v19  ;;  %v1463_v25 = vadd.f32 %v1462_v8, %v783_v11  ;;  %v1565_v26 = vmul.f32 %v783_v11, %v783_v11 }
 0x122   : > { %v1699_v27 = vadd.f32 %v1698_v13, %v1563_v22  ;;  %1299 = vst [vmem:[%s2388_s11 + $0x98] sm:$0xff] %v2072_v23  ;;  %v594_v28 = vpop.f32.mrb[20].mxu0  ;;  %v787_v29 = vpop.f32.mrb[20].mxu1 }
 0x123   : > { %v1773_v30 = vadd.f32 %v1772_v16, %v1565_v26  ;;  %v1353_v31 = vadd.f32 %v1352_v14, %v594_v28  ;;  %v1566_v32 = vmul.f32 %v594_v28, %v594_v28  ;;  %v1427_v33 = vadd.f32 %v1426_v17, %v787_v29  ;;  %v596_v34 = vpop.f32.mrb[21].mxu0  ;;  %v789_v35 = vpop.f32.mrb[21].mxu1 }
 0x124   : > { %v1568_v36 = vmul.f32 %v787_v29, %v787_v29  ;;  %v2073_v37 = vpack.c.bf16 %v596_v34, %v594_v28  ;;  %v1390_v38 = vadd.f32 %v1389_v21, %v596_v34  ;;  %v1567_v39 = vmul.f32 %v596_v34, %v596_v34  ;;  %v598_v40 = vpop.f32.mrb[22].mxu0  ;;  %v791_v41 = vpop.f32.mrb[22].mxu1 }
 0x125   : > { %v1663_v42 = vadd.f32 %v1662_v20, %v1566_v32  ;;  %v2074_v43 = vpack.c.bf16 %v789_v35, %v787_v29  ;;  %v1464_v44 = vadd.f32 %v1463_v25, %v789_v35  ;;  %v1569_v45 = vmul.f32 %v789_v35, %v789_v35  ;;  %v600_v46 = vpop.f32.mrb[23].mxu0  ;;  %v793_v47 = vpop.f32.mrb[23].mxu1 }
 0x126   : > { %v1737_v48 = vadd.f32 %v1736_v24, %v1568_v36  ;;  %1300 = vst [vmem:[%s2388_s11 + $0xa0] sm:$0xff] %v2073_v37  ;;  %v1700_v49 = vadd.f32 %v1699_v27, %v1567_v39  ;;  %v1354_v50 = vadd.f32 %v1353_v31, %v598_v40  ;;  %v1570_v51 = vmul.f32 %v598_v40, %v598_v40 }
 0x127   : > { %1301 = vst [vmem:[%s2388_s11 + $0xa8] sm:$0xff] %v2074_v43  ;;  %v1774_v52 = vadd.f32 %v1773_v30, %v1569_v45  ;;  %v1428_v53 = vadd.f32 %v1427_v33, %v791_v41  ;;  %v1572_v54 = vmul.f32 %v791_v41, %v791_v41  ;;  %v2075_v55 = vpack.c.bf16 %v600_v46, %v598_v40 }
 0x128   : > { %v1664_v56 = vadd.f32 %v1663_v42, %v1570_v51  ;;  %v1391_v57 = vadd.f32 %v1390_v38, %v600_v46  ;;  %v1571_v58 = vmul.f32 %v600_v46, %v600_v46  ;;  %v2076_v59 = vpack.c.bf16 %v793_v47, %v791_v41 }
 0x129   : > { %v1738_v60 = vadd.f32 %v1737_v48, %v1572_v54  ;;  %1302 = vst [vmem:[%s2388_s11 + $0xb0] sm:$0xff] %v2075_v55  ;;  %v1465_v61 = vadd.f32 %v1464_v44, %v793_v47  ;;  %v1573_v62 = vmul.f32 %v793_v47, %v793_v47 }
 0x12a   : > { %v1701_v63 = vadd.f32 %v1700_v49, %v1571_v58  ;;  %1303 = vst [vmem:[%s2388_s11 + $0xb8] sm:$0xff] %v2076_v59  ;;  %v604_v0 = vpop.f32.mrb[24].mxu0  ;;  %v797_v1 = vpop.f32.mrb[24].mxu1 }
 0x12b   : > { %v1775_v2 = vadd.f32 %v1774_v52, %v1573_v62  ;;  %v1355_v3 = vadd.f32 %v1354_v50, %v604_v0  ;;  %v1574_v4 = vmul.f32 %v604_v0, %v604_v0  ;;  %v1429_v5 = vadd.f32 %v1428_v53, %v797_v1  ;;  %v606_v6 = vpop.f32.mrb[25].mxu0  ;;  %v799_v7 = vpop.f32.mrb[25].mxu1 }
 0x12c   : > { %v1576_v8 = vmul.f32 %v797_v1, %v797_v1  ;;  %v2077_v9 = vpack.c.bf16 %v606_v6, %v604_v0  ;;  %v1392_v10 = vadd.f32 %v1391_v57, %v606_v6  ;;  %v1575_v11 = vmul.f32 %v606_v6, %v606_v6  ;;  %v608_v12 = vpop.f32.mrb[26].mxu0  ;;  %v801_v13 = vpop.f32.mrb[26].mxu1 }
 0x12d   : > { %v1665_v14 = vadd.f32 %v1664_v56, %v1574_v4  ;;  %v2078_v15 = vpack.c.bf16 %v799_v7, %v797_v1  ;;  %v1466_v16 = vadd.f32 %v1465_v61, %v799_v7  ;;  %v1577_v17 = vmul.f32 %v799_v7, %v799_v7  ;;  %v610_v18 = vpop.f32.mrb[27].mxu0  ;;  %v803_v19 = vpop.f32.mrb[27].mxu1 }
 0x12e   : > { %v1739_v20 = vadd.f32 %v1738_v60, %v1576_v8  ;;  %1304 = vst [vmem:[%s2388_s11 + $0xc0] sm:$0xff] %v2077_v9  ;;  %v1702_v21 = vadd.f32 %v1701_v63, %v1575_v11  ;;  %v1356_v22 = vadd.f32 %v1355_v3, %v608_v12  ;;  %v1578_v23 = vmul.f32 %v608_v12, %v608_v12 }
 0x12f   : > { %1305 = vst [vmem:[%s2388_s11 + $0xc8] sm:$0xff] %v2078_v15  ;;  %v1776_v24 = vadd.f32 %v1775_v2, %v1577_v17  ;;  %v1430_v25 = vadd.f32 %v1429_v5, %v801_v13  ;;  %v1580_v26 = vmul.f32 %v801_v13, %v801_v13  ;;  %v2079_v27 = vpack.c.bf16 %v610_v18, %v608_v12 }
 0x130   : > { %v1666_v28 = vadd.f32 %v1665_v14, %v1578_v23  ;;  %v1393_v29 = vadd.f32 %v1392_v10, %v610_v18  ;;  %v1579_v30 = vmul.f32 %v610_v18, %v610_v18  ;;  %v2080_v31 = vpack.c.bf16 %v803_v19, %v801_v13 }
 0x131   : > { %v1740_v32 = vadd.f32 %v1739_v20, %v1580_v26  ;;  %1306 = vst [vmem:[%s2388_s11 + $0xd0] sm:$0xff] %v2079_v27  ;;  %v1467_v33 = vadd.f32 %v1466_v16, %v803_v19  ;;  %v1581_v34 = vmul.f32 %v803_v19, %v803_v19 }
 0x132   : > { %v1703_v35 = vadd.f32 %v1702_v21, %v1579_v30  ;;  %1307 = vst [vmem:[%s2388_s11 + $0xd8] sm:$0xff] %v2080_v31  ;;  %v614_v36 = vpop.f32.mrb[28].mxu0  ;;  %v807_v37 = vpop.f32.mrb[28].mxu1 }
 0x133   : > { %v1777_v38 = vadd.f32 %v1776_v24, %v1581_v34  ;;  %v1357_v39 = vadd.f32 %v1356_v22, %v614_v36  ;;  %v1582_v40 = vmul.f32 %v614_v36, %v614_v36  ;;  %v1431_v41 = vadd.f32 %v1430_v25, %v807_v37  ;;  %v616_v42 = vpop.f32.mrb[29].mxu0  ;;  %v809_v43 = vpop.f32.mrb[29].mxu1 }
 0x134   : > { %v1584_v44 = vmul.f32 %v807_v37, %v807_v37  ;;  %v2081_v45 = vpack.c.bf16 %v616_v42, %v614_v36  ;;  %v1394_v46 = vadd.f32 %v1393_v29, %v616_v42  ;;  %v1583_v47 = vmul.f32 %v616_v42, %v616_v42  ;;  %v618_v48 = vpop.f32.mrb[30].mxu0  ;;  %v811_v49 = vpop.f32.mrb[30].mxu1 }
 0x135   : > { %v1667_v50 = vadd.f32 %v1666_v28, %v1582_v40  ;;  %v2082_v51 = vpack.c.bf16 %v809_v43, %v807_v37  ;;  %v1468_v52 = vadd.f32 %v1467_v33, %v809_v43  ;;  %v1585_v53 = vmul.f32 %v809_v43, %v809_v43  ;;  %v620_v54 = vpop.f32.mrb[31].mxu0  ;;  %v813_v55 = vpop.f32.mrb[31].mxu1 }
 0x136   : > { %v1741_v56 = vadd.f32 %v1740_v32, %v1584_v44  ;;  %1308 = vst [vmem:[%s2388_s11 + $0xe0] sm:$0xff] %v2081_v45  ;;  %v1704_v57 = vadd.f32 %v1703_v35, %v1583_v47  ;;  %v1358_v58 = vadd.f32 %v1357_v39, %v618_v48  ;;  %v1586_v59 = vmul.f32 %v618_v48, %v618_v48 }
 0x137   : > { %1309 = vst [vmem:[%s2388_s11 + $0xe8] sm:$0xff] %v2082_v51  ;;  %v1778_v60 = vadd.f32 %v1777_v38, %v1585_v53  ;;  %v1432_v61 = vadd.f32 %v1431_v41, %v811_v49  ;;  %v1588_v62 = vmul.f32 %v811_v49, %v811_v49  ;;  %v2083_v63 = vpack.c.bf16 %v620_v54, %v618_v48 }
 0x138   : > { %v1668_v0 = vadd.f32 %v1667_v50, %v1586_v59  ;;  %v1395_v1 = vadd.f32 %v1394_v46, %v620_v54  ;;  %v1587_v2 = vmul.f32 %v620_v54, %v620_v54  ;;  %v2084_v3 = vpack.c.bf16 %v813_v55, %v811_v49 }
 0x139   : > { %v1742_v4 = vadd.f32 %v1741_v56, %v1588_v62  ;;  %1310 = vst [vmem:[%s2388_s11 + $0xf0] sm:$0xff] %v2083_v63  ;;  %v1469_v5 = vadd.f32 %v1468_v52, %v813_v55  ;;  %v1589_v6 = vmul.f32 %v813_v55, %v813_v55 }
 0x13a   : > { %v1705_v7 = vadd.f32 %v1704_v57, %v1587_v2  ;;  %1311 = vst [vmem:[%s2388_s11 + $0xf8] sm:$0xff] %v2084_v3  ;;  %v624_v8 = vpop.f32.mrb[32].mxu0  ;;  %v817_v9 = vpop.f32.mrb[32].mxu1 }
 0x13b   : > { %v1779_v10 = vadd.f32 %v1778_v60, %v1589_v6  ;;  %v1359_v11 = vadd.f32 %v1358_v58, %v624_v8  ;;  %v1590_v12 = vmul.f32 %v624_v8, %v624_v8  ;;  %v1433_v13 = vadd.f32 %v1432_v61, %v817_v9  ;;  %v626_v14 = vpop.f32.mrb[33].mxu0  ;;  %v819_v15 = vpop.f32.mrb[33].mxu1 }
 0x13c   : > { %v1592_v16 = vmul.f32 %v817_v9, %v817_v9  ;;  %v2085_v17 = vpack.c.bf16 %v626_v14, %v624_v8  ;;  %v1396_v18 = vadd.f32 %v1395_v1, %v626_v14  ;;  %v1591_v19 = vmul.f32 %v626_v14, %v626_v14  ;;  %v628_v20 = vpop.f32.mrb[34].mxu0  ;;  %v821_v21 = vpop.f32.mrb[34].mxu1 }
 0x13d   : > { %v1669_v22 = vadd.f32 %v1668_v0, %v1590_v12  ;;  %v2086_v23 = vpack.c.bf16 %v819_v15, %v817_v9  ;;  %v1470_v24 = vadd.f32 %v1469_v5, %v819_v15  ;;  %v1593_v25 = vmul.f32 %v819_v15, %v819_v15  ;;  %v630_v26 = vpop.f32.mrb[35].mxu0  ;;  %v823_v27 = vpop.f32.mrb[35].mxu1 }
 0x13e   : > { %v1743_v28 = vadd.f32 %v1742_v4, %v1592_v16  ;;  %1312 = vst [vmem:[%s2388_s11 + $0x100] sm:$0xff] %v2085_v17  ;;  %v1706_v29 = vadd.f32 %v1705_v7, %v1591_v19  ;;  %v1360_v30 = vadd.f32 %v1359_v11, %v628_v20  ;;  %v1594_v31 = vmul.f32 %v628_v20, %v628_v20 }
 0x13f   : > { %1313 = vst [vmem:[%s2388_s11 + $0x108] sm:$0xff] %v2086_v23  ;;  %v1780_v32 = vadd.f32 %v1779_v10, %v1593_v25  ;;  %v1434_v33 = vadd.f32 %v1433_v13, %v821_v21  ;;  %v1596_v34 = vmul.f32 %v821_v21, %v821_v21  ;;  %v2087_v35 = vpack.c.bf16 %v630_v26, %v628_v20 }
 0x140   : > { %v1670_v36 = vadd.f32 %v1669_v22, %v1594_v31  ;;  %v1397_v37 = vadd.f32 %v1396_v18, %v630_v26  ;;  %v1595_v38 = vmul.f32 %v630_v26, %v630_v26  ;;  %v2088_v39 = vpack.c.bf16 %v823_v27, %v821_v21 }
 0x141   : > { %v1744_v40 = vadd.f32 %v1743_v28, %v1596_v34  ;;  %1314 = vst [vmem:[%s2388_s11 + $0x110] sm:$0xff] %v2087_v35  ;;  %v1471_v41 = vadd.f32 %v1470_v24, %v823_v27  ;;  %v1597_v42 = vmul.f32 %v823_v27, %v823_v27 }
 0x142   : > { %v1707_v43 = vadd.f32 %v1706_v29, %v1595_v38  ;;  %1315 = vst [vmem:[%s2388_s11 + $0x118] sm:$0xff] %v2088_v39  ;;  %v634_v44 = vpop.f32.mrb[36].mxu0  ;;  %v827_v45 = vpop.f32.mrb[36].mxu1 }
 0x143   : > { %v1781_v46 = vadd.f32 %v1780_v32, %v1597_v42  ;;  %v1361_v47 = vadd.f32 %v1360_v30, %v634_v44  ;;  %v1598_v48 = vmul.f32 %v634_v44, %v634_v44  ;;  %v1435_v49 = vadd.f32 %v1434_v33, %v827_v45  ;;  %v636_v50 = vpop.f32.mrb[37].mxu0  ;;  %v829_v51 = vpop.f32.mrb[37].mxu1 }
 0x144   : > { %v1600_v52 = vmul.f32 %v827_v45, %v827_v45  ;;  %v2089_v53 = vpack.c.bf16 %v636_v50, %v634_v44  ;;  %v1398_v54 = vadd.f32 %v1397_v37, %v636_v50  ;;  %v1599_v55 = vmul.f32 %v636_v50, %v636_v50  ;;  %v638_v56 = vpop.f32.mrb[38].mxu0  ;;  %v831_v57 = vpop.f32.mrb[38].mxu1 }
 0x145   : > { %v1671_v58 = vadd.f32 %v1670_v36, %v1598_v48  ;;  %v2090_v59 = vpack.c.bf16 %v829_v51, %v827_v45  ;;  %v1472_v60 = vadd.f32 %v1471_v41, %v829_v51  ;;  %v1601_v61 = vmul.f32 %v829_v51, %v829_v51  ;;  %v640_v62 = vpop.f32.mrb[39].mxu0  ;;  %v833_v63 = vpop.f32.mrb[39].mxu1 }
 0x146   : > { %v1745_v0 = vadd.f32 %v1744_v40, %v1600_v52  ;;  %1316 = vst [vmem:[%s2388_s11 + $0x120] sm:$0xff] %v2089_v53  ;;  %v1708_v1 = vadd.f32 %v1707_v43, %v1599_v55  ;;  %v1362_v2 = vadd.f32 %v1361_v47, %v638_v56  ;;  %v1602_v3 = vmul.f32 %v638_v56, %v638_v56 }
 0x147   : > { %1317 = vst [vmem:[%s2388_s11 + $0x128] sm:$0xff] %v2090_v59  ;;  %v1782_v4 = vadd.f32 %v1781_v46, %v1601_v61  ;;  %v1436_v5 = vadd.f32 %v1435_v49, %v831_v57  ;;  %v1604_v6 = vmul.f32 %v831_v57, %v831_v57  ;;  %v2091_v7 = vpack.c.bf16 %v640_v62, %v638_v56 }
 0x148   : > { %v1672_v8 = vadd.f32 %v1671_v58, %v1602_v3  ;;  %v1399_v9 = vadd.f32 %v1398_v54, %v640_v62  ;;  %v1603_v10 = vmul.f32 %v640_v62, %v640_v62  ;;  %v2092_v11 = vpack.c.bf16 %v833_v63, %v831_v57 }
 0x149   : > { %v1746_v12 = vadd.f32 %v1745_v0, %v1604_v6  ;;  %1318 = vst [vmem:[%s2388_s11 + $0x130] sm:$0xff] %v2091_v7  ;;  %v1473_v13 = vadd.f32 %v1472_v60, %v833_v63  ;;  %v1605_v14 = vmul.f32 %v833_v63, %v833_v63 }
 0x14a   : > { %v1709_v15 = vadd.f32 %v1708_v1, %v1603_v10  ;;  %1319 = vst [vmem:[%s2388_s11 + $0x138] sm:$0xff] %v2092_v11  ;;  %v644_v16 = vpop.f32.mrb[40].mxu0  ;;  %v837_v17 = vpop.f32.mrb[40].mxu1 }
 0x14b   : > { %v1783_v18 = vadd.f32 %v1782_v4, %v1605_v14  ;;  %v1363_v19 = vadd.f32 %v1362_v2, %v644_v16  ;;  %v1606_v20 = vmul.f32 %v644_v16, %v644_v16  ;;  %v1437_v21 = vadd.f32 %v1436_v5, %v837_v17  ;;  %v646_v22 = vpop.f32.mrb[41].mxu0  ;;  %v839_v23 = vpop.f32.mrb[41].mxu1 }
 0x14c   : > { %v1608_v24 = vmul.f32 %v837_v17, %v837_v17  ;;  %v2093_v25 = vpack.c.bf16 %v646_v22, %v644_v16  ;;  %v1400_v26 = vadd.f32 %v1399_v9, %v646_v22  ;;  %v1607_v27 = vmul.f32 %v646_v22, %v646_v22  ;;  %v648_v28 = vpop.f32.mrb[42].mxu0  ;;  %v841_v29 = vpop.f32.mrb[42].mxu1 }
 0x14d   : > { %v1673_v30 = vadd.f32 %v1672_v8, %v1606_v20  ;;  %v2094_v31 = vpack.c.bf16 %v839_v23, %v837_v17  ;;  %v1474_v32 = vadd.f32 %v1473_v13, %v839_v23  ;;  %v1609_v33 = vmul.f32 %v839_v23, %v839_v23  ;;  %v650_v34 = vpop.f32.mrb[43].mxu0  ;;  %v843_v35 = vpop.f32.mrb[43].mxu1 }
 0x14e   : > { %v1747_v36 = vadd.f32 %v1746_v12, %v1608_v24  ;;  %1320 = vst [vmem:[%s2388_s11 + $0x140] sm:$0xff] %v2093_v25  ;;  %v1710_v37 = vadd.f32 %v1709_v15, %v1607_v27  ;;  %v1364_v38 = vadd.f32 %v1363_v19, %v648_v28  ;;  %v1610_v39 = vmul.f32 %v648_v28, %v648_v28 }
 0x14f   : > { %1321 = vst [vmem:[%s2388_s11 + $0x148] sm:$0xff] %v2094_v31  ;;  %v1784_v40 = vadd.f32 %v1783_v18, %v1609_v33  ;;  %v1438_v41 = vadd.f32 %v1437_v21, %v841_v29  ;;  %v1612_v42 = vmul.f32 %v841_v29, %v841_v29  ;;  %v2095_v43 = vpack.c.bf16 %v650_v34, %v648_v28 }
 0x150   : > { %v1674_v44 = vadd.f32 %v1673_v30, %v1610_v39  ;;  %v1401_v45 = vadd.f32 %v1400_v26, %v650_v34  ;;  %v1611_v46 = vmul.f32 %v650_v34, %v650_v34  ;;  %v2096_v47 = vpack.c.bf16 %v843_v35, %v841_v29 }
 0x151   : > { %v1748_v48 = vadd.f32 %v1747_v36, %v1612_v42  ;;  %1322 = vst [vmem:[%s2388_s11 + $0x150] sm:$0xff] %v2095_v43  ;;  %v1475_v49 = vadd.f32 %v1474_v32, %v843_v35  ;;  %v1613_v50 = vmul.f32 %v843_v35, %v843_v35 }
 0x152   : > { %v1711_v51 = vadd.f32 %v1710_v37, %v1611_v46  ;;  %1323 = vst [vmem:[%s2388_s11 + $0x158] sm:$0xff] %v2096_v47  ;;  %v654_v52 = vpop.f32.mrb[44].mxu0  ;;  %v847_v53 = vpop.f32.mrb[44].mxu1 }
 0x153   : > { %v1785_v54 = vadd.f32 %v1784_v40, %v1613_v50  ;;  %v1365_v55 = vadd.f32 %v1364_v38, %v654_v52  ;;  %v1614_v56 = vmul.f32 %v654_v52, %v654_v52  ;;  %v1439_v57 = vadd.f32 %v1438_v41, %v847_v53  ;;  %v656_v58 = vpop.f32.mrb[45].mxu0  ;;  %v849_v59 = vpop.f32.mrb[45].mxu1 }
 0x154   : > { %v1616_v60 = vmul.f32 %v847_v53, %v847_v53  ;;  %v2097_v61 = vpack.c.bf16 %v656_v58, %v654_v52  ;;  %v1402_v62 = vadd.f32 %v1401_v45, %v656_v58  ;;  %v1615_v63 = vmul.f32 %v656_v58, %v656_v58  ;;  %v658_v0 = vpop.f32.mrb[46].mxu0  ;;  %v851_v1 = vpop.f32.mrb[46].mxu1 }
 0x155   : > { %v1675_v2 = vadd.f32 %v1674_v44, %v1614_v56  ;;  %v2098_v3 = vpack.c.bf16 %v849_v59, %v847_v53  ;;  %v1476_v4 = vadd.f32 %v1475_v49, %v849_v59  ;;  %v1617_v5 = vmul.f32 %v849_v59, %v849_v59  ;;  %v660_v6 = vpop.f32.mrb[47].mxu0  ;;  %v853_v7 = vpop.f32.mrb[47].mxu1 }
 0x156   : > { %v1749_v8 = vadd.f32 %v1748_v48, %v1616_v60  ;;  %1324 = vst [vmem:[%s2388_s11 + $0x160] sm:$0xff] %v2097_v61  ;;  %v1712_v9 = vadd.f32 %v1711_v51, %v1615_v63  ;;  %v1366_v10 = vadd.f32 %v1365_v55, %v658_v0  ;;  %v1618_v11 = vmul.f32 %v658_v0, %v658_v0 }
 0x157   : > { %1325 = vst [vmem:[%s2388_s11 + $0x168] sm:$0xff] %v2098_v3  ;;  %v1786_v12 = vadd.f32 %v1785_v54, %v1617_v5  ;;  %v1440_v13 = vadd.f32 %v1439_v57, %v851_v1  ;;  %v1620_v14 = vmul.f32 %v851_v1, %v851_v1  ;;  %v2099_v15 = vpack.c.bf16 %v660_v6, %v658_v0 }
 0x158   : > { %v1676_v16 = vadd.f32 %v1675_v2, %v1618_v11  ;;  %v1403_v17 = vadd.f32 %v1402_v62, %v660_v6  ;;  %v1619_v18 = vmul.f32 %v660_v6, %v660_v6  ;;  %v2100_v19 = vpack.c.bf16 %v853_v7, %v851_v1 }
 0x159   : > { %v1750_v20 = vadd.f32 %v1749_v8, %v1620_v14  ;;  %1326 = vst [vmem:[%s2388_s11 + $0x170] sm:$0xff] %v2099_v15  ;;  %v1477_v21 = vadd.f32 %v1476_v4, %v853_v7  ;;  %v1621_v22 = vmul.f32 %v853_v7, %v853_v7 }
 0x15a   : > { %v1713_v23 = vadd.f32 %v1712_v9, %v1619_v18  ;;  %1327 = vst [vmem:[%s2388_s11 + $0x178] sm:$0xff] %v2100_v19  ;;  %v664_v24 = vpop.f32.mrb[48].mxu0  ;;  %v857_v25 = vpop.f32.mrb[48].mxu1 }
 0x15b   : > { %v1787_v26 = vadd.f32 %v1786_v12, %v1621_v22  ;;  %v1367_v27 = vadd.f32 %v1366_v10, %v664_v24  ;;  %v1622_v28 = vmul.f32 %v664_v24, %v664_v24  ;;  %v1441_v29 = vadd.f32 %v1440_v13, %v857_v25  ;;  %v666_v30 = vpop.f32.mrb[49].mxu0  ;;  %v859_v31 = vpop.f32.mrb[49].mxu1 }
 0x15c   : > { %v1624_v32 = vmul.f32 %v857_v25, %v857_v25  ;;  %v2101_v33 = vpack.c.bf16 %v666_v30, %v664_v24  ;;  %v1404_v34 = vadd.f32 %v1403_v17, %v666_v30  ;;  %v1623_v35 = vmul.f32 %v666_v30, %v666_v30  ;;  %v668_v36 = vpop.f32.mrb[50].mxu0  ;;  %v861_v37 = vpop.f32.mrb[50].mxu1 }
 0x15d   : > { %v1677_v38 = vadd.f32 %v1676_v16, %v1622_v28  ;;  %v2102_v39 = vpack.c.bf16 %v859_v31, %v857_v25  ;;  %v1478_v40 = vadd.f32 %v1477_v21, %v859_v31  ;;  %v1625_v41 = vmul.f32 %v859_v31, %v859_v31  ;;  %v670_v42 = vpop.f32.mrb[51].mxu0  ;;  %v863_v43 = vpop.f32.mrb[51].mxu1 }
 0x15e   : > { %v1751_v44 = vadd.f32 %v1750_v20, %v1624_v32  ;;  %1328 = vst [vmem:[%s2388_s11 + $0x180] sm:$0xff] %v2101_v33  ;;  %v1714_v45 = vadd.f32 %v1713_v23, %v1623_v35  ;;  %v1368_v46 = vadd.f32 %v1367_v27, %v668_v36  ;;  %v1626_v47 = vmul.f32 %v668_v36, %v668_v36 }
 0x15f   : > { %1329 = vst [vmem:[%s2388_s11 + $0x188] sm:$0xff] %v2102_v39  ;;  %v1788_v48 = vadd.f32 %v1787_v26, %v1625_v41  ;;  %v1442_v49 = vadd.f32 %v1441_v29, %v861_v37  ;;  %v1628_v50 = vmul.f32 %v861_v37, %v861_v37  ;;  %v2103_v51 = vpack.c.bf16 %v670_v42, %v668_v36 }
 0x160   : > { %v1678_v52 = vadd.f32 %v1677_v38, %v1626_v47  ;;  %v1405_v53 = vadd.f32 %v1404_v34, %v670_v42  ;;  %v1627_v54 = vmul.f32 %v670_v42, %v670_v42  ;;  %v2104_v55 = vpack.c.bf16 %v863_v43, %v861_v37 }
 0x161   : > { %v1752_v56 = vadd.f32 %v1751_v44, %v1628_v50  ;;  %1330 = vst [vmem:[%s2388_s11 + $0x190] sm:$0xff] %v2103_v51  ;;  %v1479_v57 = vadd.f32 %v1478_v40, %v863_v43  ;;  %v1629_v58 = vmul.f32 %v863_v43, %v863_v43  ;;  %v2200_v34 = vmov 1966171168  }
 0x162   : > { %v1715_v59 = vadd.f32 %v1714_v45, %v1627_v54  ;;  %1331 = vst [vmem:[%s2388_s11 + $0x198] sm:$0xff] %v2104_v55  ;;  %v674_v60 = vpop.f32.mrb[52].mxu0  ;;  %v867_v61 = vpop.f32.mrb[52].mxu1  ;;  %v2446_v35 = vunpack.c.l.s4 %v2200_v34  ;;  %v1501_v36 = vlaneseq }
 0x163   : > { %v1789_v62 = vadd.f32 %v1788_v48, %v1629_v58  ;;  %v1369_v63 = vadd.f32 %v1368_v46, %v674_v60  ;;  %v1630_v0 = vmul.f32 %v674_v60, %v674_v60  ;;  %v1443_v1 = vadd.f32 %v1442_v49, %v867_v61  ;;  %v676_v2 = vpop.f32.mrb[53].mxu0  ;;  %v869_v3 = vpop.f32.mrb[53].mxu1 }
 0x164   : > { %v1632_v4 = vmul.f32 %v867_v61, %v867_v61  ;;  %v2105_v5 = vpack.c.bf16 %v676_v2, %v674_v60  ;;  %v1406_v6 = vadd.f32 %v1405_v53, %v676_v2  ;;  %v1631_v7 = vmul.f32 %v676_v2, %v676_v2  ;;  %v678_v8 = vpop.f32.mrb[54].mxu0  ;;  %v871_v9 = vpop.f32.mrb[54].mxu1 }
 0x165   : > { %v1679_v10 = vadd.f32 %v1678_v52, %v1630_v0  ;;  %v2106_v11 = vpack.c.bf16 %v869_v3, %v867_v61  ;;  %v1480_v12 = vadd.f32 %v1479_v57, %v869_v3  ;;  %v1633_v13 = vmul.f32 %v869_v3, %v869_v3  ;;  %v680_v14 = vpop.f32.mrb[55].mxu0  ;;  %v873_v15 = vpop.f32.mrb[55].mxu1 }
 0x166   : > { %v1753_v16 = vadd.f32 %v1752_v56, %v1632_v4  ;;  %1332 = vst [vmem:[%s2388_s11 + $0x1a0] sm:$0xff] %v2105_v5  ;;  %v1716_v17 = vadd.f32 %v1715_v59, %v1631_v7  ;;  %v1370_v18 = vadd.f32 %v1369_v63, %v678_v8  ;;  %v1634_v19 = vmul.f32 %v678_v8, %v678_v8 }
 0x167   : > { %1333 = vst [vmem:[%s2388_s11 + $0x1a8] sm:$0xff] %v2106_v11  ;;  %v1790_v20 = vadd.f32 %v1789_v62, %v1633_v13  ;;  %v1444_v21 = vadd.f32 %v1443_v1, %v871_v9  ;;  %v1636_v22 = vmul.f32 %v871_v9, %v871_v9  ;;  %v2107_v23 = vpack.c.bf16 %v680_v14, %v678_v8 }
 0x168   : > { %v1680_v24 = vadd.f32 %v1679_v10, %v1634_v19  ;;  %v1407_v25 = vadd.f32 %v1406_v6, %v680_v14  ;;  %v1635_v26 = vmul.f32 %v680_v14, %v680_v14  ;;  %v2108_v27 = vpack.c.bf16 %v873_v15, %v871_v9 }
 0x169   : > { %v1754_v28 = vadd.f32 %v1753_v16, %v1636_v22  ;;  %1334 = vst [vmem:[%s2388_s11 + $0x1b0] sm:$0xff] %v2107_v23  ;;  %v1481_v29 = vadd.f32 %v1480_v12, %v873_v15  ;;  %v1637_v30 = vmul.f32 %v873_v15, %v873_v15  ;;  %v1500_v9 = vunpack.c.0.s8 %v2446_v35 }
 0x16a   : > { %v1717_v31 = vadd.f32 %v1716_v17, %v1635_v26  ;;  %1335 = vst [vmem:[%s2388_s11 + $0x1b8] sm:$0xff] %v2108_v27  ;;  %v684_v32 = vpop.f32.mrb[56].mxu0  ;;  %v877_v33 = vpop.f32.mrb[56].mxu1  ;;  %v2454_v10 = vshrl.u32 %v1501_v36, 7  ;;  %vm1523_vm0 = vcmp.lt.s32.totalorder %v1501_v36, 512 }
 0x16b   : > { %v1791_v37 = vadd.f32 %v1790_v20, %v1637_v30  ;;  %v1371_v38 = vadd.f32 %v1370_v18, %v684_v32  ;;  %v1638_v39 = vmul.f32 %v684_v32, %v684_v32  ;;  %v1445_v40 = vadd.f32 %v1444_v21, %v877_v33  ;;  %v686_v41 = vpop.f32.mrb[57].mxu0  ;;  %v879_v42 = vpop.f32.mrb[57].mxu1 }
 0x16c   : > { %v1640_v43 = vmul.f32 %v877_v33, %v877_v33  ;;  %v2109_v44 = vpack.c.bf16 %v686_v41, %v684_v32  ;;  %v1408_v45 = vadd.f32 %v1407_v25, %v686_v41  ;;  %v1639_v46 = vmul.f32 %v686_v41, %v686_v41  ;;  %v688_v47 = vpop.f32.mrb[58].mxu0  ;;  %v881_v48 = vpop.f32.mrb[58].mxu1 }
 0x16d   : > { %v1681_v49 = vadd.f32 %v1680_v24, %v1638_v39  ;;  %v2110_v50 = vpack.c.bf16 %v879_v42, %v877_v33  ;;  %v1482_v51 = vadd.f32 %v1481_v29, %v879_v42  ;;  %v1641_v52 = vmul.f32 %v879_v42, %v879_v42  ;;  %v690_v53 = vpop.f32.mrb[59].mxu0  ;;  %v883_v54 = vpop.f32.mrb[59].mxu1 }
 0x16e   : > { %v1755_v55 = vadd.f32 %v1754_v28, %v1640_v43  ;;  %1336 = vst [vmem:[%s2388_s11 + $0x1c0] sm:$0xff] %v2109_v44  ;;  %v1718_v56 = vadd.f32 %v1717_v31, %v1639_v46  ;;  %v1372_v57 = vadd.f32 %v1371_v38, %v688_v47  ;;  %v1642_v58 = vmul.f32 %v688_v47, %v688_v47 }
 0x16f   : > { %1337 = vst [vmem:[%s2388_s11 + $0x1c8] sm:$0xff] %v2110_v50  ;;  %v1792_v59 = vadd.f32 %v1791_v37, %v1641_v52  ;;  %v1446_v60 = vadd.f32 %v1445_v40, %v881_v48  ;;  %v1644_v61 = vmul.f32 %v881_v48, %v881_v48  ;;  %v2111_v62 = vpack.c.bf16 %v690_v53, %v688_v47 }
 0x170   : > { %v1682_v63 = vadd.f32 %v1681_v49, %v1642_v58  ;;  %v1409_v0 = vadd.f32 %v1408_v45, %v690_v53  ;;  %v1643_v1 = vmul.f32 %v690_v53, %v690_v53  ;;  %v2112_v2 = vpack.c.bf16 %v883_v54, %v881_v48 }
 0x171   : > { %v1756_v3 = vadd.f32 %v1755_v55, %v1644_v61  ;;  %1338 = vst [vmem:[%s2388_s11 + $0x1d0] sm:$0xff] %v2111_v62  ;;  %v1483_v4 = vadd.f32 %v1482_v51, %v883_v54  ;;  %v1645_v5 = vmul.f32 %v883_v54, %v883_v54 }
 0x172   : > { %v1719_v6 = vadd.f32 %v1718_v56, %v1643_v1  ;;  %1339 = vst [vmem:[%s2388_s11 + $0x1d8] sm:$0xff] %v2112_v2  ;;  %v694_v7 = vpop.f32.mrb[60].mxu0  ;;  %v887_v8 = vpop.f32.mrb[60].mxu1 }
 0x173   : > { %v1793_v11 = vadd.f32 %v1792_v59, %v1645_v5  ;;  %v1373_v12 = vadd.f32 %v1372_v57, %v694_v7  ;;  %v1646_v13 = vmul.f32 %v694_v7, %v694_v7  ;;  %v1447_v14 = vadd.f32 %v1446_v60, %v887_v8  ;;  %v696_v15 = vpop.f32.mrb[61].mxu0  ;;  %v889_v16 = vpop.f32.mrb[61].mxu1 }
 0x174   : > { %v1648_v17 = vmul.f32 %v887_v8, %v887_v8  ;;  %v2113_v18 = vpack.c.bf16 %v696_v15, %v694_v7  ;;  %v1410_v19 = vadd.f32 %v1409_v0, %v696_v15  ;;  %v1647_v20 = vmul.f32 %v696_v15, %v696_v15  ;;  %v698_v21 = vpop.f32.mrb[62].mxu0  ;;  %v891_v22 = vpop.f32.mrb[62].mxu1 }
 0x175   : > { %v1683_v23 = vadd.f32 %v1682_v63, %v1646_v13  ;;  %v2114_v24 = vpack.c.bf16 %v889_v16, %v887_v8  ;;  %v1484_v25 = vadd.f32 %v1483_v4, %v889_v16  ;;  %v1649_v26 = vmul.f32 %v889_v16, %v889_v16  ;;  %v700_v27 = vpop.f32.mrb[63].mxu0  ;;  %v893_v28 = vpop.f32.mrb[63].mxu1 }
 0x176   : > { %v1757_v29 = vadd.f32 %v1756_v3, %v1648_v17  ;;  %1340 = vst [vmem:[%s2388_s11 + $0x1e0] sm:$0xff] %v2113_v18  ;;  %v1720_v30 = vadd.f32 %v1719_v6, %v1647_v20  ;;  %v1374_v31 = vadd.f32 %v1373_v12, %v698_v21  ;;  %v1650_v32 = vmul.f32 %v698_v21, %v698_v21 }
 0x177   : > { %1341 = vst [vmem:[%s2388_s11 + $0x1e8] sm:$0xff] %v2114_v24  ;;  %v1794_v33 = vadd.f32 %v1793_v11, %v1649_v26  ;;  %v1448_v34 = vadd.f32 %v1447_v14, %v891_v22  ;;  %v1652_v37 = vmul.f32 %v891_v22, %v891_v22  ;;  %v2115_v38 = vpack.c.bf16 %v700_v27, %v698_v21 }
 0x178   : > { %v1375_v39 = vrot.slane %v1374_v31, 4  ;;  %v1684_v40 = vadd.f32 %v1683_v23, %v1650_v32  ;;  %v1411_v41 = vadd.f32 %v1410_v19, %v700_v27  ;;  %v1651_v42 = vmul.f32 %v700_v27, %v700_v27 }
 0x179   : > { %v1449_v43 = vrot.slane %v1448_v34, 4  ;;  %v1758_v44 = vadd.f32 %v1757_v29, %v1652_v37  ;;  %1342 = vst [vmem:[%s2388_s11 + $0x1f0] sm:$0xff] %v2115_v38  ;;  %v2116_v45 = vpack.c.bf16 %v893_v28, %v891_v22  ;;  %v1485_v46 = vadd.f32 %v1484_v25, %v893_v28 }
 0x17a   : > { %v1376_v47 = vadd.f32 %v1375_v39, %v1374_v31  ;;  %v1685_v48 = vrot.slane %v1684_v40, 4  ;;  %v1412_v49 = vrot.slane %v1411_v41, 4  ;;  %v1721_v50 = vadd.f32 %v1720_v30, %v1651_v42 }
 0x17b   : > { %v1450_v51 = vadd.f32 %v1449_v43, %v1448_v34  ;;  %v1759_v52 = vrot.slane %v1758_v44, 4  ;;  %1343 = vst [vmem:[%s2388_s11 + $0x1f8] sm:$0xff] %v2116_v45  ;;  %v1486_v53 = vrot.slane %v1485_v46, 4  ;;  %v1653_v54 = vmul.f32 %v893_v28, %v893_v28 }
 0x17c   : > { %v1377_v55 = vrot.slane %v1376_v47, 2  ;;  %v1686_v56 = vadd.f32 %v1685_v48, %v1684_v40  ;;  %v1413_v57 = vadd.f32 %v1412_v49, %v1411_v41  ;;  %v1722_v58 = vrot.slane %v1721_v50, 4 }
 0x17d   : > { %v1451_v59 = vrot.slane %v1450_v51, 2  ;;  %v1760_v60 = vadd.f32 %v1759_v52, %v1758_v44  ;;  %v1487_v61 = vadd.f32 %v1486_v53, %v1485_v46  ;;  %v1795_v62 = vadd.f32 %v1794_v33, %v1653_v54 }
 0x17e   : > { %v1378_v63 = vadd.f32 %v1377_v55, %v1376_v47  ;;  %v1687_v0 = vrot.slane %v1686_v56, 2  ;;  %v1414_v1 = vrot.slane %v1413_v57, 2  ;;  %v1723_v2 = vadd.f32 %v1722_v58, %v1721_v50 }
 0x17f   : > { %v1452_v3 = vadd.f32 %v1451_v59, %v1450_v51  ;;  %v1761_v4 = vrot.slane %v1760_v60, 2  ;;  %v1488_v5 = vrot.slane %v1487_v61, 2  ;;  %v1796_v6 = vrot.slane %v1795_v62, 4 }
 0x180   : > { %v1379_v7 = vrot.slane %v1378_v63, 1  ;;  %v1688_v8 = vadd.f32 %v1687_v0, %v1686_v56  ;;  %v1415_v11 = vadd.f32 %v1414_v1, %v1413_v57  ;;  %v1724_v12 = vrot.slane %v1723_v2, 2 }
 0x181   : > { %v1453_v13 = vrot.slane %v1452_v3, 1  ;;  %v1762_v14 = vadd.f32 %v1761_v4, %v1760_v60  ;;  %v1489_v15 = vadd.f32 %v1488_v5, %v1487_v61  ;;  %v1797_v16 = vadd.f32 %v1796_v6, %v1795_v62 }
 0x182   : > { %v1380_v17 = vadd.f32 %v1379_v7, %v1378_v63  ;;  %v1689_v18 = vrot.slane %v1688_v8, 1  ;;  %v1416_v19 = vrot.slane %v1415_v11, 1  ;;  %v1725_v20 = vadd.f32 %v1724_v12, %v1723_v2 }
 0x183   : > { %v1454_v21 = vadd.f32 %v1453_v13, %v1452_v3  ;;  %v1763_v22 = vrot.slane %v1762_v14, 1  ;;  %v1490_v23 = vrot.slane %v1489_v15, 1  ;;  %v1798_v24 = vrot.slane %v1797_v16, 2 }
 0x184   : > { %v1690_v25 = vadd.f32 %v1689_v18, %v1688_v8  ;;  %v1417_v26 = vadd.f32 %v1416_v19, %v1415_v11  ;;  %v1503_v27 = vsub.s32 %v1500_v9, %v2454_v10  ;;  %v1726_v28 = vrot.slane %v1725_v20, 1 }
 0x185   : > { %v1491_v29 = vadd.f32 %v1490_v23, %v1489_v15  ;;  %v1799_v30 = vadd.f32 %v1798_v24, %v1797_v16  ;;  %v1764_v33 = vadd.f32 %v1763_v22, %v1762_v14 }
 0x186   : > { %v1496_v31 = vcombine.low %v1380_v17, %v1417_v26  ;;  %v1727_v32 = vadd.f32 %v1726_v28, %v1725_v20 }
 0x187   : > { %v1497_v34 = vcombine.low %v1454_v21, %v1491_v29  ;;  %v1800_v37 = vrot.slane %v1799_v30, 1 }
 0x188   : > { %v1504_v38 = vrot.slane %v1496_v31, %v1503_v27  ;;  %v1806_v39 = vcombine.low %v1690_v25, %v1727_v32 }
 0x189   : > { %v1511_v40 = vrot.slane %v1497_v34, %v1503_v27  ;;  %v1801_v41 = vadd.f32 %v1800_v37, %v1799_v30 }
 0x18a   : > { %v1814_v42 = vrot.slane %v1806_v39, %v1503_v27 }
 0x18b   : > { %v1512_v43 = vcombine.low %v1504_v38, %v1511_v40  ;;  %v1807_v44 = vcombine.low %v1764_v33, %v1801_v41 }
 0x18d   : > { %v1519_v35 = vrot.slane %v1512_v43, %v1503_v27  ;;  %v1821_v9 = vrot.slane %v1807_v44, %v1503_v27 }
 0x18f   : > { %1525 = vst.msk [vmem:[%s188_s16] ss:$2 sm:$0xf] %vm1523_vm0, %v1519_v35  ;;  %v1822_v10 = vcombine.low %v1814_v42, %v1821_v9 }
 0x191   : > { %v1829_v45 = vrot.slane %v1822_v10, %v1503_v27 }
 0x193   : > { %2048 = vst.msk [vmem:[%s188_s16 + $0x1] ss:$2 sm:$0xf] %vm1523_vm0, %v1829_v45 }
 0x194 PF: > { %s14_s12 = sadd.s32 1, %s2197_s12  }
 0x195   : > { %p11_p5 = scmp.ge.s32.totalorder %s14_s12, 4  }
 0x197   :  { %13 = sbr.rel (!%p11_p5) target bundleno = 1 (0x1), region = 71 }

// kernel: bottleneck_forward.11
= control target key start
LH: loop header
LB: loop body
LE: loop exit
PB: predicated region body
PF: predicated region fallthrough
CT: control target
= control target key end

     0   :  { %s1036_s12 = smov 0   ;;  %s1531_s0 = inlined_call_operand.vmem [shape: bf16[512,512], index: 0, kind: input, shape index: {}]   ;;  %s1532_s1 = inlined_call_operand.vmem [shape: f32[1,512], index: 1, kind: input, shape index: {}]   ;;  %s1533_s2 = inlined_call_operand.vmem [shape: f32[1,512], index: 2, kind: input, shape index: {}]   ;;  %s1534_s3 = inlined_call_operand.vmem [shape: f32[512,512], index: 3, kind: output, shape index: {}]  }
   0x1 LB: > { %s985_s13 = sadd.s32 4294967295, %s1014_s12   ;;  %p989_p0 = scmp.ge.s32.totalorder %s1014_s12, 1  ;;  %s1014_s12 = sphi %s1036_s12, %s13_s12  }
   0x2   : > { %p139_p1 = scmp.lt.s32.totalorder %s1014_s12, 3 }
   0x4   : > { %p140_p2 = pnand %p989_p0, %p139_p1 }
   0x5   : > { %s990_s14 = sshll.u32 (!%p140_p2), %s985_s13, 5  ;;  %v373_v0 = vlaneseq (!%p140_p2)  ;;  %v371_v2 = vld [vmem:[%s1532_s1] sm:$0xf] (!%p140_p2) }
   0x6   : > { %143 = sbr.rel (%p140_p2) target bundleno = 149 (0x95), region = 32  ;;  %p166_p3 = scmp.lt.s32.totalorder (!%p140_p2), %s990_s14, 63  ;;  %v521_v3 = vld [vmem:[%s1533_s2] sm:$0xf] (!%p140_p2) }
   0x7   : > { %v374_v1 = vshrl.u32 (!%p140_p2), %v373_v0, 7 }
   0x9   : > { %v375_v4 = vsub.s32 (!%p140_p2), 0, %v374_v1  ;;  %v379_v5 = vsub.s32 (!%p140_p2), 1, %v374_v1  ;;  %v383_v6 = vsub.s32 (!%p140_p2), 2, %v374_v1  ;;  %v387_v7 = vsub.s32 (!%p140_p2), 3, %v374_v1 }
   0xb   : > { %v1058_v8 = vrot.slane (!%p140_p2), %v371_v2, %v375_v4  ;;  %v1060_v9 = vrot.slane (!%p140_p2), %v521_v3, %v375_v4  ;;  %v1062_v10 = vrot.slane (!%p140_p2), %v371_v2, %v379_v5  ;;  %v1064_v11 = vrot.slane (!%p140_p2), %v521_v3, %v379_v5 }
   0xc   : > { %v1068_v14 = vrot.slane (!%p140_p2), %v371_v2, %v383_v6  ;;  %v1070_v15 = vrot.slane (!%p140_p2), %v521_v3, %v383_v6  ;;  %v1072_v16 = vrot.slane (!%p140_p2), %v371_v2, %v387_v7  ;;  %v1074_v17 = vrot.slane (!%p140_p2), %v521_v3, %v387_v7 }
   0xd   : > { %s1536_s14 = smov (!%p166_p3, %s990_s14), 63 }
   0xe   : > { %s998_s19 = sshll.u32 %s1536_s14, 4  ;;  %s999_s23 = sshll.u32 %s1536_s14, 5 }
   0xf   : > { %s1056_s22 = scalar_lea.vmem %s1531_s0, %s998_s19  ;;  %s1094_s26 = scalar_lea.vmem %s1534_s3, %s999_s23 }
  0x10   : > { %v179_v12 = vld [vmem:[%s1056_s22] sm:$0xff]  ;;  %v180_v13 = vld [vmem:[%s1056_s22 + $0x8] sm:$0xff]  ;;  %v181_v18 = vld [vmem:[%s1056_s22 + $0x10] sm:$0xff] }
  0x11   : > { %v243_v19 = vunpack.c.l.bf16 %v179_v12  ;;  %v244_v20 = vunpack.c.h.bf16 %v179_v12  ;;  %v245_v21 = vunpack.c.l.bf16 %v180_v13  ;;  %v246_v22 = vunpack.c.h.bf16 %v180_v13  ;;  %v182_v23 = vld [vmem:[%s1056_s22 + $0x18] sm:$0xff]  ;;  %v183_v44 = vld [vmem:[%s1056_s22 + $0x20] sm:$0xff]  ;;  %v184_v45 = vld [vmem:[%s1056_s22 + $0x28] sm:$0xff] }
  0x12   : > { %v247_v24 = vunpack.c.l.bf16 %v181_v18  ;;  %v248_v25 = vunpack.c.h.bf16 %v181_v18  ;;  %v249_v26 = vunpack.c.l.bf16 %v182_v23  ;;  %v250_v27 = vunpack.c.h.bf16 %v182_v23  ;;  %v185_v50 = vld [vmem:[%s1056_s22 + $0x30] sm:$0xff]  ;;  %v186_v51 = vld [vmem:[%s1056_s22 + $0x38] sm:$0xff] }
  0x13   : > { %v393_v28 = vmul.f32 %v1058_v8, %v243_v19  ;;  %v394_v29 = vmul.f32 %v1062_v10, %v244_v20  ;;  %v395_v30 = vmul.f32 %v1068_v14, %v245_v21  ;;  %v396_v31 = vmul.f32 %v1072_v16, %v246_v22 }
  0x14   : > { %v397_v32 = vmul.f32 %v1058_v8, %v247_v24  ;;  %v398_v33 = vmul.f32 %v1062_v10, %v248_v25  ;;  %v399_v34 = vmul.f32 %v1068_v14, %v249_v26  ;;  %v400_v35 = vmul.f32 %v1072_v16, %v250_v27  ;;  %v187_v24 = vld [vmem:[%s1056_s22 + $0x40] sm:$0xff]  ;;  %v188_v25 = vld [vmem:[%s1056_s22 + $0x48] sm:$0xff] }
  0x15   : > { %v543_v36 = vadd.f32 %v1060_v9, %v393_v28  ;;  %v544_v37 = vadd.f32 %v1064_v11, %v394_v29  ;;  %v545_v38 = vadd.f32 %v1070_v15, %v395_v30  ;;  %v546_v39 = vadd.f32 %v1074_v17, %v396_v31  ;;  %v189_v30 = vld [vmem:[%s1056_s22 + $0x50] sm:$0xff]  ;;  %v190_v31 = vld [vmem:[%s1056_s22 + $0x58] sm:$0xff] }
  0x16   : > { %v547_v40 = vadd.f32 %v1060_v9, %v397_v32  ;;  %v548_v41 = vadd.f32 %v1064_v11, %v398_v33  ;;  %v549_v42 = vadd.f32 %v1070_v15, %v399_v34  ;;  %v550_v43 = vadd.f32 %v1074_v17, %v400_v35 }
  0x17   : > { %v671_v46 = vmax.f32 %v543_v36, 0.0  ;;  %v672_v47 = vmax.f32 %v544_v37, 0.0  ;;  %v673_v48 = vmax.f32 %v545_v38, 0.0  ;;  %v674_v49 = vmax.f32 %v546_v39, 0.0 }
  0x18   : > { %v675_v52 = vmax.f32 %v547_v40, 0.0  ;;  %v676_v53 = vmax.f32 %v548_v41, 0.0  ;;  %v677_v54 = vmax.f32 %v549_v42, 0.0  ;;  %v678_v55 = vmax.f32 %v550_v43, 0.0 }
  0x19   : > { %799 = vst [vmem:[%s1094_s26] sm:$0xff] %v671_v46  ;;  %800 = vst [vmem:[%s1094_s26 + $0x8] sm:$0xff] %v672_v47  ;;  %v251_v56 = vunpack.c.l.bf16 %v183_v44  ;;  %v252_v57 = vunpack.c.h.bf16 %v183_v44  ;;  %v253_v58 = vunpack.c.l.bf16 %v184_v45  ;;  %v254_v59 = vunpack.c.h.bf16 %v184_v45 }
  0x1a   : > { %801 = vst [vmem:[%s1094_s26 + $0x10] sm:$0xff] %v673_v48  ;;  %802 = vst [vmem:[%s1094_s26 + $0x18] sm:$0xff] %v674_v49  ;;  %v255_v60 = vunpack.c.l.bf16 %v185_v50  ;;  %v256_v61 = vunpack.c.h.bf16 %v185_v50  ;;  %v257_v62 = vunpack.c.l.bf16 %v186_v51  ;;  %v258_v63 = vunpack.c.h.bf16 %v186_v51 }
  0x1b   : > { %803 = vst [vmem:[%s1094_s26 + $0x20] sm:$0xff] %v675_v52  ;;  %804 = vst [vmem:[%s1094_s26 + $0x28] sm:$0xff] %v676_v53  ;;  %v401_v0 = vmul.f32 %v1058_v8, %v251_v56  ;;  %v402_v1 = vmul.f32 %v1062_v10, %v252_v57  ;;  %v403_v2 = vmul.f32 %v1068_v14, %v253_v58  ;;  %v259_v36 = vunpack.c.l.bf16 %v187_v24 }
  0x1c   : > { %805 = vst [vmem:[%s1094_s26 + $0x30] sm:$0xff] %v677_v54  ;;  %806 = vst [vmem:[%s1094_s26 + $0x38] sm:$0xff] %v678_v55  ;;  %v404_v3 = vmul.f32 %v1072_v16, %v254_v59  ;;  %v405_v4 = vmul.f32 %v1058_v8, %v255_v60  ;;  %v406_v5 = vmul.f32 %v1062_v10, %v256_v61  ;;  %v260_v37 = vunpack.c.h.bf16 %v187_v24  ;;  %v191_v60 = vld [vmem:[%s1056_s22 + $0x60] sm:$0xff]  ;;  %v192_v61 = vld [vmem:[%s1056_s22 + $0x68] sm:$0xff] }
  0x1d   : > { %v407_v6 = vmul.f32 %v1068_v14, %v257_v62  ;;  %v408_v7 = vmul.f32 %v1072_v16, %v258_v63  ;;  %v551_v12 = vadd.f32 %v1060_v9, %v401_v0  ;;  %v552_v13 = vadd.f32 %v1064_v11, %v402_v1 }
  0x1e   : > { %v553_v18 = vadd.f32 %v1070_v15, %v403_v2  ;;  %v554_v19 = vadd.f32 %v1074_v17, %v404_v3  ;;  %v555_v20 = vadd.f32 %v1060_v9, %v405_v4  ;;  %v556_v21 = vadd.f32 %v1064_v11, %v406_v5  ;;  %v193_v2 = vld [vmem:[%s1056_s22 + $0x70] sm:$0xff]  ;;  %v194_v3 = vld [vmem:[%s1056_s22 + $0x78] sm:$0xff] }
  0x1f   : > { %v557_v22 = vadd.f32 %v1070_v15, %v407_v6  ;;  %v558_v23 = vadd.f32 %v1074_v17, %v408_v7  ;;  %v679_v26 = vmax.f32 %v551_v12, 0.0  ;;  %v680_v27 = vmax.f32 %v552_v13, 0.0 }
  0x20   : > { %v681_v28 = vmax.f32 %v553_v18, 0.0  ;;  %v682_v29 = vmax.f32 %v554_v19, 0.0  ;;  %v683_v32 = vmax.f32 %v555_v20, 0.0  ;;  %v684_v33 = vmax.f32 %v556_v21, 0.0 }
  0x21   : > { %v685_v34 = vmax.f32 %v557_v22, 0.0  ;;  %v686_v35 = vmax.f32 %v558_v23, 0.0  ;;  %807 = vst [vmem:[%s1094_s26 + $0x40] sm:$0xff] %v679_v26  ;;  %808 = vst [vmem:[%s1094_s26 + $0x48] sm:$0xff] %v680_v27  ;;  %v261_v38 = vunpack.c.l.bf16 %v188_v25  ;;  %v262_v39 = vunpack.c.h.bf16 %v188_v25 }
  0x22   : > { %809 = vst [vmem:[%s1094_s26 + $0x50] sm:$0xff] %v681_v28  ;;  %810 = vst [vmem:[%s1094_s26 + $0x58] sm:$0xff] %v682_v29  ;;  %v263_v40 = vunpack.c.l.bf16 %v189_v30  ;;  %v264_v41 = vunpack.c.h.bf16 %v189_v30  ;;  %v265_v42 = vunpack.c.l.bf16 %v190_v31  ;;  %v266_v43 = vunpack.c.h.bf16 %v190_v31 }
  0x23   : > { %811 = vst [vmem:[%s1094_s26 + $0x60] sm:$0xff] %v683_v32  ;;  %812 = vst [vmem:[%s1094_s26 + $0x68] sm:$0xff] %v684_v33  ;;  %v409_v44 = vmul.f32 %v1058_v8, %v259_v36  ;;  %v410_v45 = vmul.f32 %v1062_v10, %v260_v37  ;;  %v411_v46 = vmul.f32 %v1068_v14, %v261_v38  ;;  %v267_v12 = vunpack.c.l.bf16 %v191_v60 }
  0x24   : > { %813 = vst [vmem:[%s1094_s26 + $0x70] sm:$0xff] %v685_v34  ;;  %814 = vst [vmem:[%s1094_s26 + $0x78] sm:$0xff] %v686_v35  ;;  %v412_v47 = vmul.f32 %v1072_v16, %v262_v39  ;;  %v413_v48 = vmul.f32 %v1058_v8, %v263_v40  ;;  %v414_v49 = vmul.f32 %v1062_v10, %v264_v41  ;;  %v268_v13 = vunpack.c.h.bf16 %v191_v60  ;;  %v195_v40 = vld [vmem:[%s1056_s22 + $0x80] sm:$0xff]  ;;  %v196_v41 = vld [vmem:[%s1056_s22 + $0x88] sm:$0xff] }
  0x25   : > { %v415_v50 = vmul.f32 %v1068_v14, %v265_v42  ;;  %v416_v51 = vmul.f32 %v1072_v16, %v266_v43  ;;  %v559_v52 = vadd.f32 %v1060_v9, %v409_v44  ;;  %v560_v53 = vadd.f32 %v1064_v11, %v410_v45 }
  0x26   : > { %v561_v54 = vadd.f32 %v1070_v15, %v411_v46  ;;  %v562_v55 = vadd.f32 %v1074_v17, %v412_v47  ;;  %v563_v56 = vadd.f32 %v1060_v9, %v413_v48  ;;  %v564_v57 = vadd.f32 %v1064_v11, %v414_v49  ;;  %v197_v46 = vld [vmem:[%s1056_s22 + $0x90] sm:$0xff]  ;;  %v198_v47 = vld [vmem:[%s1056_s22 + $0x98] sm:$0xff] }
  0x27   : > { %v565_v58 = vadd.f32 %v1070_v15, %v415_v50  ;;  %v566_v59 = vadd.f32 %v1074_v17, %v416_v51  ;;  %v687_v62 = vmax.f32 %v559_v52, 0.0  ;;  %v688_v63 = vmax.f32 %v560_v53, 0.0 }
  0x28   : > { %v689_v0 = vmax.f32 %v561_v54, 0.0  ;;  %v690_v1 = vmax.f32 %v562_v55, 0.0  ;;  %v691_v4 = vmax.f32 %v563_v56, 0.0  ;;  %v692_v5 = vmax.f32 %v564_v57, 0.0 }
  0x29   : > { %v693_v6 = vmax.f32 %v565_v58, 0.0  ;;  %v694_v7 = vmax.f32 %v566_v59, 0.0  ;;  %815 = vst [vmem:[%s1094_s26 + $0x80] sm:$0xff] %v687_v62  ;;  %816 = vst [vmem:[%s1094_s26 + $0x88] sm:$0xff] %v688_v63  ;;  %v269_v18 = vunpack.c.l.bf16 %v192_v61  ;;  %v270_v19 = vunpack.c.h.bf16 %v192_v61 }
  0x2a   : > { %817 = vst [vmem:[%s1094_s26 + $0x90] sm:$0xff] %v689_v0  ;;  %818 = vst [vmem:[%s1094_s26 + $0x98] sm:$0xff] %v690_v1  ;;  %v271_v20 = vunpack.c.l.bf16 %v193_v2  ;;  %v272_v21 = vunpack.c.h.bf16 %v193_v2  ;;  %v273_v22 = vunpack.c.l.bf16 %v194_v3  ;;  %v274_v23 = vunpack.c.h.bf16 %v194_v3 }
  0x2b   : > { %819 = vst [vmem:[%s1094_s26 + $0xa0] sm:$0xff] %v691_v4  ;;  %820 = vst [vmem:[%s1094_s26 + $0xa8] sm:$0xff] %v692_v5  ;;  %v417_v24 = vmul.f32 %v1058_v8, %v267_v12  ;;  %v418_v25 = vmul.f32 %v1062_v10, %v268_v13  ;;  %v419_v26 = vmul.f32 %v1068_v14, %v269_v18  ;;  %v275_v52 = vunpack.c.l.bf16 %v195_v40 }
  0x2c   : > { %821 = vst [vmem:[%s1094_s26 + $0xb0] sm:$0xff] %v693_v6  ;;  %822 = vst [vmem:[%s1094_s26 + $0xb8] sm:$0xff] %v694_v7  ;;  %v420_v27 = vmul.f32 %v1072_v16, %v270_v19  ;;  %v421_v28 = vmul.f32 %v1058_v8, %v271_v20  ;;  %v422_v29 = vmul.f32 %v1062_v10, %v272_v21  ;;  %v276_v53 = vunpack.c.h.bf16 %v195_v40  ;;  %v199_v20 = vld [vmem:[%s1056_s22 + $0xa0] sm:$0xff]  ;;  %v200_v21 = vld [vmem:[%s1056_s22 + $0xa8] sm:$0xff] }
  0x2d   : > { %v423_v30 = vmul.f32 %v1068_v14, %v273_v22  ;;  %v424_v31 = vmul.f32 %v1072_v16, %v274_v23  ;;  %v567_v32 = vadd.f32 %v1060_v9, %v417_v24  ;;  %v568_v33 = vadd.f32 %v1064_v11, %v418_v25 }
  0x2e   : > { %v569_v34 = vadd.f32 %v1070_v15, %v419_v26  ;;  %v570_v35 = vadd.f32 %v1074_v17, %v420_v27  ;;  %v571_v36 = vadd.f32 %v1060_v9, %v421_v28  ;;  %v572_v37 = vadd.f32 %v1064_v11, %v422_v29  ;;  %v201_v26 = vld [vmem:[%s1056_s22 + $0xb0] sm:$0xff]  ;;  %v202_v27 = vld [vmem:[%s1056_s22 + $0xb8] sm:$0xff] }
  0x2f   : > { %v573_v38 = vadd.f32 %v1070_v15, %v423_v30  ;;  %v574_v39 = vadd.f32 %v1074_v17, %v424_v31  ;;  %v695_v42 = vmax.f32 %v567_v32, 0.0  ;;  %v696_v43 = vmax.f32 %v568_v33, 0.0 }
  0x30   : > { %v697_v44 = vmax.f32 %v569_v34, 0.0  ;;  %v698_v45 = vmax.f32 %v570_v35, 0.0  ;;  %v699_v48 = vmax.f32 %v571_v36, 0.0  ;;  %v700_v49 = vmax.f32 %v572_v37, 0.0 }
  0x31   : > { %v701_v50 = vmax.f32 %v573_v38, 0.0  ;;  %v702_v51 = vmax.f32 %v574_v39, 0.0  ;;  %823 = vst [vmem:[%s1094_s26 + $0xc0] sm:$0xff] %v695_v42  ;;  %824 = vst [vmem:[%s1094_s26 + $0xc8] sm:$0xff] %v696_v43  ;;  %v277_v54 = vunpack.c.l.bf16 %v196_v41  ;;  %v278_v55 = vunpack.c.h.bf16 %v196_v41 }
  0x32   : > { %825 = vst [vmem:[%s1094_s26 + $0xd0] sm:$0xff] %v697_v44  ;;  %826 = vst [vmem:[%s1094_s26 + $0xd8] sm:$0xff] %v698_v45  ;;  %v279_v56 = vunpack.c.l.bf16 %v197_v46  ;;  %v280_v57 = vunpack.c.h.bf16 %v197_v46  ;;  %v281_v58 = vunpack.c.l.bf16 %v198_v47  ;;  %v282_v59 = vunpack.c.h.bf16 %v198_v47 }
  0x33   : > { %827 = vst [vmem:[%s1094_s26 + $0xe0] sm:$0xff] %v699_v48  ;;  %828 = vst [vmem:[%s1094_s26 + $0xe8] sm:$0xff] %v700_v49  ;;  %v425_v60 = vmul.f32 %v1058_v8, %v275_v52  ;;  %v426_v61 = vmul.f32 %v1062_v10, %v276_v53  ;;  %v427_v62 = vmul.f32 %v1068_v14, %v277_v54  ;;  %v283_v32 = vunpack.c.l.bf16 %v199_v20 }
  0x34   : > { %829 = vst [vmem:[%s1094_s26 + $0xf0] sm:$0xff] %v701_v50  ;;  %830 = vst [vmem:[%s1094_s26 + $0xf8] sm:$0xff] %v702_v51  ;;  %v428_v63 = vmul.f32 %v1072_v16, %v278_v55  ;;  %v429_v0 = vmul.f32 %v1058_v8, %v279_v56  ;;  %v430_v1 = vmul.f32 %v1062_v10, %v280_v57  ;;  %v284_v33 = vunpack.c.h.bf16 %v199_v20  ;;  %v203_v56 = vld [vmem:[%s1056_s22 + $0xc0] sm:$0xff]  ;;  %v204_v57 = vld [vmem:[%s1056_s22 + $0xc8] sm:$0xff] }
  0x35   : > { %v431_v2 = vmul.f32 %v1068_v14, %v281_v58  ;;  %v432_v3 = vmul.f32 %v1072_v16, %v282_v59  ;;  %v575_v4 = vadd.f32 %v1060_v9, %v425_v60  ;;  %v576_v5 = vadd.f32 %v1064_v11, %v426_v61 }
  0x36   : > { %v577_v6 = vadd.f32 %v1070_v15, %v427_v62  ;;  %v578_v7 = vadd.f32 %v1074_v17, %v428_v63  ;;  %v579_v12 = vadd.f32 %v1060_v9, %v429_v0  ;;  %v580_v13 = vadd.f32 %v1064_v11, %v430_v1  ;;  %v205_v62 = vld [vmem:[%s1056_s22 + $0xd0] sm:$0xff]  ;;  %v206_v63 = vld [vmem:[%s1056_s22 + $0xd8] sm:$0xff] }
  0x37   : > { %v581_v18 = vadd.f32 %v1070_v15, %v431_v2  ;;  %v582_v19 = vadd.f32 %v1074_v17, %v432_v3  ;;  %v703_v22 = vmax.f32 %v575_v4, 0.0  ;;  %v704_v23 = vmax.f32 %v576_v5, 0.0 }
  0x38   : > { %v705_v24 = vmax.f32 %v577_v6, 0.0  ;;  %v706_v25 = vmax.f32 %v578_v7, 0.0  ;;  %v707_v28 = vmax.f32 %v579_v12, 0.0  ;;  %v708_v29 = vmax.f32 %v580_v13, 0.0 }
  0x39   : > { %v709_v30 = vmax.f32 %v581_v18, 0.0  ;;  %v710_v31 = vmax.f32 %v582_v19, 0.0  ;;  %831 = vst [vmem:[%s1094_s26 + $0x100] sm:$0xff] %v703_v22  ;;  %832 = vst [vmem:[%s1094_s26 + $0x108] sm:$0xff] %v704_v23  ;;  %v285_v34 = vunpack.c.l.bf16 %v200_v21  ;;  %v286_v35 = vunpack.c.h.bf16 %v200_v21 }
  0x3a   : > { %833 = vst [vmem:[%s1094_s26 + $0x110] sm:$0xff] %v705_v24  ;;  %834 = vst [vmem:[%s1094_s26 + $0x118] sm:$0xff] %v706_v25  ;;  %v287_v36 = vunpack.c.l.bf16 %v201_v26  ;;  %v288_v37 = vunpack.c.h.bf16 %v201_v26  ;;  %v289_v38 = vunpack.c.l.bf16 %v202_v27  ;;  %v290_v39 = vunpack.c.h.bf16 %v202_v27 }
  0x3b   : > { %835 = vst [vmem:[%s1094_s26 + $0x120] sm:$0xff] %v707_v28  ;;  %836 = vst [vmem:[%s1094_s26 + $0x128] sm:$0xff] %v708_v29  ;;  %v433_v40 = vmul.f32 %v1058_v8, %v283_v32  ;;  %v434_v41 = vmul.f32 %v1062_v10, %v284_v33  ;;  %v435_v42 = vmul.f32 %v1068_v14, %v285_v34  ;;  %v291_v4 = vunpack.c.l.bf16 %v203_v56 }
  0x3c   : > { %837 = vst [vmem:[%s1094_s26 + $0x130] sm:$0xff] %v709_v30  ;;  %838 = vst [vmem:[%s1094_s26 + $0x138] sm:$0xff] %v710_v31  ;;  %v436_v43 = vmul.f32 %v1072_v16, %v286_v35  ;;  %v437_v44 = vmul.f32 %v1058_v8, %v287_v36  ;;  %v438_v45 = vmul.f32 %v1062_v10, %v288_v37  ;;  %v292_v5 = vunpack.c.h.bf16 %v203_v56  ;;  %v207_v36 = vld [vmem:[%s1056_s22 + $0xe0] sm:$0xff]  ;;  %v208_v37 = vld [vmem:[%s1056_s22 + $0xe8] sm:$0xff] }
  0x3d   : > { %v439_v46 = vmul.f32 %v1068_v14, %v289_v38  ;;  %v440_v47 = vmul.f32 %v1072_v16, %v290_v39  ;;  %v583_v48 = vadd.f32 %v1060_v9, %v433_v40  ;;  %v584_v49 = vadd.f32 %v1064_v11, %v434_v41 }
  0x3e   : > { %v585_v50 = vadd.f32 %v1070_v15, %v435_v42  ;;  %v586_v51 = vadd.f32 %v1074_v17, %v436_v43  ;;  %v587_v52 = vadd.f32 %v1060_v9, %v437_v44  ;;  %v588_v53 = vadd.f32 %v1064_v11, %v438_v45  ;;  %v209_v42 = vld [vmem:[%s1056_s22 + $0xf0] sm:$0xff]  ;;  %v210_v43 = vld [vmem:[%s1056_s22 + $0xf8] sm:$0xff] }
  0x3f   : > { %v589_v54 = vadd.f32 %v1070_v15, %v439_v46  ;;  %v590_v55 = vadd.f32 %v1074_v17, %v440_v47  ;;  %v711_v58 = vmax.f32 %v583_v48, 0.0  ;;  %v712_v59 = vmax.f32 %v584_v49, 0.0 }
  0x40   : > { %v713_v60 = vmax.f32 %v585_v50, 0.0  ;;  %v714_v61 = vmax.f32 %v586_v51, 0.0  ;;  %v715_v0 = vmax.f32 %v587_v52, 0.0  ;;  %v716_v1 = vmax.f32 %v588_v53, 0.0 }
  0x41   : > { %v717_v2 = vmax.f32 %v589_v54, 0.0  ;;  %v718_v3 = vmax.f32 %v590_v55, 0.0  ;;  %839 = vst [vmem:[%s1094_s26 + $0x140] sm:$0xff] %v711_v58  ;;  %840 = vst [vmem:[%s1094_s26 + $0x148] sm:$0xff] %v712_v59  ;;  %v293_v6 = vunpack.c.l.bf16 %v204_v57  ;;  %v294_v7 = vunpack.c.h.bf16 %v204_v57 }
  0x42   : > { %841 = vst [vmem:[%s1094_s26 + $0x150] sm:$0xff] %v713_v60  ;;  %842 = vst [vmem:[%s1094_s26 + $0x158] sm:$0xff] %v714_v61  ;;  %v295_v12 = vunpack.c.l.bf16 %v205_v62  ;;  %v296_v13 = vunpack.c.h.bf16 %v205_v62  ;;  %v297_v18 = vunpack.c.l.bf16 %v206_v63  ;;  %v298_v19 = vunpack.c.h.bf16 %v206_v63 }
  0x43   : > { %843 = vst [vmem:[%s1094_s26 + $0x160] sm:$0xff] %v715_v0  ;;  %844 = vst [vmem:[%s1094_s26 + $0x168] sm:$0xff] %v716_v1  ;;  %v441_v20 = vmul.f32 %v1058_v8, %v291_v4  ;;  %v442_v21 = vmul.f32 %v1062_v10, %v292_v5  ;;  %v443_v22 = vmul.f32 %v1068_v14, %v293_v6  ;;  %v299_v48 = vunpack.c.l.bf16 %v207_v36 }
  0x44   : > { %845 = vst [vmem:[%s1094_s26 + $0x170] sm:$0xff] %v717_v2  ;;  %846 = vst [vmem:[%s1094_s26 + $0x178] sm:$0xff] %v718_v3  ;;  %v444_v23 = vmul.f32 %v1072_v16, %v294_v7  ;;  %v445_v24 = vmul.f32 %v1058_v8, %v295_v12  ;;  %v446_v25 = vmul.f32 %v1062_v10, %v296_v13  ;;  %v300_v49 = vunpack.c.h.bf16 %v207_v36  ;;  %v211_v12 = vld [vmem:[%s1056_s22 + $0x100] sm:$0xff]  ;;  %v212_v13 = vld [vmem:[%s1056_s22 + $0x108] sm:$0xff] }
  0x45   : > { %v447_v26 = vmul.f32 %v1068_v14, %v297_v18  ;;  %v448_v27 = vmul.f32 %v1072_v16, %v298_v19  ;;  %v591_v28 = vadd.f32 %v1060_v9, %v441_v20  ;;  %v592_v29 = vadd.f32 %v1064_v11, %v442_v21 }
  0x46   : > { %v593_v30 = vadd.f32 %v1070_v15, %v443_v22  ;;  %v594_v31 = vadd.f32 %v1074_v17, %v444_v23  ;;  %v595_v32 = vadd.f32 %v1060_v9, %v445_v24  ;;  %v596_v33 = vadd.f32 %v1064_v11, %v446_v25  ;;  %v213_v22 = vld [vmem:[%s1056_s22 + $0x110] sm:$0xff]  ;;  %v214_v23 = vld [vmem:[%s1056_s22 + $0x118] sm:$0xff] }
  0x47   : > { %v597_v34 = vadd.f32 %v1070_v15, %v447_v26  ;;  %v598_v35 = vadd.f32 %v1074_v17, %v448_v27  ;;  %v719_v38 = vmax.f32 %v591_v28, 0.0  ;;  %v720_v39 = vmax.f32 %v592_v29, 0.0 }
  0x48   : > { %v721_v40 = vmax.f32 %v593_v30, 0.0  ;;  %v722_v41 = vmax.f32 %v594_v31, 0.0  ;;  %v723_v44 = vmax.f32 %v595_v32, 0.0  ;;  %v724_v45 = vmax.f32 %v596_v33, 0.0 }
  0x49   : > { %v725_v46 = vmax.f32 %v597_v34, 0.0  ;;  %v726_v47 = vmax.f32 %v598_v35, 0.0  ;;  %847 = vst [vmem:[%s1094_s26 + $0x180] sm:$0xff] %v719_v38  ;;  %848 = vst [vmem:[%s1094_s26 + $0x188] sm:$0xff] %v720_v39  ;;  %v301_v50 = vunpack.c.l.bf16 %v208_v37  ;;  %v302_v51 = vunpack.c.h.bf16 %v208_v37 }
  0x4a   : > { %849 = vst [vmem:[%s1094_s26 + $0x190] sm:$0xff] %v721_v40  ;;  %850 = vst [vmem:[%s1094_s26 + $0x198] sm:$0xff] %v722_v41  ;;  %v303_v52 = vunpack.c.l.bf16 %v209_v42  ;;  %v304_v53 = vunpack.c.h.bf16 %v209_v42  ;;  %v305_v54 = vunpack.c.l.bf16 %v210_v43  ;;  %v306_v55 = vunpack.c.h.bf16 %v210_v43 }
  0x4b   : > { %851 = vst [vmem:[%s1094_s26 + $0x1a0] sm:$0xff] %v723_v44  ;;  %852 = vst [vmem:[%s1094_s26 + $0x1a8] sm:$0xff] %v724_v45  ;;  %v449_v56 = vmul.f32 %v1058_v8, %v299_v48  ;;  %v450_v57 = vmul.f32 %v1062_v10, %v300_v49  ;;  %v451_v58 = vmul.f32 %v1068_v14, %v301_v50  ;;  %v307_v28 = vunpack.c.l.bf16 %v211_v12 }
  0x4c   : > { %853 = vst [vmem:[%s1094_s26 + $0x1b0] sm:$0xff] %v725_v46  ;;  %854 = vst [vmem:[%s1094_s26 + $0x1b8] sm:$0xff] %v726_v47  ;;  %v452_v59 = vmul.f32 %v1072_v16, %v302_v51  ;;  %v453_v60 = vmul.f32 %v1058_v8, %v303_v52  ;;  %v454_v61 = vmul.f32 %v1062_v10, %v304_v53  ;;  %v308_v29 = vunpack.c.h.bf16 %v211_v12  ;;  %v215_v52 = vld [vmem:[%s1056_s22 + $0x120] sm:$0xff]  ;;  %v216_v53 = vld [vmem:[%s1056_s22 + $0x128] sm:$0xff] }
  0x4d   : > { %v455_v62 = vmul.f32 %v1068_v14, %v305_v54  ;;  %v456_v63 = vmul.f32 %v1072_v16, %v306_v55  ;;  %v599_v0 = vadd.f32 %v1060_v9, %v449_v56  ;;  %v600_v1 = vadd.f32 %v1064_v11, %v450_v57 }
  0x4e   : > { %v601_v2 = vadd.f32 %v1070_v15, %v451_v58  ;;  %v602_v3 = vadd.f32 %v1074_v17, %v452_v59  ;;  %v603_v4 = vadd.f32 %v1060_v9, %v453_v60  ;;  %v604_v5 = vadd.f32 %v1064_v11, %v454_v61  ;;  %v217_v58 = vld [vmem:[%s1056_s22 + $0x130] sm:$0xff]  ;;  %v218_v59 = vld [vmem:[%s1056_s22 + $0x138] sm:$0xff] }
  0x4f   : > { %v605_v6 = vadd.f32 %v1070_v15, %v455_v62  ;;  %v606_v7 = vadd.f32 %v1074_v17, %v456_v63  ;;  %v727_v18 = vmax.f32 %v599_v0, 0.0  ;;  %v728_v19 = vmax.f32 %v600_v1, 0.0 }
  0x50   : > { %v729_v20 = vmax.f32 %v601_v2, 0.0  ;;  %v730_v21 = vmax.f32 %v602_v3, 0.0  ;;  %v731_v24 = vmax.f32 %v603_v4, 0.0  ;;  %v732_v25 = vmax.f32 %v604_v5, 0.0 }
  0x51   : > { %v733_v26 = vmax.f32 %v605_v6, 0.0  ;;  %v734_v27 = vmax.f32 %v606_v7, 0.0  ;;  %855 = vst [vmem:[%s1094_s26 + $0x1c0] sm:$0xff] %v727_v18  ;;  %856 = vst [vmem:[%s1094_s26 + $0x1c8] sm:$0xff] %v728_v19  ;;  %v309_v30 = vunpack.c.l.bf16 %v212_v13  ;;  %v310_v31 = vunpack.c.h.bf16 %v212_v13 }
  0x52   : > { %857 = vst [vmem:[%s1094_s26 + $0x1d0] sm:$0xff] %v729_v20  ;;  %858 = vst [vmem:[%s1094_s26 + $0x1d8] sm:$0xff] %v730_v21  ;;  %v311_v32 = vunpack.c.l.bf16 %v213_v22  ;;  %v312_v33 = vunpack.c.h.bf16 %v213_v22  ;;  %v313_v34 = vunpack.c.l.bf16 %v214_v23  ;;  %v314_v35 = vunpack.c.h.bf16 %v214_v23 }
  0x53   : > { %859 = vst [vmem:[%s1094_s26 + $0x1e0] sm:$0xff] %v731_v24  ;;  %860 = vst [vmem:[%s1094_s26 + $0x1e8] sm:$0xff] %v732_v25  ;;  %v457_v36 = vmul.f32 %v1058_v8, %v307_v28  ;;  %v458_v37 = vmul.f32 %v1062_v10, %v308_v29  ;;  %v459_v38 = vmul.f32 %v1068_v14, %v309_v30  ;;  %v315_v0 = vunpack.c.l.bf16 %v215_v52 }
  0x54   : > { %861 = vst [vmem:[%s1094_s26 + $0x1f0] sm:$0xff] %v733_v26  ;;  %862 = vst [vmem:[%s1094_s26 + $0x1f8] sm:$0xff] %v734_v27  ;;  %v460_v39 = vmul.f32 %v1072_v16, %v310_v31  ;;  %v461_v40 = vmul.f32 %v1058_v8, %v311_v32  ;;  %v462_v41 = vmul.f32 %v1062_v10, %v312_v33  ;;  %v316_v1 = vunpack.c.h.bf16 %v215_v52  ;;  %v219_v32 = vld [vmem:[%s1056_s22 + $0x140] sm:$0xff]  ;;  %v220_v33 = vld [vmem:[%s1056_s22 + $0x148] sm:$0xff] }
  0x55   : > { %v463_v42 = vmul.f32 %v1068_v14, %v313_v34  ;;  %v464_v43 = vmul.f32 %v1072_v16, %v314_v35  ;;  %v607_v44 = vadd.f32 %v1060_v9, %v457_v36  ;;  %v608_v45 = vadd.f32 %v1064_v11, %v458_v37 }
  0x56   : > { %v609_v46 = vadd.f32 %v1070_v15, %v459_v38  ;;  %v610_v47 = vadd.f32 %v1074_v17, %v460_v39  ;;  %v611_v48 = vadd.f32 %v1060_v9, %v461_v40  ;;  %v612_v49 = vadd.f32 %v1064_v11, %v462_v41  ;;  %v221_v38 = vld [vmem:[%s1056_s22 + $0x150] sm:$0xff]  ;;  %v222_v39 = vld [vmem:[%s1056_s22 + $0x158] sm:$0xff] }
  0x57   : > { %v613_v50 = vadd.f32 %v1070_v15, %v463_v42  ;;  %v614_v51 = vadd.f32 %v1074_v17, %v464_v43  ;;  %v735_v54 = vmax.f32 %v607_v44, 0.0  ;;  %v736_v55 = vmax.f32 %v608_v45, 0.0 }
  0x58   : > { %v737_v56 = vmax.f32 %v609_v46, 0.0  ;;  %v738_v57 = vmax.f32 %v610_v47, 0.0  ;;  %v739_v60 = vmax.f32 %v611_v48, 0.0  ;;  %v740_v61 = vmax.f32 %v612_v49, 0.0 }
  0x59   : > { %v741_v62 = vmax.f32 %v613_v50, 0.0  ;;  %v742_v63 = vmax.f32 %v614_v51, 0.0  ;;  %863 = vst [vmem:[%s1094_s26 + $0x200] sm:$0xff] %v735_v54  ;;  %864 = vst [vmem:[%s1094_s26 + $0x208] sm:$0xff] %v736_v55  ;;  %v317_v2 = vunpack.c.l.bf16 %v216_v53  ;;  %v318_v3 = vunpack.c.h.bf16 %v216_v53 }
  0x5a   : > { %865 = vst [vmem:[%s1094_s26 + $0x210] sm:$0xff] %v737_v56  ;;  %866 = vst [vmem:[%s1094_s26 + $0x218] sm:$0xff] %v738_v57  ;;  %v319_v4 = vunpack.c.l.bf16 %v217_v58  ;;  %v320_v5 = vunpack.c.h.bf16 %v217_v58  ;;  %v321_v6 = vunpack.c.l.bf16 %v218_v59  ;;  %v322_v7 = vunpack.c.h.bf16 %v218_v59 }
  0x5b   : > { %867 = vst [vmem:[%s1094_s26 + $0x220] sm:$0xff] %v739_v60  ;;  %868 = vst [vmem:[%s1094_s26 + $0x228] sm:$0xff] %v740_v61  ;;  %v465_v12 = vmul.f32 %v1058_v8, %v315_v0  ;;  %v466_v13 = vmul.f32 %v1062_v10, %v316_v1  ;;  %v467_v18 = vmul.f32 %v1068_v14, %v317_v2  ;;  %v323_v44 = vunpack.c.l.bf16 %v219_v32 }
  0x5c   : > { %869 = vst [vmem:[%s1094_s26 + $0x230] sm:$0xff] %v741_v62  ;;  %870 = vst [vmem:[%s1094_s26 + $0x238] sm:$0xff] %v742_v63  ;;  %v468_v19 = vmul.f32 %v1072_v16, %v318_v3  ;;  %v469_v20 = vmul.f32 %v1058_v8, %v319_v4  ;;  %v470_v21 = vmul.f32 %v1062_v10, %v320_v5  ;;  %v324_v45 = vunpack.c.h.bf16 %v219_v32  ;;  %v223_v4 = vld [vmem:[%s1056_s22 + $0x160] sm:$0xff]  ;;  %v224_v5 = vld [vmem:[%s1056_s22 + $0x168] sm:$0xff] }
  0x5d   : > { %v471_v22 = vmul.f32 %v1068_v14, %v321_v6  ;;  %v472_v23 = vmul.f32 %v1072_v16, %v322_v7  ;;  %v615_v24 = vadd.f32 %v1060_v9, %v465_v12  ;;  %v616_v25 = vadd.f32 %v1064_v11, %v466_v13 }
  0x5e   : > { %v617_v26 = vadd.f32 %v1070_v15, %v467_v18  ;;  %v618_v27 = vadd.f32 %v1074_v17, %v468_v19  ;;  %v619_v28 = vadd.f32 %v1060_v9, %v469_v20  ;;  %v620_v29 = vadd.f32 %v1064_v11, %v470_v21  ;;  %v225_v18 = vld [vmem:[%s1056_s22 + $0x170] sm:$0xff]  ;;  %v226_v19 = vld [vmem:[%s1056_s22 + $0x178] sm:$0xff] }
  0x5f   : > { %v621_v30 = vadd.f32 %v1070_v15, %v471_v22  ;;  %v622_v31 = vadd.f32 %v1074_v17, %v472_v23  ;;  %v743_v34 = vmax.f32 %v615_v24, 0.0  ;;  %v744_v35 = vmax.f32 %v616_v25, 0.0 }
  0x60   : > { %v745_v36 = vmax.f32 %v617_v26, 0.0  ;;  %v746_v37 = vmax.f32 %v618_v27, 0.0  ;;  %v747_v40 = vmax.f32 %v619_v28, 0.0  ;;  %v748_v41 = vmax.f32 %v620_v29, 0.0 }
  0x61   : > { %v749_v42 = vmax.f32 %v621_v30, 0.0  ;;  %v750_v43 = vmax.f32 %v622_v31, 0.0  ;;  %871 = vst [vmem:[%s1094_s26 + $0x240] sm:$0xff] %v743_v34  ;;  %872 = vst [vmem:[%s1094_s26 + $0x248] sm:$0xff] %v744_v35  ;;  %v325_v46 = vunpack.c.l.bf16 %v220_v33  ;;  %v326_v47 = vunpack.c.h.bf16 %v220_v33 }
  0x62   : > { %873 = vst [vmem:[%s1094_s26 + $0x250] sm:$0xff] %v745_v36  ;;  %874 = vst [vmem:[%s1094_s26 + $0x258] sm:$0xff] %v746_v37  ;;  %v327_v48 = vunpack.c.l.bf16 %v221_v38  ;;  %v328_v49 = vunpack.c.h.bf16 %v221_v38  ;;  %v329_v50 = vunpack.c.l.bf16 %v222_v39  ;;  %v330_v51 = vunpack.c.h.bf16 %v222_v39 }
  0x63   : > { %875 = vst [vmem:[%s1094_s26 + $0x260] sm:$0xff] %v747_v40  ;;  %876 = vst [vmem:[%s1094_s26 + $0x268] sm:$0xff] %v748_v41  ;;  %v473_v52 = vmul.f32 %v1058_v8, %v323_v44  ;;  %v474_v53 = vmul.f32 %v1062_v10, %v324_v45  ;;  %v475_v54 = vmul.f32 %v1068_v14, %v325_v46  ;;  %v331_v24 = vunpack.c.l.bf16 %v223_v4 }
  0x64   : > { %877 = vst [vmem:[%s1094_s26 + $0x270] sm:$0xff] %v749_v42  ;;  %878 = vst [vmem:[%s1094_s26 + $0x278] sm:$0xff] %v750_v43  ;;  %v476_v55 = vmul.f32 %v1072_v16, %v326_v47  ;;  %v477_v56 = vmul.f32 %v1058_v8, %v327_v48  ;;  %v478_v57 = vmul.f32 %v1062_v10, %v328_v49  ;;  %v332_v25 = vunpack.c.h.bf16 %v223_v4  ;;  %v227_v48 = vld [vmem:[%s1056_s22 + $0x180] sm:$0xff]  ;;  %v228_v49 = vld [vmem:[%s1056_s22 + $0x188] sm:$0xff] }
  0x65   : > { %v479_v58 = vmul.f32 %v1068_v14, %v329_v50  ;;  %v480_v59 = vmul.f32 %v1072_v16, %v330_v51  ;;  %v623_v60 = vadd.f32 %v1060_v9, %v473_v52  ;;  %v624_v61 = vadd.f32 %v1064_v11, %v474_v53 }
  0x66   : > { %v625_v62 = vadd.f32 %v1070_v15, %v475_v54  ;;  %v626_v63 = vadd.f32 %v1074_v17, %v476_v55  ;;  %v627_v0 = vadd.f32 %v1060_v9, %v477_v56  ;;  %v628_v1 = vadd.f32 %v1064_v11, %v478_v57  ;;  %v229_v54 = vld [vmem:[%s1056_s22 + $0x190] sm:$0xff]  ;;  %v230_v55 = vld [vmem:[%s1056_s22 + $0x198] sm:$0xff] }
  0x67   : > { %v629_v2 = vadd.f32 %v1070_v15, %v479_v58  ;;  %v630_v3 = vadd.f32 %v1074_v17, %v480_v59  ;;  %v751_v6 = vmax.f32 %v623_v60, 0.0  ;;  %v752_v7 = vmax.f32 %v624_v61, 0.0 }
  0x68   : > { %v753_v12 = vmax.f32 %v625_v62, 0.0  ;;  %v754_v13 = vmax.f32 %v626_v63, 0.0  ;;  %v755_v20 = vmax.f32 %v627_v0, 0.0  ;;  %v756_v21 = vmax.f32 %v628_v1, 0.0 }
  0x69   : > { %v757_v22 = vmax.f32 %v629_v2, 0.0  ;;  %v758_v23 = vmax.f32 %v630_v3, 0.0  ;;  %879 = vst [vmem:[%s1094_s26 + $0x280] sm:$0xff] %v751_v6  ;;  %880 = vst [vmem:[%s1094_s26 + $0x288] sm:$0xff] %v752_v7  ;;  %v333_v26 = vunpack.c.l.bf16 %v224_v5  ;;  %v334_v27 = vunpack.c.h.bf16 %v224_v5 }
  0x6a   : > { %881 = vst [vmem:[%s1094_s26 + $0x290] sm:$0xff] %v753_v12  ;;  %882 = vst [vmem:[%s1094_s26 + $0x298] sm:$0xff] %v754_v13  ;;  %v335_v28 = vunpack.c.l.bf16 %v225_v18  ;;  %v336_v29 = vunpack.c.h.bf16 %v225_v18  ;;  %v337_v30 = vunpack.c.l.bf16 %v226_v19  ;;  %v338_v31 = vunpack.c.h.bf16 %v226_v19 }
  0x6b   : > { %883 = vst [vmem:[%s1094_s26 + $0x2a0] sm:$0xff] %v755_v20  ;;  %884 = vst [vmem:[%s1094_s26 + $0x2a8] sm:$0xff] %v756_v21  ;;  %v481_v32 = vmul.f32 %v1058_v8, %v331_v24  ;;  %v482_v33 = vmul.f32 %v1062_v10, %v332_v25  ;;  %v483_v34 = vmul.f32 %v1068_v14, %v333_v26  ;;  %v339_v60 = vunpack.c.l.bf16 %v227_v48 }
  0x6c   : > { %885 = vst [vmem:[%s1094_s26 + $0x2b0] sm:$0xff] %v757_v22  ;;  %886 = vst [vmem:[%s1094_s26 + $0x2b8] sm:$0xff] %v758_v23  ;;  %v484_v35 = vmul.f32 %v1072_v16, %v334_v27  ;;  %v485_v36 = vmul.f32 %v1058_v8, %v335_v28  ;;  %v486_v37 = vmul.f32 %v1062_v10, %v336_v29  ;;  %v340_v61 = vunpack.c.h.bf16 %v227_v48  ;;  %v231_v28 = vld [vmem:[%s1056_s22 + $0x1a0] sm:$0xff]  ;;  %v232_v29 = vld [vmem:[%s1056_s22 + $0x1a8] sm:$0xff] }
  0x6d   : > { %v487_v38 = vmul.f32 %v1068_v14, %v337_v30  ;;  %v488_v39 = vmul.f32 %v1072_v16, %v338_v31  ;;  %v631_v40 = vadd.f32 %v1060_v9, %v481_v32  ;;  %v632_v41 = vadd.f32 %v1064_v11, %v482_v33 }
  0x6e   : > { %v633_v42 = vadd.f32 %v1070_v15, %v483_v34  ;;  %v634_v43 = vadd.f32 %v1074_v17, %v484_v35  ;;  %v635_v44 = vadd.f32 %v1060_v9, %v485_v36  ;;  %v636_v45 = vadd.f32 %v1064_v11, %v486_v37  ;;  %v233_v34 = vld [vmem:[%s1056_s22 + $0x1b0] sm:$0xff]  ;;  %v234_v35 = vld [vmem:[%s1056_s22 + $0x1b8] sm:$0xff] }
  0x6f   : > { %v637_v46 = vadd.f32 %v1070_v15, %v487_v38  ;;  %v638_v47 = vadd.f32 %v1074_v17, %v488_v39  ;;  %v759_v50 = vmax.f32 %v631_v40, 0.0  ;;  %v760_v51 = vmax.f32 %v632_v41, 0.0 }
  0x70   : > { %v761_v52 = vmax.f32 %v633_v42, 0.0  ;;  %v762_v53 = vmax.f32 %v634_v43, 0.0  ;;  %v763_v56 = vmax.f32 %v635_v44, 0.0  ;;  %v764_v57 = vmax.f32 %v636_v45, 0.0 }
  0x71   : > { %v765_v58 = vmax.f32 %v637_v46, 0.0  ;;  %v766_v59 = vmax.f32 %v638_v47, 0.0  ;;  %887 = vst [vmem:[%s1094_s26 + $0x2c0] sm:$0xff] %v759_v50  ;;  %888 = vst [vmem:[%s1094_s26 + $0x2c8] sm:$0xff] %v760_v51  ;;  %v341_v62 = vunpack.c.l.bf16 %v228_v49  ;;  %v342_v63 = vunpack.c.h.bf16 %v228_v49 }
  0x72   : > { %889 = vst [vmem:[%s1094_s26 + $0x2d0] sm:$0xff] %v761_v52  ;;  %890 = vst [vmem:[%s1094_s26 + $0x2d8] sm:$0xff] %v762_v53  ;;  %v343_v0 = vunpack.c.l.bf16 %v229_v54  ;;  %v344_v1 = vunpack.c.h.bf16 %v229_v54  ;;  %v345_v2 = vunpack.c.l.bf16 %v230_v55  ;;  %v346_v3 = vunpack.c.h.bf16 %v230_v55 }
  0x73   : > { %891 = vst [vmem:[%s1094_s26 + $0x2e0] sm:$0xff] %v763_v56  ;;  %892 = vst [vmem:[%s1094_s26 + $0x2e8] sm:$0xff] %v764_v57  ;;  %v489_v4 = vmul.f32 %v1058_v8, %v339_v60  ;;  %v490_v5 = vmul.f32 %v1062_v10, %v340_v61  ;;  %v491_v6 = vmul.f32 %v1068_v14, %v341_v62  ;;  %v347_v40 = vunpack.c.l.bf16 %v231_v28 }
  0x74   : > { %893 = vst [vmem:[%s1094_s26 + $0x2f0] sm:$0xff] %v765_v58  ;;  %894 = vst [vmem:[%s1094_s26 + $0x2f8] sm:$0xff] %v766_v59  ;;  %v492_v7 = vmul.f32 %v1072_v16, %v342_v63  ;;  %v493_v12 = vmul.f32 %v1058_v8, %v343_v0  ;;  %v494_v13 = vmul.f32 %v1062_v10, %v344_v1  ;;  %v348_v41 = vunpack.c.h.bf16 %v231_v28  ;;  %v235_v0 = vld [vmem:[%s1056_s22 + $0x1c0] sm:$0xff]  ;;  %v236_v1 = vld [vmem:[%s1056_s22 + $0x1c8] sm:$0xff] }
  0x75   : > { %v495_v18 = vmul.f32 %v1068_v14, %v345_v2  ;;  %v496_v19 = vmul.f32 %v1072_v16, %v346_v3  ;;  %v639_v20 = vadd.f32 %v1060_v9, %v489_v4  ;;  %v640_v21 = vadd.f32 %v1064_v11, %v490_v5 }
  0x76   : > { %v641_v22 = vadd.f32 %v1070_v15, %v491_v6  ;;  %v642_v23 = vadd.f32 %v1074_v17, %v492_v7  ;;  %v643_v24 = vadd.f32 %v1060_v9, %v493_v12  ;;  %v644_v25 = vadd.f32 %v1064_v11, %v494_v13  ;;  %v237_v6 = vld [vmem:[%s1056_s22 + $0x1d0] sm:$0xff]  ;;  %v238_v7 = vld [vmem:[%s1056_s22 + $0x1d8] sm:$0xff] }
  0x77   : > { %v645_v26 = vadd.f32 %v1070_v15, %v495_v18  ;;  %v646_v27 = vadd.f32 %v1074_v17, %v496_v19  ;;  %v767_v30 = vmax.f32 %v639_v20, 0.0  ;;  %v768_v31 = vmax.f32 %v640_v21, 0.0 }
  0x78   : > { %v769_v32 = vmax.f32 %v641_v22, 0.0  ;;  %v770_v33 = vmax.f32 %v642_v23, 0.0  ;;  %v771_v36 = vmax.f32 %v643_v24, 0.0  ;;  %v772_v37 = vmax.f32 %v644_v25, 0.0 }
  0x79   : > { %v773_v38 = vmax.f32 %v645_v26, 0.0  ;;  %v774_v39 = vmax.f32 %v646_v27, 0.0  ;;  %895 = vst [vmem:[%s1094_s26 + $0x300] sm:$0xff] %v767_v30  ;;  %896 = vst [vmem:[%s1094_s26 + $0x308] sm:$0xff] %v768_v31  ;;  %v349_v42 = vunpack.c.l.bf16 %v232_v29  ;;  %v350_v43 = vunpack.c.h.bf16 %v232_v29 }
  0x7a   : > { %897 = vst [vmem:[%s1094_s26 + $0x310] sm:$0xff] %v769_v32  ;;  %898 = vst [vmem:[%s1094_s26 + $0x318] sm:$0xff] %v770_v33  ;;  %v351_v44 = vunpack.c.l.bf16 %v233_v34  ;;  %v352_v45 = vunpack.c.h.bf16 %v233_v34  ;;  %v353_v46 = vunpack.c.l.bf16 %v234_v35  ;;  %v354_v47 = vunpack.c.h.bf16 %v234_v35 }
  0x7b   : > { %899 = vst [vmem:[%s1094_s26 + $0x320] sm:$0xff] %v771_v36  ;;  %900 = vst [vmem:[%s1094_s26 + $0x328] sm:$0xff] %v772_v37  ;;  %v497_v48 = vmul.f32 %v1058_v8, %v347_v40  ;;  %v498_v49 = vmul.f32 %v1062_v10, %v348_v41  ;;  %v499_v50 = vmul.f32 %v1068_v14, %v349_v42  ;;  %v355_v20 = vunpack.c.l.bf16 %v235_v0 }
  0x7c   : > { %901 = vst [vmem:[%s1094_s26 + $0x330] sm:$0xff] %v773_v38  ;;  %902 = vst [vmem:[%s1094_s26 + $0x338] sm:$0xff] %v774_v39  ;;  %v500_v51 = vmul.f32 %v1072_v16, %v350_v43  ;;  %v501_v52 = vmul.f32 %v1058_v8, %v351_v44  ;;  %v502_v53 = vmul.f32 %v1062_v10, %v352_v45  ;;  %v356_v21 = vunpack.c.h.bf16 %v235_v0  ;;  %v239_v44 = vld [vmem:[%s1056_s22 + $0x1e0] sm:$0xff]  ;;  %v240_v45 = vld [vmem:[%s1056_s22 + $0x1e8] sm:$0xff] }
  0x7d   : > { %v503_v54 = vmul.f32 %v1068_v14, %v353_v46  ;;  %v504_v55 = vmul.f32 %v1072_v16, %v354_v47  ;;  %v647_v56 = vadd.f32 %v1060_v9, %v497_v48  ;;  %v648_v57 = vadd.f32 %v1064_v11, %v498_v49 }
  0x7e   : > { %v649_v58 = vadd.f32 %v1070_v15, %v499_v50  ;;  %v650_v59 = vadd.f32 %v1074_v17, %v500_v51  ;;  %v651_v60 = vadd.f32 %v1060_v9, %v501_v52  ;;  %v652_v61 = vadd.f32 %v1064_v11, %v502_v53  ;;  %v241_v50 = vld [vmem:[%s1056_s22 + $0x1f0] sm:$0xff]  ;;  %v242_v51 = vld [vmem:[%s1056_s22 + $0x1f8] sm:$0xff] }
  0x7f   : > { %v653_v62 = vadd.f32 %v1070_v15, %v503_v54  ;;  %v654_v63 = vadd.f32 %v1074_v17, %v504_v55  ;;  %v775_v2 = vmax.f32 %v647_v56, 0.0  ;;  %v776_v3 = vmax.f32 %v648_v57, 0.0 }
  0x80   : > { %v777_v4 = vmax.f32 %v649_v58, 0.0  ;;  %v778_v5 = vmax.f32 %v650_v59, 0.0  ;;  %v779_v12 = vmax.f32 %v651_v60, 0.0  ;;  %v780_v13 = vmax.f32 %v652_v61, 0.0 }
  0x81   : > { %v781_v18 = vmax.f32 %v653_v62, 0.0  ;;  %v782_v19 = vmax.f32 %v654_v63, 0.0  ;;  %903 = vst [vmem:[%s1094_s26 + $0x340] sm:$0xff] %v775_v2  ;;  %904 = vst [vmem:[%s1094_s26 + $0x348] sm:$0xff] %v776_v3  ;;  %v357_v22 = vunpack.c.l.bf16 %v236_v1  ;;  %v358_v23 = vunpack.c.h.bf16 %v236_v1 }
  0x82   : > { %905 = vst [vmem:[%s1094_s26 + $0x350] sm:$0xff] %v777_v4  ;;  %906 = vst [vmem:[%s1094_s26 + $0x358] sm:$0xff] %v778_v5  ;;  %v359_v24 = vunpack.c.l.bf16 %v237_v6  ;;  %v360_v25 = vunpack.c.h.bf16 %v237_v6  ;;  %v361_v26 = vunpack.c.l.bf16 %v238_v7  ;;  %v362_v27 = vunpack.c.h.bf16 %v238_v7 }
  0x83   : > { %907 = vst [vmem:[%s1094_s26 + $0x360] sm:$0xff] %v779_v12  ;;  %908 = vst [vmem:[%s1094_s26 + $0x368] sm:$0xff] %v780_v13  ;;  %v505_v28 = vmul.f32 %v1058_v8, %v355_v20  ;;  %v506_v29 = vmul.f32 %v1062_v10, %v356_v21  ;;  %v507_v30 = vmul.f32 %v1068_v14, %v357_v22  ;;  %v363_v56 = vunpack.c.l.bf16 %v239_v44 }
  0x84   : > { %909 = vst [vmem:[%s1094_s26 + $0x370] sm:$0xff] %v781_v18  ;;  %910 = vst [vmem:[%s1094_s26 + $0x378] sm:$0xff] %v782_v19  ;;  %v508_v31 = vmul.f32 %v1072_v16, %v358_v23  ;;  %v509_v32 = vmul.f32 %v1058_v8, %v359_v24  ;;  %v510_v33 = vmul.f32 %v1062_v10, %v360_v25  ;;  %v364_v57 = vunpack.c.h.bf16 %v239_v44 }
  0x85   : > { %v511_v34 = vmul.f32 %v1068_v14, %v361_v26  ;;  %v512_v35 = vmul.f32 %v1072_v16, %v362_v27  ;;  %v655_v36 = vadd.f32 %v1060_v9, %v505_v28  ;;  %v656_v37 = vadd.f32 %v1064_v11, %v506_v29 }
  0x86   : > { %v657_v38 = vadd.f32 %v1070_v15, %v507_v30  ;;  %v658_v39 = vadd.f32 %v1074_v17, %v508_v31  ;;  %v659_v40 = vadd.f32 %v1060_v9, %v509_v32  ;;  %v660_v41 = vadd.f32 %v1064_v11, %v510_v33 }
  0x87   : > { %v661_v42 = vadd.f32 %v1070_v15, %v511_v34  ;;  %v662_v43 = vadd.f32 %v1074_v17, %v512_v35  ;;  %v783_v46 = vmax.f32 %v655_v36, 0.0  ;;  %v784_v47 = vmax.f32 %v656_v37, 0.0 }
  0x88   : > { %v785_v48 = vmax.f32 %v657_v38, 0.0  ;;  %v786_v49 = vmax.f32 %v658_v39, 0.0  ;;  %v787_v52 = vmax.f32 %v659_v40, 0.0  ;;  %v788_v53 = vmax.f32 %v660_v41, 0.0 }
  0x89   : > { %v789_v54 = vmax.f32 %v661_v42, 0.0  ;;  %v790_v55 = vmax.f32 %v662_v43, 0.0  ;;  %911 = vst [vmem:[%s1094_s26 + $0x380] sm:$0xff] %v783_v46  ;;  %912 = vst [vmem:[%s1094_s26 + $0x388] sm:$0xff] %v784_v47  ;;  %v365_v58 = vunpack.c.l.bf16 %v240_v45  ;;  %v366_v59 = vunpack.c.h.bf16 %v240_v45 }
  0x8a   : > { %913 = vst [vmem:[%s1094_s26 + $0x390] sm:$0xff] %v785_v48  ;;  %914 = vst [vmem:[%s1094_s26 + $0x398] sm:$0xff] %v786_v49  ;;  %v367_v60 = vunpack.c.l.bf16 %v241_v50  ;;  %v368_v61 = vunpack.c.h.bf16 %v241_v50  ;;  %v369_v62 = vunpack.c.l.bf16 %v242_v51  ;;  %v370_v63 = vunpack.c.h.bf16 %v242_v51 }
  0x8b   : > { %915 = vst [vmem:[%s1094_s26 + $0x3a0] sm:$0xff] %v787_v52  ;;  %916 = vst [vmem:[%s1094_s26 + $0x3a8] sm:$0xff] %v788_v53  ;;  %v513_v0 = vmul.f32 %v1058_v8, %v363_v56  ;;  %v514_v1 = vmul.f32 %v1062_v10, %v364_v57  ;;  %v515_v2 = vmul.f32 %v1068_v14, %v365_v58 }
  0x8c   : > { %917 = vst [vmem:[%s1094_s26 + $0x3b0] sm:$0xff] %v789_v54  ;;  %918 = vst [vmem:[%s1094_s26 + $0x3b8] sm:$0xff] %v790_v55  ;;  %v516_v3 = vmul.f32 %v1072_v16, %v366_v59  ;;  %v517_v4 = vmul.f32 %v1058_v8, %v367_v60  ;;  %v518_v5 = vmul.f32 %v1062_v10, %v368_v61 }
  0x8d   : > { %v519_v6 = vmul.f32 %v1068_v14, %v369_v62  ;;  %v520_v7 = vmul.f32 %v1072_v16, %v370_v63  ;;  %v663_v12 = vadd.f32 %v1060_v9, %v513_v0  ;;  %v664_v13 = vadd.f32 %v1064_v11, %v514_v1 }
  0x8e   : > { %v665_v18 = vadd.f32 %v1070_v15, %v515_v2  ;;  %v666_v19 = vadd.f32 %v1074_v17, %v516_v3  ;;  %v667_v8 = vadd.f32 %v1060_v9, %v517_v4  ;;  %v668_v10 = vadd.f32 %v1064_v11, %v518_v5 }
  0x8f   : > { %v669_v14 = vadd.f32 %v1070_v15, %v519_v6  ;;  %v670_v16 = vadd.f32 %v1074_v17, %v520_v7  ;;  %v791_v20 = vmax.f32 %v663_v12, 0.0  ;;  %v792_v21 = vmax.f32 %v664_v13, 0.0 }
  0x90   : > { %v793_v22 = vmax.f32 %v665_v18, 0.0  ;;  %v794_v23 = vmax.f32 %v666_v19, 0.0  ;;  %v795_v24 = vmax.f32 %v667_v8, 0.0  ;;  %v796_v25 = vmax.f32 %v668_v10, 0.0 }
  0x91   : > { %v797_v26 = vmax.f32 %v669_v14, 0.0  ;;  %v798_v27 = vmax.f32 %v670_v16, 0.0  ;;  %919 = vst [vmem:[%s1094_s26 + $0x3c0] sm:$0xff] %v791_v20  ;;  %920 = vst [vmem:[%s1094_s26 + $0x3c8] sm:$0xff] %v792_v21 }
  0x92   : > { %921 = vst [vmem:[%s1094_s26 + $0x3d0] sm:$0xff] %v793_v22  ;;  %922 = vst [vmem:[%s1094_s26 + $0x3d8] sm:$0xff] %v794_v23 }
  0x93   : > { %923 = vst [vmem:[%s1094_s26 + $0x3e0] sm:$0xff] %v795_v24  ;;  %924 = vst [vmem:[%s1094_s26 + $0x3e8] sm:$0xff] %v796_v25 }
  0x94   : > { %925 = vst [vmem:[%s1094_s26 + $0x3f0] sm:$0xff] %v797_v26  ;;  %926 = vst [vmem:[%s1094_s26 + $0x3f8] sm:$0xff] %v798_v27 }
  0x95 PF: > { %s13_s12 = sadd.s32 1, %s1014_s12  }
  0x96   : > { %p10_p4 = scmp.ge.s32.totalorder %s13_s12, 4  }
  0x98   :  { %12 = sbr.rel (!%p10_p4) target bundleno = 1 (0x1), region = 62 }

// kernel: bottleneck_forward.8
= control target key start
LH: loop header
LB: loop body
LE: loop exit
PB: predicated region body
PF: predicated region fallthrough
CT: control target
= control target key end

     0   :  { %s7378_s12 = smov 0   ;;  %s8477_s0 = inlined_call_operand.vmem [shape: bf16[2,20,20,128], index: 0, kind: input, shape index: {}]   ;;  %s8478_s1 = inlined_call_operand.vmem [shape: bf16[9,128,128], index: 1, kind: input, shape index: {}]   ;;  %s8479_s2 = inlined_call_operand.vmem [shape: bf16[2,256,128], index: 2, kind: output, shape index: {0}]   ;;  %s8480_s3 = inlined_call_operand.vmem [shape: f32[2,2,128], index: 3, kind: output, shape index: {1}]  }
   0x1 LB: > { %s5426_s13 = sadd.s32 4294967295, %s7356_s12   ;;  %p5430_p0 = scmp.ge.s32.totalorder %s7356_s12, 1  ;;  %s7356_s12 = sphi %s7378_s12, %s14_s12  }
   0x2   : > { %p140_p1 = scmp.lt.s32.totalorder %s7356_s12, 3 }
   0x4   : > { %p141_p2 = pnand %p5430_p0, %p140_p1 }
   0x5   : > { %v7222_v0 = vld [vmem:[%s8478_s1] sm:$0xff] (!%p141_p2)   ;;  %v7224_v2 = vld [vmem:[%s8478_s1 + $0x8] sm:$0xff] (!%p141_p2)   ;;  %p168_p3 = scmp.lt.s32.totalorder (!%p141_p2), %s5426_s13, 1  ;;  %v7226_v4 = vld [vmem:[%s8478_s1 + $0x10] sm:$0xff] (!%p141_p2)   ;;  %vm664_vm0 = vcmask (!%p141_p2), 1042432   ;;  %vm665_vm1 = vcmask (!%p141_p2), 1046532  }
   0x6   : > { %144 = sbr.rel (%p141_p2) target bundleno = 557 (0x22d), region = 28  ;;  %v7223_v1 = vld [vmem:[%s8478_s1 + $0x100] sm:$0xff] (!%p141_p2)   ;;  %6509 = vmatprep.subr.bf16.mxu1 (!%p141_p2), %v7222_v0  ;;  %v7225_v3 = vld [vmem:[%s8478_s1 + $0x108] sm:$0xff] (!%p141_p2)   ;;  %v7227_v5 = vld [vmem:[%s8478_s1 + $0x110] sm:$0xff] (!%p141_p2)   ;;  %vm1261_vm3 = vcmask (!%p141_p2), 1041408   ;;  %vm1262_vm4 = vcmask (!%p141_p2), 1045508  }
   0x7   : > { %6701 = vmatprep.subr.bf16.mxu0 (!%p141_p2), %v7223_v1  ;;  %6510 = vmatpush3.bf16.msra.mxu1 (!%p141_p2), %v7222_v0  ;;  %v7228_v6 = vld [vmem:[%s8478_s1 + $0x18] sm:$0xff] (!%p141_p2)   ;;  %v7230_v8 = vld [vmem:[%s8478_s1 + $0x20] sm:$0xff] (!%p141_p2)   ;;  %v7232_v10 = vld [vmem:[%s8478_s1 + $0x28] sm:$0xff] (!%p141_p2)  }
   0x8   : > { %6702 = vmatpush3.bf16.msra.mxu0 (!%p141_p2), %v7223_v1  ;;  %6511 = vmatprep.subr.bf16.mxu1 (!%p141_p2), %v7224_v2  ;;  %v7229_v7 = vld [vmem:[%s8478_s1 + $0x118] sm:$0xff] (!%p141_p2)   ;;  %v7231_v9 = vld [vmem:[%s8478_s1 + $0x120] sm:$0xff] (!%p141_p2)   ;;  %v7233_v11 = vld [vmem:[%s8478_s1 + $0x128] sm:$0xff] (!%p141_p2)  }
   0x9   : > { %6703 = vmatprep.subr.bf16.mxu0 (!%p141_p2), %v7225_v3  ;;  %vm7431_vm2 = vmor (!%p141_p2), %vm664_vm0, %vm665_vm1  ;;  %v7234_v20 = vld [vmem:[%s8478_s1 + $0x30] sm:$0xff] (!%p141_p2)   ;;  %v7236_v27 = vld [vmem:[%s8478_s1 + $0x38] sm:$0xff] (!%p141_p2)  }
   0xa   : > { %v7235_v24 = vld [vmem:[%s8478_s1 + $0x130] sm:$0xff] (!%p141_p2)   ;;  %v7237_v30 = vld [vmem:[%s8478_s1 + $0x138] sm:$0xff] (!%p141_p2)   ;;  %v7240_v41 = vld [vmem:[%s8478_s1 + $0x40] sm:$0xff] (!%p141_p2)  }
   0xb   : > { %6512 = vmatpush3.bf16.msra.mxu1 (!%p141_p2), %v7224_v2  ;;  %v7241_v47 = vld [vmem:[%s8478_s1 + $0x140] sm:$0xff] (!%p141_p2)   ;;  %v7242_v54 = vld [vmem:[%s8478_s1 + $0x148] sm:$0xff] (!%p141_p2)   ;;  %vm7540_vm5 = vmor (!%p141_p2), %vm1261_vm3, %vm1262_vm4 }
   0xc   : > { %6704 = vmatpush3.bf16.msra.mxu0 (!%p141_p2), %v7225_v3  ;;  %6513 = vmatprep.subr.bf16.mxu1 (!%p141_p2), %v7226_v4  ;;  %v7245_v61 = vld [vmem:[%s8478_s1 + $0x48] sm:$0xff] (!%p141_p2)  }
   0xd   : > { %s8486_s13 = smov (!%p168_p3, %s5426_s13), 1  ;;  %6705 = vmatprep.subr.bf16.mxu0 %v7227_v5 }
   0xe   : > { %s7213_s30 = smul.u32 240, %s8486_s13  ;;  %s5434_s9 = sshll.u32 %s8486_s13, 1 }
   0xf   : > { %6514 = vmatpush3.bf16.msra.mxu1 %v7226_v4  ;;  %s181_s15 = scalar_lea.vmem %s8480_s3, %s5434_s9 }
  0x10   : > { %6706 = vmatpush3.bf16.msra.mxu0 %v7227_v5  ;;  %6515 = vmatprep.subr.bf16.mxu1 %v7228_v6  ;;  %s7425_s14 = scalar_lea.vmem %s8477_s0, %s7213_s30 }
  0x11   : > { %6707 = vmatprep.subr.bf16.mxu0 %v7229_v7  ;;  %v7238_v12 = vld [vmem:[%s7425_s14] sm:$0xff]   ;;  %v5643_v14 = vld [vmem:[%s7425_s14 + $0x18] sm:$0xe]  ;;  %v5644_v15 = vld [vmem:[%s7425_s14 + $0x1c] sm:$0xf] }
  0x12   : > { %6525 = vmatprep.mubr.bf16.mxu1 %v7238_v12  ;;  %v5645_v16 = vld [vmem:[%s7425_s14 + $0x20] sm:$0x1]  ;;  %v5691_v17 = vrot.slane %v5643_v14, 9  ;;  %v2311_v18 = vrot.slane %v5644_v15, 5  ;;  %v5646_v23 = vld [vmem:[%s7425_s14 + $0x24] sm:$0xe] }
  0x13   : > { %6516 = vmatpush3.bf16.msra.mxu1 %v7228_v6  ;;  %v2314_v19 = vrot.slane %v5645_v16, 5  ;;  %v5647_v25 = vld [vmem:[%s7425_s14 + $0x28] sm:$0xf]  ;;  %v5648_v26 = vld [vmem:[%s7425_s14 + $0x2c] sm:$0x1]  ;;  %v5692_v32 = vrot.slane %v5646_v23, 9 }
  0x14   : > { %6708 = vmatpush3.bf16.msra.mxu0 %v7229_v7  ;;  %6517 = vmatprep.subr.bf16.mxu1 %v7230_v8  ;;  %v2312_v21 = vsel %vm7431_vm2, %v5691_v17, %v2311_v18  ;;  %v2313_v22 = vrot.slane %v2311_v18, 4  ;;  %v2318_v29 = vrot.slane %v5647_v25, 5  ;;  %v2321_v34 = vrot.slane %v5648_v26, 5  ;;  %v5649_v35 = vld [vmem:[%s7425_s14 + $0x30] sm:$0xe]  ;;  %v7243_v55 = vld [vmem:[%s7425_s14 + $0x18] sm:$0xff]  }
  0x15   : > { %6709 = vmatprep.subr.bf16.mxu0 %v7231_v9  ;;  %v5650_v36 = vld [vmem:[%s7425_s14 + $0x34] sm:$0xf]  ;;  %v5651_v37 = vld [vmem:[%s7425_s14 + $0x38] sm:$0x1]  ;;  %v5693_v38 = vrot.slane %v5649_v35, 9  ;;  %v7239_v50 = vld [vmem:[%s7425_s14 + $0xc] sm:$0xff]  }
  0x16   : > { %v2315_v28 = vsel %vm7431_vm2, %v2313_v22, %v2314_v19  ;;  %v2320_v33 = vrot.slane %v2318_v29, 4  ;;  %v2325_v39 = vrot.slane %v5650_v36, 5  ;;  %v2328_v40 = vrot.slane %v5651_v37, 5  ;;  %v5652_v45 = vld [vmem:[%s7425_s14 + $0x3c] sm:$0xe]  ;;  %v7244_v3 = vld [vmem:[%s7425_s14 + $0x24] sm:$0xff]  }
  0x17   : > { %6518 = vmatpush3.bf16.msra.mxu1 %v7230_v8  ;;  %v5723_v31 = vcombine.low %v2312_v21, %v2315_v28  ;;  %v2319_v42 = vsel %vm7431_vm2, %v5692_v32, %v2318_v29  ;;  %v5653_v46 = vld [vmem:[%s7425_s14 + $0x40] sm:$0xf]  ;;  %v5654_v48 = vld [vmem:[%s7425_s14 + $0x44] sm:$0x1]  ;;  %v5694_v56 = vrot.slane %v5652_v45, 9  ;;  %v7250_v7 = vld [vmem:[%s8478_s1 + $0x50] sm:$0xff]  }
  0x18   : > { %6710 = vmatpush3.bf16.msra.mxu0 %v7231_v9  ;;  %6519 = vmatprep.subr.bf16.mxu1 %v7232_v10  ;;  %v2322_v43 = vsel %vm7431_vm2, %v2320_v33, %v2321_v34  ;;  %v2327_v44 = vrot.slane %v2325_v39, 4  ;;  %v2332_v49 = vrot.slane %v5653_v46, 5  ;;  %v2326_v51 = vsel %vm7431_vm2, %v5693_v38, %v2325_v39  ;;  %v5655_v59 = vld [vmem:[%s7425_s14 + $0x48] sm:$0xe]  ;;  %v5656_v62 = vld [vmem:[%s7425_s14 + $0x4c] sm:$0xf] }
  0x19   : > { %6711 = vmatprep.subr.bf16.mxu0 %v7233_v11  ;;  %6717 = vmatprep.mubr.bf16.mxu0 %v5723_v31  ;;  %v5724_v53 = vcombine.low %v2319_v42, %v2322_v43  ;;  %v2335_v58 = vrot.slane %v5654_v48, 5  ;;  %v5657_v63 = vld [vmem:[%s7425_s14 + $0x50] sm:$0x1]  ;;  %v5695_v0 = vrot.slane %v5655_v59, 9  ;;  %v2339_v1 = vrot.slane %v5656_v62, 5  ;;  %v7247_v19 = vld [vmem:[%s8478_s1 + $0x158] sm:$0xff]  }
  0x1a   : > { %v2329_v52 = vsel %vm7431_vm2, %v2327_v44, %v2328_v40  ;;  %v2334_v57 = vrot.slane %v2332_v49, 4  ;;  %v2342_v2 = vrot.slane %v5657_v63, 5  ;;  %v2333_v4 = vsel %vm7431_vm2, %v5694_v56, %v2332_v49  ;;  %v5658_v8 = vld [vmem:[%s7425_s14 + $0x54] sm:$0xe]  ;;  %v5659_v9 = vld [vmem:[%s7425_s14 + $0x58] sm:$0xf] }
  0x1b   : > { %6520 = vmatpush3.bf16.msra.mxu1 %v7232_v10  ;;  %v5725_v60 = vcombine.low %v2326_v51, %v2329_v52  ;;  %v2341_v6 = vrot.slane %v2339_v1, 4  ;;  %v7246_v10 = vld [vmem:[%s8478_s1 + $0x150] sm:$0xff]   ;;  %v5660_v12 = vld [vmem:[%s7425_s14 + $0x5c] sm:$0x1]  ;;  %v2346_v14 = vrot.slane %v5659_v9, 5  ;;  %v5696_v17 = vrot.slane %v5658_v8, 9 }
  0x1c   : > { %6712 = vmatpush3.bf16.msra.mxu0 %v7233_v11  ;;  %6521 = vmatprep.subr.bf16.mxu1 %v7234_v20  ;;  %v2336_v5 = vsel %vm7431_vm2, %v2334_v57, %v2335_v58  ;;  %v2340_v11 = vsel %vm7431_vm2, %v5695_v0, %v2339_v1  ;;  %v7248_v15 = vld [vmem:[%s7425_s14 + $0x30] sm:$0xff]   ;;  %v2349_v21 = vrot.slane %v5660_v12, 5  ;;  %v5661_v23 = vld [vmem:[%s7425_s14 + $0x60] sm:$0xe]  ;;  %v5663_v25 = vld [vmem:[%s7425_s14 + $0x68] sm:$0x1] }
  0x1d   : > { %6713 = vmatprep.subr.bf16.mxu0 %v7235_v24  ;;  %v2343_v16 = vsel %vm7431_vm2, %v2341_v6, %v2342_v2  ;;  %v5726_v18 = vcombine.low %v2333_v4, %v2336_v5  ;;  %v5697_v26 = vrot.slane %v5661_v23, 9  ;;  %v2356_v28 = vrot.slane %v5663_v25, 5  ;;  %v5664_v31 = vld [vmem:[%s7425_s14 + $0x6c] sm:$0xe]  ;;  %v7249_v32 = vld [vmem:[%s7425_s14 + $0x3c] sm:$0xff]   ;;  %v7254_v59 = vld [vmem:[%s7425_s14 + $0x54] sm:$0xff]  }
  0x1e   : > { %v5727_v22 = vcombine.low %v2340_v11, %v2343_v16  ;;  %v2347_v33 = vsel %vm7431_vm2, %v5696_v17, %v2346_v14  ;;  %v5665_v35 = vld [vmem:[%s7425_s14 + $0x70] sm:$0xf]  ;;  %v5666_v36 = vld [vmem:[%s7425_s14 + $0x74] sm:$0x1]  ;;  %v7251_v37 = vld [vmem:[%s8478_s1 + $0x160] sm:$0xff]   ;;  %v5698_v42 = vrot.slane %v5664_v31, 9 }
  0x1f   : > { %6522 = vmatpush3.bf16.msra.mxu1 %v7234_v20  ;;  %v2348_v20 = vrot.slane %v2346_v14, 4  ;;  %v2360_v40 = vrot.slane %v5665_v35, 5  ;;  %v2363_v45 = vrot.slane %v5666_v36, 5  ;;  %v5748_v48 = vld [vmem:[%s7425_s14 + $0x1c] sm:$0xf]  ;;  %v7260_v56 = vld [vmem:[%s8478_s1 + $0x60] sm:$0xff]  }
  0x20   : > { %6714 = vmatpush3.bf16.msra.mxu0 %v7235_v24  ;;  %6523 = vmatprep.subr.bf16.mxu1 %v7236_v27  ;;  %v5662_v24 = vld [vmem:[%s7425_s14 + $0x64] sm:$0xf]  ;;  %v5749_v49 = vld [vmem:[%s7425_s14 + $0x20] sm:$0x3]  ;;  %v5751_v58 = vld [vmem:[%s7425_s14 + $0x28] sm:$0xf] }
  0x21   : > { %6715 = vmatprep.subr.bf16.mxu0 %v7237_v30  ;;  %v2350_v34 = vsel %vm7431_vm2, %v2348_v20, %v2349_v21  ;;  %v2362_v44 = vrot.slane %v2360_v40, 4  ;;  %v5750_v57 = vld [vmem:[%s7425_s14 + $0x24] sm:$0xc]  ;;  %v5752_v62 = vld [vmem:[%s7425_s14 + $0x2c] sm:$0x3]  ;;  %v2912_v63 = vrot.slane %v5751_v58, 6 }
  0x22   : > { %v5728_v43 = vcombine.low %v2347_v33, %v2350_v34  ;;  %v7256_v0 = vld [vmem:[%s8478_s1 + $0x170] sm:$0xff]   ;;  %v5796_v4 = vrot.slane %v5750_v57, 10  ;;  %v2915_v9 = vrot.slane %v5752_v62, 6  ;;  %v5755_v11 = vld [vmem:[%s7425_s14 + $0x38] sm:$0x3]  ;;  %v7264_v17 = vld [vmem:[%s8478_s1 + $0x68] sm:$0xff]  }
  0x23   : > { %6524 = vmatpush3.bf16.msra.mxu1 %v7236_v27  ;;  %v2353_v27 = vrot.slane %v5662_v24, 5  ;;  %v5753_v5 = vld [vmem:[%s7425_s14 + $0x30] sm:$0xc]  ;;  %v2914_v8 = vrot.slane %v2912_v63, 4  ;;  %v2922_v16 = vrot.slane %v5755_v11, 6 }
  0x24   : > { %6716 = vmatpush3.bf16.msra.mxu0 %v7237_v30  ;;  %6557 = vmatprep.subr.bf16.mxu1 %v7240_v41  ;;  %v7255_v30 = vld [vmem:[%s8478_s1 + $0x58] sm:$0xff]   ;;  %v5797_v14 = vrot.slane %v5753_v5, 10  ;;  %v5757_v20 = vld [vmem:[%s7425_s14 + $0x40] sm:$0xf]  ;;  %v5758_v21 = vld [vmem:[%s7425_s14 + $0x44] sm:$0x3]  ;;  %v2913_v24 = vsel %vm7540_vm5, %v5796_v4, %v2912_v63 }
  0x25   : > { %6749 = vmatprep.subr.bf16.mxu0 %v7241_v47  ;;  %v2355_v29 = vrot.slane %v2353_v27, 4  ;;  %v2354_v38 = vsel %vm7431_vm2, %v5697_v26, %v2353_v27  ;;  %v7259_v23 = vld [vmem:[%s7425_s14 + $0x6c] sm:$0xff]   ;;  %v2916_v25 = vsel %vm7540_vm5, %v2914_v8, %v2915_v9  ;;  %v7261_v26 = vld [vmem:[%s8478_s1 + $0x180] sm:$0xff]   ;;  %v7262_v27 = vld [vmem:[%s7425_s14 + $0x78] sm:$0xff]  }
  0x26   : > { %6526 = vmatmul.mubr.bf16.vlgmr.msra.gmra.mrb[0].mxu1 %v7239_v50  ;;  %v7252_v50 = vld [vmem:[%s8478_s1 + $0x168] sm:$0xff]   ;;  %v5761_v34 = vld [vmem:[%s7425_s14 + $0x50] sm:$0x3]  ;;  %v5828_v36 = vcombine.low %v2913_v24, %v2916_v25  ;;  %v5770_v8 = vld [vmem:[%s7425_s14 + $0x74] sm:$0x3] }
  0x27   : > { %6718 = vmatmul.mubr.bf16.vlgmr.msra.gmra.mrb[0].mxu0 %v5724_v53  ;;  %6558 = vmatpush3.bf16.msra.mxu1 %v7240_v41  ;;  %v2357_v39 = vsel %vm7431_vm2, %v2355_v29, %v2356_v28  ;;  %v7253_v41 = vld [vmem:[%s7425_s14 + $0x48] sm:$0xff]   ;;  %v2905_v53 = vrot.slane %v5748_v48, 6  ;;  %v7268_v35 = vld [vmem:[%s8478_s1 + $0x70] sm:$0xff]   ;;  %v569_v11 = vld [vmem:[%s7425_s14 + $0x4] sm:$0xf] }
  0x28   : > { %6750 = vmatpush3.bf16.msra.mxu0 %v7241_v47  ;;  %6529 = vmatprep.mubr.bf16.mxu1 %v7243_v55  ;;  %v5729_v46 = vcombine.low %v2354_v38, %v2357_v39  ;;  %v5747_v47 = vld [vmem:[%s7425_s14 + $0x18] sm:$0xc]  ;;  %v5759_v31 = vld [vmem:[%s7425_s14 + $0x48] sm:$0xc]  ;;  %v5760_v33 = vld [vmem:[%s7425_s14 + $0x4c] sm:$0xf] }
  0x29   : > { %6751 = vmatprep.subr.bf16.mxu0 %v7242_v54  ;;  %6721 = vmatprep.mubr.bf16.mxu0 %v5725_v60  ;;  %v5795_v52 = vrot.slane %v5747_v47, 10  ;;  %v2907_v55 = vrot.slane %v2905_v53, 4  ;;  %v2361_v60 = vsel %vm7431_vm2, %v5698_v42, %v2360_v40  ;;  %v2933_v38 = vrot.slane %v5760_v33, 6  ;;  %v7265_v42 = vld [vmem:[%s8478_s1 + $0x188] sm:$0xff]   ;;  %v5764_v47 = vld [vmem:[%s7425_s14 + $0x5c] sm:$0x3] }
  0x2a   : > { %6559 = vmatprep.subr.bf16.mxu1 %v7245_v61  ;;  %v5799_v40 = vrot.slane %v5759_v31, 10  ;;  %v7263_v48 = vld [vmem:[%s7425_s14 + $0x84] sm:$0xff]   ;;  %v2943_v63 = vrot.slane %v5764_v47, 6  ;;  %v5773_v24 = vld [vmem:[%s7425_s14 + $0x80] sm:$0x3] }
  0x2b   : > { %6560 = vmatpush3.bf16.msra.mxu1 %v7245_v61  ;;  %v2364_v61 = vsel %vm7431_vm2, %v2362_v44, %v2363_v45  ;;  %v2906_v1 = vsel %vm7540_vm5, %v5795_v52, %v2905_v53  ;;  %v5763_v44 = vld [vmem:[%s7425_s14 + $0x58] sm:$0xf]  ;;  %v5762_v45 = vld [vmem:[%s7425_s14 + $0x54] sm:$0xc]  ;;  %v5767_v57 = vld [vmem:[%s7425_s14 + $0x68] sm:$0x3] }
  0x2c   : > { %6752 = vmatpush3.bf16.msra.mxu0 %v7242_v54  ;;  %6561 = vmatprep.subr.bf16.mxu1 %v7250_v7  ;;  %v2908_v54 = vrot.slane %v5749_v49, 6  ;;  %v5730_v6 = vcombine.low %v2361_v60, %v2364_v61  ;;  %v2940_v53 = vrot.slane %v5763_v44, 6  ;;  %v5800_v60 = vrot.slane %v5762_v45, 10  ;;  %v7270_v25 = vld [vmem:[%s7425_s14 + $0xa8] sm:$0xff]  }
  0x2d   : > { %6753 = vmatprep.subr.bf16.mxu0 %v7246_v10  ;;  %v2950_v5 = vrot.slane %v5767_v57, 6  ;;  %v5776_v47 = vld [vmem:[%s7425_s14 + $0x8c] sm:$0x3] }
  0x2e   : > { %6530 = vmatmul.mubr.bf16.gmra.mrb[4].mxu1 %v7244_v3  ;;  %v2909_v2 = vsel %vm7540_vm5, %v2907_v55, %v2908_v54  ;;  %v7258_v3 = vld [vmem:[%s7425_s14 + $0x60] sm:$0xff]  }
  0x2f   : > { %6722 = vmatmul.mubr.bf16.gmra.mrb[4].mxu0 %v5726_v18  ;;  %6533 = vmatprep.mubr.bf16.mxu1 %v7248_v15  ;;  %v5827_v12 = vcombine.low %v2906_v1, %v2909_v2  ;;  %v5765_v54 = vld [vmem:[%s7425_s14 + $0x60] sm:$0xc]  ;;  %v5766_v55 = vld [vmem:[%s7425_s14 + $0x64] sm:$0xf]  ;;  %v7620_v1 = vld [vmem:[%s7425_s14 + $0x6c] sm:$0xc] }
  0x30   : > { %6754 = vmatpush3.bf16.msra.mxu0 %v7246_v10  ;;  %6725 = vmatprep.mubr.bf16.mxu0 %v5727_v22  ;;  %v5754_v10 = vld [vmem:[%s7425_s14 + $0x34] sm:$0xf]  ;;  %v2926_v22 = vrot.slane %v5757_v20, 6  ;;  %v2947_v58 = vrot.slane %v5766_v55, 6  ;;  %v2942_v2 = vrot.slane %v2940_v53, 4  ;;  %v5802_v9 = vrot.slane %v7620_v1, 10 }
  0x31   : > { %6755 = vmatprep.subr.bf16.mxu0 %v7247_v19  ;;  %6562 = vmatpush3.bf16.msra.mxu1 %v7250_v7  ;;  %v7257_v7 = vld [vmem:[%s8478_s1 + $0x178] sm:$0xff]   ;;  %v2919_v15 = vrot.slane %v5754_v10, 6  ;;  %v576_v55 = vld [vmem:[%s7425_s14 + $0x20] sm:$0x1]  ;;  %v2971_v1 = vrot.slane %v5776_v47, 6 }
  0x32   : > { %6563 = vmatprep.subr.bf16.mxu1 %v7255_v30  ;;  %v2949_v4 = vrot.slane %v2947_v58, 4 }
  0x33   : > { %v2921_v18 = vrot.slane %v2919_v15, 4  ;;  %v2920_v28 = vsel %vm7540_vm5, %v5797_v14, %v2919_v15  ;;  %v568_v14 = vld [vmem:[%s7425_s14] sm:$0xe]  ;;  %v570_v15 = vld [vmem:[%s7425_s14 + $0x8] sm:$0x1] }
  0x34   : > { %6756 = vmatpush3.bf16.msra.mxu0 %v7247_v19  ;;  %v5756_v19 = vld [vmem:[%s7425_s14 + $0x3c] sm:$0xc]  ;;  %v5459_v31 = vrot.slane %v568_v14, 9  ;;  %v579_v14 = vld [vmem:[%s7425_s14 + $0x2c] sm:$0x1] }
  0x35   : > { %6757 = vmatprep.subr.bf16.mxu0 %v7251_v37  ;;  %6564 = vmatpush3.bf16.msra.mxu1 %v7255_v30  ;;  %v2923_v29 = vsel %vm7540_vm5, %v2921_v18, %v2922_v16  ;;  %v5798_v30 = vrot.slane %v5756_v19, 10  ;;  %v669_v16 = vrot.slane %v569_v11, 5  ;;  %v7267_v18 = vld [vmem:[%s7425_s14 + $0x9c] sm:$0xff]   ;;  %v2944_v19 = vsel %vm7540_vm5, %v2942_v2, %v2943_v63  ;;  %v5779_v2 = vld [vmem:[%s7425_s14 + $0x98] sm:$0x3] }
  0x36   : > { %6534 = vmatmul.mubr.bf16.gmra.mrb[8].mxu1 %v7249_v32  ;;  %6565 = vmatprep.subr.bf16.mxu1 %v7260_v56  ;;  %v2929_v32 = vrot.slane %v5758_v21, 6  ;;  %v5829_v39 = vcombine.low %v2920_v28, %v2923_v29  ;;  %v2951_v21 = vsel %vm7540_vm5, %v2949_v4, %v2950_v5  ;;  %v7650_v28 = vld [vmem:[%s7425_s14 + $0xc] sm:$0xe]  ;;  %v7653_v29 = vld [vmem:[%s7425_s14 + $0x10] sm:$0xf] }
  0x37   : > { %6726 = vmatmul.mubr.bf16.gmra.mrb[8].mxu0 %v5728_v43  ;;  %6537 = vmatprep.mubr.bf16.mxu1 %v7253_v41  ;;  %v2936_v41 = vrot.slane %v5761_v34, 6  ;;  %v2935_v43 = vrot.slane %v2933_v38, 4  ;;  %v676_v33 = vrot.slane %v7653_v29, 5  ;;  %v7275_v34 = vld [vmem:[%s8478_s1 + $0x1a0] sm:$0xff]   ;;  %v670_v57 = vsel %vm7431_vm2, %v5459_v31, %v669_v16 }
  0x38   : > { %6758 = vmatpush3.bf16.msra.mxu0 %v7251_v37  ;;  %6729 = vmatprep.mubr.bf16.mxu0 %v5729_v46  ;;  %v2928_v37 = vrot.slane %v2926_v22, 4  ;;  %v2927_v46 = vsel %vm7540_vm5, %v5798_v30, %v2926_v22  ;;  %v5771_v22 = vld [vmem:[%s7425_s14 + $0x78] sm:$0xc]  ;;  %v577_v4 = vld [vmem:[%s7425_s14 + $0x24] sm:$0xe] }
  0x39   : > { %6759 = vmatprep.subr.bf16.mxu0 %v7252_v50  ;;  %6566 = vmatpush3.bf16.msra.mxu1 %v7260_v56  ;;  %v2937_v52 = vsel %vm7540_vm5, %v2935_v43, %v2936_v41  ;;  %v7269_v56 = vld [vmem:[%s8478_s1 + $0x190] sm:$0xff]   ;;  %v2964_v41 = vrot.slane %v5773_v24, 6  ;;  %v7665_v43 = vld [vmem:[%s7425_s14 + $0x88] sm:$0xf]  ;;  %v678_v44 = vrot.slane %v676_v33, 4 }
  0x3a   : > { %6567 = vmatprep.subr.bf16.mxu1 %v7264_v17  ;;  %v2930_v49 = vsel %vm7540_vm5, %v2928_v37, %v2929_v32  ;;  %v7656_v32 = vld [vmem:[%s7425_s14 + $0x14] sm:$0x1]  ;;  %v672_v37 = vrot.slane %v570_v15, 5  ;;  %v5782_v24 = vld [vmem:[%s7425_s14 + $0xa4] sm:$0x3] }
  0x3b   : > { %v5830_v61 = vcombine.low %v2927_v46, %v2930_v49  ;;  %v679_v45 = vrot.slane %v7656_v32, 5  ;;  %v5774_v46 = vld [vmem:[%s7425_s14 + $0x84] sm:$0xc]  ;;  %v7277_v49 = vld [vmem:[%s8478_s1 + $0x1a8] sm:$0xff]  }
  0x3c   : > { %6760 = vmatpush3.bf16.msra.mxu0 %v7252_v50  ;;  %v2934_v50 = vsel %vm7540_vm5, %v5799_v40, %v2933_v38  ;;  %v5803_v38 = vrot.slane %v5771_v22, 10  ;;  %v5780_v22 = vld [vmem:[%s7425_s14 + $0x9c] sm:$0xc] }
  0x3d   : > { %6761 = vmatprep.subr.bf16.mxu0 %v7256_v0  ;;  %6568 = vmatpush3.bf16.msra.mxu1 %v7264_v17  ;;  %v5831_v62 = vcombine.low %v2934_v50, %v2937_v52  ;;  %v7636_v17 = vld [vmem:[%s8478_s1 + $0x80] sm:$0xff]   ;;  %v680_v31 = vsel %vm7431_vm2, %v678_v44, %v679_v45  ;;  %v5784_v45 = vld [vmem:[%s7425_s14 + $0xac] sm:$0xf] }
  0x3e   : > { %6538 = vmatmul.mubr.bf16.gmra.mrb[12].mxu1 %v7254_v59  ;;  %6569 = vmatprep.subr.bf16.mxu1 %v7268_v35  ;;  %v7266_v59 = vld [vmem:[%s7425_s14 + $0x90] sm:$0xff]  }
  0x3f   : > { %6730 = vmatmul.mubr.bf16.gmra.mrb[12].mxu0 %v5730_v6  ;;  %6541 = vmatprep.mubr.bf16.mxu1 %v7258_v3  ;;  %v5801_v3 = vrot.slane %v5765_v54, 10  ;;  %v5769_v6 = vld [vmem:[%s7425_s14 + $0x70] sm:$0xf]  ;;  %v575_v54 = vld [vmem:[%s7425_s14 + $0x1c] sm:$0xf] }
  0x40   : > { %6762 = vmatpush3.bf16.msra.mxu0 %v7256_v0  ;;  %6765 = vmatprep.mubr.bf16.mxu0 %v5827_v12  ;;  %v7272_v0 = vld [vmem:[%s8478_s1 + $0x78] sm:$0xff]   ;;  %v2954_v10 = vrot.slane %v5769_v6, 6  ;;  %v2941_v12 = vsel %vm7540_vm5, %v5800_v60, %v2940_v53  ;;  %v683_v60 = vrot.slane %v575_v54, 5  ;;  %v7276_v54 = vld [vmem:[%s8478_s1 + $0x88] sm:$0xff]  }
  0x41   : > { %6763 = vmatprep.subr.bf16.mxu0 %v7257_v7  ;;  %6570 = vmatpush3.bf16.msra.mxu1 %v7268_v35  ;;  %v2948_v20 = vsel %vm7540_vm5, %v5801_v3, %v2947_v58  ;;  %v5832_v35 = vcombine.low %v2941_v12, %v2944_v19  ;;  %v574_v53 = vld [vmem:[%s7425_s14 + $0x18] sm:$0xe]  ;;  %v2978_v19 = vrot.slane %v5779_v2, 6 }
  0x42   : > { %6571 = vmatprep.subr.bf16.mxu1 %v7272_v0  ;;  %v2956_v30 = vrot.slane %v2954_v10, 4  ;;  %v2955_v50 = vsel %vm7540_vm5, %v5802_v9, %v2954_v10  ;;  %v5461_v6 = vrot.slane %v574_v53, 9  ;;  %v578_v9 = vld [vmem:[%s7425_s14 + $0x28] sm:$0xf]  ;;  %v685_v12 = vrot.slane %v683_v60, 4 }
  0x43   : > { %v690_v15 = vrot.slane %v578_v9, 5 }
  0x44   : > { %6764 = vmatpush3.bf16.msra.mxu0 %v7257_v7  ;;  %v7273_v7 = vld [vmem:[%s8478_s1 + $0x198] sm:$0xff]  }
  0x45   : > { %6797 = vmatprep.subr.bf16.mxu0 %v7261_v26  ;;  %6572 = vmatpush3.bf16.msra.mxu1 %v7272_v0 }
  0x46   : > { %6542 = vmatmul.mubr.bf16.gmra.mrb[16].mxu1 %v7259_v23  ;;  %v5772_v23 = vld [vmem:[%s7425_s14 + $0x7c] sm:$0xf]  ;;  %6605 = vmatprep.subr.bf16.mxu1 %v7636_v17 }
  0x47   : > { %6766 = vmatmul.mubr.bf16.vlgmr.msra.gmra.mrb[0].mxu0 %v5828_v36  ;;  %6545 = vmatprep.mubr.bf16.mxu1 %v7262_v27  ;;  %v2961_v27 = vrot.slane %v5772_v23, 6  ;;  %v5833_v36 = vcombine.low %v2948_v20, %v2951_v21  ;;  %v5462_v20 = vrot.slane %v577_v4, 9  ;;  %v7279_v21 = vld [vmem:[%s8478_s1 + $0x1b0] sm:$0xff]   ;;  %v5781_v23 = vld [vmem:[%s7425_s14 + $0xa0] sm:$0xf] }
  0x48   : > { %6798 = vmatpush3.bf16.msra.mxu0 %v7261_v26  ;;  %6769 = vmatprep.mubr.bf16.mxu0 %v5829_v39  ;;  %v2957_v26 = vrot.slane %v5770_v8, 6  ;;  %v671_v39 = vrot.slane %v669_v16, 4  ;;  %v5787_v4 = vld [vmem:[%s7425_s14 + $0xb8] sm:$0xf] }
  0x49   : > { %6799 = vmatprep.subr.bf16.mxu0 %v7265_v42  ;;  %v2963_v40 = vrot.slane %v2961_v27, 4  ;;  %v2962_v63 = vsel %vm7540_vm5, %v5803_v38, %v2961_v27  ;;  %v693_v27 = vrot.slane %v579_v14, 5  ;;  %v2985_v38 = vrot.slane %v5782_v24, 6  ;;  %v5790_v24 = vld [vmem:[%s7425_s14 + $0xc4] sm:$0xf] }
  0x4a   : > { %v2958_v52 = vsel %vm7540_vm5, %v2956_v30, %v2957_v26  ;;  %v673_v58 = vsel %vm7431_vm2, %v671_v39, %v672_v37  ;;  %v692_v26 = vrot.slane %v690_v15, 4  ;;  %v7281_v30 = vld [vmem:[%s8478_s1 + $0x1b8] sm:$0xff]   ;;  %v5806_v37 = vrot.slane %v5780_v22, 10 }
  0x4b   : > { %v2965_v0 = vsel %vm7540_vm5, %v2963_v40, %v2964_v41  ;;  %v5834_v10 = vcombine.low %v2955_v50, %v2958_v52  ;;  %v5491_v11 = vcombine.low %v670_v57, %v673_v58  ;;  %v582_v39 = vld [vmem:[%s7425_s14 + $0x38] sm:$0x1]  ;;  %v5783_v40 = vld [vmem:[%s7425_s14 + $0xa8] sm:$0xc]  ;;  %v2989_v50 = vrot.slane %v5784_v45, 6 }
  0x4c   : > { %6800 = vmatpush3.bf16.msra.mxu0 %v7265_v42  ;;  %v5460_v42 = vrot.slane %v7650_v28, 9  ;;  %v5835_v16 = vcombine.low %v2962_v63, %v2965_v0  ;;  %v2982_v28 = vrot.slane %v5781_v23, 6  ;;  %v7733_v53 = vsel %vm7431_vm2, %v5462_v20, %v690_v15  ;;  %v583_v57 = vld [vmem:[%s7425_s14 + $0x3c] sm:$0xe]  ;;  %v584_v58 = vld [vmem:[%s7425_s14 + $0x40] sm:$0xf] }
  0x4d   : > { %6801 = vmatprep.subr.bf16.mxu0 %v7269_v56  ;;  %v585_v63 = vld [vmem:[%s7425_s14 + $0x44] sm:$0x1]  ;;  %v2991_v2 = vrot.slane %v2989_v50, 4  ;;  %v586_v15 = vld [vmem:[%s7425_s14 + $0x48] sm:$0xe] }
  0x4e   : > { %6546 = vmatmul.mubr.bf16.gmra.mrb[20].mxu1 %v7263_v48  ;;  %v2968_v48 = vrot.slane %v7665_v43, 6  ;;  %v2984_v43 = vrot.slane %v2982_v28, 4  ;;  %v2983_v0 = vsel %vm7540_vm5, %v5806_v37, %v2982_v28  ;;  %v707_v22 = vrot.slane %v585_v63, 5  ;;  %v5789_v23 = vld [vmem:[%s7425_s14 + $0xc0] sm:$0xc] }
  0x4f   : > { %6770 = vmatmul.mubr.bf16.gmra.mrb[4].mxu0 %v5830_v61  ;;  %6549 = vmatprep.mubr.bf16.mxu1 %v7266_v59  ;;  %v5804_v59 = vrot.slane %v5774_v46, 10  ;;  %v5777_v61 = vld [vmem:[%s7425_s14 + $0x90] sm:$0xc]  ;;  %v5785_v46 = vld [vmem:[%s7425_s14 + $0xb0] sm:$0x3]  ;;  %v5809_v37 = vrot.slane %v5789_v23, 10 }
  0x50   : > { %6773 = vmatprep.mubr.bf16.mxu0 %v5831_v62  ;;  %6802 = vmatpush3.bf16.msra.mxu0 %v7269_v56  ;;  %v7271_v56 = vld [vmem:[%s7425_s14 + $0xb4] sm:$0xff]   ;;  %v2970_v5 = vrot.slane %v2968_v48, 4  ;;  %v5805_v8 = vrot.slane %v5777_v61, 10  ;;  %v5807_v61 = vrot.slane %v5783_v40, 10  ;;  %v5791_v28 = vld [vmem:[%s7425_s14 + $0xc8] sm:$0x3] }
  0x51   : > { %6803 = vmatprep.subr.bf16.mxu0 %v7273_v7  ;;  %v5778_v62 = vld [vmem:[%s7425_s14 + $0x94] sm:$0xf]  ;;  %v2969_v29 = vsel %vm7540_vm5, %v5804_v59, %v2968_v48  ;;  %v591_v45 = vld [vmem:[%s7425_s14 + $0x5c] sm:$0x1]  ;;  %v594_v63 = vld [vmem:[%s7425_s14 + $0x68] sm:$0x1] }
  0x52   : > { %v2975_v3 = vrot.slane %v5778_v62, 6  ;;  %v2972_v32 = vsel %vm7540_vm5, %v2970_v5, %v2971_v1  ;;  %v2992_v62 = vrot.slane %v5785_v46, 6  ;;  %v2986_v1 = vsel %vm7540_vm5, %v2984_v43, %v2985_v38  ;;  %v7280_v38 = vld [vmem:[%s8478_s1 + $0x98] sm:$0xff]   ;;  %v589_v43 = vld [vmem:[%s7425_s14 + $0x54] sm:$0xe] }
  0x53   : > { %v5836_v48 = vcombine.low %v2969_v29, %v2972_v32  ;;  %v5464_v5 = vrot.slane %v583_v57, 9  ;;  %v5465_v32 = vrot.slane %v586_v15, 9  ;;  %v7283_v57 = vld [vmem:[%s8478_s1 + $0xa0] sm:$0xff]  }
  0x54   : > { %6804 = vmatpush3.bf16.msra.mxu0 %v7273_v7  ;;  %v686_v7 = vrot.slane %v576_v55, 5  ;;  %v2976_v41 = vsel %vm7540_vm5, %v5805_v8, %v2975_v3  ;;  %v2993_v20 = vsel %vm7540_vm5, %v2991_v2, %v2992_v62  ;;  %v593_v62 = vld [vmem:[%s7425_s14 + $0x64] sm:$0xf] }
  0x55   : > { %6805 = vmatprep.subr.bf16.mxu0 %v7275_v34 }
  0x56   : > { %6550 = vmatmul.mubr.bf16.gmra.mrb[24].mxu1 %v7267_v18  ;;  %v2977_v18 = vrot.slane %v2975_v3, 4  ;;  %v704_v3 = vrot.slane %v584_v58, 5 }
  0x57   : > { %6774 = vmatmul.mubr.bf16.gmra.mrb[8].mxu0 %v5832_v35  ;;  %6553 = vmatprep.mubr.bf16.mxu1 %v7270_v25  ;;  %v677_v25 = vsel %vm7431_vm2, %v5460_v42, %v676_v33  ;;  %v580_v33 = vld [vmem:[%s7425_s14 + $0x30] sm:$0xe]  ;;  %v684_v35 = vsel %vm7431_vm2, %v5461_v6, %v683_v60  ;;  %v694_v60 = vsel %vm7431_vm2, %v692_v26, %v693_v27 }
  0x58   : > { %6777 = vmatprep.mubr.bf16.mxu0 %v5833_v36  ;;  %6806 = vmatpush3.bf16.msra.mxu0 %v7275_v34  ;;  %v581_v34 = vld [vmem:[%s7425_s14 + $0x34] sm:$0xf]  ;;  %v687_v36 = vsel %vm7431_vm2, %v685_v12, %v686_v7  ;;  %v2979_v42 = vsel %vm7540_vm5, %v2977_v18, %v2978_v19  ;;  %v5492_v47 = vcombine.low %v677_v25, %v680_v31  ;;  %v7761_v12 = vld [vmem:[%s8478_s1 + $0x1c0] sm:$0xff]   ;;  %v588_v18 = vld [vmem:[%s7425_s14 + $0x50] sm:$0x1] }
  0x59   : > { %6807 = vmatprep.subr.bf16.mxu0 %v7277_v49  ;;  %v697_v44 = vrot.slane %v581_v34, 5  ;;  %v5493_v52 = vcombine.low %v684_v35, %v687_v36  ;;  %v5837_v59 = vcombine.low %v2976_v41, %v2979_v42  ;;  %v7278_v6 = vld [vmem:[%s8478_s1 + $0x90] sm:$0xff]   ;;  %v5494_v14 = vcombine.low %v7733_v53, %v694_v60  ;;  %v590_v34 = vld [vmem:[%s7425_s14 + $0x58] sm:$0xf] }
  0x5a   : > { %v5786_v7 = vld [vmem:[%s7425_s14 + $0xb4] sm:$0xc]  ;;  %v2990_v19 = vsel %vm7540_vm5, %v5807_v61, %v2989_v50  ;;  %v3006_v42 = vrot.slane %v5791_v28, 6  ;;  %v718_v46 = vrot.slane %v590_v34, 5  ;;  %v5466_v60 = vrot.slane %v589_v43, 9  ;;  %v7295_v43 = vld [vmem:[%s8478_s1 + $0xb8] sm:$0xff]  }
  0x5b   : > { %v699_v55 = vrot.slane %v697_v44, 4  ;;  %v5808_v26 = vrot.slane %v5786_v7, 10  ;;  %v5839_v35 = vcombine.low %v2990_v19, %v2993_v20  ;;  %v721_v61 = vrot.slane %v591_v45, 5 }
  0x5c   : > { %6808 = vmatpush3.bf16.msra.mxu0 %v7277_v49  ;;  %v5463_v49 = vrot.slane %v580_v33, 9  ;;  %v714_v33 = vrot.slane %v588_v18, 5  ;;  %v720_v2 = vrot.slane %v718_v46, 4  ;;  %v719_v18 = vsel %vm7431_vm2, %v5466_v60, %v718_v46  ;;  %v7289_v60 = vld [vmem:[%s8478_s1 + $0x1c8] sm:$0xff]  }
  0x5d   : > { %6809 = vmatprep.subr.bf16.mxu0 %v7279_v21 }
  0x5e   : > { %6554 = vmatmul.mubr.bf16.gmra.mrb[28].mxu1 %v7271_v56  ;;  %v700_v56 = vrot.slane %v582_v39, 5  ;;  %v698_v8 = vsel %vm7431_vm2, %v5463_v49, %v697_v44  ;;  %v705_v39 = vsel %vm7431_vm2, %v5464_v5, %v704_v3  ;;  %v722_v19 = vsel %vm7431_vm2, %v720_v2, %v721_v61  ;;  %v611_v2 = vld [vmem:[%s7425_s14 + $0xac] sm:$0xf] }
  0x5f   : > { %6778 = vmatmul.mubr.bf16.gmra.mrb[12].mxu0 %v5834_v10  ;;  %6573 = vmatprep.mubr.bf16.mxu1 %v5491_v11  ;;  %v5788_v10 = vld [vmem:[%s7425_s14 + $0xbc] sm:$0x3]  ;;  %v2996_v11 = vrot.slane %v5787_v4, 6  ;;  %v5498_v28 = vcombine.low %v719_v18, %v722_v19  ;;  %v7290_v19 = vld [vmem:[%s7425_s14 + $0x60] sm:$0xff]  }
  0x60   : > { %6781 = vmatprep.mubr.bf16.mxu0 %v5835_v16  ;;  %6810 = vmatpush3.bf16.msra.mxu0 %v7279_v21  ;;  %v701_v9 = vsel %vm7431_vm2, %v699_v55, %v700_v56  ;;  %v587_v16 = vld [vmem:[%s7425_s14 + $0x4c] sm:$0xf]  ;;  %v706_v21 = vrot.slane %v704_v3, 4  ;;  %v2999_v29 = vrot.slane %v5788_v10, 6  ;;  %v592_v56 = vld [vmem:[%s7425_s14 + $0x60] sm:$0xe] }
  0x61   : > { %6811 = vmatprep.subr.bf16.mxu0 %v7281_v30  ;;  %v5495_v25 = vcombine.low %v698_v8, %v701_v9  ;;  %v711_v27 = vrot.slane %v587_v16, 5  ;;  %v2998_v31 = vrot.slane %v2996_v11, 4  ;;  %v2997_v44 = vsel %vm7540_vm5, %v5808_v26, %v2996_v11  ;;  %v596_v8 = vld [vmem:[%s7425_s14 + $0x70] sm:$0xf]  ;;  %v7287_v16 = vld [vmem:[%s8478_s1 + $0xa8] sm:$0xff]  }
  0x62   : > { %v708_v40 = vsel %vm7431_vm2, %v706_v21, %v707_v22  ;;  %v725_v3 = vrot.slane %v593_v62, 5  ;;  %v5467_v7 = vrot.slane %v592_v56, 9  ;;  %v728_v11 = vrot.slane %v594_v63, 5  ;;  %v598_v21 = vld [vmem:[%s7425_s14 + $0x78] sm:$0xe] }
  0x63   : > { %v713_v36 = vrot.slane %v711_v27, 4  ;;  %v712_v49 = vsel %vm7431_vm2, %v5465_v32, %v711_v27  ;;  %v5496_v53 = vcombine.low %v705_v39, %v708_v40  ;;  %v732_v15 = vrot.slane %v596_v8, 5  ;;  %v599_v22 = vld [vmem:[%s7425_s14 + $0x7c] sm:$0xf]  ;;  %v600_v26 = vld [vmem:[%s7425_s14 + $0x80] sm:$0x1] }
  0x64   : > { %6812 = vmatpush3.bf16.msra.mxu0 %v7281_v30  ;;  %v3003_v30 = vrot.slane %v5790_v24, 6  ;;  %v727_v10 = vrot.slane %v725_v3, 4  ;;  %v726_v24 = vsel %vm7431_vm2, %v5467_v7, %v725_v3  ;;  %v739_v27 = vrot.slane %v599_v22, 5  ;;  %v7282_v32 = vld [vmem:[%s7425_s14 + $0x30] sm:$0xff]   ;;  %v602_v39 = vld [vmem:[%s7425_s14 + $0x88] sm:$0xf] }
  0x65   : > { %6845 = vmatprep.subr.bf16.mxu0 %v7761_v12  ;;  %v715_v50 = vsel %vm7431_vm2, %v713_v36, %v714_v33  ;;  %v734_v33 = vrot.slane %v732_v15, 4  ;;  %v5469_v34 = vrot.slane %v598_v21, 9  ;;  %v742_v36 = vrot.slane %v600_v26, 5  ;;  %v601_v40 = vld [vmem:[%s7425_s14 + $0x84] sm:$0xe] }
  0x66   : > { %6574 = vmatmul.mubr.bf16.vlgmr.msra.gmra.mrb[0].mxu1 %v5492_v47  ;;  %v3005_v41 = vrot.slane %v3003_v30, 4  ;;  %v5793_v47 = vld [vmem:[%s7425_s14 + $0xd0] sm:$0xf]  ;;  %v3004_v58 = vsel %vm7540_vm5, %v5809_v37, %v3003_v30  ;;  %v746_v46 = vrot.slane %v602_v39, 5  ;;  %v5470_v56 = vrot.slane %v601_v40, 9  ;;  %v7301_v39 = vld [vmem:[%s8478_s1 + $0x1e0] sm:$0xff]  }
  0x67   : > { %6782 = vmatmul.mubr.bf16.gmra.mrb[16].mxu0 %v5836_v48  ;;  %6606 = vmatpush3.bf16.msra.mxu1 %v7636_v17  ;;  %v5838_v17 = vcombine.low %v2983_v0, %v2986_v1  ;;  %v3000_v48 = vsel %vm7540_vm5, %v2998_v31, %v2999_v29  ;;  %v3010_v55 = vrot.slane %v5793_v47, 6  ;;  %v5497_v1 = vcombine.low %v712_v49, %v715_v50  ;;  %v7291_v29 = vld [vmem:[%s8478_s1 + $0xb0] sm:$0xff]   ;;  %v609_v3 = vld [vmem:[%s7425_s14 + $0xa4] sm:$0x1]  ;;  %v610_v8 = vld [vmem:[%s7425_s14 + $0xa8] sm:$0xe] }
  0x68   : > { %6577 = vmatprep.mubr.bf16.mxu1 %v5493_v52  ;;  %6785 = vmatprep.mubr.bf16.mxu0 %v5837_v59  ;;  %v5792_v52 = vld [vmem:[%s7425_s14 + $0xcc] sm:$0xc]  ;;  %v3007_v59 = vsel %vm7540_vm5, %v3005_v41, %v3006_v42  ;;  %v5840_v0 = vcombine.low %v2997_v44, %v3000_v48  ;;  %v603_v41 = vld [vmem:[%s7425_s14 + $0x8c] sm:$0x1]  ;;  %v605_v42 = vld [vmem:[%s7425_s14 + $0x94] sm:$0xf]  ;;  %v740_v47 = vsel %vm7431_vm2, %v5469_v34, %v739_v27 }
  0x69   : > { %6607 = vmatprep.subr.bf16.mxu1 %v7276_v54  ;;  %v5810_v4 = vrot.slane %v5792_v52, 10  ;;  %v3012_v5 = vrot.slane %v3010_v55, 4  ;;  %v5841_v9 = vcombine.low %v3004_v58, %v3007_v59  ;;  %v604_v49 = vld [vmem:[%s7425_s14 + $0x90] sm:$0xe]  ;;  %v753_v50 = vrot.slane %v605_v42, 5  ;;  %v7284_v52 = vld [vmem:[%s7425_s14 + $0x3c] sm:$0xff]  }
  0x6a   : > { %v748_v59 = vrot.slane %v746_v46, 4  ;;  %v5471_v61 = vrot.slane %v604_v49, 9  ;;  %v763_v21 = vrot.slane %v609_v3, 5  ;;  %v5473_v22 = vrot.slane %v610_v8, 9  ;;  %v613_v26 = vld [vmem:[%s7425_s14 + $0xb4] sm:$0xe] }
  0x6b   : > { %6608 = vmatpush3.bf16.msra.mxu1 %v7276_v54  ;;  %v5794_v54 = vld [vmem:[%s7425_s14 + $0xd4] sm:$0x3]  ;;  %v3011_v20 = vsel %vm7540_vm5, %v5810_v4, %v3010_v55  ;;  %v7286_v55 = vld [vmem:[%s7425_s14 + $0x48] sm:$0xff]   ;;  %v755_v62 = vrot.slane %v753_v50, 4  ;;  %v7860_v4 = vld [vmem:[%s8478_s1 + $0xc0] sm:$0xff]  }
  0x6c   : > { %6609 = vmatprep.subr.bf16.mxu1 %v7278_v6 }
  0x6e   : > { %6578 = vmatmul.mubr.bf16.gmra.mrb[4].mxu1 %v5494_v14  ;;  %v595_v14 = vld [vmem:[%s7425_s14 + $0x6c] sm:$0xe] }
  0x6f   : > { %6786 = vmatmul.mubr.bf16.gmra.mrb[20].mxu0 %v5838_v17  ;;  %6581 = vmatprep.mubr.bf16.mxu1 %v5495_v25  ;;  %v597_v17 = vld [vmem:[%s7425_s14 + $0x74] sm:$0x1]  ;;  %v729_v25 = vsel %vm7431_vm2, %v727_v10, %v728_v11  ;;  %v5468_v30 = vrot.slane %v595_v14, 9  ;;  %v754_v10 = vsel %vm7431_vm2, %v5471_v61, %v753_v50  ;;  %v1172_v50 = vld [vmem:[%s7425_s14 + $0x1c] sm:$0xf] }
  0x70   : > { %6789 = vmatprep.mubr.bf16.mxu0 %v5839_v35  ;;  %6610 = vmatpush3.bf16.msra.mxu1 %v7278_v6  ;;  %v3013_v6 = vrot.slane %v5794_v54, 6  ;;  %v735_v31 = vrot.slane %v597_v17, 5  ;;  %v741_v35 = vrot.slane %v739_v27, 4  ;;  %v7293_v14 = vld [vmem:[%s8478_s1 + $0x1d0] sm:$0xff]   ;;  %v767_v17 = vrot.slane %v611_v2, 5  ;;  %v7297_v27 = vld [vmem:[%s8478_s1 + $0x1d8] sm:$0xff]  }
  0x71   : > { %6611 = vmatprep.subr.bf16.mxu1 %v7280_v38  ;;  %v733_v44 = vsel %vm7431_vm2, %v5468_v30, %v732_v15  ;;  %v615_v30 = vld [vmem:[%s7425_s14 + $0xbc] sm:$0x1]  ;;  %v7298_v2 = vld [vmem:[%s7425_s14 + $0x90] sm:$0xff]  }
  0x72   : > { %v3014_v23 = vsel %vm7540_vm5, %v3012_v5, %v3013_v6  ;;  %v736_v45 = vsel %vm7431_vm2, %v734_v33, %v735_v31  ;;  %v743_v48 = vsel %vm7431_vm2, %v741_v35, %v742_v36  ;;  %v747_v5 = vsel %vm7431_vm2, %v5470_v56, %v746_v46  ;;  %v1165_v33 = vld [vmem:[%s7425_s14] sm:$0xc]  ;;  %v7294_v46 = vld [vmem:[%s7425_s14 + $0x78] sm:$0xff]  }
  0x73   : > { %v5842_v37 = vcombine.low %v3011_v20, %v3014_v23  ;;  %v5500_v54 = vcombine.low %v733_v44, %v736_v45  ;;  %v5501_v58 = vcombine.low %v740_v47, %v743_v48  ;;  %v614_v23 = vld [vmem:[%s7425_s14 + $0xb8] sm:$0xf]  ;;  %v768_v34 = vsel %vm7431_vm2, %v5473_v22, %v767_v17  ;;  %v7292_v44 = vld [vmem:[%s7425_s14 + $0x6c] sm:$0xff]  }
  0x74   : > { %6612 = vmatpush3.bf16.msra.mxu1 %v7280_v38  ;;  %v5499_v38 = vcombine.low %v726_v24, %v729_v25  ;;  %v769_v24 = vrot.slane %v767_v17, 4  ;;  %v774_v31 = vrot.slane %v614_v23, 5  ;;  %v777_v42 = vrot.slane %v615_v30, 5 }
  0x75   : > { %6613 = vmatprep.subr.bf16.mxu1 %v7283_v57  ;;  %v5515_v47 = vrot.slane %v1165_v33, 10  ;;  %v1184_v33 = vld [vmem:[%s7425_s14 + $0x4c] sm:$0xf] }
  0x76   : > { %6582 = vmatmul.mubr.bf16.gmra.mrb[8].mxu1 %v5496_v53  ;;  %v606_v53 = vld [vmem:[%s7425_s14 + $0x98] sm:$0x1] }
  0x77   : > { %6790 = vmatmul.mubr.bf16.gmra.mrb[24].mxu0 %v5840_v0  ;;  %6585 = vmatprep.mubr.bf16.mxu1 %v5497_v1  ;;  %v756_v63 = vrot.slane %v606_v53, 5  ;;  %v608_v0 = vld [vmem:[%s7425_s14 + $0xa0] sm:$0xf]  ;;  %v607_v1 = vld [vmem:[%s7425_s14 + $0x9c] sm:$0xe] }
  0x78   : > { %6793 = vmatprep.mubr.bf16.mxu0 %v5841_v9  ;;  %6614 = vmatpush3.bf16.msra.mxu1 %v7283_v57  ;;  %v749_v57 = vrot.slane %v603_v41, 5  ;;  %v760_v7 = vrot.slane %v608_v0, 5  ;;  %v612_v9 = vld [vmem:[%s7425_s14 + $0xb0] sm:$0x1]  ;;  %v776_v41 = vrot.slane %v774_v31, 4 }
  0x79   : > { %6615 = vmatprep.subr.bf16.mxu1 %v7287_v16  ;;  %v757_v11 = vsel %vm7431_vm2, %v755_v62, %v756_v63  ;;  %v770_v25 = vrot.slane %v612_v9, 5  ;;  %v1170_v53 = vld [vmem:[%s7425_s14 + $0x14] sm:$0x3]  ;;  %v1173_v62 = vld [vmem:[%s7425_s14 + $0x20] sm:$0x3] }
  0x7a   : > { %v750_v6 = vsel %vm7431_vm2, %v748_v59, %v749_v57  ;;  %v5503_v18 = vcombine.low %v754_v10, %v757_v11  ;;  %v762_v20 = vrot.slane %v760_v7, 4  ;;  %v778_v57 = vsel %vm7431_vm2, %v776_v41, %v777_v42  ;;  %v1175_v0 = vld [vmem:[%s7425_s14 + $0x28] sm:$0xf]  ;;  %v1174_v11 = vld [vmem:[%s7425_s14 + $0x24] sm:$0xc] }
  0x7b   : > { %v5502_v15 = vcombine.low %v747_v5, %v750_v6  ;;  %v771_v35 = vsel %vm7431_vm2, %v769_v24, %v770_v25  ;;  %v1280_v59 = vrot.slane %v1172_v50, 6  ;;  %v1276_v6 = vrot.slane %v1170_v53, 6  ;;  %v7300_v25 = vld [vmem:[%s7425_s14 + $0x9c] sm:$0xff]   ;;  %v1183_v41 = vld [vmem:[%s7425_s14 + $0x48] sm:$0xc] }
  0x7c   : > { %6616 = vmatpush3.bf16.msra.mxu1 %v7287_v16  ;;  %v5472_v16 = vrot.slane %v607_v1, 9  ;;  %v5505_v45 = vcombine.low %v768_v34, %v771_v35  ;;  %v7296_v1 = vld [vmem:[%s7425_s14 + $0x84] sm:$0xff]   ;;  %v1283_v10 = vrot.slane %v1173_v62, 6  ;;  %v1287_v17 = vrot.slane %v1175_v0, 6  ;;  %v1185_v42 = vld [vmem:[%s7425_s14 + $0x50] sm:$0x3] }
  0x7d   : > { %6617 = vmatprep.subr.bf16.mxu1 %v7291_v29  ;;  %v1282_v9 = vrot.slane %v1280_v59, 4  ;;  %v5518_v22 = vrot.slane %v1174_v11, 10  ;;  %v7969_v50 = vld [vmem:[%s7425_s14 + $0x58] sm:$0xf] }
  0x7e   : > { %6586 = vmatmul.mubr.bf16.gmra.mrb[12].mxu1 %v5498_v28  ;;  %v1166_v28 = vld [vmem:[%s7425_s14 + $0x4] sm:$0xf]  ;;  %v1315_v0 = vrot.slane %v7969_v50, 6 }
  0x7f   : > { %6794 = vmatmul.mubr.bf16.gmra.mrb[28].mxu0 %v5842_v37  ;;  %6589 = vmatprep.mubr.bf16.mxu1 %v5499_v38  ;;  %v1266_v36 = vrot.slane %v1166_v28, 6  ;;  %v5474_v37 = vrot.slane %v613_v26, 9  ;;  %v1167_v38 = vld [vmem:[%s7425_s14 + $0x8] sm:$0x3]  ;;  %v1284_v26 = vsel %vm7540_vm5, %v1282_v9, %v1283_v10  ;;  %v5925_v10 = vld [vmem:[%s7425_s14 + $0x38] sm:$0x1] }
  0x80   : > { %6813 = vmatprep.mubr.bf16.mxu0 %v7282_v32  ;;  %6618 = vmatpush3.bf16.msra.mxu1 %v7291_v29  ;;  %v761_v29 = vsel %vm7431_vm2, %v5472_v16, %v760_v7  ;;  %v764_v32 = vsel %vm7431_vm2, %v762_v20, %v763_v21  ;;  %v1269_v49 = vrot.slane %v1167_v38, 6  ;;  %v1177_v16 = vld [vmem:[%s7425_s14 + $0x30] sm:$0xc]  ;;  %v1180_v38 = vld [vmem:[%s7425_s14 + $0x3c] sm:$0xc] }
  0x81   : > { %6619 = vmatprep.subr.bf16.mxu1 %v7295_v43  ;;  %v5504_v40 = vcombine.low %v761_v29, %v764_v32  ;;  %v1268_v48 = vrot.slane %v1266_v36, 4  ;;  %v775_v56 = vsel %vm7431_vm2, %v5474_v37, %v774_v31  ;;  %v5519_v28 = vrot.slane %v1177_v16, 10  ;;  %v7302_v29 = vld [vmem:[%s7425_s14 + $0xa8] sm:$0xff]   ;;  %v1181_v32 = vld [vmem:[%s7425_s14 + $0x40] sm:$0xf] }
  0x82   : > { %v5506_v63 = vcombine.low %v775_v56, %v778_v57  ;;  %v7303_v37 = vld [vmem:[%s8478_s1 + $0xc8] sm:$0xff]   ;;  %v1311_v56 = vrot.slane %v1185_v42, 6  ;;  %v7995_v16 = vld [vmem:[%s7425_s14 + $0x70] sm:$0xf] }
  0x83   : > { %v1270_v61 = vsel %vm7540_vm5, %v1268_v48, %v1269_v49  ;;  %v5520_v48 = vrot.slane %v1180_v38, 10  ;;  %v7307_v49 = vld [vmem:[%s8478_s1 + $0xd0] sm:$0xff]  }
  0x84   : > { %6620 = vmatpush3.bf16.msra.mxu1 %v7295_v43  ;;  %v1169_v43 = vld [vmem:[%s7425_s14 + $0x10] sm:$0xf] }
  0x85   : > { %6653 = vmatprep.subr.bf16.mxu1 %v7860_v4 }
  0x86   : > { %6590 = vmatmul.mubr.bf16.gmra.mrb[16].mxu1 %v5500_v54  ;;  %v1273_v54 = vrot.slane %v1169_v43, 6  ;;  %v1288_v43 = vsel %vm7540_vm5, %v5518_v22, %v1287_v17  ;;  %v7314_v22 = vld [vmem:[%s8478_s1 + $0xe0] sm:$0xff]  }
  0x87   : > { %6814 = vmatmul.mubr.bf16.vlgmr.msra.gmra.mrb[0].mxu0 %v7284_v52  ;;  %6593 = vmatprep.mubr.bf16.mxu1 %v5501_v58  ;;  %v1168_v52 = vld [vmem:[%s7425_s14 + $0xc] sm:$0xc]  ;;  %v1171_v58 = vld [vmem:[%s7425_s14 + $0x18] sm:$0xc] }
  0x88   : > { %6846 = vmatpush3.bf16.msra.mxu0 %v7761_v12  ;;  %6817 = vmatprep.mubr.bf16.mxu0 %v7286_v55  ;;  %v7288_v12 = vld [vmem:[%s7425_s14 + $0x54] sm:$0xff]   ;;  %v7305_v55 = vld [vmem:[%s8478_s1 + $0x1e8] sm:$0xff]   ;;  %v5516_v3 = vrot.slane %v1168_v52, 10  ;;  %v1275_v5 = vrot.slane %v1273_v54, 4  ;;  %v5517_v7 = vrot.slane %v1171_v58, 10  ;;  %v7306_v58 = vld [vmem:[%s7425_s14 + $0xc0] sm:$0xff]  }
  0x89   : > { %6847 = vmatprep.subr.bf16.mxu0 %v7289_v60  ;;  %v7304_v52 = vld [vmem:[%s7425_s14 + $0xb4] sm:$0xff]  }
  0x8a   : > { %v1277_v20 = vsel %vm7540_vm5, %v1275_v5, %v1276_v6  ;;  %v1281_v21 = vsel %vm7540_vm5, %v5517_v7, %v1280_v59  ;;  %v1186_v59 = vld [vmem:[%s7425_s14 + $0x54] sm:$0xc]  ;;  %v7311_v5 = vld [vmem:[%s8478_s1 + $0xd8] sm:$0xff]   ;;  %v5923_v7 = vld [vmem:[%s7425_s14 + $0x30] sm:$0xe] }
  0x8b   : > { %v5549_v34 = vcombine.low %v1281_v21, %v1284_v26  ;;  %v5971_v21 = vrot.slane %v5923_v7, 9  ;;  %v1192_v26 = vld [vmem:[%s7425_s14 + $0x6c] sm:$0xc]  ;;  %v1200_v7 = vld [vmem:[%s7425_s14 + $0x8c] sm:$0x3] }
  0x8c   : > { %6848 = vmatpush3.bf16.msra.mxu0 %v7289_v60  ;;  %v1267_v60 = vsel %vm7540_vm5, %v5515_v47, %v1266_v36  ;;  %v7313_v36 = vld [vmem:[%s8478_s1 + $0x1f8] sm:$0xff]  }
  0x8d   : > { %6849 = vmatprep.subr.bf16.mxu0 %v7293_v14  ;;  %v5547_v8 = vcombine.low %v1267_v60, %v1270_v61  ;;  %v1190_v60 = vld [vmem:[%s7425_s14 + $0x64] sm:$0xf] }
  0x8e   : > { %6594 = vmatmul.mubr.bf16.gmra.mrb[20].mxu1 %v5502_v15  ;;  %v7309_v15 = vld [vmem:[%s8478_s1 + $0x1f0] sm:$0xff]   ;;  %v1322_v6 = vrot.slane %v1190_v60, 6 }
  0x8f   : > { %6818 = vmatmul.mubr.bf16.gmra.mrb[4].mxu0 %v7288_v12  ;;  %6597 = vmatprep.mubr.bf16.mxu1 %v5503_v18  ;;  %v1178_v12 = vld [vmem:[%s7425_s14 + $0x34] sm:$0xf]  ;;  %v1179_v18 = vld [vmem:[%s7425_s14 + $0x38] sm:$0x3] }
  0x90   : > { %6821 = vmatprep.mubr.bf16.mxu0 %v7290_v19  ;;  %6850 = vmatpush3.bf16.msra.mxu0 %v7293_v14  ;;  %v1176_v14 = vld [vmem:[%s7425_s14 + $0x2c] sm:$0x3]  ;;  %v1274_v19 = vsel %vm7540_vm5, %v5516_v3, %v1273_v54  ;;  %v1294_v24 = vrot.slane %v1178_v12, 6  ;;  %v1297_v30 = vrot.slane %v1179_v18, 6  ;;  %v1191_v3 = vld [vmem:[%s7425_s14 + $0x68] sm:$0x3] }
  0x91   : > { %6851 = vmatprep.subr.bf16.mxu0 %v7297_v27  ;;  %v1290_v23 = vrot.slane %v1176_v14, 6  ;;  %v5548_v31 = vcombine.low %v1274_v19, %v1277_v20  ;;  %v1317_v18 = vrot.slane %v1315_v0, 4  ;;  %v1325_v20 = vrot.slane %v1191_v3, 6  ;;  %v1198_v3 = vld [vmem:[%s7425_s14 + $0x84] sm:$0xc] }
  0x92   : > { %v1296_v35 = vrot.slane %v1294_v24, 4 }
  0x94   : > { %6852 = vmatpush3.bf16.msra.mxu0 %v7297_v27  ;;  %v1289_v27 = vrot.slane %v1287_v17, 4  ;;  %v1298_v47 = vsel %vm7540_vm5, %v1296_v35, %v1297_v30  ;;  %v5928_v35 = vld [vmem:[%s7425_s14 + $0x44] sm:$0x1] }
  0x95   : > { %6853 = vmatprep.subr.bf16.mxu0 %v7301_v39 }
  0x96   : > { %6598 = vmatmul.mubr.bf16.gmra.mrb[24].mxu1 %v5504_v40  ;;  %v1182_v40 = vld [vmem:[%s7425_s14 + $0x44] sm:$0x3] }
  0x97   : > { %6822 = vmatmul.mubr.bf16.gmra.mrb[8].mxu0 %v7292_v44  ;;  %6601 = vmatprep.mubr.bf16.mxu1 %v5505_v45  ;;  %v1291_v44 = vsel %vm7540_vm5, %v1289_v27, %v1290_v23  ;;  %v1308_v45 = vrot.slane %v1184_v33, 6  ;;  %v1304_v54 = vrot.slane %v1182_v40, 6  ;;  %v7308_v23 = vld [vmem:[%s7425_s14 + $0xcc] sm:$0xff]   ;;  %v8003_v27 = vld [vmem:[%s7425_s14 + $0x40] sm:$0xf] }
  0x98   : > { %6825 = vmatprep.mubr.bf16.mxu0 %v7294_v46  ;;  %6854 = vmatpush3.bf16.msra.mxu0 %v7301_v39  ;;  %v1301_v39 = vrot.slane %v1181_v32, 6  ;;  %v7959_v46 = vld [vmem:[%s8478_s1 + $0x200] sm:$0xff]   ;;  %v5550_v57 = vcombine.low %v1288_v43, %v1291_v44  ;;  %v8008_v32 = vld [vmem:[%s7425_s14 + $0x7c] sm:$0xf]  ;;  %v3957_v38 = vrot.slane %v8003_v27, 5  ;;  %v7316_v44 = vld [vmem:[%s8478_s1 + $0xe8] sm:$0xff]  }
  0x99   : > { %6855 = vmatprep.subr.bf16.mxu0 %v7305_v55  ;;  %v1310_v62 = vrot.slane %v1308_v45, 4  ;;  %v1197_v40 = vld [vmem:[%s7425_s14 + $0x80] sm:$0x3]  ;;  %v1336_v43 = vrot.slane %v8008_v32, 6  ;;  %v1203_v27 = vld [vmem:[%s7425_s14 + $0x98] sm:$0x3] }
  0x9a   : > { %v1303_v53 = vrot.slane %v1301_v39, 4  ;;  %v5935_v32 = vld [vmem:[%s7425_s14 + $0x60] sm:$0xe] }
  0x9b   : > { %v1312_v17 = vsel %vm7540_vm5, %v1310_v62, %v1311_v56  ;;  %v8039_v56 = vld [vmem:[%s7425_s14 + $0x88] sm:$0xf] }
  0x9c   : > { %6856 = vmatpush3.bf16.msra.mxu0 %v7305_v55  ;;  %v5521_v55 = vrot.slane %v1183_v41, 10  ;;  %v1305_v9 = vsel %vm7540_vm5, %v1303_v53, %v1304_v54  ;;  %v7312_v62 = vld [vmem:[%s7425_s14 + $0xe4] sm:$0xff]  }
  0x9d   : > { %6857 = vmatprep.subr.bf16.mxu0 %v7309_v15 }
  0x9e   : > { %6602 = vmatmul.mubr.bf16.gmra.mrb[28].mxu1 %v5506_v63  ;;  %v1188_v63 = vld [vmem:[%s7425_s14 + $0x5c] sm:$0x3]  ;;  %v1309_v14 = vsel %vm7540_vm5, %v5521_v55, %v1308_v45 }
  0x9f   : > { %6826 = vmatmul.mubr.bf16.gmra.mrb[12].mxu0 %v7296_v1  ;;  %6621 = vmatprep.mubr.bf16.mxu1 %v5547_v8  ;;  %v5924_v1 = vld [vmem:[%s7425_s14 + $0x34] sm:$0xf]  ;;  %v1302_v8 = vsel %vm7540_vm5, %v5520_v48, %v1301_v39  ;;  %v1318_v12 = vrot.slane %v1188_v63, 6  ;;  %v5553_v33 = vcombine.low %v1309_v14, %v1312_v17  ;;  %v1195_v39 = vld [vmem:[%s7425_s14 + $0x78] sm:$0xc]  ;;  %v1338_v63 = vrot.slane %v1336_v43, 4 }
  0xa0   : > { %6829 = vmatprep.mubr.bf16.mxu0 %v7298_v2  ;;  %6858 = vmatpush3.bf16.msra.mxu0 %v7309_v15  ;;  %v1189_v2 = vld [vmem:[%s7425_s14 + $0x60] sm:$0xc]  ;;  %v3950_v11 = vrot.slane %v5924_v1, 5  ;;  %v5522_v15 = vrot.slane %v1186_v59, 10  ;;  %v5929_v48 = vld [vmem:[%s7425_s14 + $0x48] sm:$0xe] }
  0xa1   : > { %6859 = vmatprep.subr.bf16.mxu0 %v7313_v36  ;;  %v5523_v19 = vrot.slane %v1189_v2, 10  ;;  %v1319_v42 = vsel %vm7540_vm5, %v1317_v18, %v1318_v12  ;;  %v3960_v59 = vrot.slane %v5928_v35, 5  ;;  %v5525_v60 = vrot.slane %v1195_v39, 10  ;;  %v8051_v14 = vld [vmem:[%s7425_s14 + $0x94] sm:$0xf] }
  0xa2   : > { %v3952_v30 = vrot.slane %v3950_v11, 4  ;;  %v1316_v41 = vsel %vm7540_vm5, %v5522_v15, %v1315_v0  ;;  %v1339_v0 = vrot.slane %v1197_v40, 6  ;;  %v5973_v1 = vrot.slane %v5929_v48, 9  ;;  %v5934_v12 = vld [vmem:[%s7425_s14 + $0x5c] sm:$0x1] }
  0xa3   : > { %v1323_v45 = vsel %vm7540_vm5, %v5523_v19, %v1322_v6  ;;  %v8086_v39 = vld [vmem:[%s7425_s14 + $0xa0] sm:$0xf]  ;;  %v1206_v48 = vld [vmem:[%s7425_s14 + $0xa4] sm:$0x3] }
  0xa4   : > { %6860 = vmatpush3.bf16.msra.mxu0 %v7313_v36  ;;  %v8013_v36 = vld [vmem:[%s7425_s14 + $0x4c] sm:$0xf] }
  0xa5   : > { %6893 = vmatprep.subr.bf16.mxu0 %v7959_v46  ;;  %v3964_v50 = vrot.slane %v8013_v36, 5 }
  0xa6   : > { %6622 = vmatmul.mubr.bf16.vlgmr.msra.gmra.mrb[0].mxu1 %v5548_v31  ;;  %v1194_v31 = vld [vmem:[%s7425_s14 + $0x74] sm:$0x3] }
  0xa7   : > { %6830 = vmatmul.mubr.bf16.gmra.mrb[16].mxu0 %v7300_v25  ;;  %6654 = vmatpush3.bf16.msra.mxu1 %v7860_v4  ;;  %v1295_v4 = vsel %vm7540_vm5, %v5519_v28, %v1294_v24  ;;  %v1324_v24 = vrot.slane %v1322_v6, 4  ;;  %v3953_v25 = vrot.slane %v5925_v10, 5  ;;  %v5552_v28 = vcombine.low %v1302_v8, %v1305_v9  ;;  %v5933_v9 = vld [vmem:[%s7425_s14 + $0x58] sm:$0xf] }
  0xa8   : > { %6625 = vmatprep.mubr.bf16.mxu1 %v5549_v34  ;;  %6833 = vmatprep.mubr.bf16.mxu0 %v7302_v29  ;;  %v5551_v61 = vcombine.low %v1295_v4, %v1298_v47  ;;  %v1329_v29 = vrot.slane %v7995_v16, 6  ;;  %v5926_v34 = vld [vmem:[%s7425_s14 + $0x3c] sm:$0xe]  ;;  %v5524_v47 = vrot.slane %v1192_v26, 10  ;;  %v1332_v55 = vrot.slane %v1194_v31, 6 }
  0xa9   : > { %6655 = vmatprep.subr.bf16.mxu1 %v7303_v37  ;;  %v1326_v4 = vsel %vm7540_vm5, %v1324_v24, %v1325_v20  ;;  %v3954_v53 = vsel %vm7431_vm2, %v3952_v30, %v3953_v25  ;;  %v3966_v6 = vrot.slane %v3964_v50, 4  ;;  %v1343_v8 = vrot.slane %v8039_v56, 6  ;;  %v8057_v16 = vld [vmem:[%s7425_s14 + $0x64] sm:$0xf] }
  0xaa   : > { %v1331_v54 = vrot.slane %v1329_v29, 4  ;;  %v5555_v10 = vcombine.low %v1323_v45, %v1326_v4  ;;  %v1330_v15 = vsel %vm7540_vm5, %v5524_v47, %v1329_v29  ;;  %v1337_v24 = vsel %vm7540_vm5, %v5525_v60, %v1336_v43  ;;  %v5942_v60 = vld [vmem:[%s7425_s14 + $0x7c] sm:$0xf] }
  0xab   : > { %6656 = vmatpush3.bf16.msra.mxu1 %v7303_v37  ;;  %v7310_v37 = vld [vmem:[%s7425_s14 + $0xd8] sm:$0xff]   ;;  %v1340_v25 = vsel %vm7540_vm5, %v1338_v63, %v1339_v0  ;;  %v5526_v26 = vrot.slane %v1198_v3, 10  ;;  %v1345_v30 = vrot.slane %v1343_v8, 4  ;;  %v1346_v31 = vrot.slane %v1200_v7, 6  ;;  %v5938_v0 = vld [vmem:[%s7425_s14 + $0x6c] sm:$0xe] }
  0xac   : > { %6657 = vmatprep.subr.bf16.mxu1 %v7307_v49  ;;  %v1333_v18 = vsel %vm7540_vm5, %v1331_v54, %v1332_v55  ;;  %v3965_v35 = vsel %vm7431_vm2, %v5973_v1, %v3964_v50  ;;  %v1353_v43 = vrot.slane %v1203_v27, 6  ;;  %v5557_v45 = vcombine.low %v1337_v24, %v1340_v25  ;;  %v7317_v50 = vld [vmem:[%s8478_s1 + $0x208] sm:$0xff]   ;;  %v5940_v1 = vld [vmem:[%s7425_s14 + $0x74] sm:$0x1]  ;;  %v8110_v3 = vld [vmem:[%s8478_s1 + $0x100] sm:$0xff]  }
  0xad   : > { %v5975_v47 = vrot.slane %v5935_v32, 9  ;;  %v1357_v55 = vrot.slane %v8086_v39, 6  ;;  %v1360_v63 = vrot.slane %v1206_v48, 6  ;;  %v1207_v7 = vld [vmem:[%s7425_s14 + $0xa8] sm:$0xc] }
  0xae   : > { %6626 = vmatmul.mubr.bf16.gmra.mrb[4].mxu1 %v5550_v57  ;;  %v5972_v57 = vrot.slane %v5926_v34, 9  ;;  %v5556_v34 = vcombine.low %v1330_v15, %v1333_v18  ;;  %v5941_v15 = vld [vmem:[%s7425_s14 + $0x78] sm:$0xe]  ;;  %v5945_v32 = vld [vmem:[%s7425_s14 + $0x88] sm:$0xf] }
  0xaf   : > { %6834 = vmatmul.mubr.bf16.gmra.mrb[20].mxu0 %v7304_v52  ;;  %6629 = vmatprep.mubr.bf16.mxu1 %v5551_v61  ;;  %v3951_v52 = vsel %vm7431_vm2, %v5971_v21, %v3950_v11  ;;  %v7318_v61 = vld [vmem:[%s8478_s1 + $0xf0] sm:$0xff]   ;;  %v3971_v21 = vrot.slane %v5933_v9, 5 }
  0xb0   : > { %6837 = vmatprep.mubr.bf16.mxu0 %v7306_v58  ;;  %6658 = vmatpush3.bf16.msra.mxu1 %v7307_v49  ;;  %v5931_v49 = vld [vmem:[%s7425_s14 + $0x50] sm:$0x1]  ;;  %v3959_v58 = vrot.slane %v3957_v38, 4  ;;  %v5932_v11 = vld [vmem:[%s7425_s14 + $0x54] sm:$0xe]  ;;  %v6003_v17 = vcombine.low %v3951_v52, %v3954_v53  ;;  %v3958_v19 = vsel %vm7431_vm2, %v5972_v57, %v3957_v38  ;;  %v1344_v57 = vsel %vm7540_vm5, %v5526_v26, %v1343_v8 }
  0xb1   : > { %6659 = vmatprep.subr.bf16.mxu1 %v7311_v5  ;;  %v3967_v2 = vrot.slane %v5931_v49, 5  ;;  %v5974_v29 = vrot.slane %v5932_v11, 9  ;;  %v8083_v38 = vld [vmem:[%s7425_s14 + $0x9c] sm:$0xc]  ;;  %v3973_v40 = vrot.slane %v3971_v21, 4  ;;  %v5977_v26 = vrot.slane %v5941_v15, 9 }
  0xb2   : > { %v3961_v20 = vsel %vm7431_vm2, %v3959_v58, %v3960_v59  ;;  %v5939_v49 = vld [vmem:[%s7425_s14 + $0x70] sm:$0xf]  ;;  %v5528_v54 = vrot.slane %v8083_v38, 10  ;;  %v1347_v58 = vsel %vm7540_vm5, %v1345_v30, %v1346_v31  ;;  %v1208_v59 = vld [vmem:[%s7425_s14 + $0xac] sm:$0xf]  ;;  %v7321_v31 = vld [vmem:[%s8478_s1 + $0x218] sm:$0xff]  }
  0xb3   : > { %v3968_v36 = vsel %vm7431_vm2, %v3966_v6, %v3967_v2  ;;  %v3985_v2 = vrot.slane %v5939_v49, 5  ;;  %v1209_v8 = vld [vmem:[%s7425_s14 + $0xb0] sm:$0x3]  ;;  %v1364_v9 = vrot.slane %v1208_v59, 6  ;;  %v5558_v11 = vcombine.low %v1344_v57, %v1347_v58  ;;  %v1211_v30 = vld [vmem:[%s7425_s14 + $0xb8] sm:$0xf] }
  0xb4   : > { %6660 = vmatpush3.bf16.msra.mxu1 %v7311_v5  ;;  %v5554_v5 = vcombine.low %v1316_v41, %v1319_v42  ;;  %v3974_v41 = vrot.slane %v5934_v12, 5  ;;  %v6005_v56 = vcombine.low %v3965_v35, %v3968_v36  ;;  %v5943_v12 = vld [vmem:[%s7425_s14 + $0x80] sm:$0x1]  ;;  %v1367_v24 = vrot.slane %v1209_v8, 6  ;;  %v5952_v8 = vld [vmem:[%s7425_s14 + $0xa4] sm:$0x1] }
  0xb5   : > { %6661 = vmatprep.subr.bf16.mxu1 %v7314_v22  ;;  %v1366_v25 = vrot.slane %v1364_v9, 4  ;;  %v1371_v38 = vrot.slane %v1211_v30, 6 }
  0xb6   : > { %6630 = vmatmul.mubr.bf16.gmra.mrb[8].mxu1 %v5552_v28  ;;  %v1350_v28 = vrot.slane %v8051_v14, 6 }
  0xb7   : > { %6838 = vmatmul.mubr.bf16.gmra.mrb[24].mxu0 %v7308_v23  ;;  %6633 = vmatprep.mubr.bf16.mxu1 %v5553_v33  ;;  %v7320_v23 = vld [vmem:[%s8478_s1 + $0xf8] sm:$0xff]   ;;  %v3978_v33 = vrot.slane %v8057_v16, 5 }
  0xb8   : > { %6841 = vmatprep.mubr.bf16.mxu0 %v7310_v37  ;;  %6662 = vmatpush3.bf16.msra.mxu1 %v7314_v22  ;;  %v1201_v22 = vld [vmem:[%s7425_s14 + $0x90] sm:$0xc]  ;;  %v5937_v37 = vld [vmem:[%s7425_s14 + $0x68] sm:$0x1]  ;;  %v1352_v4 = vrot.slane %v1350_v28, 4 }
  0xb9   : > { %6663 = vmatprep.subr.bf16.mxu1 %v7316_v44  ;;  %v5527_v42 = vrot.slane %v1201_v22, 10  ;;  %v3980_v52 = vrot.slane %v3978_v33, 4  ;;  %v3981_v53 = vrot.slane %v5937_v37, 5  ;;  %v3988_v22 = vrot.slane %v5940_v1, 5  ;;  %v1210_v37 = vld [vmem:[%s7425_s14 + $0xb4] sm:$0xc] }
  0xba   : > { %v1354_v6 = vsel %vm7540_vm5, %v1352_v4, %v1353_v43  ;;  %v5944_v43 = vld [vmem:[%s7425_s14 + $0x84] sm:$0xe]  ;;  %v5946_v4 = vld [vmem:[%s7425_s14 + $0x8c] sm:$0x1]  ;;  %v5530_v49 = vrot.slane %v1210_v37, 10 }
  0xbb   : > { %v3982_v18 = vsel %vm7431_vm2, %v3980_v52, %v3981_v53  ;;  %v5949_v52 = vld [vmem:[%s7425_s14 + $0x98] sm:$0x1]  ;;  %v7324_v53 = vld [vmem:[%s8478_s1 + $0x220] sm:$0xff]  }
  0xbc   : > { %6664 = vmatpush3.bf16.msra.mxu1 %v7316_v44  ;;  %v6004_v44 = vcombine.low %v3958_v19, %v3961_v20  ;;  %v1359_v19 = vrot.slane %v1357_v55, 4  ;;  %v5976_v20 = vrot.slane %v5938_v0, 9 }
  0xbd   : > { %6665 = vmatprep.subr.bf16.mxu1 %v7318_v61 }
  0xbe   : > { %6634 = vmatmul.mubr.bf16.gmra.mrb[12].mxu1 %v5554_v5  ;;  %v1351_v5 = vsel %vm7540_vm5, %v5527_v42, %v1350_v28  ;;  %v3995_v28 = vrot.slane %v5943_v12, 5  ;;  %v1361_v35 = vsel %vm7540_vm5, %v1359_v19, %v1360_v63  ;;  %v3986_v36 = vsel %vm7431_vm2, %v5976_v20, %v3985_v2  ;;  %v1212_v42 = vld [vmem:[%s7425_s14 + $0xbc] sm:$0x3]  ;;  %v5955_v19 = vld [vmem:[%s7425_s14 + $0xb0] sm:$0x1] }
  0xbf   : > { %6842 = vmatmul.mubr.bf16.gmra.mrb[28].mxu0 %v7312_v62  ;;  %6637 = vmatprep.mubr.bf16.mxu1 %v5555_v10  ;;  %v3975_v62 = vsel %vm7431_vm2, %v3973_v40, %v3974_v41  ;;  %v3992_v10 = vrot.slane %v5942_v60, 5  ;;  %v5559_v16 = vcombine.low %v1351_v5, %v1354_v6  ;;  %v1374_v57 = vrot.slane %v1212_v42, 6  ;;  %v5951_v5 = vld [vmem:[%s7425_s14 + $0xa0] sm:$0xf]  ;;  %v5954_v6 = vld [vmem:[%s7425_s14 + $0xac] sm:$0xf] }
  0xc0   : > { %6861 = vmatprep.mubr.bf16.mxu0 %v6003_v17  ;;  %6666 = vmatpush3.bf16.msra.mxu1 %v7318_v61  ;;  %v3972_v61 = vsel %vm7431_vm2, %v5974_v29, %v3971_v21  ;;  %v3979_v17 = vsel %vm7431_vm2, %v5975_v47, %v3978_v33  ;;  %v3987_v21 = vrot.slane %v3985_v2, 4  ;;  %v5948_v33 = vld [vmem:[%s7425_s14 + $0x94] sm:$0xf]  ;;  %v3999_v47 = vrot.slane %v5945_v32, 5  ;;  %v5960_v32 = vld [vmem:[%s7425_s14 + $0xc4] sm:$0xf] }
  0xc1   : > { %6667 = vmatprep.subr.bf16.mxu1 %v7320_v23  ;;  %v6006_v14 = vcombine.low %v3972_v61, %v3975_v62  ;;  %v3994_v27 = vrot.slane %v3992_v10, 4  ;;  %v6007_v29 = vcombine.low %v3979_v17, %v3982_v18  ;;  %v3993_v41 = vsel %vm7431_vm2, %v5977_v26, %v3992_v10  ;;  %v7327_v62 = vld [vmem:[%s8478_s1 + $0x228] sm:$0xff]   ;;  %v7330_v20 = vld [vmem:[%s8478_s1 + $0x230] sm:$0xff]  }
  0xc2   : > { %v3989_v39 = vsel %vm7431_vm2, %v3987_v21, %v3988_v22  ;;  %v4006_v48 = vrot.slane %v5948_v33, 5  ;;  %v5978_v60 = vrot.slane %v5944_v43, 9  ;;  %v4002_v61 = vrot.slane %v5946_v4, 5  ;;  %v5953_v18 = vld [vmem:[%s7425_s14 + $0xa8] sm:$0xe]  ;;  %v7322_v22 = vld [vmem:[%s7425_s14 + $0x18] sm:$0xff]  }
  0xc3   : > { %v4001_v63 = vrot.slane %v3999_v47, 4  ;;  %v4009_v2 = vrot.slane %v5949_v52, 5  ;;  %v4020_v15 = vrot.slane %v5954_v6, 5  ;;  %v4023_v30 = vrot.slane %v5955_v19, 5  ;;  %v5956_v33 = vld [vmem:[%s7425_s14 + $0xb4] sm:$0xe] }
  0xc4   : > { %6668 = vmatpush3.bf16.msra.mxu1 %v7320_v23  ;;  %v5529_v23 = vrot.slane %v1207_v7, 10  ;;  %v4008_v1 = vrot.slane %v4006_v48, 4  ;;  %v5950_v7 = vld [vmem:[%s7425_s14 + $0x9c] sm:$0xe]  ;;  %v7323_v42 = vld [vmem:[%s7425_s14 + $0x24] sm:$0xff]   ;;  %v7325_v4 = vld [vmem:[%s7425_s14 + $0x30] sm:$0xff]  }
  0xc5   : > { %6941 = vmatprep.subr.bf16.mxu1 %v8110_v3  ;;  %v4003_v17 = vsel %vm7431_vm2, %v4001_v63, %v4002_v61  ;;  %v5961_v43 = vld [vmem:[%s7425_s14 + $0xc8] sm:$0x1]  ;;  %v5963_v52 = vld [vmem:[%s7425_s14 + $0xd0] sm:$0xf]  ;;  %v5965_v63 = vld [vmem:[%s7425_s14 + $0xd8] sm:$0xe] }
  0xc6   : > { %6638 = vmatmul.mubr.bf16.gmra.mrb[16].mxu1 %v5556_v34  ;;  %v1358_v34 = vsel %vm7540_vm5, %v5528_v54, %v1357_v55  ;;  %v1365_v40 = vsel %vm7540_vm5, %v5529_v23, %v1364_v9  ;;  %v6008_v55 = vcombine.low %v3986_v36, %v3989_v39  ;;  %v1372_v9 = vsel %vm7540_vm5, %v5530_v49, %v1371_v38  ;;  %v5958_v39 = vld [vmem:[%s7425_s14 + $0xbc] sm:$0x1]  ;;  %v7343_v61 = vld [vmem:[%s8478_s1 + $0x108] sm:$0xff]  }
  0xc7   : > { %6862 = vmatmul.mubr.bf16.vlgmr.msra.gmra.mrb[0].mxu0 %v6004_v44  ;;  %6641 = vmatprep.mubr.bf16.mxu1 %v5557_v45  ;;  %v1368_v44 = vsel %vm7540_vm5, %v1366_v25, %v1367_v24  ;;  %v3996_v45 = vsel %vm7431_vm2, %v3994_v27, %v3995_v28  ;;  %v5560_v54 = vcombine.low %v1358_v34, %v1361_v35  ;;  %v5980_v23 = vrot.slane %v5950_v7, 9  ;;  %v7328_v6 = vld [vmem:[%s7425_s14 + $0x48] sm:$0xff]  }
  0xc8   : > { %6894 = vmatpush3.bf16.msra.mxu0 %v7959_v46  ;;  %6865 = vmatprep.mubr.bf16.mxu0 %v6005_v56  ;;  %v7319_v46 = vld [vmem:[%s8478_s1 + $0x210] sm:$0xff]   ;;  %v1373_v56 = vrot.slane %v1371_v38, 4  ;;  %v5561_v58 = vcombine.low %v1365_v40, %v1368_v44  ;;  %v6009_v59 = vcombine.low %v3993_v41, %v3996_v45  ;;  %v4016_v25 = vrot.slane %v5952_v8, 5  ;;  %v5959_v40 = vld [vmem:[%s7425_s14 + $0xc0] sm:$0xe] }
  0xc9   : > { %6895 = vmatprep.subr.bf16.mxu0 %v7317_v50  ;;  %v5981_v27 = vrot.slane %v5953_v18, 9  ;;  %v4022_v28 = vrot.slane %v4020_v15, 4  ;;  %v4034_v41 = vrot.slane %v5960_v32, 5  ;;  %v5982_v45 = vrot.slane %v5956_v33, 9 }
  0xca   : > { %v1375_v10 = vsel %vm7540_vm5, %v1373_v56, %v1374_v57  ;;  %v4030_v49 = vrot.slane %v5958_v39, 5  ;;  %v6031_v39 = vld [vmem:[%s7425_s14 + $0x40] sm:$0xf] }
  0xcb   : > { %v4021_v37 = vsel %vm7431_vm2, %v5981_v27, %v4020_v15  ;;  %v4024_v38 = vsel %vm7431_vm2, %v4022_v28, %v4023_v30  ;;  %v6027_v27 = vld [vmem:[%s7425_s14 + $0x30] sm:$0xc]  ;;  %v6029_v28 = vld [vmem:[%s7425_s14 + $0x38] sm:$0x3] }
  0xcc   : > { %6896 = vmatpush3.bf16.msra.mxu0 %v7317_v50  ;;  %v5947_v50 = vld [vmem:[%s7425_s14 + $0x90] sm:$0xe] }
  0xcd   : > { %6897 = vmatprep.subr.bf16.mxu0 %v7319_v46  ;;  %v5979_v0 = vrot.slane %v5947_v50, 9  ;;  %v5983_v50 = vrot.slane %v5959_v40, 9  ;;  %v6034_v40 = vld [vmem:[%s7425_s14 + $0x4c] sm:$0xf] }
  0xce   : > { %6642 = vmatmul.mubr.bf16.gmra.mrb[20].mxu1 %v5558_v11  ;;  %v4013_v11 = vrot.slane %v5951_v5, 5 }
  0xcf   : > { %6866 = vmatmul.mubr.bf16.gmra.mrb[4].mxu0 %v6006_v14  ;;  %6645 = vmatprep.mubr.bf16.mxu1 %v5559_v16  ;;  %v4000_v14 = vsel %vm7431_vm2, %v5978_v60, %v3999_v47  ;;  %v4007_v12 = vsel %vm7431_vm2, %v5979_v0, %v4006_v48  ;;  %v4010_v16 = vsel %vm7431_vm2, %v4008_v1, %v4009_v2  ;;  %v4041_v60 = vrot.slane %v5963_v52, 5  ;;  %v7326_v1 = vld [vmem:[%s7425_s14 + $0x3c] sm:$0xff]   ;;  %v6033_v52 = vld [vmem:[%s7425_s14 + $0x48] sm:$0xc] }
  0xd0   : > { %6869 = vmatprep.mubr.bf16.mxu0 %v6007_v29  ;;  %6898 = vmatpush3.bf16.msra.mxu0 %v7319_v46  ;;  %v5562_v46 = vcombine.low %v1372_v9, %v1375_v10  ;;  %v6010_v21 = vcombine.low %v4000_v14, %v4003_v17  ;;  %v4015_v24 = vrot.slane %v4013_v11, 4  ;;  %v6011_v26 = vcombine.low %v4007_v12, %v4010_v16  ;;  %v5957_v29 = vld [vmem:[%s7425_s14 + $0xb8] sm:$0xf]  ;;  %v5967_v2 = vld [vmem:[%s7425_s14 + $0xe0] sm:$0x1]  ;;  %v7344_v9 = vld [vmem:[%s8478_s1 + $0x110] sm:$0xff]  }
  0xd1   : > { %6899 = vmatprep.subr.bf16.mxu0 %v7321_v31  ;;  %v4014_v34 = vsel %vm7431_vm2, %v5980_v23, %v4013_v11  ;;  %v4027_v36 = vrot.slane %v5957_v29, 5  ;;  %v6013_v47 = vcombine.low %v4021_v37, %v4024_v38  ;;  %v4043_v10 = vrot.slane %v4041_v60, 4  ;;  %v5969_v12 = vld [vmem:[%s7425_s14 + $0xe8] sm:$0xf]  ;;  %v6028_v16 = vld [vmem:[%s7425_s14 + $0x34] sm:$0xf] }
  0xd2   : > { %v4017_v35 = vsel %vm7431_vm2, %v4015_v24, %v4016_v25  ;;  %v5985_v14 = vrot.slane %v5965_v63, 9  ;;  %v4051_v15 = vrot.slane %v5967_v2, 5  ;;  %v5968_v23 = vld [vmem:[%s7425_s14 + $0xe4] sm:$0xe]  ;;  %v5970_v24 = vld [vmem:[%s7425_s14 + $0xec] sm:$0x1] }
  0xd3   : > { %v6012_v44 = vcombine.low %v4014_v34, %v4017_v35  ;;  %v4029_v48 = vrot.slane %v4027_v36, 4  ;;  %v4028_v56 = vsel %vm7431_vm2, %v5982_v45, %v4027_v36  ;;  %v4544_v25 = vrot.slane %v6028_v16, 6  ;;  %v7346_v38 = vld [vmem:[%s8478_s1 + $0x120] sm:$0xff]   ;;  %v7348_v63 = vld [vmem:[%s8478_s1 + $0x130] sm:$0xff]  }
  0xd4   : > { %6900 = vmatpush3.bf16.msra.mxu0 %v7321_v31  ;;  %v7333_v31 = vld [vmem:[%s8478_s1 + $0x238] sm:$0xff]   ;;  %v5986_v32 = vrot.slane %v5968_v23, 9  ;;  %v4058_v34 = vrot.slane %v5970_v24, 5  ;;  %v6075_v35 = vrot.slane %v6027_v27, 10  ;;  %v4547_v37 = vrot.slane %v6029_v28, 6  ;;  %v7336_v16 = vld [vmem:[%s7425_s14 + $0x90] sm:$0xff]  }
  0xd5   : > { %6901 = vmatprep.subr.bf16.mxu0 %v7324_v53  ;;  %v4031_v57 = vsel %vm7431_vm2, %v4029_v48, %v4030_v49  ;;  %v4546_v36 = vrot.slane %v4544_v25, 4  ;;  %v4558_v48 = vrot.slane %v6034_v40, 6  ;;  %v7347_v49 = vld [vmem:[%s8478_s1 + $0x128] sm:$0xff]  }
  0xd6   : > { %6646 = vmatmul.mubr.bf16.gmra.mrb[24].mxu1 %v5560_v54  ;;  %v4037_v54 = vrot.slane %v5961_v43, 5  ;;  %v6014_v5 = vcombine.low %v4028_v56, %v4031_v57  ;;  %v4551_v43 = vrot.slane %v6031_v39, 6 }
  0xd7   : > { %6870 = vmatmul.mubr.bf16.gmra.mrb[8].mxu0 %v6008_v55  ;;  %6649 = vmatprep.mubr.bf16.mxu1 %v5561_v58  ;;  %v5966_v55 = vld [vmem:[%s7425_s14 + $0xdc] sm:$0xf]  ;;  %v5962_v58 = vld [vmem:[%s7425_s14 + $0xcc] sm:$0xe]  ;;  %v4548_v45 = vsel %vm7540_vm5, %v4546_v36, %v4547_v37  ;;  %v6047_v36 = vld [vmem:[%s7425_s14 + $0x80] sm:$0x3] }
  0xd8   : > { %6873 = vmatprep.mubr.bf16.mxu0 %v6009_v59  ;;  %6902 = vmatpush3.bf16.msra.mxu0 %v7324_v53  ;;  %v4036_v53 = vrot.slane %v4034_v41, 4  ;;  %v5964_v59 = vld [vmem:[%s7425_s14 + $0xd4] sm:$0x1]  ;;  %v4048_v0 = vrot.slane %v5966_v55, 5  ;;  %v5984_v7 = vrot.slane %v5962_v58, 9  ;;  %v7334_v55 = vld [vmem:[%s7425_s14 + $0x78] sm:$0xff]  }
  0xd9   : > { %6903 = vmatprep.subr.bf16.mxu0 %v7327_v62  ;;  %v4044_v11 = vrot.slane %v5964_v59, 5  ;;  %v4553_v58 = vrot.slane %v4551_v43, 4 }
  0xda   : > { %v4050_v17 = vrot.slane %v4048_v0, 4  ;;  %v4042_v18 = vsel %vm7431_vm2, %v5984_v7, %v4041_v60  ;;  %v6077_v60 = vrot.slane %v6033_v52, 10  ;;  %v6048_v52 = vld [vmem:[%s7425_s14 + $0x84] sm:$0xc] }
  0xdb   : > { %v4045_v19 = vsel %vm7431_vm2, %v4043_v10, %v4044_v11  ;;  %v7349_v11 = vld [vmem:[%s8478_s1 + $0x138] sm:$0xff]  }
  0xdc   : > { %6904 = vmatpush3.bf16.msra.mxu0 %v7327_v62  ;;  %v4038_v62 = vsel %vm7431_vm2, %v4036_v53, %v4037_v54  ;;  %v6016_v30 = vcombine.low %v4042_v18, %v4045_v19  ;;  %v6035_v53 = vld [vmem:[%s7425_s14 + $0x50] sm:$0x3] }
  0xdd   : > { %6905 = vmatprep.subr.bf16.mxu0 %v7330_v20 }
  0xde   : > { %6650 = vmatmul.mubr.bf16.gmra.mrb[28].mxu1 %v5562_v46  ;;  %v4049_v46 = vsel %vm7431_vm2, %v5985_v14, %v4048_v0  ;;  %v6040_v0 = vld [vmem:[%s7425_s14 + $0x64] sm:$0xf] }
  0xdf   : > { %6874 = vmatmul.mubr.bf16.gmra.mrb[12].mxu0 %v6010_v21  ;;  %6669 = vmatprep.mubr.bf16.mxu1 %v7322_v22  ;;  %v4052_v21 = vsel %vm7431_vm2, %v4050_v17, %v4051_v15  ;;  %v7345_v22 = vld [vmem:[%s8478_s1 + $0x118] sm:$0xff]   ;;  %v4572_v10 = vrot.slane %v6040_v0, 6  ;;  %v7335_v14 = vld [vmem:[%s7425_s14 + $0x84] sm:$0xff]   ;;  %v6039_v17 = vld [vmem:[%s7425_s14 + $0x60] sm:$0xc] }
  0xe0   : > { %6877 = vmatprep.mubr.bf16.mxu0 %v6011_v26  ;;  %6906 = vmatpush3.bf16.msra.mxu0 %v7330_v20  ;;  %v4055_v20 = vrot.slane %v5969_v12, 5  ;;  %v7329_v26 = vld [vmem:[%s7425_s14 + $0x54] sm:$0xff]   ;;  %v6017_v29 = vcombine.low %v4049_v46, %v4052_v21  ;;  %v6041_v15 = vld [vmem:[%s7425_s14 + $0x68] sm:$0x3]  ;;  %v6043_v21 = vld [vmem:[%s7425_s14 + $0x70] sm:$0xf] }
  0xe1   : > { %6907 = vmatprep.subr.bf16.mxu0 %v7333_v31  ;;  %v4574_v23 = vrot.slane %v4572_v10, 4  ;;  %v4575_v24 = vrot.slane %v6041_v15, 6 }
  0xe2   : > { %v4057_v33 = vrot.slane %v4055_v20, 4 }
  0xe4   : > { %6908 = vmatpush3.bf16.msra.mxu0 %v7333_v31  ;;  %v7331_v31 = vld [vmem:[%s7425_s14 + $0x60] sm:$0xff]  }
  0xe6   : > { %6670 = vmatmul.mubr.bf16.vlgmr.msra.gmra.mrb[0].mxu1 %v7323_v42  ;;  %v4059_v42 = vsel %vm7431_vm2, %v4057_v33, %v4058_v34  ;;  %v7337_v34 = vld [vmem:[%s7425_s14 + $0x9c] sm:$0xff]  }
  0xe7   : > { %6878 = vmatmul.mubr.bf16.gmra.mrb[16].mxu0 %v6012_v44  ;;  %6949 = vmatpush3.bf16.msra.mxu1 %v8110_v3  ;;  %v4035_v3 = vsel %vm7431_vm2, %v5983_v50, %v4034_v41  ;;  %v4056_v41 = vsel %vm7431_vm2, %v5986_v32, %v4055_v20  ;;  %v4545_v44 = vsel %vm7540_vm5, %v6075_v35, %v4544_v25  ;;  %v7332_v50 = vld [vmem:[%s7425_s14 + $0x6c] sm:$0xff]   ;;  %v6046_v25 = vld [vmem:[%s7425_s14 + $0x7c] sm:$0xf]  ;;  %v6045_v35 = vld [vmem:[%s7425_s14 + $0x78] sm:$0xc] }
  0xe8   : > { %6673 = vmatprep.mubr.bf16.mxu1 %v7325_v4  ;;  %6881 = vmatprep.mubr.bf16.mxu0 %v6013_v47  ;;  %v6015_v8 = vcombine.low %v4035_v3, %v4038_v62  ;;  %v6030_v4 = vld [vmem:[%s7425_s14 + $0x3c] sm:$0xc]  ;;  %v6032_v47 = vld [vmem:[%s7425_s14 + $0x44] sm:$0x3]  ;;  %v6018_v54 = vcombine.low %v4056_v41, %v4059_v42  ;;  %v6107_v56 = vcombine.low %v4545_v44, %v4548_v45  ;;  %v4561_v3 = vrot.slane %v6035_v53, 6 }
  0xe9   : > { %6942 = vmatprep.subr.bf16.mxu1 %v7343_v61  ;;  %v6076_v57 = vrot.slane %v6030_v4, 10  ;;  %v4554_v59 = vrot.slane %v6032_v47, 6  ;;  %v6037_v62 = vld [vmem:[%s7425_s14 + $0x58] sm:$0xf]  ;;  %v4576_v32 = vsel %vm7540_vm5, %v4574_v23, %v4575_v24  ;;  %v4586_v33 = vrot.slane %v6046_v25, 6 }
  0xea   : > { %v5668_v44 = vld [vmem:[%s7425_s14 + $0x7c] sm:$0xf]  ;;  %v6081_v45 = vrot.slane %v6045_v35, 10  ;;  %v4589_v47 = vrot.slane %v6047_v36, 6  ;;  %v6057_v36 = vld [vmem:[%s7425_s14 + $0xa8] sm:$0xc] }
  0xeb   : > { %6950 = vmatpush3.bf16.msra.mxu1 %v7343_v61  ;;  %v4560_v61 = vrot.slane %v4558_v48, 4  ;;  %v4555_v2 = vsel %vm7540_vm5, %v4553_v58, %v4554_v59  ;;  %v4588_v4 = vrot.slane %v4586_v33, 4  ;;  %v7339_v58 = vld [vmem:[%s7425_s14 + $0xb4] sm:$0xff]   ;;  %v6054_v24 = vld [vmem:[%s7425_s14 + $0x9c] sm:$0xc] }
  0xec   : > { %6943 = vmatprep.subr.bf16.mxu1 %v7344_v9  ;;  %v4587_v59 = vsel %vm7540_vm5, %v6081_v45, %v4586_v33 }
  0xed   : > { %v4562_v7 = vsel %vm7540_vm5, %v4560_v61, %v4561_v3  ;;  %v6051_v61 = vld [vmem:[%s7425_s14 + $0x90] sm:$0xc] }
  0xee   : > { %6674 = vmatmul.mubr.bf16.gmra.mrb[4].mxu1 %v7326_v1  ;;  %v4552_v1 = vsel %vm7540_vm5, %v6076_v57, %v4551_v43  ;;  %v6049_v43 = vld [vmem:[%s7425_s14 + $0x88] sm:$0xf]  ;;  %v5669_v57 = vld [vmem:[%s7425_s14 + $0x80] sm:$0x1] }
  0xef   : > { %6882 = vmatmul.mubr.bf16.gmra.mrb[20].mxu0 %v6014_v5  ;;  %6677 = vmatprep.mubr.bf16.mxu1 %v7328_v6  ;;  %v4565_v5 = vrot.slane %v6037_v62, 6  ;;  %v4559_v6 = vsel %vm7540_vm5, %v6077_v60, %v4558_v48  ;;  %v6108_v12 = vcombine.low %v4552_v1, %v4555_v2  ;;  %v6052_v48 = vld [vmem:[%s7425_s14 + $0x94] sm:$0xf]  ;;  %v4593_v53 = vrot.slane %v6049_v43, 6  ;;  %v6053_v1 = vld [vmem:[%s7425_s14 + $0x98] sm:$0x3] }
  0xf0   : > { %6885 = vmatprep.mubr.bf16.mxu0 %v6015_v8  ;;  %6951 = vmatpush3.bf16.msra.mxu1 %v7344_v9  ;;  %v6036_v8 = vld [vmem:[%s7425_s14 + $0x54] sm:$0xc]  ;;  %v6038_v9 = vld [vmem:[%s7425_s14 + $0x5c] sm:$0x3]  ;;  %v6109_v18 = vcombine.low %v4559_v6, %v4562_v7  ;;  %v4590_v60 = vsel %vm7540_vm5, %v4588_v4, %v4589_v47  ;;  %v4600_v3 = vrot.slane %v6052_v48, 6 }
  0xf1   : > { %6944 = vmatprep.subr.bf16.mxu1 %v7345_v22  ;;  %v6078_v19 = vrot.slane %v6036_v8, 10  ;;  %v4567_v20 = vrot.slane %v4565_v5, 4  ;;  %v4568_v46 = vrot.slane %v6038_v9, 6  ;;  %v5671_v2 = vld [vmem:[%s7425_s14 + $0x88] sm:$0xf]  ;;  %v4595_v6 = vrot.slane %v4593_v53, 4 }
  0xf2   : > { %v2370_v9 = vrot.slane %v5669_v57, 5  ;;  %v4602_v15 = vrot.slane %v4600_v3, 4  ;;  %v5677_v43 = vld [vmem:[%s7425_s14 + $0xa0] sm:$0xf]  ;;  %v5676_v57 = vld [vmem:[%s7425_s14 + $0x9c] sm:$0xe] }
  0xf3   : > { %v4566_v27 = vsel %vm7540_vm5, %v6078_v19, %v4565_v5  ;;  %v4569_v28 = vsel %vm7540_vm5, %v4567_v20, %v4568_v46  ;;  %v7340_v5 = vld [vmem:[%s7425_s14 + $0xc0] sm:$0xff]   ;;  %v5672_v46 = vld [vmem:[%s7425_s14 + $0x8c] sm:$0x1] }
  0xf4   : > { %6952 = vmatpush3.bf16.msra.mxu1 %v7345_v22  ;;  %v6079_v22 = vrot.slane %v6039_v17, 10  ;;  %v6110_v37 = vcombine.low %v4566_v27, %v4569_v28  ;;  %v5674_v17 = vld [vmem:[%s7425_s14 + $0x94] sm:$0xf]  ;;  %v2377_v35 = vrot.slane %v5672_v46, 5  ;;  %v6065_v46 = vld [vmem:[%s7425_s14 + $0xc8] sm:$0x3] }
  0xf5   : > { %6945 = vmatprep.subr.bf16.mxu1 %v7346_v38  ;;  %v2381_v27 = vrot.slane %v5674_v17, 5 }
  0xf6   : > { %6678 = vmatmul.mubr.bf16.gmra.mrb[8].mxu1 %v7329_v26  ;;  %v4579_v26 = vrot.slane %v6043_v21, 6  ;;  %v6058_v21 = vld [vmem:[%s7425_s14 + $0xac] sm:$0xf] }
  0xf7   : > { %6886 = vmatmul.mubr.bf16.gmra.mrb[24].mxu0 %v6016_v30  ;;  %6681 = vmatprep.mubr.bf16.mxu1 %v7331_v31  ;;  %v6042_v30 = vld [vmem:[%s7425_s14 + $0x6c] sm:$0xc]  ;;  %v6044_v31 = vld [vmem:[%s7425_s14 + $0x74] sm:$0x3]  ;;  %v2383_v4 = vrot.slane %v2381_v27, 4 }
  0xf8   : > { %6889 = vmatprep.mubr.bf16.mxu0 %v6017_v29  ;;  %6953 = vmatpush3.bf16.msra.mxu1 %v7346_v38  ;;  %v4573_v29 = vsel %vm7540_vm5, %v6079_v22, %v4572_v10  ;;  %v7338_v38 = vld [vmem:[%s7425_s14 + $0xa8] sm:$0xff]   ;;  %v6080_v39 = vrot.slane %v6042_v30, 10  ;;  %v4581_v40 = vrot.slane %v4579_v26, 4  ;;  %v4582_v41 = vrot.slane %v6044_v31, 6  ;;  %v6056_v31 = vld [vmem:[%s7425_s14 + $0xa4] sm:$0x3] }
  0xf9   : > { %6946 = vmatprep.subr.bf16.mxu1 %v7347_v49  ;;  %v6111_v42 = vcombine.low %v4573_v29, %v4576_v32  ;;  %v6113_v10 = vcombine.low %v4587_v59, %v4590_v60  ;;  %v5675_v29 = vld [vmem:[%s7425_s14 + $0x98] sm:$0x1]  ;;  %v7341_v32 = vld [vmem:[%s7425_s14 + $0xcc] sm:$0xff]   ;;  %v4610_v45 = vrot.slane %v6056_v31, 6  ;;  %v4631_v31 = vrot.slane %v6065_v46, 6 }
  0xfa   : > { %v2384_v47 = vrot.slane %v5675_v29, 5  ;;  %v5686_v29 = vld [vmem:[%s7425_s14 + $0xc4] sm:$0xf] }
  0xfc   : > { %6954 = vmatpush3.bf16.msra.mxu1 %v7347_v49  ;;  %v4580_v49 = vsel %vm7540_vm5, %v6080_v39, %v4579_v26  ;;  %v5673_v26 = vld [vmem:[%s7425_s14 + $0x90] sm:$0xe] }
  0xfd   : > { %6947 = vmatprep.subr.bf16.mxu1 %v7348_v63 }
  0xfe   : > { %6682 = vmatmul.mubr.bf16.gmra.mrb[12].mxu1 %v7332_v50  ;;  %v4583_v50 = vsel %vm7540_vm5, %v4581_v40, %v4582_v41  ;;  %v6084_v40 = vrot.slane %v6054_v24, 10  ;;  %v5701_v41 = vrot.slane %v5673_v26, 9  ;;  %v5683_v26 = vld [vmem:[%s7425_s14 + $0xb8] sm:$0xf] }
  0xff   : > { %6890 = vmatmul.mubr.bf16.gmra.mrb[28].mxu0 %v6018_v54  ;;  %6685 = vmatprep.mubr.bf16.mxu1 %v7334_v55  ;;  %v5667_v54 = vld [vmem:[%s7425_s14 + $0x78] sm:$0xe]  ;;  %v2367_v55 = vrot.slane %v5668_v44, 5  ;;  %v6112_v62 = vcombine.low %v4580_v49, %v4583_v50  ;;  %v6085_v50 = vrot.slane %v6057_v36, 10  ;;  %v6070_v36 = vld [vmem:[%s7425_s14 + $0xdc] sm:$0xf] }
 0x100   : > { %6909 = vmatprep.mubr.bf16.mxu0 %v6107_v56  ;;  %6955 = vmatpush3.bf16.msra.mxu1 %v7348_v63  ;;  %v6050_v56 = vld [vmem:[%s7425_s14 + $0x8c] sm:$0x3]  ;;  %v6082_v63 = vrot.slane %v6048_v52, 10  ;;  %v5699_v0 = vrot.slane %v5667_v54, 9  ;;  %v6061_v52 = vld [vmem:[%s7425_s14 + $0xb8] sm:$0xf]  ;;  %v2382_v60 = vsel %vm7431_vm2, %v5701_v41, %v2381_v27 }
 0x101   : > { %6948 = vmatprep.subr.bf16.mxu1 %v7349_v11  ;;  %v4596_v7 = vrot.slane %v6050_v56, 6  ;;  %v2369_v8 = vrot.slane %v2367_v55, 4  ;;  %v6067_v27 = vld [vmem:[%s7425_s14 + $0xd0] sm:$0xf]  ;;  %v2402_v41 = vrot.slane %v5683_v26, 5 }
 0x102   : > { %v4594_v19 = vsel %vm7540_vm5, %v6082_v63, %v4593_v53  ;;  %v2368_v20 = vsel %vm7431_vm2, %v5699_v0, %v2367_v55  ;;  %v5680_v53 = vld [vmem:[%s7425_s14 + $0xac] sm:$0xf]  ;;  %v2385_v63 = vsel %vm7431_vm2, %v2383_v4, %v2384_v47  ;;  %v6060_v0 = vld [vmem:[%s7425_s14 + $0xb4] sm:$0xc] }
 0x103   : > { %v4597_v22 = vsel %vm7540_vm5, %v4595_v6, %v4596_v7  ;;  %v2371_v23 = vsel %vm7431_vm2, %v2369_v8, %v2370_v9  ;;  %v5702_v8 = vrot.slane %v5676_v57, 9  ;;  %v6062_v9 = vld [vmem:[%s7425_s14 + $0xbc] sm:$0x3]  ;;  %v6069_v57 = vld [vmem:[%s7425_s14 + $0xd8] sm:$0xc] }
 0x104   : > { %6956 = vmatpush3.bf16.msra.mxu1 %v7349_v11  ;;  %v6083_v11 = vrot.slane %v6051_v61, 10  ;;  %v5731_v39 = vcombine.low %v2368_v20, %v2371_v23  ;;  %v5678_v61 = vld [vmem:[%s7425_s14 + $0xa4] sm:$0x1]  ;;  %v6063_v20 = vld [vmem:[%s7425_s14 + $0xc0] sm:$0xc] }
 0x105   : > { %v2391_v17 = vrot.slane %v5678_v61, 5 }
 0x106   : > { %6686 = vmatmul.mubr.bf16.gmra.mrb[16].mxu1 %v7335_v14  ;;  %v6055_v14 = vld [vmem:[%s7425_s14 + $0xa0] sm:$0xf]  ;;  %v4601_v28 = vsel %vm7540_vm5, %v6083_v11, %v4600_v3  ;;  %v6064_v3 = vld [vmem:[%s7425_s14 + $0xc4] sm:$0xf] }
 0x107   : > { %6910 = vmatmul.mubr.bf16.vlgmr.msra.gmra.mrb[0].mxu0 %v6108_v12  ;;  %6689 = vmatprep.mubr.bf16.mxu1 %v7336_v16  ;;  %v4603_v12 = vrot.slane %v6053_v1, 6  ;;  %v5670_v16 = vld [vmem:[%s7425_s14 + $0x84] sm:$0xe]  ;;  %v4607_v25 = vrot.slane %v6055_v14, 6  ;;  %v4621_v1 = vrot.slane %v6061_v52, 6  ;;  %v4642_v52 = vrot.slane %v6070_v36, 6 }
 0x108   : > { %6913 = vmatprep.mubr.bf16.mxu0 %v6109_v18  ;;  %v2374_v18 = vrot.slane %v5671_v2, 5  ;;  %v5700_v30 = vrot.slane %v5670_v16, 9  ;;  %v5679_v2 = vld [vmem:[%s7425_s14 + $0xa8] sm:$0xe]  ;;  %v5733_v16 = vcombine.low %v2382_v60, %v2385_v63 }
 0x109   : > { %v4604_v33 = vsel %vm7540_vm5, %v4602_v15, %v4603_v12  ;;  %v4609_v44 = vrot.slane %v4607_v25, 4  ;;  %v4608_v59 = vsel %vm7540_vm5, %v6084_v40, %v4607_v25  ;;  %v4628_v15 = vrot.slane %v6064_v3, 6  ;;  %v5684_v40 = vld [vmem:[%s7425_s14 + $0xbc] sm:$0x1] }
 0x10a   : > { %v6115_v48 = vcombine.low %v4601_v28, %v4604_v33  ;;  %v2375_v49 = vsel %vm7431_vm2, %v5700_v30, %v2374_v18  ;;  %v6087_v28 = vrot.slane %v6063_v20, 10 }
 0x10b   : > { %v4630_v30 = vrot.slane %v4628_v15, 4 }
 0x10c   : > { %v4629_v47 = vsel %vm7540_vm5, %v6087_v28, %v4628_v15 }
 0x10e   : > { %6690 = vmatmul.mubr.bf16.gmra.mrb[20].mxu1 %v7337_v34  ;;  %v2376_v34 = vrot.slane %v2374_v18, 4  ;;  %v6086_v18 = vrot.slane %v6060_v0, 10 }
 0x10f   : > { %6914 = vmatmul.mubr.bf16.gmra.mrb[4].mxu0 %v6110_v37  ;;  %6693 = vmatprep.mubr.bf16.mxu1 %v7338_v38  ;;  %v4614_v37 = vrot.slane %v6058_v21, 6  ;;  %v6114_v38 = vcombine.low %v4594_v19, %v4597_v22  ;;  %v5703_v19 = vrot.slane %v5679_v2, 9  ;;  %v4623_v21 = vrot.slane %v4621_v1, 4  ;;  %v5689_v2 = vld [vmem:[%s7425_s14 + $0xd0] sm:$0xf] }
 0x110   : > { %6917 = vmatprep.mubr.bf16.mxu0 %v6111_v42  ;;  %v6059_v42 = vld [vmem:[%s7425_s14 + $0xb0] sm:$0x3]  ;;  %v2378_v54 = vsel %vm7431_vm2, %v2376_v34, %v2377_v35  ;;  %v4624_v22 = vrot.slane %v6062_v9, 6  ;;  %v4622_v34 = vsel %vm7540_vm5, %v6086_v18, %v4621_v1  ;;  %v5690_v18 = vld [vmem:[%s7425_s14 + $0xd4] sm:$0x1] }
 0x111   : > { %v4616_v55 = vrot.slane %v4614_v37, 4  ;;  %v4617_v56 = vrot.slane %v6059_v42, 6  ;;  %v5732_v6 = vcombine.low %v2375_v49, %v2378_v54  ;;  %v4615_v7 = vsel %vm7540_vm5, %v6085_v50, %v4614_v37  ;;  %v5685_v49 = vld [vmem:[%s7425_s14 + $0xc0] sm:$0xe]  ;;  %v5687_v50 = vld [vmem:[%s7425_s14 + $0xc8] sm:$0x1] }
 0x112   : > { %v4625_v37 = vsel %vm7540_vm5, %v4623_v21, %v4624_v22  ;;  %v4635_v42 = vrot.slane %v6067_v27, 6  ;;  %v5705_v63 = vrot.slane %v5685_v49, 9  ;;  %v2412_v1 = vrot.slane %v5687_v50, 5  ;;  %v6072_v21 = vld [vmem:[%s7425_s14 + $0xe4] sm:$0xc] }
 0x113   : > { %v4618_v11 = vsel %vm7540_vm5, %v4616_v55, %v4617_v56  ;;  %v2405_v56 = vrot.slane %v5684_v40, 5  ;;  %v6074_v22 = vld [vmem:[%s7425_s14 + $0xec] sm:$0x3]  ;;  %v2419_v28 = vrot.slane %v5690_v18, 5 }
 0x114   : > { %v6117_v25 = vcombine.low %v4615_v7, %v4618_v11  ;;  %v4637_v61 = vrot.slane %v4635_v42, 4 }
 0x116   : > { %6694 = vmatmul.mubr.bf16.gmra.mrb[24].mxu1 %v7339_v58  ;;  %v2388_v58 = vrot.slane %v5677_v43, 5  ;;  %v6066_v43 = vld [vmem:[%s7425_s14 + $0xcc] sm:$0xc] }
 0x117   : > { %6918 = vmatmul.mubr.bf16.gmra.mrb[8].mxu0 %v6112_v62  ;;  %6697 = vmatprep.mubr.bf16.mxu1 %v7340_v5  ;;  %v4611_v62 = vsel %vm7540_vm5, %v4609_v44, %v4610_v45  ;;  %v2395_v5 = vrot.slane %v5680_v53, 5  ;;  %v6068_v44 = vld [vmem:[%s7425_s14 + $0xd4] sm:$0x3]  ;;  %v2409_v45 = vrot.slane %v5686_v29, 5  ;;  %v6118_v53 = vcombine.low %v4622_v34, %v4625_v37 }
 0x118   : > { %6921 = vmatprep.mubr.bf16.mxu0 %v6113_v10  ;;  %v5681_v10 = vld [vmem:[%s7425_s14 + $0xb0] sm:$0x1]  ;;  %v2390_v14 = vrot.slane %v2388_v58, 4  ;;  %v6116_v12 = vcombine.low %v4608_v59, %v4611_v62  ;;  %v2404_v59 = vrot.slane %v2402_v41, 4  ;;  %v6088_v60 = vrot.slane %v6066_v43, 10 }
 0x119   : > { %v2397_v23 = vrot.slane %v2395_v5, 4  ;;  %v2398_v24 = vrot.slane %v5681_v10, 5  ;;  %v2396_v35 = vsel %vm7431_vm2, %v5703_v19, %v2395_v5  ;;  %v4638_v3 = vrot.slane %v6068_v44, 6 }
 0x11a   : > { %v2392_v33 = vsel %vm7431_vm2, %v2390_v14, %v2391_v17  ;;  %v2411_v0 = vrot.slane %v2409_v45, 4  ;;  %v6089_v5 = vrot.slane %v6069_v57, 10  ;;  %v2406_v10 = vsel %vm7431_vm2, %v2404_v59, %v2405_v56 }
 0x11b   : > { %v4636_v11 = vsel %vm7540_vm5, %v6088_v60, %v4635_v42  ;;  %v4639_v14 = vsel %vm7540_vm5, %v4637_v61, %v4638_v3  ;;  %v2416_v17 = vrot.slane %v5689_v2, 5  ;;  %v2410_v15 = vsel %vm7431_vm2, %v5705_v63, %v2409_v45 }
 0x11c   : > { %v4643_v20 = vsel %vm7540_vm5, %v6089_v5, %v4642_v52 }
 0x11d   : > { %v2418_v27 = vrot.slane %v2416_v17, 4 }
 0x11e   : > { %6698 = vmatmul.mubr.bf16.gmra.mrb[28].mxu1 %v7341_v32  ;;  %v2389_v32 = vsel %vm7431_vm2, %v5702_v8, %v2388_v58  ;;  %v6071_v58 = vld [vmem:[%s7425_s14 + $0xe0] sm:$0x3]  ;;  %v6073_v8 = vld [vmem:[%s7425_s14 + $0xe8] sm:$0xf] }
 0x11f   : > { %6922 = vmatmul.mubr.bf16.gmra.mrb[12].mxu0 %v6114_v38  ;;  %6733 = vmatprep.mubr.bf16.mxu1 %v5731_v39  ;;  %v2399_v38 = vsel %vm7431_vm2, %v2397_v23, %v2398_v24  ;;  %v5682_v39 = vld [vmem:[%s7425_s14 + $0xb4] sm:$0xe]  ;;  %v5734_v4 = vcombine.low %v2389_v32, %v2392_v33  ;;  %v4645_v7 = vrot.slane %v6071_v58, 6  ;;  %v4649_v19 = vrot.slane %v6073_v8, 6 }
 0x120   : > { %6925 = vmatprep.mubr.bf16.mxu0 %v6115_v48  ;;  %v4632_v48 = vsel %vm7540_vm5, %v4630_v30, %v4631_v31  ;;  %v5735_v54 = vcombine.low %v2396_v35, %v2399_v38  ;;  %v5704_v55 = vrot.slane %v5682_v39, 9  ;;  %v6120_v24 = vcombine.low %v4636_v11, %v4639_v14 }
 0x121   : > { %v6119_v62 = vcombine.low %v4629_v47, %v4632_v48  ;;  %v6090_v31 = vrot.slane %v6072_v21, 10  ;;  %v4651_v29 = vrot.slane %v4649_v19, 4  ;;  %v4652_v32 = vrot.slane %v6074_v22, 6 }
 0x122   : > { %v2403_v9 = vsel %vm7431_vm2, %v5704_v55, %v2402_v41  ;;  %v2420_v34 = vsel %vm7431_vm2, %v2418_v27, %v2419_v28 }
 0x123   : > { %v5736_v23 = vcombine.low %v2403_v9, %v2406_v10  ;;  %v4650_v35 = vsel %vm7540_vm5, %v6090_v31, %v4649_v19  ;;  %v4653_v36 = vsel %vm7540_vm5, %v4651_v29, %v4652_v32 }
 0x124   : > { %v6122_v38 = vcombine.low %v4650_v35, %v4653_v36 }
 0x126   : > { %6734 = vmatmul.mubr.bf16.vlgmr.msra.gmra.mrb[16].mxu1 %v5732_v6  ;;  %v4644_v6 = vrot.slane %v4642_v52, 4 }
 0x127   : > { %6926 = vmatmul.mubr.bf16.gmra.mrb[16].mxu0 %v6116_v12  ;;  %6737 = vmatprep.mubr.bf16.mxu1 %v5733_v16  ;;  %v2413_v12 = vsel %vm7431_vm2, %v2411_v0, %v2412_v1  ;;  %v5688_v16 = vld [vmem:[%s7425_s14 + $0xcc] sm:$0xe]  ;;  %s6165_s14 = sshll.u32 %s8486_s13, 7 }
 0x128   : > { %6929 = vmatprep.mubr.bf16.mxu0 %v6117_v25  ;;  %v4646_v46 = vsel %vm7540_vm5, %v4644_v6, %v4645_v7  ;;  %v5737_v25 = vcombine.low %v2410_v15, %v2413_v12  ;;  %v5706_v26 = vrot.slane %v5688_v16, 9  ;;  %s8448_s8 = scalar_lea.vmem %s8479_s2, %s6165_s14 }
 0x129   : > { %v6121_v30 = vcombine.low %v4643_v20, %v4646_v46 }
 0x12a   : > { %v2417_v33 = vsel %vm7431_vm2, %v5706_v26, %v2416_v17 }
 0x12b   : > { %v5738_v37 = vcombine.low %v2417_v33, %v2420_v34 }
 0x12e   : > { %6738 = vmatmul.mubr.bf16.gmra.mrb[20].mxu1 %v5734_v4 }
 0x12f   : > { %6930 = vmatmul.mubr.bf16.gmra.mrb[20].mxu0 %v6118_v53  ;;  %6741 = vmatprep.mubr.bf16.mxu1 %v5735_v54 }
 0x130   : > { %6933 = vmatprep.mubr.bf16.mxu0 %v6119_v62 }
 0x136   : > { %6742 = vmatmul.mubr.bf16.gmra.mrb[24].mxu1 %v5736_v23 }
 0x137   : > { %6934 = vmatmul.mubr.bf16.gmra.mrb[24].mxu0 %v6120_v24  ;;  %6745 = vmatprep.mubr.bf16.mxu1 %v5737_v25 }
 0x138   : > { %6937 = vmatprep.mubr.bf16.mxu0 %v6121_v30 }
 0x13e   : > { %6746 = vmatmul.mubr.bf16.gmra.mrb[28].mxu1 %v5738_v37 }
 0x13f   : > { %6938 = vmatmul.mubr.bf16.gmra.mrb[28].mxu0 %v6122_v38 }
 0x1b9   : > { %v6671_v39 = vpop.f32.mrb[0].mxu1 }
 0x1ba   : > { %v1990_v40 = vpop.f32.mrb[1].mxu1 }
 0x1bb   : > { %v6672_v41 = vpop.f32.mrb[2].mxu1 }
 0x1bc   : > { %v1993_v42 = vpop.f32.mrb[3].mxu1 }
 0x1c1   : > { %v6675_v43 = vpop.f32.mrb[4].mxu1 }
 0x1c2   : > { %v2006_v44 = vpop.f32.mrb[5].mxu1 }
 0x1c3   : > { %v6676_v13 = vpop.f32.mrb[6].mxu1 }
 0x1c4   : > { %v2009_v45 = vpop.f32.mrb[7].mxu1 }
 0x1c9   : > { %v6679_v4 = vpop.f32.mrb[8].mxu1 }
 0x1ca   : > { %v2022_v47 = vpop.f32.mrb[9].mxu1 }
 0x1cb   : > { %v6680_v48 = vpop.f32.mrb[10].mxu1 }
 0x1cc   : > { %v2025_v49 = vpop.f32.mrb[11].mxu1 }
 0x1d1   : > { %v8436_v50 = vpop.f32.mrb[12].mxu1 }
 0x1d2   : > { %v8438_v51 = vpop.f32.mrb[13].mxu1 }
 0x1d3   : > { %v8440_v52 = vpop.f32.mrb[14].mxu1 }
 0x1d4   : > { %v8442_v53 = vpop.f32.mrb[15].mxu1 }
 0x1da   : > { %v6911_v54 = vpop.f32.mrb[0].mxu0 }
 0x1db   : > { %v6957_v55 = vadd.f32 %v6911_v54, %v6671_v39  ;;  %v4817_v56 = vpop.f32.mrb[1].mxu0 }
 0x1dc   : > { %v6958_v57 = vadd.f32 %v4817_v56, %v1990_v40  ;;  %v6912_v58 = vpop.f32.mrb[2].mxu0 }
 0x1dd   : > { %v6959_v59 = vadd.f32 %v6912_v58, %v6672_v41  ;;  %v4820_v60 = vpop.f32.mrb[3].mxu0  ;;  %v5272_v2 = vmul.f32 %v6957_v55, %v6957_v55 }
 0x1de   : > { %v6960_v61 = vadd.f32 %v4820_v60, %v1993_v42  ;;  %v5270_v62 = vmul.f32 %v6958_v57, %v6958_v57 }
 0x1df   : > { %v6206_v3 = vpack.c.bf16 %v6959_v59, %v6957_v55  ;;  %v5273_v10 = vmul.f32 %v6959_v59, %v6959_v59 }
 0x1e0   : > { %v6201_v63 = vpack.c.bf16 %v6960_v61, %v6958_v57  ;;  %v5232_v0 = vadd.f32 %v6960_v61, %v6958_v57  ;;  %v5271_v1 = vmul.f32 %v6960_v61, %v6960_v61 }
 0x1e1   : > { %6278 = vst [vmem:[%s8448_s8 + $0x8] sm:$0xff] %v6206_v3  }
 0x1e2   : > { %6202 = vst [vmem:[%s8448_s8] sm:$0xff] %v6201_v63   ;;  %v5233_v5 = vadd.f32 %v6957_v55, %v5232_v0  ;;  %v5302_v6 = vadd.f32 %v5271_v1, %v5270_v62  ;;  %v6915_v7 = vpop.f32.mrb[4].mxu0 }
 0x1e3   : > { %v6961_v8 = vadd.f32 %v6915_v7, %v6675_v43  ;;  %v4833_v9 = vpop.f32.mrb[5].mxu0 }
 0x1e4   : > { %v5303_v11 = vadd.f32 %v5302_v6, %v5272_v2  ;;  %v6962_v14 = vadd.f32 %v4833_v9, %v2006_v44  ;;  %v5234_v17 = vadd.f32 %v6959_v59, %v5233_v5  ;;  %v6916_v15 = vpop.f32.mrb[6].mxu0 }
 0x1e5   : > { %v6963_v12 = vadd.f32 %v6916_v15, %v6676_v13  ;;  %v4836_v16 = vpop.f32.mrb[7].mxu0  ;;  %v5276_v26 = vmul.f32 %v6961_v8, %v6961_v8 }
 0x1e6   : > { %v5235_v18 = vadd.f32 %v6962_v14, %v5234_v17  ;;  %v5274_v19 = vmul.f32 %v6962_v14, %v6962_v14  ;;  %v5304_v20 = vadd.f32 %v5303_v11, %v5273_v10  ;;  %v6964_v46 = vadd.f32 %v4836_v16, %v2009_v45 }
 0x1e7   : > { %v6216_v21 = vpack.c.bf16 %v6963_v12, %v6961_v8  ;;  %v5277_v32 = vmul.f32 %v6963_v12, %v6963_v12 }
 0x1e8   : > { %v5305_v22 = vadd.f32 %v5304_v20, %v5274_v19  ;;  %v6211_v23 = vpack.c.bf16 %v6964_v46, %v6962_v14  ;;  %v5236_v24 = vadd.f32 %v6964_v46, %v5235_v18  ;;  %v5275_v25 = vmul.f32 %v6964_v46, %v6964_v46 }
 0x1e9   : > { %6280 = vst [vmem:[%s8448_s8 + $0x18] sm:$0xff] %v6216_v21  }
 0x1ea   : > { %6279 = vst [vmem:[%s8448_s8 + $0x10] sm:$0xff] %v6211_v23   ;;  %v5237_v27 = vadd.f32 %v6961_v8, %v5236_v24  ;;  %v5306_v28 = vadd.f32 %v5305_v22, %v5275_v25  ;;  %v6919_v30 = vpop.f32.mrb[8].mxu0 }
 0x1eb   : > { %v6965_v31 = vadd.f32 %v6919_v30, %v6679_v4  ;;  %v4849_v29 = vpop.f32.mrb[9].mxu0 }
 0x1ec   : > { %v5307_v33 = vadd.f32 %v5306_v28, %v5276_v26  ;;  %v6966_v34 = vadd.f32 %v4849_v29, %v2022_v47  ;;  %v5238_v35 = vadd.f32 %v6963_v12, %v5237_v27  ;;  %v6920_v36 = vpop.f32.mrb[10].mxu0 }
 0x1ed   : > { %v6967_v37 = vadd.f32 %v6920_v36, %v6680_v48  ;;  %v4852_v38 = vpop.f32.mrb[11].mxu0  ;;  %v5280_v4 = vmul.f32 %v6965_v31, %v6965_v31 }
 0x1ee   : > { %v5239_v39 = vadd.f32 %v6966_v34, %v5238_v35  ;;  %v5278_v40 = vmul.f32 %v6966_v34, %v6966_v34  ;;  %v5308_v41 = vadd.f32 %v5307_v33, %v5277_v32  ;;  %v6968_v42 = vadd.f32 %v4852_v38, %v2025_v49 }
 0x1ef   : > { %v6226_v43 = vpack.c.bf16 %v6967_v37, %v6965_v31  ;;  %v5281_v48 = vmul.f32 %v6967_v37, %v6967_v37 }
 0x1f0   : > { %v5309_v44 = vadd.f32 %v5308_v41, %v5278_v40  ;;  %v6221_v13 = vpack.c.bf16 %v6968_v42, %v6966_v34  ;;  %v5240_v45 = vadd.f32 %v6968_v42, %v5239_v39  ;;  %v5279_v54 = vmul.f32 %v6968_v42, %v6968_v42 }
 0x1f1   : > { %6282 = vst [vmem:[%s8448_s8 + $0x28] sm:$0xff] %v6226_v43  }
 0x1f2   : > { %6281 = vst [vmem:[%s8448_s8 + $0x20] sm:$0xff] %v6221_v13   ;;  %v5241_v55 = vadd.f32 %v6965_v31, %v5240_v45  ;;  %v5310_v56 = vadd.f32 %v5309_v44, %v5279_v54  ;;  %v6923_v47 = vpop.f32.mrb[12].mxu0 }
 0x1f3   : > { %v6969_v57 = vadd.f32 %v6923_v47, %v8436_v50  ;;  %v4865_v58 = vpop.f32.mrb[13].mxu0 }
 0x1f4   : > { %v5311_v59 = vadd.f32 %v5310_v56, %v5280_v4  ;;  %v6970_v60 = vadd.f32 %v4865_v58, %v8438_v51  ;;  %v5242_v49 = vadd.f32 %v6967_v37, %v5241_v55  ;;  %v6924_v61 = vpop.f32.mrb[14].mxu0 }
 0x1f5   : > { %v6971_v3 = vadd.f32 %v6924_v61, %v8440_v52  ;;  %v4868_v62 = vpop.f32.mrb[15].mxu0  ;;  %v5284_v10 = vmul.f32 %v6969_v57, %v6969_v57 }
 0x1f6   : > { %v5243_v63 = vadd.f32 %v6970_v60, %v5242_v49  ;;  %v5282_v0 = vmul.f32 %v6970_v60, %v6970_v60  ;;  %v5312_v1 = vadd.f32 %v5311_v59, %v5281_v48  ;;  %v6972_v2 = vadd.f32 %v4868_v62, %v8442_v53 }
 0x1f7   : > { %v6236_v5 = vpack.c.bf16 %v6971_v3, %v6969_v57  ;;  %v5285_v16 = vmul.f32 %v6971_v3, %v6971_v3 }
 0x1f8   : > { %v5313_v6 = vadd.f32 %v5312_v1, %v5282_v0  ;;  %v6231_v50 = vpack.c.bf16 %v6972_v2, %v6970_v60  ;;  %v5244_v7 = vadd.f32 %v6972_v2, %v5243_v63  ;;  %v5283_v8 = vmul.f32 %v6972_v2, %v6972_v2 }
 0x1f9   : > { %6284 = vst [vmem:[%s8448_s8 + $0x38] sm:$0xff] %v6236_v5   ;;  %v6735_v9 = vpop.f32.mrb[16].mxu1 }
 0x1fa   : > { %6283 = vst [vmem:[%s8448_s8 + $0x30] sm:$0xff] %v6231_v50   ;;  %v5245_v51 = vadd.f32 %v6969_v57, %v5244_v7  ;;  %v5314_v11 = vadd.f32 %v5313_v6, %v5283_v8  ;;  %v6927_v14 = vpop.f32.mrb[16].mxu0  ;;  %v2648_v17 = vpop.f32.mrb[17].mxu1 }
 0x1fb   : > { %v6973_v52 = vadd.f32 %v6927_v14, %v6735_v9  ;;  %v4881_v15 = vpop.f32.mrb[17].mxu0  ;;  %v6736_v12 = vpop.f32.mrb[18].mxu1 }
 0x1fc   : > { %v5315_v18 = vadd.f32 %v5314_v11, %v5284_v10  ;;  %v6974_v53 = vadd.f32 %v4881_v15, %v2648_v17  ;;  %v5246_v19 = vadd.f32 %v6971_v3, %v5245_v51  ;;  %v6928_v20 = vpop.f32.mrb[18].mxu0  ;;  %v2651_v46 = vpop.f32.mrb[19].mxu1 }
 0x1fd   : > { %v6975_v21 = vadd.f32 %v6928_v20, %v6736_v12  ;;  %v4884_v22 = vpop.f32.mrb[19].mxu0  ;;  %v5288_v33 = vmul.f32 %v6973_v52, %v6973_v52 }
 0x1fe   : > { %v5247_v23 = vadd.f32 %v6974_v53, %v5246_v19  ;;  %v5286_v24 = vmul.f32 %v6974_v53, %v6974_v53  ;;  %v5316_v25 = vadd.f32 %v5315_v18, %v5285_v16  ;;  %v6976_v26 = vadd.f32 %v4884_v22, %v2651_v46 }
 0x1ff   : > { %v6246_v27 = vpack.c.bf16 %v6975_v21, %v6973_v52  ;;  %v5289_v41 = vmul.f32 %v6975_v21, %v6975_v21 }
 0x200   : > { %v5317_v28 = vadd.f32 %v5316_v25, %v5286_v24  ;;  %v6241_v30 = vpack.c.bf16 %v6976_v26, %v6974_v53  ;;  %v5248_v31 = vadd.f32 %v6976_v26, %v5247_v23  ;;  %v5287_v29 = vmul.f32 %v6976_v26, %v6976_v26 }
 0x201   : > { %6286 = vst [vmem:[%s8448_s8 + $0x48] sm:$0xff] %v6246_v27   ;;  %v6739_v32 = vpop.f32.mrb[20].mxu1 }
 0x202   : > { %6285 = vst [vmem:[%s8448_s8 + $0x40] sm:$0xff] %v6241_v30   ;;  %v5249_v34 = vadd.f32 %v6973_v52, %v5248_v31  ;;  %v5318_v35 = vadd.f32 %v5317_v28, %v5287_v29  ;;  %v6931_v36 = vpop.f32.mrb[20].mxu0  ;;  %v2664_v37 = vpop.f32.mrb[21].mxu1 }
 0x203   : > { %v6977_v38 = vadd.f32 %v6931_v36, %v6739_v32  ;;  %v4897_v39 = vpop.f32.mrb[21].mxu0  ;;  %v6740_v40 = vpop.f32.mrb[22].mxu1 }
 0x204   : > { %v5319_v42 = vadd.f32 %v5318_v35, %v5288_v33  ;;  %v6978_v43 = vadd.f32 %v4897_v39, %v2664_v37  ;;  %v5250_v44 = vadd.f32 %v6975_v21, %v5249_v34  ;;  %v6932_v13 = vpop.f32.mrb[22].mxu0  ;;  %v2667_v45 = vpop.f32.mrb[23].mxu1 }
 0x205   : > { %v6979_v54 = vadd.f32 %v6932_v13, %v6740_v40  ;;  %v4900_v4 = vpop.f32.mrb[23].mxu0  ;;  %v5292_v3 = vmul.f32 %v6977_v38, %v6977_v38 }
 0x206   : > { %v5251_v55 = vadd.f32 %v6978_v43, %v5250_v44  ;;  %v5290_v56 = vmul.f32 %v6978_v43, %v6978_v43  ;;  %v5320_v47 = vadd.f32 %v5319_v42, %v5289_v41  ;;  %v6980_v57 = vadd.f32 %v4900_v4, %v2667_v45 }
 0x207   : > { %v6256_v58 = vpack.c.bf16 %v6979_v54, %v6977_v38  ;;  %v5293_v50 = vmul.f32 %v6979_v54, %v6979_v54 }
 0x208   : > { %v5321_v48 = vadd.f32 %v5320_v47, %v5290_v56  ;;  %v6251_v59 = vpack.c.bf16 %v6980_v57, %v6978_v43  ;;  %v5252_v60 = vadd.f32 %v6980_v57, %v5251_v55  ;;  %v5291_v49 = vmul.f32 %v6980_v57, %v6980_v57 }
 0x209   : > { %6288 = vst [vmem:[%s8448_s8 + $0x58] sm:$0xff] %v6256_v58   ;;  %v6743_v61 = vpop.f32.mrb[24].mxu1 }
 0x20a   : > { %6287 = vst [vmem:[%s8448_s8 + $0x50] sm:$0xff] %v6251_v59   ;;  %v5253_v62 = vadd.f32 %v6977_v38, %v5252_v60  ;;  %v5322_v63 = vadd.f32 %v5321_v48, %v5291_v49  ;;  %v6935_v0 = vpop.f32.mrb[24].mxu0  ;;  %v2680_v1 = vpop.f32.mrb[25].mxu1 }
 0x20b   : > { %v6981_v2 = vadd.f32 %v6935_v0, %v6743_v61  ;;  %v4913_v5 = vpop.f32.mrb[25].mxu0  ;;  %v6744_v6 = vpop.f32.mrb[26].mxu1 }
 0x20c   : > { %v5323_v7 = vadd.f32 %v5322_v63, %v5292_v3  ;;  %v6982_v8 = vadd.f32 %v4913_v5, %v2680_v1  ;;  %v5254_v9 = vadd.f32 %v6979_v54, %v5253_v62  ;;  %v6936_v10 = vpop.f32.mrb[26].mxu0  ;;  %v2683_v51 = vpop.f32.mrb[27].mxu1 }
 0x20d   : > { %v6983_v11 = vadd.f32 %v6936_v10, %v6744_v6  ;;  %v4916_v14 = vpop.f32.mrb[27].mxu0  ;;  %v5296_v21 = vmul.f32 %v6981_v2, %v6981_v2 }
 0x20e   : > { %v5255_v17 = vadd.f32 %v6982_v8, %v5254_v9  ;;  %v5294_v52 = vmul.f32 %v6982_v8, %v6982_v8  ;;  %v5324_v15 = vadd.f32 %v5323_v7, %v5293_v50  ;;  %v6984_v12 = vadd.f32 %v4916_v14, %v2683_v51 }
 0x20f   : > { %v6266_v16 = vpack.c.bf16 %v6983_v11, %v6981_v2  ;;  %v5297_v30 = vmul.f32 %v6983_v11, %v6983_v11 }
 0x210   : > { %v5325_v18 = vadd.f32 %v5324_v15, %v5294_v52  ;;  %v6261_v53 = vpack.c.bf16 %v6984_v12, %v6982_v8  ;;  %v5256_v19 = vadd.f32 %v6984_v12, %v5255_v17  ;;  %v5295_v20 = vmul.f32 %v6984_v12, %v6984_v12 }
 0x211   : > { %6290 = vst [vmem:[%s8448_s8 + $0x68] sm:$0xff] %v6266_v16   ;;  %v6747_v46 = vpop.f32.mrb[28].mxu1 }
 0x212   : > { %6289 = vst [vmem:[%s8448_s8 + $0x60] sm:$0xff] %v6261_v53   ;;  %v5257_v22 = vadd.f32 %v6981_v2, %v5256_v19  ;;  %v5326_v23 = vadd.f32 %v5325_v18, %v5295_v20  ;;  %v6939_v24 = vpop.f32.mrb[28].mxu0  ;;  %v2696_v25 = vpop.f32.mrb[29].mxu1 }
 0x213   : > { %v6985_v26 = vadd.f32 %v6939_v24, %v6747_v46  ;;  %v4929_v27 = vpop.f32.mrb[29].mxu0  ;;  %v6748_v28 = vpop.f32.mrb[30].mxu1 }
 0x214   : > { %v5327_v31 = vadd.f32 %v5326_v23, %v5296_v21  ;;  %v6986_v29 = vadd.f32 %v4929_v27, %v2696_v25  ;;  %v5258_v32 = vadd.f32 %v6983_v11, %v5257_v22  ;;  %v6940_v33 = vpop.f32.mrb[30].mxu0  ;;  %v2699_v34 = vpop.f32.mrb[31].mxu1 }
 0x215   : > { %v6987_v35 = vadd.f32 %v6940_v33, %v6748_v28  ;;  %v4932_v36 = vpop.f32.mrb[31].mxu0  ;;  %v5300_v45 = vmul.f32 %v6985_v26, %v6985_v26 }
 0x216   : > { %v5259_v37 = vadd.f32 %v6986_v29, %v5258_v32  ;;  %v5298_v38 = vmul.f32 %v6986_v29, %v6986_v29  ;;  %v5328_v39 = vadd.f32 %v5327_v31, %v5297_v30  ;;  %v6988_v40 = vadd.f32 %v4932_v36, %v2699_v34 }
 0x217   : > { %v6276_v41 = vpack.c.bf16 %v6987_v35, %v6985_v26  ;;  %v5301_v55 = vmul.f32 %v6987_v35, %v6987_v35 }
 0x218   : > { %v5329_v42 = vadd.f32 %v5328_v39, %v5298_v38  ;;  %v6271_v43 = vpack.c.bf16 %v6988_v40, %v6986_v29  ;;  %v5260_v44 = vadd.f32 %v6988_v40, %v5259_v37  ;;  %v5299_v13 = vmul.f32 %v6988_v40, %v6988_v40 }
 0x219   : > { %6292 = vst [vmem:[%s8448_s8 + $0x78] sm:$0xff] %v6276_v41  }
 0x21a   : > { %6291 = vst [vmem:[%s8448_s8 + $0x70] sm:$0xff] %v6271_v43   ;;  %v5261_v54 = vadd.f32 %v6985_v26, %v5260_v44  ;;  %v5330_v4 = vadd.f32 %v5329_v42, %v5299_v13 }
 0x21c   : > { %v5262_v56 = vadd.f32 %v6987_v35, %v5261_v54  ;;  %v5331_v47 = vadd.f32 %v5330_v4, %v5300_v45 }
 0x21e   : > { %v5263_v57 = vrot.slane %v5262_v56, 4  ;;  %v5332_v58 = vadd.f32 %v5331_v47, %v5301_v55 }
 0x220   : > { %v5264_v48 = vadd.f32 %v5263_v57, %v5262_v56  ;;  %v5333_v59 = vrot.slane %v5332_v58, 4 }
 0x222   : > { %v5265_v60 = vrot.slane %v5264_v48, 2  ;;  %v5334_v49 = vadd.f32 %v5333_v59, %v5332_v58 }
 0x224   : > { %v5266_v61 = vadd.f32 %v5265_v60, %v5264_v48  ;;  %v5335_v3 = vrot.slane %v5334_v49, 2 }
 0x226   : > { %v5267_v62 = vrot.slane %v5266_v61, 1  ;;  %v5336_v63 = vadd.f32 %v5335_v3, %v5334_v49 }
 0x228   : > { %v5268_v0 = vadd.f32 %v5267_v62, %v5266_v61  ;;  %v5337_v1 = vrot.slane %v5336_v63, 1 }
 0x22a   : > { %5269 = vst [vmem:[%s181_s15] sm:$0x1] %v5268_v0  ;;  %v5338_v2 = vadd.f32 %v5337_v1, %v5336_v63 }
 0x22c   : > { %5339 = vst [vmem:[%s181_s15 + $0x1] sm:$0x1] %v5338_v2 }
 0x22d PF: > { %s14_s12 = sadd.s32 1, %s7356_s12  }
 0x22e   : > { %p11_p4 = scmp.ge.s32.totalorder %s14_s12, 4  }
 0x230   :  { %13 = sbr.rel (!%p11_p4) target bundleno = 1 (0x1), region = 80 }

</bundles_post_ra>
